<compile_context>
chip_gen: v7x
topology: tpu7x:2x2x1
jax: 0.10.0
libtpu: 0.0.40
codegen_flags: <defaults>
</compile_context>

<pallas_src>
import functools

import jax
import jax.numpy as jnp
from jax.experimental import pallas as pl
from jax.experimental.pallas import tpu as pltpu


# ---------------------------------------------------------------------------
# Pallas kernel: VALID 3x3 conv, unrolled per-tap MXU accumulation.
# ---------------------------------------------------------------------------
def _conv3x3_tap_kernel(x_ref, w_ref, b_ref, o_ref, *, th, apply_relu,
                        ry_split):
    """One (batch, row-tile) step of a VALID 3x3 convolution.

    x_ref: (1, Hp, Wp, Cin)         padded dense input for this batch (NHWC)
    w_ref: (9*Cin, Pout)            tap-major, Cin-minor packed weight
    b_ref: (1, Pout)                bias (f32)
    o_ref: (1, th, W, Pout)         if not ry_split
           (1, th, 2, W, Pout//2)   if ry_split (phase rows interleaved)
    """
    _, _, wp, cin = x_ref.shape
    w = wp - 2
    pout = w_ref.shape[1]
    h0 = pl.multiple_of(pl.program_id(1) * th, th)

    acc = None
    for ty in range(3):
        for tx in range(3):
            # Shifted slab read straight from the ref (no in-VMEM patch copy,
            # no lane-axis concatenate).
            slab = x_ref[0, pl.ds(h0 + ty, th), tx:tx + w, :]          # (th,W,Cin)
            tap = w_ref[(3 * ty + tx) * cin:(3 * ty + tx + 1) * cin, :]  # (Cin,Pout)
            contrib = jnp.dot(slab.reshape(th * w, cin), tap,
                              preferred_element_type=jnp.float32)
            acc = contrib if acc is None else acc + contrib
    acc = acc + b_ref[...]                      # f32 bias
    if apply_relu:
        acc = jnp.maximum(acc, 0.0)
    acc = acc.astype(o_ref.dtype)

    if ry_split:
        # Pout is ordered (ry, rx, cout) -> the two ry halves are contiguous
        # lane ranges; storing them into separate sub-rows makes the wrapper
        # pixel-shuffle a pure reshape.
        half = pout // 2
        o_ref[0, :, 0, :, :] = acc[:, :half].reshape(th, w, half)
        o_ref[0, :, 1, :, :] = acc[:, half:].reshape(th, w, half)
    else:
        o_ref[0] = acc.reshape(th, w, pout)


# ---------------------------------------------------------------------------
# Tiling / VMEM helpers.
# ---------------------------------------------------------------------------
def _row_tiling(h, batch, cap=32):
    """Pick (rows-per-step, padded height). Avoids the th=1 cliff by padding H
    when it has no good divisor, and keeps >=2 grid steps when batch == 1."""
    cap = max(1, min(cap, h))
    min_steps = 2 if batch == 1 else 1
    best = None
    for t in range(cap, 0, -1):
        h_pad = -(-h // t) * t
        if (h_pad // t) < min_steps and t > 1:
            continue
        key = (h_pad - h, -t)        # least padding first, then largest tile
        if best is None or key < best[0]:
            best = (key, t, h_pad)
    _, t, h_pad = best
    return t, h_pad


def _vmem_limit_bytes(required):
    try:
        cap = pltpu.get_tpu_info().vmem_capacity_bytes
    except Exception:
        cap = 64 << 20                      # conservative: v7x physical VMEM
    hi = (cap * 3) // 4                     # leave headroom for Mosaic scratch
    limit = min(max(required, 32 << 20), hi)
    return int(max(limit, required))        # never clamp below the requirement


# ---------------------------------------------------------------------------
# pallas_call wrapper for one fused conv layer.
# ---------------------------------------------------------------------------
def _conv3x3_pallas(x_nhwc, w_mat, bias_row, *, relu, ry_split, row_cap=32,
                    out_dtype=None):
    """VALID 3x3 conv of zero-pad(x, 1) against a packed (9*Cin, Pout) weight."""
    B, H, W, Cin = x_nhwc.shape
    kc, Pout = w_mat.shape
    assert kc == 9 * Cin
    out_dtype = x_nhwc.dtype if out_dtype is None else out_dtype

    th, H_pad = _row_tiling(H, B, cap=row_cap)
    # TODO(synk): fuse this zero-pad / halo into the producing kernel to save
    # one full HBM round trip of the activation per layer.
    xp = jnp.pad(x_nhwc, ((0, 0), (1, 1 + (H_pad - H)), (1, 1), (0, 0)))
    Hp, Wp = H_pad + 2, W + 2

    dsz = jnp.dtype(x_nhwc.dtype).itemsize
    osz = jnp.dtype(out_dtype).itemsize
    wsz = jnp.dtype(w_mat.dtype).itemsize
    need = (2 * Hp * Wp * Cin * dsz          # padded image (double buffered)
            + 2 * th * W * Pout * osz        # output tile (double buffered)
            + 2 * (w_mat.size * wsz + Pout * 4)   # weight + bias
            + th * W * Pout * 4              # f32 accumulator
            + 2 * th * W * Cin * dsz         # in-flight shifted slab / staging
            + (2 << 20))                     # Mosaic internal scratch headroom
    vmem_limit = _vmem_limit_bytes(int(need))

    flops = 2 * B * H_pad * W * 9 * Cin * Pout
    bytes_accessed = int(xp.size * dsz + w_mat.size * wsz
                         + B * H_pad * W * Pout * osz)

    if ry_split:
        assert Pout % 2 == 0
        out_shape = jax.ShapeDtypeStruct((B, H_pad, 2, W, Pout // 2), out_dtype)
        out_spec = pl.BlockSpec((1, th, 2, W, Pout // 2),
                                lambda b, h: (b, h, 0, 0, 0))
    else:
        out_shape = jax.ShapeDtypeStruct((B, H_pad, W, Pout), out_dtype)
        out_spec = pl.BlockSpec((1, th, W, Pout), lambda b, h: (b, h, 0, 0))

    kernel = functools.partial(_conv3x3_tap_kernel, th=th, apply_relu=relu,
                               ry_split=ry_split)
    # TODO(synk): at production sizes on v7x, H-block the input with a
    # (th+2)-row halo slab (or single-buffer it) instead of keeping the whole
    # padded image double-buffered in VMEM.
    y = pl.pallas_call(
        kernel,
        out_shape=out_shape,
        grid=(B, H_pad // th),
        in_specs=[
            pl.BlockSpec((1, Hp, Wp, Cin), lambda b, h: (b, 0, 0, 0)),
            pl.BlockSpec((kc, Pout), lambda b, h: (0, 0)),
            pl.BlockSpec((1, Pout), lambda b, h: (0, 0)),
        ],
        out_specs=out_spec,
        compiler_params=pltpu.CompilerParams(
            dimension_semantics=("parallel", "parallel"),
            vmem_limit_bytes=vmem_limit),
        cost_estimate=pl.CostEstimate(
            flops=flops, transcendentals=0, bytes_accessed=bytes_accessed),
    )(xp, w_mat, bias_row)

    if H_pad != H:
        y = y[:, :H]
    return y


# ---------------------------------------------------------------------------
# Weight re-packing (done ONCE, outside the forward pass).
# ---------------------------------------------------------------------------
def _polyphase_weight_s2(w_torch):
    """ConvTranspose2d(k=5, s=2, p=2, op=1) weight (Cin, Cout, 5, 5)
    -> (9*Cin, 4*Cout) packed weight for the 4-phase sub-pixel decomposition on
    the dense input.  The Pout axis is ordered (ry, rx, cout)."""
    cin, cout, kh, kw = w_torch.shape
    assert kh == 5 and kw == 5
    wf = jnp.flip(w_torch, axis=(2, 3))                    # equivalent conv taps
    wfp = jnp.pad(wf, ((0, 0), (0, 0), (1, 0), (1, 0)))    # (Cin, Cout, 6, 6)
    taps = []
    for ty in range(3):
        for tx in range(3):
            phases = []
            for ry in range(2):
                for rx in range(2):
                    phases.append(wfp[:, :, 2 * ty + 1 - ry, 2 * tx + 1 - rx])
            taps.append(jnp.concatenate(phases, axis=1))   # (Cin, 4*Cout)
    return jnp.concatenate(taps, axis=0)                   # (9*Cin, 4*Cout)


def _conv_weight_s1(w_torch):
    """ConvTranspose2d(k=3, s=1, p=1) weight -> (9*Cin, Cout) packed weight."""
    cin, cout, kh, kw = w_torch.shape
    assert kh == 3 and kw == 3
    wf = jnp.flip(w_torch, axis=(2, 3))
    taps = [wf[:, :, a, b] for a in range(3) for b in range(3)]
    return jnp.concatenate(taps, axis=0)


def pack_params(params, compute_dtype=jnp.bfloat16):
    """Pack torch-layout deconv weights once into MXU-friendly matrices.
    bf16 weights/activations with f32 accumulation is the intended default
    operating point; pass jnp.float32 for a bit-tighter reference match."""
    (w1, b1), (w2, b2), (w3, b3) = params

    def bias4(b):   # 4-phase bias, same (ry, rx, cout) order as the weight
        return jnp.tile(b, 4).reshape(1, -1).astype(jnp.float32)

    return (
        (_polyphase_weight_s2(w1).astype(compute_dtype), bias4(b1)),
        (_polyphase_weight_s2(w2).astype(compute_dtype), bias4(b2)),
        (_conv_weight_s1(w3).astype(compute_dtype),
         b3.reshape(1, -1).astype(jnp.float32)),
    )


# ---------------------------------------------------------------------------
# Layer wrappers & full forward.
# ---------------------------------------------------------------------------
def _deconv_s2(x_nhwc, w_mat, bias_row, *, relu, row_cap):
    """deconv(Cin, Cout, k=5, s=2, p=2, op=1) via polyphase decomposition."""
    B, H, W, _ = x_nhwc.shape
    cout = w_mat.shape[1] // 4
    y = _conv3x3_pallas(x_nhwc, w_mat, bias_row, relu=relu, ry_split=True,
                        row_cap=row_cap)
    # (B, H, 2, W, 2*Cout) is already in (2H, 2W, Cout) row-major order:
    # the pixel-shuffle is a pure reshape (no transpose, no extra HBM pass).
    return y.reshape(B, 2 * H, 2 * W, cout)


def _deconv_s1(x_nhwc, w_mat, bias_row, *, relu, row_cap, out_dtype=None):
    """deconv(Cin, Cout, k=3, s=1, p=1, op=0) == SAME 3x3 conv (flipped taps)."""
    return _conv3x3_pallas(x_nhwc, w_mat, bias_row, relu=relu, ry_split=False,
                           row_cap=row_cap, out_dtype=out_dtype)


def hyper_synthesis_ex_pallas(x_nchw, packed_params, row_cap=32):
    """Forward pass.  packed_params comes from pack_params().  Returns f32."""
    (w1, b1), (w2, b2), (w3, b3) = packed_params
    cdt = w1.dtype
    x = jnp.transpose(x_nchw, (0, 2, 3, 1)).astype(cdt)    # NCHW -> NHWC
    x = _deconv_s2(x, w1, b1, relu=True, row_cap=row_cap)
    x = _deconv_s2(x, w2, b2, relu=True, row_cap=row_cap)
    x = _deconv_s1(x, w3, b3, relu=False, row_cap=row_cap,
                   out_dtype=jnp.float32)
    return jnp.transpose(x, (0, 3, 1, 2))                  # NHWC -> NCHW


def init_params(key, N, M):
    """Deterministic synthetic params (same shapes as the torch module)."""
    specs = [
        (N, M, 5),                  # deconv(N, M)
        (M, M * 3 // 2, 5),         # deconv(M, 3M/2)
        (M * 3 // 2, M * 2, 3),     # deconv(3M/2, 2M, k=3, s=1)
    ]
    params = []
    for i, (cin, cout, k) in enumerate(specs):
        kw, kb = jax.random.split(jax.random.fold_in(key, i))
        w = 0.1 * jax.random.normal(kw, (cin, cout, k, k), jnp.float32)
        b = 0.1 * jax.random.normal(kb, (cout,), jnp.float32)
        params.append((w, b))
    return params


# ---------------- pure-JAX reference (for correctness check only) -----------
def _deconv_ref(x_nhwc, w_torch, bias, *, stride, padding, output_padding,
                relu):
    k = w_torch.shape[2]
    w_conv = jnp.flip(w_torch, axis=(2, 3)).transpose(2, 3, 0, 1)
    lo = k - 1 - padding
    y = jax.lax.conv_general_dilated(
        x_nhwc, w_conv, window_strides=(1, 1),
        padding=[(lo, lo + output_padding), (lo, lo + output_padding)],
        lhs_dilation=(stride, stride),
        dimension_numbers=("NHWC", "HWIO", "NHWC"))
    y = y + bias[None, None, None, :]
    return jnp.maximum(y, 0.0) if relu else y


def hyper_synthesis_ex_ref(x_nchw, params):
    x = jnp.transpose(x_nchw, (0, 2, 3, 1))
    (w1, b1), (w2, b2), (w3, b3) = params
    x = _deconv_ref(x, w1, b1, stride=2, padding=2, output_padding=1,
                    relu=True)
    x = _deconv_ref(x, w2, b2, stride=2, padding=2, output_padding=1,
                    relu=True)
    x = _deconv_ref(x, w3, b3, stride=1, padding=1, output_padding=0,
                    relu=False)
    return jnp.transpose(x, (0, 3, 1, 2))


if __name__ == "__main__":
    key = jax.random.PRNGKey(0)
    N, M = 4, 8
    B, H, W = 2, 8, 8

    kx, kp = jax.random.split(key)
    x = jax.random.normal(kx, (B, N, H, W), jnp.float32)
    params = init_params(kp, N, M)

    ref = jax.block_until_ready(hyper_synthesis_ex_ref(x, params))

    fwd = jax.jit(hyper_synthesis_ex_pallas)

    # f32 compute path: tight check against the conv_general_dilated reference.
    out = jax.block_until_ready(fwd(x, pack_params(params, jnp.float32)))
    assert out.shape == (B, 2 * M, 4 * H, 4 * W), out.shape
    max_err = float(jnp.max(jnp.abs(out - ref)))
    assert jnp.allclose(out, ref, atol=1e-3, rtol=1e-3), max_err

    # Default bf16-compute / f32-accumulate operating point: loose check.
    out_bf16 = jax.block_until_ready(fwd(x, pack_params(params)))
    bf16_err = float(jnp.max(jnp.abs(out_bf16 - ref)))
    assert bf16_err < 0.1, bf16_err

    print("KERNEL_OK")
</pallas_src>

<mosaic_0001>
module attributes {stable_mosaic.version = 11 : i64} {
  func.func @_conv3x3_tap_kernel(%arg0: i32, %arg1: i32, %arg2: memref<1x18x18x8xf32, #tpu.memory_space<vmem>>, %arg3: memref<72x48xf32, #tpu.memory_space<vmem>>, %arg4: memref<1x48xf32, #tpu.memory_space<vmem>>, %arg5: memref<1x16x2x16x24xf32, #tpu.memory_space<vmem>>) attributes {dimension_semantics = [#tpu.dimension_semantics<parallel>, #tpu.dimension_semantics<parallel>], iteration_bounds = array<i64: 2, 1>, scalar_prefetch = 0 : i64, scratch_operands = 0 : i64, tpu.core_type = #tpu.core_type<tc>, window_params = [{transform_indices = @transform_0, window_bounds = array<i64: 1, 18, 18, 8>}, {pipeline_mode = #tpu.pipeline_mode<synchronous>, transform_indices = @transform_1, window_bounds = array<i64: 72, 48>}, {pipeline_mode = #tpu.pipeline_mode<synchronous>, transform_indices = @transform_2, window_bounds = array<i64: 1, 48>}, {transform_indices = @transform_3, window_bounds = array<i64: 1, 16, 2, 16, 24>}]} {
    %c16_i32 = arith.constant 16 : i32
    %0 = arith.muli %arg1, %c16_i32 : i32
    %1 = tpu.assume_multiple %0, 16 : i32
    %c0_i32 = arith.constant 0 : i32
    %2 = arith.addi %1, %c0_i32 : i32
    %c0 = arith.constant 0 : index
    %3 = arith.index_cast %2 : i32 to index
    %c0_0 = arith.constant 0 : index
    %c0_1 = arith.constant 0 : index
    %4 = vector.load %arg2[%c0, %3, %c0_0, %c0_1] : memref<1x18x18x8xf32, #tpu.memory_space<vmem>>, vector<1x16x16x8xf32>
    %5 = vector.shape_cast %4 : vector<1x16x16x8xf32> to vector<16x16x8xf32>
    %c0_2 = arith.constant 0 : index
    %c0_3 = arith.constant 0 : index
    %6 = vector.load %arg3[%c0_2, %c0_3] : memref<72x48xf32, #tpu.memory_space<vmem>>, vector<8x48xf32>
    %7 = vector.shape_cast %5 : vector<16x16x8xf32> to vector<256x8xf32>
    %cst = arith.constant dense<0.000000e+00> : vector<256x48xf32>
    %8 = tpu.matmul %7, %6, %cst {dimension_numbers = #tpu.dot_dimension_numbers<[1], [0], [0], [1], [0, 0, 1, 1], [], []>} : vector<256x8xf32>, vector<8x48xf32>, vector<256x48xf32> -> vector<256x48xf32>
    %c0_i32_4 = arith.constant 0 : i32
    %9 = arith.addi %1, %c0_i32_4 : i32
    %c0_5 = arith.constant 0 : index
    %10 = arith.index_cast %9 : i32 to index
    %c1 = arith.constant 1 : index
    %c0_6 = arith.constant 0 : index
    %11 = vector.load %arg2[%c0_5, %10, %c1, %c0_6] : memref<1x18x18x8xf32, #tpu.memory_space<vmem>>, vector<1x16x16x8xf32>
    %12 = vector.shape_cast %11 : vector<1x16x16x8xf32> to vector<16x16x8xf32>
    %c8 = arith.constant 8 : index
    %c0_7 = arith.constant 0 : index
    %13 = vector.load %arg3[%c8, %c0_7] : memref<72x48xf32, #tpu.memory_space<vmem>>, vector<8x48xf32>
    %14 = vector.shape_cast %12 : vector<16x16x8xf32> to vector<256x8xf32>
    %cst_8 = arith.constant dense<0.000000e+00> : vector<256x48xf32>
    %15 = tpu.matmul %14, %13, %cst_8 {dimension_numbers = #tpu.dot_dimension_numbers<[1], [0], [0], [1], [0, 0, 1, 1], [], []>} : vector<256x8xf32>, vector<8x48xf32>, vector<256x48xf32> -> vector<256x48xf32>
    %16 = arith.addf %8, %15 : vector<256x48xf32>
    %c0_i32_9 = arith.constant 0 : i32
    %17 = arith.addi %1, %c0_i32_9 : i32
    %c0_10 = arith.constant 0 : index
    %18 = arith.index_cast %17 : i32 to index
    %c2 = arith.constant 2 : index
    %c0_11 = arith.constant 0 : index
    %19 = vector.load %arg2[%c0_10, %18, %c2, %c0_11] : memref<1x18x18x8xf32, #tpu.memory_space<vmem>>, vector<1x16x16x8xf32>
    %20 = vector.shape_cast %19 : vector<1x16x16x8xf32> to vector<16x16x8xf32>
    %c16 = arith.constant 16 : index
    %c0_12 = arith.constant 0 : index
    %21 = vector.load %arg3[%c16, %c0_12] : memref<72x48xf32, #tpu.memory_space<vmem>>, vector<8x48xf32>
    %22 = vector.shape_cast %20 : vector<16x16x8xf32> to vector<256x8xf32>
    %cst_13 = arith.constant dense<0.000000e+00> : vector<256x48xf32>
    %23 = tpu.matmul %22, %21, %cst_13 {dimension_numbers = #tpu.dot_dimension_numbers<[1], [0], [0], [1], [0, 0, 1, 1], [], []>} : vector<256x8xf32>, vector<8x48xf32>, vector<256x48xf32> -> vector<256x48xf32>
    %24 = arith.addf %16, %23 : vector<256x48xf32>
    %c1_i32 = arith.constant 1 : i32
    %25 = arith.addi %1, %c1_i32 : i32
    %c0_14 = arith.constant 0 : index
    %26 = arith.index_cast %25 : i32 to index
    %c0_15 = arith.constant 0 : index
    %c0_16 = arith.constant 0 : index
    %27 = vector.load %arg2[%c0_14, %26, %c0_15, %c0_16] : memref<1x18x18x8xf32, #tpu.memory_space<vmem>>, vector<1x16x16x8xf32>
    %28 = vector.shape_cast %27 : vector<1x16x16x8xf32> to vector<16x16x8xf32>
    %c24 = arith.constant 24 : index
    %c0_17 = arith.constant 0 : index
    %29 = vector.load %arg3[%c24, %c0_17] : memref<72x48xf32, #tpu.memory_space<vmem>>, vector<8x48xf32>
    %30 = vector.shape_cast %28 : vector<16x16x8xf32> to vector<256x8xf32>
    %cst_18 = arith.constant dense<0.000000e+00> : vector<256x48xf32>
    %31 = tpu.matmul %30, %29, %cst_18 {dimension_numbers = #tpu.dot_dimension_numbers<[1], [0], [0], [1], [0, 0, 1, 1], [], []>} : vector<256x8xf32>, vector<8x48xf32>, vector<256x48xf32> -> vector<256x48xf32>
    %32 = arith.addf %24, %31 : vector<256x48xf32>
    %c1_i32_19 = arith.constant 1 : i32
    %33 = arith.addi %1, %c1_i32_19 : i32
    %c0_20 = arith.constant 0 : index
    %34 = arith.index_cast %33 : i32 to index
    %c1_21 = arith.constant 1 : index
    %c0_22 = arith.constant 0 : index
    %35 = vector.load %arg2[%c0_20, %34, %c1_21, %c0_22] : memref<1x18x18x8xf32, #tpu.memory_space<vmem>>, vector<1x16x16x8xf32>
    %36 = vector.shape_cast %35 : vector<1x16x16x8xf32> to vector<16x16x8xf32>
    %c32 = arith.constant 32 : index
    %c0_23 = arith.constant 0 : index
    %37 = vector.load %arg3[%c32, %c0_23] : memref<72x48xf32, #tpu.memory_space<vmem>>, vector<8x48xf32>
    %38 = vector.shape_cast %36 : vector<16x16x8xf32> to vector<256x8xf32>
    %cst_24 = arith.constant dense<0.000000e+00> : vector<256x48xf32>
    %39 = tpu.matmul %38, %37, %cst_24 {dimension_numbers = #tpu.dot_dimension_numbers<[1], [0], [0], [1], [0, 0, 1, 1], [], []>} : vector<256x8xf32>, vector<8x48xf32>, vector<256x48xf32> -> vector<256x48xf32>
    %40 = arith.addf %32, %39 : vector<256x48xf32>
    %c1_i32_25 = arith.constant 1 : i32
    %41 = arith.addi %1, %c1_i32_25 : i32
    %c0_26 = arith.constant 0 : index
    %42 = arith.index_cast %41 : i32 to index
    %c2_27 = arith.constant 2 : index
    %c0_28 = arith.constant 0 : index
    %43 = vector.load %arg2[%c0_26, %42, %c2_27, %c0_28] : memref<1x18x18x8xf32, #tpu.memory_space<vmem>>, vector<1x16x16x8xf32>
    %44 = vector.shape_cast %43 : vector<1x16x16x8xf32> to vector<16x16x8xf32>
    %c40 = arith.constant 40 : index
    %c0_29 = arith.constant 0 : index
    %45 = vector.load %arg3[%c40, %c0_29] : memref<72x48xf32, #tpu.memory_space<vmem>>, vector<8x48xf32>
    %46 = vector.shape_cast %44 : vector<16x16x8xf32> to vector<256x8xf32>
    %cst_30 = arith.constant dense<0.000000e+00> : vector<256x48xf32>
    %47 = tpu.matmul %46, %45, %cst_30 {dimension_numbers = #tpu.dot_dimension_numbers<[1], [0], [0], [1], [0, 0, 1, 1], [], []>} : vector<256x8xf32>, vector<8x48xf32>, vector<256x48xf32> -> vector<256x48xf32>
    %48 = arith.addf %40, %47 : vector<256x48xf32>
    %c2_i32 = arith.constant 2 : i32
    %49 = arith.addi %1, %c2_i32 : i32
    %c0_31 = arith.constant 0 : index
    %50 = arith.index_cast %49 : i32 to index
    %c0_32 = arith.constant 0 : index
    %c0_33 = arith.constant 0 : index
    %51 = vector.load %arg2[%c0_31, %50, %c0_32, %c0_33] : memref<1x18x18x8xf32, #tpu.memory_space<vmem>>, vector<1x16x16x8xf32>
    %52 = vector.shape_cast %51 : vector<1x16x16x8xf32> to vector<16x16x8xf32>
    %c48 = arith.constant 48 : index
    %c0_34 = arith.constant 0 : index
    %53 = vector.load %arg3[%c48, %c0_34] : memref<72x48xf32, #tpu.memory_space<vmem>>, vector<8x48xf32>
    %54 = vector.shape_cast %52 : vector<16x16x8xf32> to vector<256x8xf32>
    %cst_35 = arith.constant dense<0.000000e+00> : vector<256x48xf32>
    %55 = tpu.matmul %54, %53, %cst_35 {dimension_numbers = #tpu.dot_dimension_numbers<[1], [0], [0], [1], [0, 0, 1, 1], [], []>} : vector<256x8xf32>, vector<8x48xf32>, vector<256x48xf32> -> vector<256x48xf32>
    %56 = arith.addf %48, %55 : vector<256x48xf32>
    %c2_i32_36 = arith.constant 2 : i32
    %57 = arith.addi %1, %c2_i32_36 : i32
    %c0_37 = arith.constant 0 : index
    %58 = arith.index_cast %57 : i32 to index
    %c1_38 = arith.constant 1 : index
    %c0_39 = arith.constant 0 : index
    %59 = vector.load %arg2[%c0_37, %58, %c1_38, %c0_39] : memref<1x18x18x8xf32, #tpu.memory_space<vmem>>, vector<1x16x16x8xf32>
    %60 = vector.shape_cast %59 : vector<1x16x16x8xf32> to vector<16x16x8xf32>
    %c56 = arith.constant 56 : index
    %c0_40 = arith.constant 0 : index
    %61 = vector.load %arg3[%c56, %c0_40] : memref<72x48xf32, #tpu.memory_space<vmem>>, vector<8x48xf32>
    %62 = vector.shape_cast %60 : vector<16x16x8xf32> to vector<256x8xf32>
    %cst_41 = arith.constant dense<0.000000e+00> : vector<256x48xf32>
    %63 = tpu.matmul %62, %61, %cst_41 {dimension_numbers = #tpu.dot_dimension_numbers<[1], [0], [0], [1], [0, 0, 1, 1], [], []>} : vector<256x8xf32>, vector<8x48xf32>, vector<256x48xf32> -> vector<256x48xf32>
    %64 = arith.addf %56, %63 : vector<256x48xf32>
    %c2_i32_42 = arith.constant 2 : i32
    %65 = arith.addi %1, %c2_i32_42 : i32
    %c0_43 = arith.constant 0 : index
    %66 = arith.index_cast %65 : i32 to index
    %c2_44 = arith.constant 2 : index
    %c0_45 = arith.constant 0 : index
    %67 = vector.load %arg2[%c0_43, %66, %c2_44, %c0_45] : memref<1x18x18x8xf32, #tpu.memory_space<vmem>>, vector<1x16x16x8xf32>
    %68 = vector.shape_cast %67 : vector<1x16x16x8xf32> to vector<16x16x8xf32>
    %c64 = arith.constant 64 : index
    %c0_46 = arith.constant 0 : index
    %69 = vector.load %arg3[%c64, %c0_46] : memref<72x48xf32, #tpu.memory_space<vmem>>, vector<8x48xf32>
    %70 = vector.shape_cast %68 : vector<16x16x8xf32> to vector<256x8xf32>
    %cst_47 = arith.constant dense<0.000000e+00> : vector<256x48xf32>
    %71 = tpu.matmul %70, %69, %cst_47 {dimension_numbers = #tpu.dot_dimension_numbers<[1], [0], [0], [1], [0, 0, 1, 1], [], []>} : vector<256x8xf32>, vector<8x48xf32>, vector<256x48xf32> -> vector<256x48xf32>
    %72 = arith.addf %64, %71 : vector<256x48xf32>
    %c0_48 = arith.constant 0 : index
    %c0_49 = arith.constant 0 : index
    %73 = vector.load %arg4[%c0_48, %c0_49] : memref<1x48xf32, #tpu.memory_space<vmem>>, vector<1x48xf32>
    %74 = vector.broadcast %73 : vector<1x48xf32> to vector<256x48xf32>
    %75 = arith.addf %72, %74 : vector<256x48xf32>
    %cst_50 = arith.constant 0.000000e+00 : f32
    %76 = vector.broadcast %cst_50 : f32 to vector<256x48xf32>
    %77 = arith.maximumf %75, %76 : vector<256x48xf32>
    %78 = vector.extract_strided_slice %77 {offsets = [0, 0], sizes = [256, 24], strides = [1, 1]} : vector<256x48xf32> to vector<256x24xf32>
    %79 = vector.shape_cast %78 : vector<256x24xf32> to vector<16x16x24xf32>
    %c0_51 = arith.constant 0 : index
    %c0_52 = arith.constant 0 : index
    %c0_53 = arith.constant 0 : index
    %c0_54 = arith.constant 0 : index
    %c0_55 = arith.constant 0 : index
    %80 = vector.load %arg5[%c0_51, %c0_52, %c0_53, %c0_54, %c0_55] : memref<1x16x2x16x24xf32, #tpu.memory_space<vmem>>, vector<1x16x1x16x24xf32>
    %81 = vector.shape_cast %80 : vector<1x16x1x16x24xf32> to vector<16x16x24xf32>
    %82 = vector.shape_cast %79 : vector<16x16x24xf32> to vector<1x16x1x16x24xf32>
    tpu.vector_store %arg5[%c0_51, %c0_52, %c0_53, %c0_54, %c0_55], %82 {strides = array<i32>} : memref<1x16x2x16x24xf32, #tpu.memory_space<vmem>>, vector<1x16x1x16x24xf32>,
    %83 = vector.extract_strided_slice %77 {offsets = [0, 24], sizes = [256, 24], strides = [1, 1]} : vector<256x48xf32> to vector<256x24xf32>
    %84 = vector.shape_cast %83 : vector<256x24xf32> to vector<16x16x24xf32>
    %c0_56 = arith.constant 0 : index
    %c0_57 = arith.constant 0 : index
    %c1_58 = arith.constant 1 : index
    %c0_59 = arith.constant 0 : index
    %c0_60 = arith.constant 0 : index
    %85 = vector.load %arg5[%c0_56, %c0_57, %c1_58, %c0_59, %c0_60] : memref<1x16x2x16x24xf32, #tpu.memory_space<vmem>>, vector<1x16x1x16x24xf32>
    %86 = vector.shape_cast %85 : vector<1x16x1x16x24xf32> to vector<16x16x24xf32>
    %87 = vector.shape_cast %84 : vector<16x16x24xf32> to vector<1x16x1x16x24xf32>
    tpu.vector_store %arg5[%c0_56, %c0_57, %c1_58, %c0_59, %c0_60], %87 {strides = array<i32>} : memref<1x16x2x16x24xf32, #tpu.memory_space<vmem>>, vector<1x16x1x16x24xf32>,
    return
  }
  func.func @transform_0(%arg0: i32, %arg1: i32) -> (i32, i32, i32, i32) {
    %c0_i32 = arith.constant 0 : i32
    %c0_i32_0 = arith.constant 0 : i32
    %c0_i32_1 = arith.constant 0 : i32
    %c0_i32_2 = arith.constant 0 : i32
    return %arg0, %c0_i32, %c0_i32_0, %c0_i32_1 : i32, i32, i32, i32
  }
  func.func @transform_1(%arg0: i32, %arg1: i32) -> (i32, i32) {
    %c0_i32 = arith.constant 0 : i32
    %c0_i32_0 = arith.constant 0 : i32
    %c0_i32_1 = arith.constant 0 : i32
    return %c0_i32, %c0_i32_0 : i32, i32
  }
  func.func @transform_2(%arg0: i32, %arg1: i32) -> (i32, i32) {
    %c0_i32 = arith.constant 0 : i32
    %c0_i32_0 = arith.constant 0 : i32
    %c0_i32_1 = arith.constant 0 : i32
    return %c0_i32, %c0_i32_0 : i32, i32
  }
  func.func @transform_3(%arg0: i32, %arg1: i32) -> (i32, i32, i32, i32, i32) {
    %c0_i32 = arith.constant 0 : i32
    %c0_i32_0 = arith.constant 0 : i32
    %c0_i32_1 = arith.constant 0 : i32
    %c0_i32_2 = arith.constant 0 : i32
    return %arg0, %arg1, %c0_i32, %c0_i32_0, %c0_i32_1 : i32, i32, i32, i32, i32
  }
}

module attributes {stable_mosaic.version = 11 : i64} {
  func.func @_conv3x3_tap_kernel(%arg0: i32, %arg1: i32, %arg2: memref<1x10x10x4xf32, #tpu.memory_space<vmem>>, %arg3: memref<36x32xf32, #tpu.memory_space<vmem>>, %arg4: memref<1x32xf32, #tpu.memory_space<vmem>>, %arg5: memref<1x8x2x8x16xf32, #tpu.memory_space<vmem>>) attributes {dimension_semantics = [#tpu.dimension_semantics<parallel>, #tpu.dimension_semantics<parallel>], iteration_bounds = array<i64: 2, 1>, scalar_prefetch = 0 : i64, scratch_operands = 0 : i64, tpu.core_type = #tpu.core_type<tc>, window_params = [{transform_indices = @transform_0, window_bounds = array<i64: 1, 10, 10, 4>}, {pipeline_mode = #tpu.pipeline_mode<synchronous>, transform_indices = @transform_1, window_bounds = array<i64: 36, 32>}, {pipeline_mode = #tpu.pipeline_mode<synchronous>, transform_indices = @transform_2, window_bounds = array<i64: 1, 32>}, {transform_indices = @transform_3, window_bounds = array<i64: 1, 8, 2, 8, 16>}]} {
    %c8_i32 = arith.constant 8 : i32
    %0 = arith.muli %arg1, %c8_i32 : i32
    %1 = tpu.assume_multiple %0, 8 : i32
    %c0_i32 = arith.constant 0 : i32
    %2 = arith.addi %1, %c0_i32 : i32
    %c0 = arith.constant 0 : index
    %3 = arith.index_cast %2 : i32 to index
    %c0_0 = arith.constant 0 : index
    %c0_1 = arith.constant 0 : index
    %4 = vector.load %arg2[%c0, %3, %c0_0, %c0_1] : memref<1x10x10x4xf32, #tpu.memory_space<vmem>>, vector<1x8x8x4xf32>
    %5 = vector.shape_cast %4 : vector<1x8x8x4xf32> to vector<8x8x4xf32>
    %c0_2 = arith.constant 0 : index
    %c0_3 = arith.constant 0 : index
    %6 = vector.load %arg3[%c0_2, %c0_3] : memref<36x32xf32, #tpu.memory_space<vmem>>, vector<4x32xf32>
    %7 = vector.shape_cast %5 : vector<8x8x4xf32> to vector<64x4xf32>
    %cst = arith.constant dense<0.000000e+00> : vector<64x32xf32>
    %8 = tpu.matmul %7, %6, %cst {dimension_numbers = #tpu.dot_dimension_numbers<[1], [0], [0], [1], [0, 0, 1, 1], [], []>} : vector<64x4xf32>, vector<4x32xf32>, vector<64x32xf32> -> vector<64x32xf32>
    %c0_i32_4 = arith.constant 0 : i32
    %9 = arith.addi %1, %c0_i32_4 : i32
    %c0_5 = arith.constant 0 : index
    %10 = arith.index_cast %9 : i32 to index
    %c1 = arith.constant 1 : index
    %c0_6 = arith.constant 0 : index
    %11 = vector.load %arg2[%c0_5, %10, %c1, %c0_6] : memref<1x10x10x4xf32, #tpu.memory_space<vmem>>, vector<1x8x8x4xf32>
    %12 = vector.shape_cast %11 : vector<1x8x8x4xf32> to vector<8x8x4xf32>
    %c4 = arith.constant 4 : index
    %c0_7 = arith.constant 0 : index
    %13 = vector.load %arg3[%c4, %c0_7] : memref<36x32xf32, #tpu.memory_space<vmem>>, vector<4x32xf32>
    %14 = vector.shape_cast %12 : vector<8x8x4xf32> to vector<64x4xf32>
    %cst_8 = arith.constant dense<0.000000e+00> : vector<64x32xf32>
    %15 = tpu.matmul %14, %13, %cst_8 {dimension_numbers = #tpu.dot_dimension_numbers<[1], [0], [0], [1], [0, 0, 1, 1], [], []>} : vector<64x4xf32>, vector<4x32xf32>, vector<64x32xf32> -> vector<64x32xf32>
    %16 = arith.addf %8, %15 : vector<64x32xf32>
    %c0_i32_9 = arith.constant 0 : i32
    %17 = arith.addi %1, %c0_i32_9 : i32
    %c0_10 = arith.constant 0 : index
    %18 = arith.index_cast %17 : i32 to index
    %c2 = arith.constant 2 : index
    %c0_11 = arith.constant 0 : index
    %19 = vector.load %arg2[%c0_10, %18, %c2, %c0_11] : memref<1x10x10x4xf32, #tpu.memory_space<vmem>>, vector<1x8x8x4xf32>
    %20 = vector.shape_cast %19 : vector<1x8x8x4xf32> to vector<8x8x4xf32>
    %c8 = arith.constant 8 : index
    %c0_12 = arith.constant 0 : index
    %21 = vector.load %arg3[%c8, %c0_12] : memref<36x32xf32, #tpu.memory_space<vmem>>, vector<4x32xf32>
    %22 = vector.shape_cast %20 : vector<8x8x4xf32> to vector<64x4xf32>
    %cst_13 = arith.constant dense<0.000000e+00> : vector<64x32xf32>
    %23 = tpu.matmul %22, %21, %cst_13 {dimension_numbers = #tpu.dot_dimension_numbers<[1], [0], [0], [1], [0, 0, 1, 1], [], []>} : vector<64x4xf32>, vector<4x32xf32>, vector<64x32xf32> -> vector<64x32xf32>
    %24 = arith.addf %16, %23 : vector<64x32xf32>
    %c1_i32 = arith.constant 1 : i32
    %25 = arith.addi %1, %c1_i32 : i32
    %c0_14 = arith.constant 0 : index
    %26 = arith.index_cast %25 : i32 to index
    %c0_15 = arith.constant 0 : index
    %c0_16 = arith.constant 0 : index
    %27 = vector.load %arg2[%c0_14, %26, %c0_15, %c0_16] : memref<1x10x10x4xf32, #tpu.memory_space<vmem>>, vector<1x8x8x4xf32>
    %28 = vector.shape_cast %27 : vector<1x8x8x4xf32> to vector<8x8x4xf32>
    %c12 = arith.constant 12 : index
    %c0_17 = arith.constant 0 : index
    %29 = vector.load %arg3[%c12, %c0_17] : memref<36x32xf32, #tpu.memory_space<vmem>>, vector<4x32xf32>
    %30 = vector.shape_cast %28 : vector<8x8x4xf32> to vector<64x4xf32>
    %cst_18 = arith.constant dense<0.000000e+00> : vector<64x32xf32>
    %31 = tpu.matmul %30, %29, %cst_18 {dimension_numbers = #tpu.dot_dimension_numbers<[1], [0], [0], [1], [0, 0, 1, 1], [], []>} : vector<64x4xf32>, vector<4x32xf32>, vector<64x32xf32> -> vector<64x32xf32>
    %32 = arith.addf %24, %31 : vector<64x32xf32>
    %c1_i32_19 = arith.constant 1 : i32
    %33 = arith.addi %1, %c1_i32_19 : i32
    %c0_20 = arith.constant 0 : index
    %34 = arith.index_cast %33 : i32 to index
    %c1_21 = arith.constant 1 : index
    %c0_22 = arith.constant 0 : index
    %35 = vector.load %arg2[%c0_20, %34, %c1_21, %c0_22] : memref<1x10x10x4xf32, #tpu.memory_space<vmem>>, vector<1x8x8x4xf32>
    %36 = vector.shape_cast %35 : vector<1x8x8x4xf32> to vector<8x8x4xf32>
    %c16 = arith.constant 16 : index
    %c0_23 = arith.constant 0 : index
    %37 = vector.load %arg3[%c16, %c0_23] : memref<36x32xf32, #tpu.memory_space<vmem>>, vector<4x32xf32>
    %38 = vector.shape_cast %36 : vector<8x8x4xf32> to vector<64x4xf32>
    %cst_24 = arith.constant dense<0.000000e+00> : vector<64x32xf32>
    %39 = tpu.matmul %38, %37, %cst_24 {dimension_numbers = #tpu.dot_dimension_numbers<[1], [0], [0], [1], [0, 0, 1, 1], [], []>} : vector<64x4xf32>, vector<4x32xf32>, vector<64x32xf32> -> vector<64x32xf32>
    %40 = arith.addf %32, %39 : vector<64x32xf32>
    %c1_i32_25 = arith.constant 1 : i32
    %41 = arith.addi %1, %c1_i32_25 : i32
    %c0_26 = arith.constant 0 : index
    %42 = arith.index_cast %41 : i32 to index
    %c2_27 = arith.constant 2 : index
    %c0_28 = arith.constant 0 : index
    %43 = vector.load %arg2[%c0_26, %42, %c2_27, %c0_28] : memref<1x10x10x4xf32, #tpu.memory_space<vmem>>, vector<1x8x8x4xf32>
    %44 = vector.shape_cast %43 : vector<1x8x8x4xf32> to vector<8x8x4xf32>
    %c20 = arith.constant 20 : index
    %c0_29 = arith.constant 0 : index
    %45 = vector.load %arg3[%c20, %c0_29] : memref<36x32xf32, #tpu.memory_space<vmem>>, vector<4x32xf32>
    %46 = vector.shape_cast %44 : vector<8x8x4xf32> to vector<64x4xf32>
    %cst_30 = arith.constant dense<0.000000e+00> : vector<64x32xf32>
    %47 = tpu.matmul %46, %45, %cst_30 {dimension_numbers = #tpu.dot_dimension_numbers<[1], [0], [0], [1], [0, 0, 1, 1], [], []>} : vector<64x4xf32>, vector<4x32xf32>, vector<64x32xf32> -> vector<64x32xf32>
    %48 = arith.addf %40, %47 : vector<64x32xf32>
    %c2_i32 = arith.constant 2 : i32
    %49 = arith.addi %1, %c2_i32 : i32
    %c0_31 = arith.constant 0 : index
    %50 = arith.index_cast %49 : i32 to index
    %c0_32 = arith.constant 0 : index
    %c0_33 = arith.constant 0 : index
    %51 = vector.load %arg2[%c0_31, %50, %c0_32, %c0_33] : memref<1x10x10x4xf32, #tpu.memory_space<vmem>>, vector<1x8x8x4xf32>
    %52 = vector.shape_cast %51 : vector<1x8x8x4xf32> to vector<8x8x4xf32>
    %c24 = arith.constant 24 : index
    %c0_34 = arith.constant 0 : index
    %53 = vector.load %arg3[%c24, %c0_34] : memref<36x32xf32, #tpu.memory_space<vmem>>, vector<4x32xf32>
    %54 = vector.shape_cast %52 : vector<8x8x4xf32> to vector<64x4xf32>
    %cst_35 = arith.constant dense<0.000000e+00> : vector<64x32xf32>
    %55 = tpu.matmul %54, %53, %cst_35 {dimension_numbers = #tpu.dot_dimension_numbers<[1], [0], [0], [1], [0, 0, 1, 1], [], []>} : vector<64x4xf32>, vector<4x32xf32>, vector<64x32xf32> -> vector<64x32xf32>
    %56 = arith.addf %48, %55 : vector<64x32xf32>
    %c2_i32_36 = arith.constant 2 : i32
    %57 = arith.addi %1, %c2_i32_36 : i32
    %c0_37 = arith.constant 0 : index
    %58 = arith.index_cast %57 : i32 to index
    %c1_38 = arith.constant 1 : index
    %c0_39 = arith.constant 0 : index
    %59 = vector.load %arg2[%c0_37, %58, %c1_38, %c0_39] : memref<1x10x10x4xf32, #tpu.memory_space<vmem>>, vector<1x8x8x4xf32>
    %60 = vector.shape_cast %59 : vector<1x8x8x4xf32> to vector<8x8x4xf32>
    %c28 = arith.constant 28 : index
    %c0_40 = arith.constant 0 : index
    %61 = vector.load %arg3[%c28, %c0_40] : memref<36x32xf32, #tpu.memory_space<vmem>>, vector<4x32xf32>
    %62 = vector.shape_cast %60 : vector<8x8x4xf32> to vector<64x4xf32>
    %cst_41 = arith.constant dense<0.000000e+00> : vector<64x32xf32>
    %63 = tpu.matmul %62, %61, %cst_41 {dimension_numbers = #tpu.dot_dimension_numbers<[1], [0], [0], [1], [0, 0, 1, 1], [], []>} : vector<64x4xf32>, vector<4x32xf32>, vector<64x32xf32> -> vector<64x32xf32>
    %64 = arith.addf %56, %63 : vector<64x32xf32>
    %c2_i32_42 = arith.constant 2 : i32
    %65 = arith.addi %1, %c2_i32_42 : i32
    %c0_43 = arith.constant 0 : index
    %66 = arith.index_cast %65 : i32 to index
    %c2_44 = arith.constant 2 : index
    %c0_45 = arith.constant 0 : index
    %67 = vector.load %arg2[%c0_43, %66, %c2_44, %c0_45] : memref<1x10x10x4xf32, #tpu.memory_space<vmem>>, vector<1x8x8x4xf32>
    %68 = vector.shape_cast %67 : vector<1x8x8x4xf32> to vector<8x8x4xf32>
    %c32 = arith.constant 32 : index
    %c0_46 = arith.constant 0 : index
    %69 = vector.load %arg3[%c32, %c0_46] : memref<36x32xf32, #tpu.memory_space<vmem>>, vector<4x32xf32>
    %70 = vector.shape_cast %68 : vector<8x8x4xf32> to vector<64x4xf32>
    %cst_47 = arith.constant dense<0.000000e+00> : vector<64x32xf32>
    %71 = tpu.matmul %70, %69, %cst_47 {dimension_numbers = #tpu.dot_dimension_numbers<[1], [0], [0], [1], [0, 0, 1, 1], [], []>} : vector<64x4xf32>, vector<4x32xf32>, vector<64x32xf32> -> vector<64x32xf32>
    %72 = arith.addf %64, %71 : vector<64x32xf32>
    %c0_48 = arith.constant 0 : index
    %c0_49 = arith.constant 0 : index
    %73 = vector.load %arg4[%c0_48, %c0_49] : memref<1x32xf32, #tpu.memory_space<vmem>>, vector<1x32xf32>
    %74 = vector.broadcast %73 : vector<1x32xf32> to vector<64x32xf32>
    %75 = arith.addf %72, %74 : vector<64x32xf32>
    %cst_50 = arith.constant 0.000000e+00 : f32
    %76 = vector.broadcast %cst_50 : f32 to vector<64x32xf32>
    %77 = arith.maximumf %75, %76 : vector<64x32xf32>
    %78 = vector.extract_strided_slice %77 {offsets = [0, 0], sizes = [64, 16], strides = [1, 1]} : vector<64x32xf32> to vector<64x16xf32>
    %79 = vector.shape_cast %78 : vector<64x16xf32> to vector<8x8x16xf32>
    %c0_51 = arith.constant 0 : index
    %c0_52 = arith.constant 0 : index
    %c0_53 = arith.constant 0 : index
    %c0_54 = arith.constant 0 : index
    %c0_55 = arith.constant 0 : index
    %80 = vector.load %arg5[%c0_51, %c0_52, %c0_53, %c0_54, %c0_55] : memref<1x8x2x8x16xf32, #tpu.memory_space<vmem>>, vector<1x8x1x8x16xf32>
    %81 = vector.shape_cast %80 : vector<1x8x1x8x16xf32> to vector<8x8x16xf32>
    %82 = vector.shape_cast %79 : vector<8x8x16xf32> to vector<1x8x1x8x16xf32>
    tpu.vector_store %arg5[%c0_51, %c0_52, %c0_53, %c0_54, %c0_55], %82 {strides = array<i32>} : memref<1x8x2x8x16xf32, #tpu.memory_space<vmem>>, vector<1x8x1x8x16xf32>,
    %83 = vector.extract_strided_slice %77 {offsets = [0, 16], sizes = [64, 16], strides = [1, 1]} : vector<64x32xf32> to vector<64x16xf32>
    %84 = vector.shape_cast %83 : vector<64x16xf32> to vector<8x8x16xf32>
    %c0_56 = arith.constant 0 : index
    %c0_57 = arith.constant 0 : index
    %c1_58 = arith.constant 1 : index
    %c0_59 = arith.constant 0 : index
    %c0_60 = arith.constant 0 : index
    %85 = vector.load %arg5[%c0_56, %c0_57, %c1_58, %c0_59, %c0_60] : memref<1x8x2x8x16xf32, #tpu.memory_space<vmem>>, vector<1x8x1x8x16xf32>
    %86 = vector.shape_cast %85 : vector<1x8x1x8x16xf32> to vector<8x8x16xf32>
    %87 = vector.shape_cast %84 : vector<8x8x16xf32> to vector<1x8x1x8x16xf32>
    tpu.vector_store %arg5[%c0_56, %c0_57, %c1_58, %c0_59, %c0_60], %87 {strides = array<i32>} : memref<1x8x2x8x16xf32, #tpu.memory_space<vmem>>, vector<1x8x1x8x16xf32>,
    return
  }
  func.func @transform_0(%arg0: i32, %arg1: i32) -> (i32, i32, i32, i32) {
    %c0_i32 = arith.constant 0 : i32
    %c0_i32_0 = arith.constant 0 : i32
    %c0_i32_1 = arith.constant 0 : i32
    %c0_i32_2 = arith.constant 0 : i32
    return %arg0, %c0_i32, %c0_i32_0, %c0_i32_1 : i32, i32, i32, i32
  }
  func.func @transform_1(%arg0: i32, %arg1: i32) -> (i32, i32) {
    %c0_i32 = arith.constant 0 : i32
    %c0_i32_0 = arith.constant 0 : i32
    %c0_i32_1 = arith.constant 0 : i32
    return %c0_i32, %c0_i32_0 : i32, i32
  }
  func.func @transform_2(%arg0: i32, %arg1: i32) -> (i32, i32) {
    %c0_i32 = arith.constant 0 : i32
    %c0_i32_0 = arith.constant 0 : i32
    %c0_i32_1 = arith.constant 0 : i32
    return %c0_i32, %c0_i32_0 : i32, i32
  }
  func.func @transform_3(%arg0: i32, %arg1: i32) -> (i32, i32, i32, i32, i32) {
    %c0_i32 = arith.constant 0 : i32
    %c0_i32_0 = arith.constant 0 : i32
    %c0_i32_1 = arith.constant 0 : i32
    %c0_i32_2 = arith.constant 0 : i32
    return %arg0, %arg1, %c0_i32, %c0_i32_0, %c0_i32_1 : i32, i32, i32, i32, i32
  }
}

module attributes {stable_mosaic.version = 11 : i64} {
  func.func @_conv3x3_tap_kernel(%arg0: i32, %arg1: i32, %arg2: memref<1x34x34x12xf32, #tpu.memory_space<vmem>>, %arg3: memref<108x16xf32, #tpu.memory_space<vmem>>, %arg4: memref<1x16xf32, #tpu.memory_space<vmem>>, %arg5: memref<1x32x32x16xf32, #tpu.memory_space<vmem>>) attributes {dimension_semantics = [#tpu.dimension_semantics<parallel>, #tpu.dimension_semantics<parallel>], iteration_bounds = array<i64: 2, 1>, scalar_prefetch = 0 : i64, scratch_operands = 0 : i64, tpu.core_type = #tpu.core_type<tc>, window_params = [{transform_indices = @transform_0, window_bounds = array<i64: 1, 34, 34, 12>}, {pipeline_mode = #tpu.pipeline_mode<synchronous>, transform_indices = @transform_1, window_bounds = array<i64: 108, 16>}, {pipeline_mode = #tpu.pipeline_mode<synchronous>, transform_indices = @transform_2, window_bounds = array<i64: 1, 16>}, {transform_indices = @transform_3, window_bounds = array<i64: 1, 32, 32, 16>}]} {
    %c32_i32 = arith.constant 32 : i32
    %0 = arith.muli %arg1, %c32_i32 : i32
    %1 = tpu.assume_multiple %0, 32 : i32
    %c0_i32 = arith.constant 0 : i32
    %2 = arith.addi %1, %c0_i32 : i32
    %c0 = arith.constant 0 : index
    %3 = arith.index_cast %2 : i32 to index
    %c0_0 = arith.constant 0 : index
    %c0_1 = arith.constant 0 : index
    %4 = vector.load %arg2[%c0, %3, %c0_0, %c0_1] : memref<1x34x34x12xf32, #tpu.memory_space<vmem>>, vector<1x32x32x12xf32>
    %5 = vector.shape_cast %4 : vector<1x32x32x12xf32> to vector<32x32x12xf32>
    %c0_2 = arith.constant 0 : index
    %c0_3 = arith.constant 0 : index
    %6 = vector.load %arg3[%c0_2, %c0_3] : memref<108x16xf32, #tpu.memory_space<vmem>>, vector<12x16xf32>
    %7 = vector.shape_cast %5 : vector<32x32x12xf32> to vector<1024x12xf32>
    %cst = arith.constant dense<0.000000e+00> : vector<1024x16xf32>
    %8 = tpu.matmul %7, %6, %cst {dimension_numbers = #tpu.dot_dimension_numbers<[1], [0], [0], [1], [0, 0, 1, 1], [], []>} : vector<1024x12xf32>, vector<12x16xf32>, vector<1024x16xf32> -> vector<1024x16xf32>
    %c0_i32_4 = arith.constant 0 : i32
    %9 = arith.addi %1, %c0_i32_4 : i32
    %c0_5 = arith.constant 0 : index
    %10 = arith.index_cast %9 : i32 to index
    %c1 = arith.constant 1 : index
    %c0_6 = arith.constant 0 : index
    %11 = vector.load %arg2[%c0_5, %10, %c1, %c0_6] : memref<1x34x34x12xf32, #tpu.memory_space<vmem>>, vector<1x32x32x12xf32>
    %12 = vector.shape_cast %11 : vector<1x32x32x12xf32> to vector<32x32x12xf32>
    %c12 = arith.constant 12 : index
    %c0_7 = arith.constant 0 : index
    %13 = vector.load %arg3[%c12, %c0_7] : memref<108x16xf32, #tpu.memory_space<vmem>>, vector<12x16xf32>
    %14 = vector.shape_cast %12 : vector<32x32x12xf32> to vector<1024x12xf32>
    %cst_8 = arith.constant dense<0.000000e+00> : vector<1024x16xf32>
    %15 = tpu.matmul %14, %13, %cst_8 {dimension_numbers = #tpu.dot_dimension_numbers<[1], [0], [0], [1], [0, 0, 1, 1], [], []>} : vector<1024x12xf32>, vector<12x16xf32>, vector<1024x16xf32> -> vector<1024x16xf32>
    %16 = arith.addf %8, %15 : vector<1024x16xf32>
    %c0_i32_9 = arith.constant 0 : i32
    %17 = arith.addi %1, %c0_i32_9 : i32
    %c0_10 = arith.constant 0 : index
    %18 = arith.index_cast %17 : i32 to index
    %c2 = arith.constant 2 : index
    %c0_11 = arith.constant 0 : index
    %19 = vector.load %arg2[%c0_10, %18, %c2, %c0_11] : memref<1x34x34x12xf32, #tpu.memory_space<vmem>>, vector<1x32x32x12xf32>
    %20 = vector.shape_cast %19 : vector<1x32x32x12xf32> to vector<32x32x12xf32>
    %c24 = arith.constant 24 : index
    %c0_12 = arith.constant 0 : index
    %21 = vector.load %arg3[%c24, %c0_12] : memref<108x16xf32, #tpu.memory_space<vmem>>, vector<12x16xf32>
    %22 = vector.shape_cast %20 : vector<32x32x12xf32> to vector<1024x12xf32>
    %cst_13 = arith.constant dense<0.000000e+00> : vector<1024x16xf32>
    %23 = tpu.matmul %22, %21, %cst_13 {dimension_numbers = #tpu.dot_dimension_numbers<[1], [0], [0], [1], [0, 0, 1, 1], [], []>} : vector<1024x12xf32>, vector<12x16xf32>, vector<1024x16xf32> -> vector<1024x16xf32>
    %24 = arith.addf %16, %23 : vector<1024x16xf32>
    %c1_i32 = arith.constant 1 : i32
    %25 = arith.addi %1, %c1_i32 : i32
    %c0_14 = arith.constant 0 : index
    %26 = arith.index_cast %25 : i32 to index
    %c0_15 = arith.constant 0 : index
    %c0_16 = arith.constant 0 : index
    %27 = vector.load %arg2[%c0_14, %26, %c0_15, %c0_16] : memref<1x34x34x12xf32, #tpu.memory_space<vmem>>, vector<1x32x32x12xf32>
    %28 = vector.shape_cast %27 : vector<1x32x32x12xf32> to vector<32x32x12xf32>
    %c36 = arith.constant 36 : index
    %c0_17 = arith.constant 0 : index
    %29 = vector.load %arg3[%c36, %c0_17] : memref<108x16xf32, #tpu.memory_space<vmem>>, vector<12x16xf32>
    %30 = vector.shape_cast %28 : vector<32x32x12xf32> to vector<1024x12xf32>
    %cst_18 = arith.constant dense<0.000000e+00> : vector<1024x16xf32>
    %31 = tpu.matmul %30, %29, %cst_18 {dimension_numbers = #tpu.dot_dimension_numbers<[1], [0], [0], [1], [0, 0, 1, 1], [], []>} : vector<1024x12xf32>, vector<12x16xf32>, vector<1024x16xf32> -> vector<1024x16xf32>
    %32 = arith.addf %24, %31 : vector<1024x16xf32>
    %c1_i32_19 = arith.constant 1 : i32
    %33 = arith.addi %1, %c1_i32_19 : i32
    %c0_20 = arith.constant 0 : index
    %34 = arith.index_cast %33 : i32 to index
    %c1_21 = arith.constant 1 : index
    %c0_22 = arith.constant 0 : index
    %35 = vector.load %arg2[%c0_20, %34, %c1_21, %c0_22] : memref<1x34x34x12xf32, #tpu.memory_space<vmem>>, vector<1x32x32x12xf32>
    %36 = vector.shape_cast %35 : vector<1x32x32x12xf32> to vector<32x32x12xf32>
    %c48 = arith.constant 48 : index
    %c0_23 = arith.constant 0 : index
    %37 = vector.load %arg3[%c48, %c0_23] : memref<108x16xf32, #tpu.memory_space<vmem>>, vector<12x16xf32>
    %38 = vector.shape_cast %36 : vector<32x32x12xf32> to vector<1024x12xf32>
    %cst_24 = arith.constant dense<0.000000e+00> : vector<1024x16xf32>
    %39 = tpu.matmul %38, %37, %cst_24 {dimension_numbers = #tpu.dot_dimension_numbers<[1], [0], [0], [1], [0, 0, 1, 1], [], []>} : vector<1024x12xf32>, vector<12x16xf32>, vector<1024x16xf32> -> vector<1024x16xf32>
    %40 = arith.addf %32, %39 : vector<1024x16xf32>
    %c1_i32_25 = arith.constant 1 : i32
    %41 = arith.addi %1, %c1_i32_25 : i32
    %c0_26 = arith.constant 0 : index
    %42 = arith.index_cast %41 : i32 to index
    %c2_27 = arith.constant 2 : index
    %c0_28 = arith.constant 0 : index
    %43 = vector.load %arg2[%c0_26, %42, %c2_27, %c0_28] : memref<1x34x34x12xf32, #tpu.memory_space<vmem>>, vector<1x32x32x12xf32>
    %44 = vector.shape_cast %43 : vector<1x32x32x12xf32> to vector<32x32x12xf32>
    %c60 = arith.constant 60 : index
    %c0_29 = arith.constant 0 : index
    %45 = vector.load %arg3[%c60, %c0_29] : memref<108x16xf32, #tpu.memory_space<vmem>>, vector<12x16xf32>
    %46 = vector.shape_cast %44 : vector<32x32x12xf32> to vector<1024x12xf32>
    %cst_30 = arith.constant dense<0.000000e+00> : vector<1024x16xf32>
    %47 = tpu.matmul %46, %45, %cst_30 {dimension_numbers = #tpu.dot_dimension_numbers<[1], [0], [0], [1], [0, 0, 1, 1], [], []>} : vector<1024x12xf32>, vector<12x16xf32>, vector<1024x16xf32> -> vector<1024x16xf32>
    %48 = arith.addf %40, %47 : vector<1024x16xf32>
    %c2_i32 = arith.constant 2 : i32
    %49 = arith.addi %1, %c2_i32 : i32
    %c0_31 = arith.constant 0 : index
    %50 = arith.index_cast %49 : i32 to index
    %c0_32 = arith.constant 0 : index
    %c0_33 = arith.constant 0 : index
    %51 = vector.load %arg2[%c0_31, %50, %c0_32, %c0_33] : memref<1x34x34x12xf32, #tpu.memory_space<vmem>>, vector<1x32x32x12xf32>
    %52 = vector.shape_cast %51 : vector<1x32x32x12xf32> to vector<32x32x12xf32>
    %c72 = arith.constant 72 : index
    %c0_34 = arith.constant 0 : index
    %53 = vector.load %arg3[%c72, %c0_34] : memref<108x16xf32, #tpu.memory_space<vmem>>, vector<12x16xf32>
    %54 = vector.shape_cast %52 : vector<32x32x12xf32> to vector<1024x12xf32>
    %cst_35 = arith.constant dense<0.000000e+00> : vector<1024x16xf32>
    %55 = tpu.matmul %54, %53, %cst_35 {dimension_numbers = #tpu.dot_dimension_numbers<[1], [0], [0], [1], [0, 0, 1, 1], [], []>} : vector<1024x12xf32>, vector<12x16xf32>, vector<1024x16xf32> -> vector<1024x16xf32>
    %56 = arith.addf %48, %55 : vector<1024x16xf32>
    %c2_i32_36 = arith.constant 2 : i32
    %57 = arith.addi %1, %c2_i32_36 : i32
    %c0_37 = arith.constant 0 : index
    %58 = arith.index_cast %57 : i32 to index
    %c1_38 = arith.constant 1 : index
    %c0_39 = arith.constant 0 : index
    %59 = vector.load %arg2[%c0_37, %58, %c1_38, %c0_39] : memref<1x34x34x12xf32, #tpu.memory_space<vmem>>, vector<1x32x32x12xf32>
    %60 = vector.shape_cast %59 : vector<1x32x32x12xf32> to vector<32x32x12xf32>
    %c84 = arith.constant 84 : index
    %c0_40 = arith.constant 0 : index
    %61 = vector.load %arg3[%c84, %c0_40] : memref<108x16xf32, #tpu.memory_space<vmem>>, vector<12x16xf32>
    %62 = vector.shape_cast %60 : vector<32x32x12xf32> to vector<1024x12xf32>
    %cst_41 = arith.constant dense<0.000000e+00> : vector<1024x16xf32>
    %63 = tpu.matmul %62, %61, %cst_41 {dimension_numbers = #tpu.dot_dimension_numbers<[1], [0], [0], [1], [0, 0, 1, 1], [], []>} : vector<1024x12xf32>, vector<12x16xf32>, vector<1024x16xf32> -> vector<1024x16xf32>
    %64 = arith.addf %56, %63 : vector<1024x16xf32>
    %c2_i32_42 = arith.constant 2 : i32
    %65 = arith.addi %1, %c2_i32_42 : i32
    %c0_43 = arith.constant 0 : index
    %66 = arith.index_cast %65 : i32 to index
    %c2_44 = arith.constant 2 : index
    %c0_45 = arith.constant 0 : index
    %67 = vector.load %arg2[%c0_43, %66, %c2_44, %c0_45] : memref<1x34x34x12xf32, #tpu.memory_space<vmem>>, vector<1x32x32x12xf32>
    %68 = vector.shape_cast %67 : vector<1x32x32x12xf32> to vector<32x32x12xf32>
    %c96 = arith.constant 96 : index
    %c0_46 = arith.constant 0 : index
    %69 = vector.load %arg3[%c96, %c0_46] : memref<108x16xf32, #tpu.memory_space<vmem>>, vector<12x16xf32>
    %70 = vector.shape_cast %68 : vector<32x32x12xf32> to vector<1024x12xf32>
    %cst_47 = arith.constant dense<0.000000e+00> : vector<1024x16xf32>
    %71 = tpu.matmul %70, %69, %cst_47 {dimension_numbers = #tpu.dot_dimension_numbers<[1], [0], [0], [1], [0, 0, 1, 1], [], []>} : vector<1024x12xf32>, vector<12x16xf32>, vector<1024x16xf32> -> vector<1024x16xf32>
    %72 = arith.addf %64, %71 : vector<1024x16xf32>
    %c0_48 = arith.constant 0 : index
    %c0_49 = arith.constant 0 : index
    %73 = vector.load %arg4[%c0_48, %c0_49] : memref<1x16xf32, #tpu.memory_space<vmem>>, vector<1x16xf32>
    %74 = vector.broadcast %73 : vector<1x16xf32> to vector<1024x16xf32>
    %75 = arith.addf %72, %74 : vector<1024x16xf32>
    %76 = vector.shape_cast %75 : vector<1024x16xf32> to vector<32x32x16xf32>
    %c0_50 = arith.constant 0 : index
    %c0_51 = arith.constant 0 : index
    %c0_52 = arith.constant 0 : index
    %c0_53 = arith.constant 0 : index
    %77 = vector.load %arg5[%c0_50, %c0_51, %c0_52, %c0_53] : memref<1x32x32x16xf32, #tpu.memory_space<vmem>>, vector<1x32x32x16xf32>
    %78 = vector.shape_cast %77 : vector<1x32x32x16xf32> to vector<32x32x16xf32>
    %79 = vector.shape_cast %76 : vector<32x32x16xf32> to vector<1x32x32x16xf32>
    tpu.vector_store %arg5[%c0_50, %c0_51, %c0_52, %c0_53], %79 {strides = array<i32>} : memref<1x32x32x16xf32, #tpu.memory_space<vmem>>, vector<1x32x32x16xf32>,
    return
  }
  func.func @transform_0(%arg0: i32, %arg1: i32) -> (i32, i32, i32, i32) {
    %c0_i32 = arith.constant 0 : i32
    %c0_i32_0 = arith.constant 0 : i32
    %c0_i32_1 = arith.constant 0 : i32
    %c0_i32_2 = arith.constant 0 : i32
    return %arg0, %c0_i32, %c0_i32_0, %c0_i32_1 : i32, i32, i32, i32
  }
  func.func @transform_1(%arg0: i32, %arg1: i32) -> (i32, i32) {
    %c0_i32 = arith.constant 0 : i32
    %c0_i32_0 = arith.constant 0 : i32
    %c0_i32_1 = arith.constant 0 : i32
    return %c0_i32, %c0_i32_0 : i32, i32
  }
  func.func @transform_2(%arg0: i32, %arg1: i32) -> (i32, i32) {
    %c0_i32 = arith.constant 0 : i32
    %c0_i32_0 = arith.constant 0 : i32
    %c0_i32_1 = arith.constant 0 : i32
    return %c0_i32, %c0_i32_0 : i32, i32
  }
  func.func @transform_3(%arg0: i32, %arg1: i32) -> (i32, i32, i32, i32) {
    %c0_i32 = arith.constant 0 : i32
    %c0_i32_0 = arith.constant 0 : i32
    %c0_i32_1 = arith.constant 0 : i32
    return %arg0, %arg1, %c0_i32, %c0_i32_0 : i32, i32, i32, i32
  }
}

</mosaic_0001>

<bundles_post_ra>
// kernel: hyper_synthesis_ex_pallas.3
= control target key start
LH: loop header
LB: loop body
LE: loop exit
PB: predicated region body
PF: predicated region fallthrough
CT: control target
= control target key end

     0   :  { %8 = vsyncpa [#allocation3], 0  ;;  %s2266_s12 = smov 0   ;;  %s2268_s13 = smov 0   ;;  %s2613_s0 = inlined_call_operand.vmem [shape: f32[2,10,10,4], index: 0, kind: input, shape index: {}]   ;;  %s2614_s1 = inlined_call_operand.vmem [shape: f32[36,32], index: 1, kind: input, shape index: {}]   ;;  %s2615_s2 = inlined_call_operand.hbm [shape: f32[1,32], index: 2, kind: input, shape index: {}]   ;;  %s2616_s3 = inlined_call_operand.vmem [shape: f32[2,8,2,8,16], index: 3, kind: output, shape index: {}]  }
   0x1   :  { %s2270_s14 = smov 0  }
   0x2 LB: > { %s1727_s15 = sadd.s32 4294967295, %s2242_s14   ;;  %s26_s16 = sadd.s32 1, %s2238_s13  ;;  %s2242_s14 = sphi %s2270_s14, %s14_s14   ;;  %s2238_s13 = sphi %s2268_s13, %s2626_s13   ;;  %s2234_s12 = sphi %s2266_s12, %s2625_s12  }
   0x3   : > { %p28_p0 = scmp.ge.s32.totalorder %s26_s16, 2  ;;  %p1729_p1 = scmp.ge.s32.totalorder %s2242_s14, 1 }
   0x4   : > { %p127_p2 = scmp.lt.s32.totalorder %s2242_s14, 3  ;;  %p2291_p4 = scmp.eq.s32.totalorder %s1727_s15, 0 }
   0x5   : > { %s2628_s16 = smov (%p28_p0, %s26_s16), 0  ;;  %s2244_s19 = smov [#allocation2]  }
   0x6   : > { %p2287_p3 = pnand %p1729_p1, %p127_p2  ;;  %s143_s20 = sshll.u32 %s2244_s19, 4  ;;  %s144_s20 = int_to_ptr.vmem [resolvable:$true] %s143_s20 }
   0x7   : > { %s2621_s18 = scalar_select %p2291_p4, 1, 0 }
   0x8   : > { %s2620_s17 = scalar_select %p2287_p3, 1, 0 }
   0x9   : > { %p2156_p5 = pneg %p2287_p3  ;;  %s2188_s24 = scalar_lea.hbm %s2615_s2, 16 }
   0xa   : > { %p2189_p7 = scmp.ne.s32.totalorder %s2615_s2, %s2188_s24  ;;  %p2195_p11 = scmp.lt.u32.totalorder %s2188_s24, %s2615_s2 }
   0xb   : > { %p2299_p6 = pnand %p2291_p4, %p2156_p5 }
   0xd   : > { %p2190_p8 = pneg %p2299_p6 }
   0xf   : > { %p2191_p9 = pnand %p2190_p8, %p2189_p7 }
  0x11   : > { %p2192_p10 = pneg %p2191_p9 }
  0x13   : > { %p2197_p12 = pnand %p2195_p11, %p2192_p10 }
  0x15   : > { %2200 = shalt.err (!%p2197_p12)
}
  0x16   : > { %s2201_s29 = scalar_lea.vmem %s144_s20, 16  ;;  %s2208_s30 = scalar_lea.vmem %s144_s20, 32 }
  0x17   : > { %p2202_p13 = scmp.ne.s32.totalorder %s144_s20, %s2201_s29  ;;  %p2209_p2 = scmp.lt.s32.totalorder %s144_s20, %s144_s20 }
  0x18   : > { %p2210_p5 = scmp.lt.s32.totalorder %s2208_s30, %s2201_s29 }
  0x19   : > { %p2204_p0 = pnand %p2202_p13, %p2190_p8 }
  0x1a   : > { %p2211_p4 = por %p2210_p5, %p2209_p2 }
  0x1b   : > { %p2205_p1 = pneg %p2204_p0 }
  0x1d   : > { %p2212_p3 = pnand %p2211_p4, %p2205_p1 }
  0x1f   : > { %2215 = shalt.err (!%p2212_p3)
}
  0x20   : > { %2159 = dma.hbm_to_vmem [thread:$0]  (!%p2299_p6), %s2615_s2, 16, %s144_s20, [#allocation3]  }
  0x21   : > { %p2623_p7 = scmp.ne.s32.totalorder %s2620_s17, 0 }
  0x22   : > { %p2624_p9 = scmp.ne.s32.totalorder (!%p2623_p7), %s2621_s18, 0 }
  0x23   : > { %164 = sbr.rel (%p2623_p7) target bundleno = 457 (0x1c9), region = 32 }
  0x2a   : > { %2229 = dma.done.wait (%p2624_p9), [#allocation3], 16  }
  0x2b   : > { %2231 = vsyncadd (%p2624_p9), [#allocation3], 4294967280  ;;  %p193_p8 = scmp.lt.s32.totalorder %s2234_s12, 1  ;;  %vm255_vm0 = vcmask 1043456   ;;  %vm230_vm1 = vcmask 31744   ;;  %vm1568_vm2 = vcmask 130048  }
  0x2c   : > { %v229_v0 = vld [vmem:[%s2614_s1 + $0x4] sm:$0xf]  ;;  %v2341_v1 = vld [vmem:[%s2614_s1 + $0x10] sm:$0xf]  ;;  %v954_v5 = vld [vmem:[%s2614_s1 + $0x14] sm:$0xf] }
  0x2d   : > { %s2630_s12 = smov (!%p193_p8, %s2234_s12), 1  ;;  %1959 = vmatprep.subr.msk.mxu1 %vm255_vm0, %v229_v0  ;;  %2015 = vmatprep.subr.msk.mxu0 %vm255_vm0, %v2341_v1  ;;  %v220_v6 = vld [vmem:[%s2614_s1] sm:$0xf]  ;;  %v1106_v10 = vld [vmem:[%s2614_s1 + $0x18] sm:$0xf] }
  0x2e   : > { %s2151_s6 = smul.u32 160, %s2630_s12  ;;  %1960 = vmatpush3.msk.msra.mxu1 %vm255_vm0, %v229_v0  ;;  %2016 = vmatpush3.msk.msra.mxu0 %vm255_vm0, %v2341_v1  ;;  %v504_v11 = vld [vmem:[%s2614_s1 + $0x8] sm:$0xf]  ;;  %v1255_v16 = vld [vmem:[%s2614_s1 + $0x1c] sm:$0xf]  ;;  %s1877_s5 = sshll.u32 %s2630_s12, 7 }
  0x2f   : > { %2029 = vmatprep.subr.msk.mxu0 %vm255_vm0, %v954_v5  ;;  %1973 = vmatprep.subr.msk.mxu1 %vm255_vm0, %v220_v6  ;;  %v656_v25 = vld [vmem:[%s2614_s1 + $0xc] sm:$0xf]  ;;  %v1404_v31 = vld [vmem:[%s2614_s1 + $0x20] sm:$0xf]  ;;  %s2562_s8 = scalar_lea.vmem %s2616_s3, %s1877_s5 }
  0x30   : > { %s2333_s9 = scalar_lea.vmem %s2613_s0, %s2151_s6  ;;  %v1866_v44 = vld [vmem:[#allocation2] ss:$0 sm:$0xff] }
  0x31   : > { %v221_v2 = vld [vmem:[%s2333_s9 + $0x1] sm:$0xff]  ;;  %v1781_v3 = vld [vmem:[%s2333_s9 + $0x11] sm:$0xff] }
  0x32   : > { %v2349_v4 = vld [vmem:[%s2333_s9 + $0x21] sm:$0xff]  ;;  %1961 = vmatprep.mubr.msk.f32.mxu1 %vm230_vm1, %v221_v2  ;;  %2017 = vmatprep.mubr.msk.f32.mxu0 %vm230_vm1, %v1781_v3  ;;  %v2366_v7 = vld [vmem:[%s2333_s9 + $0x31] sm:$0xff] }
  0x33   : > { %1962 = vmatmul.mubr.msk.f32.vlgmr.msra.gmra.mrb[0].mxu1 %vm230_vm1, %v1781_v3  ;;  %2018 = vmatmul.mubr.msk.f32.vlgmr.msra.gmra.mrb[0].mxu0 %vm230_vm1, %v2349_v4  ;;  %v2372_v8 = vld [vmem:[%s2333_s9 + $0x41] sm:$0xff]  ;;  %v2377_v9 = vld [vmem:[%s2333_s9 + $0x12] sm:$0xff] }
  0x34   : > { %1964 = vmatprep.mubr.msk.f32.mxu1 %vm230_vm1, %v2349_v4  ;;  %2030 = vmatpush3.msk.msra.mxu0 %vm255_vm0, %v954_v5  ;;  %v2397_v12 = vld [vmem:[%s2333_s9 + $0x51] sm:$0xff]  ;;  %v2400_v13 = vld [vmem:[%s2333_s9 + $0x22] sm:$0xff] }
  0x35   : > { %2020 = vmatprep.mubr.msk.f32.mxu0 %vm230_vm1, %v2366_v7  ;;  %1974 = vmatpush3.msk.msra.mxu1 %vm255_vm0, %v220_v6  ;;  %v2404_v14 = vld [vmem:[%s2333_s9 + $0x61] sm:$0xff]  ;;  %v2408_v15 = vld [vmem:[%s2333_s9 + $0x32] sm:$0xff] }
  0x36   : > { %2043 = vmatprep.subr.msk.mxu0 %vm255_vm0, %v1106_v10  ;;  %1987 = vmatprep.subr.msk.mxu1 %vm255_vm0, %v504_v11  ;;  %v2421_v17 = vld [vmem:[%s2333_s9 + $0x71] sm:$0xff]  ;;  %v2424_v18 = vld [vmem:[%s2333_s9 + $0x42] sm:$0xff] }
  0x37   : > { %1965 = vmatmul.mubr.msk.f32.gmra.mrb[2].mxu1 %vm230_vm1, %v2366_v7  ;;  %2021 = vmatmul.mubr.msk.f32.gmra.mrb[2].mxu0 %vm230_vm1, %v2372_v8  ;;  %v212_v19 = vld [vmem:[%s2333_s9] sm:$0xff]  ;;  %v2430_v20 = vld [vmem:[%s2333_s9 + $0x52] sm:$0xff] }
  0x38   : > { %1967 = vmatprep.mubr.msk.f32.mxu1 %vm230_vm1, %v2372_v8  ;;  %2031 = vmatprep.mubr.msk.f32.mxu0 %vm230_vm1, %v2377_v9  ;;  %v213_v21 = vld [vmem:[%s2333_s9 + $0x10] sm:$0xff]  ;;  %v2442_v22 = vld [vmem:[%s2333_s9 + $0x62] sm:$0xff] }
  0x39   : > { %v214_v23 = vld [vmem:[%s2333_s9 + $0x20] sm:$0xff]  ;;  %v2446_v24 = vld [vmem:[%s2333_s9 + $0x72] sm:$0xff] }
  0x3a   : > { %v215_v26 = vld [vmem:[%s2333_s9 + $0x30] sm:$0xff]  ;;  %v2459_v27 = vld [vmem:[%s2333_s9 + $0x82] sm:$0xff] }
  0x3b   : > { %1968 = vmatmul.mubr.msk.f32.gmra.mrb[4].mxu1 %vm230_vm1, %v2397_v12  ;;  %2032 = vmatmul.mubr.msk.f32.vlgmr.msra.gmra.mrb[0].mxu0 %vm230_vm1, %v2400_v13  ;;  %v216_v28 = vld [vmem:[%s2333_s9 + $0x40] sm:$0xff]  ;;  %v217_v29 = vld [vmem:[%s2333_s9 + $0x50] sm:$0xff] }
  0x3c   : > { %2044 = vmatpush3.msk.msra.mxu0 %vm255_vm0, %v1106_v10  ;;  %1970 = vmatprep.mubr.msk.f32.mxu1 %vm230_vm1, %v2404_v14  ;;  %v218_v30 = vld [vmem:[%s2333_s9 + $0x60] sm:$0xff]  ;;  %v219_v32 = vld [vmem:[%s2333_s9 + $0x70] sm:$0xff] }
  0x3d   : > { %2034 = vmatprep.mubr.msk.f32.mxu0 %vm230_vm1, %v2408_v15  ;;  %2057 = vmatprep.subr.msk.mxu0 %vm255_vm0, %v1255_v16  ;;  %v496_v33 = vld [vmem:[%s2333_s9 + $0x2] sm:$0xff]  ;;  %v1822_v35 = vld [vmem:[%s2333_s9 + $0x90] sm:$0xff] }
  0x3e   : > { %v1821_v34 = vld [vmem:[%s2333_s9 + $0x80] sm:$0xff]  ;;  %v1839_v37 = vld [vmem:[%s2333_s9 + $0x91] sm:$0xff] }
  0x3f   : > { %1971 = vmatmul.mubr.msk.f32.gmra.mrb[6].mxu1 %vm230_vm1, %v2421_v17  ;;  %2035 = vmatmul.mubr.msk.f32.gmra.mrb[2].mxu0 %vm230_vm1, %v2424_v18  ;;  %v1838_v36 = vld [vmem:[%s2333_s9 + $0x81] sm:$0xff]  ;;  %v1856_v38 = vld [vmem:[%s2333_s9 + $0x92] sm:$0xff]  ;;  %s2245_s9 = smov 112  }
  0x40   : > { %1975 = vmatprep.mubr.msk.f32.mxu1 %vm230_vm1, %v212_v19  ;;  %2037 = vmatprep.mubr.msk.f32.mxu0 %vm230_vm1, %v2430_v20 }
  0x43   : > { %1976 = vmatmul.mubr.msk.f32.vlgmr.msra.gmra.mrb[0].mxu1 %vm230_vm1, %v213_v21  ;;  %2038 = vmatmul.mubr.msk.f32.gmra.mrb[4].mxu0 %vm230_vm1, %v2442_v22 }
  0x44   : > { %1978 = vmatprep.mubr.msk.f32.mxu1 %vm230_vm1, %v214_v23  ;;  %2040 = vmatprep.mubr.msk.f32.mxu0 %vm230_vm1, %v2446_v24 }
  0x45   : > { %1988 = vmatpush3.msk.msra.mxu1 %vm255_vm0, %v504_v11 }
  0x46   : > { %2001 = vmatprep.subr.msk.mxu1 %vm255_vm0, %v656_v25 }
  0x47   : > { %1979 = vmatmul.mubr.msk.f32.gmra.mrb[2].mxu1 %vm230_vm1, %v215_v26  ;;  %2041 = vmatmul.mubr.msk.f32.gmra.mrb[6].mxu0 %vm230_vm1, %v2459_v27 }
  0x48   : > { %1981 = vmatprep.mubr.msk.f32.mxu1 %vm230_vm1, %v216_v28  ;;  %2045 = vmatprep.mubr.msk.f32.mxu0 %vm230_vm1, %v214_v23 }
  0x4b   : > { %1982 = vmatmul.mubr.msk.f32.gmra.mrb[4].mxu1 %vm230_vm1, %v217_v29  ;;  %2046 = vmatmul.mubr.msk.f32.vlgmr.msra.gmra.mrb[0].mxu0 %vm230_vm1, %v215_v26 }
  0x4c   : > { %2058 = vmatpush3.msk.msra.mxu0 %vm255_vm0, %v1255_v16  ;;  %1984 = vmatprep.mubr.msk.f32.mxu1 %vm230_vm1, %v218_v30 }
  0x4d   : > { %2048 = vmatprep.mubr.msk.f32.mxu0 %vm230_vm1, %v216_v28  ;;  %2071 = vmatprep.subr.msk.mxu0 %vm255_vm0, %v1404_v31 }
  0x4f   : > { %1985 = vmatmul.mubr.msk.f32.gmra.mrb[6].mxu1 %vm230_vm1, %v219_v32  ;;  %2049 = vmatmul.mubr.msk.f32.gmra.mrb[2].mxu0 %vm230_vm1, %v217_v29 }
  0x50   : > { %1989 = vmatprep.mubr.msk.f32.mxu1 %vm230_vm1, %v496_v33  ;;  %2051 = vmatprep.mubr.msk.f32.mxu0 %vm230_vm1, %v218_v30 }
  0x53   : > { %1990 = vmatmul.mubr.msk.f32.vlgmr.msra.gmra.mrb[0].mxu1 %vm230_vm1, %v2377_v9  ;;  %2052 = vmatmul.mubr.msk.f32.gmra.mrb[4].mxu0 %vm230_vm1, %v219_v32 }
  0x54   : > { %1992 = vmatprep.mubr.msk.f32.mxu1 %vm230_vm1, %v2400_v13  ;;  %2054 = vmatprep.mubr.msk.f32.mxu0 %vm230_vm1, %v1821_v34 }
  0x55   : > { %2002 = vmatpush3.msk.msra.mxu1 %vm255_vm0, %v656_v25 }
  0x56   : > { %2085 = vmatprep.subr.msk.mxu1 %vm255_vm0, %v2341_v1 }
  0x57   : > { %1993 = vmatmul.mubr.msk.f32.gmra.mrb[2].mxu1 %vm230_vm1, %v2408_v15  ;;  %2055 = vmatmul.mubr.msk.f32.gmra.mrb[6].mxu0 %vm230_vm1, %v1822_v35 }
  0x58   : > { %1995 = vmatprep.mubr.msk.f32.mxu1 %vm230_vm1, %v2424_v18  ;;  %2059 = vmatprep.mubr.msk.f32.mxu0 %vm230_vm1, %v2349_v4 }
  0x5b   : > { %1996 = vmatmul.mubr.msk.f32.gmra.mrb[4].mxu1 %vm230_vm1, %v2430_v20  ;;  %2060 = vmatmul.mubr.msk.f32.vlgmr.msra.gmra.mrb[0].mxu0 %vm230_vm1, %v2366_v7 }
  0x5c   : > { %2072 = vmatpush3.msk.msra.mxu0 %vm255_vm0, %v1404_v31  ;;  %1998 = vmatprep.mubr.msk.f32.mxu1 %vm230_vm1, %v2442_v22 }
  0x5d   : > { %2062 = vmatprep.mubr.msk.f32.mxu0 %vm230_vm1, %v2372_v8 }
  0x5f   : > { %1999 = vmatmul.mubr.msk.f32.gmra.mrb[6].mxu1 %vm230_vm1, %v2446_v24  ;;  %2063 = vmatmul.mubr.msk.f32.gmra.mrb[2].mxu0 %vm230_vm1, %v2397_v12 }
  0x60   : > { %2003 = vmatprep.mubr.msk.f32.mxu1 %vm230_vm1, %v213_v21  ;;  %2065 = vmatprep.mubr.msk.f32.mxu0 %vm230_vm1, %v2404_v14 }
  0x63   : > { %2004 = vmatmul.mubr.msk.f32.vlgmr.msra.gmra.mrb[0].mxu1 %vm230_vm1, %v214_v23  ;;  %2066 = vmatmul.mubr.msk.f32.gmra.mrb[4].mxu0 %vm230_vm1, %v2421_v17 }
  0x64   : > { %2006 = vmatprep.mubr.msk.f32.mxu1 %vm230_vm1, %v215_v26  ;;  %2068 = vmatprep.mubr.msk.f32.mxu0 %vm230_vm1, %v1838_v36 }
  0x65   : > { %2086 = vmatpush3.msk.msra.mxu1 %vm255_vm0, %v2341_v1 }
  0x67   : > { %2007 = vmatmul.mubr.msk.f32.gmra.mrb[2].mxu1 %vm230_vm1, %v216_v28  ;;  %2069 = vmatmul.mubr.msk.f32.gmra.mrb[6].mxu0 %vm230_vm1, %v1839_v37 }
  0x68   : > { %2009 = vmatprep.mubr.msk.f32.mxu1 %vm230_vm1, %v217_v29  ;;  %2073 = vmatprep.mubr.msk.f32.mxu0 %vm230_vm1, %v2400_v13 }
  0x6b   : > { %2010 = vmatmul.mubr.msk.f32.gmra.mrb[4].mxu1 %vm230_vm1, %v218_v30  ;;  %2074 = vmatmul.mubr.msk.f32.vlgmr.msra.gmra.mrb[0].mxu0 %vm230_vm1, %v2408_v15 }
  0x6c   : > { %2012 = vmatprep.mubr.msk.f32.mxu1 %vm230_vm1, %v219_v32  ;;  %2076 = vmatprep.mubr.msk.f32.mxu0 %vm230_vm1, %v2424_v18 }
  0x6f   : > { %2013 = vmatmul.mubr.msk.f32.gmra.mrb[6].mxu1 %vm230_vm1, %v1821_v34  ;;  %2077 = vmatmul.mubr.msk.f32.gmra.mrb[2].mxu0 %vm230_vm1, %v2430_v20 }
  0x70   : > { %2023 = vmatprep.mubr.msk.f32.mxu1 %vm230_vm1, %v2397_v12  ;;  %2079 = vmatprep.mubr.msk.f32.mxu0 %vm230_vm1, %v2442_v22 }
  0x73   : > { %2024 = vmatmul.mubr.msk.f32.vlgmr.msra.gmra.mrb[4].mxu1 %vm230_vm1, %v2404_v14  ;;  %2080 = vmatmul.mubr.msk.f32.gmra.mrb[4].mxu0 %vm230_vm1, %v2446_v24 }
  0x74   : > { %2026 = vmatprep.mubr.msk.f32.mxu1 %vm230_vm1, %v2421_v17  ;;  %2082 = vmatprep.mubr.msk.f32.mxu0 %vm230_vm1, %v2459_v27 }
  0x77   : > { %2027 = vmatmul.mubr.msk.f32.gmra.mrb[6].mxu1 %vm230_vm1, %v1838_v36  ;;  %2083 = vmatmul.mubr.msk.f32.gmra.mrb[6].mxu0 %vm230_vm1, %v1856_v38 }
 0x136   : > { %v2005_v39 = vpop.f32.mrb[0].mxu1 }
 0x137   : > { %v750_v40 = vpop.f32.mrb[1].mxu1 }
 0x13a   : > { %v2008_v41 = vpop.f32.mrb[2].mxu1 }
 0x13b   : > { %v760_v42 = vpop.f32.mrb[3].mxu1 }
 0x13e   : > { %v2075_v43 = vpop.f32.mrb[0].mxu0 }
 0x13f   : > { %v2087_v45 = vadd.f32 %v2075_v43, %v2005_v39  ;;  %v1498_v46 = vpop.f32.mrb[1].mxu0 }
 0x140   : > { %v2088_v47 = vadd.f32 %v1498_v46, %v750_v40 }
 0x141   : > { %v1553_v48 = vadd.f32 %v2087_v45, %v1866_v44 }
 0x142   : > { %v1552_v49 = vadd.f32 %v2088_v47, %v1866_v44  ;;  %v2078_v50 = vpop.f32.mrb[2].mxu0 }
 0x143   : > { %v2089_v51 = vadd.f32 %v2078_v50, %v2008_v41  ;;  %v1508_v52 = vpop.f32.mrb[3].mxu0  ;;  %v1561_v53 = vmax.f32 %v1553_v48, 0.0 }
 0x144   : > { %v1560_v54 = vmax.f32 %v1552_v49, 0.0  ;;  %v2090_v55 = vadd.f32 %v1508_v52, %v760_v42 }
 0x145   : > { %1587 = vrot.lane.b32.xlu0 %v1561_v53, %s2245_s9  ;;  %1570 = vst.msk [vmem:[%s2562_s8 + $0x10] sm:$0xff] %vm1568_vm2, %v1561_v53  ;;  %v1555_v56 = vadd.f32 %v2089_v51, %v1866_v44 }
 0x146   : > { %1569 = vst.msk [vmem:[%s2562_s8] sm:$0xff] %vm1568_vm2, %v1560_v54  ;;  %v1554_v57 = vadd.f32 %v2090_v55, %v1866_v44  ;;  %v2025_v58 = vpop.f32.mrb[4].mxu1  ;;  %v2081_v59 = vpop.f32.mrb[4].mxu0 }
 0x147   : > { %v2091_v60 = vadd.f32 %v2081_v59, %v2025_v58  ;;  %v919_v61 = vpop.f32.mrb[5].mxu1  ;;  %v1518_v62 = vpop.f32.mrb[5].mxu0  ;;  %v1563_v63 = vmax.f32 %v1555_v56, 0.0 }
 0x148   : > { %v1562_v0 = vmax.f32 %v1554_v57, 0.0  ;;  %v2092_v1 = vadd.f32 %v1518_v62, %v919_v61 }
 0x149   : > { %v1557_v2 = vadd.f32 %v2091_v60, %v1866_v44  ;;  %1585 = vrot.lane.b32.xlu0 %v1560_v54, %s2245_s9  ;;  %1591 = vrot.lane.b32.xlu1 %v1563_v63, %s2245_s9  ;;  %1572 = vst.msk [vmem:[%s2562_s8 + $0x30] sm:$0xff] %vm1568_vm2, %v1563_v63 }
 0x14a   : > { %1571 = vst.msk [vmem:[%s2562_s8 + $0x20] sm:$0xff] %vm1568_vm2, %v1562_v0  ;;  %v1556_v3 = vadd.f32 %v2092_v1, %v1866_v44  ;;  %v2028_v4 = vpop.f32.mrb[6].mxu1  ;;  %v2084_v5 = vpop.f32.mrb[6].mxu0 }
 0x14b   : > { %v1565_v6 = vmax.f32 %v1557_v2, 0.0  ;;  %v2093_v7 = vadd.f32 %v2084_v5, %v2028_v4  ;;  %v929_v8 = vpop.f32.mrb[7].mxu1  ;;  %v1528_v9 = vpop.f32.mrb[7].mxu0 }
 0x14c   : > { %v1564_v10 = vmax.f32 %v1556_v3, 0.0  ;;  %v2094_v11 = vadd.f32 %v1528_v9, %v929_v8 }
 0x14d   : > { %1574 = vst.msk [vmem:[%s2562_s8 + $0x50] sm:$0xff] %vm1568_vm2, %v1565_v6  ;;  %v1559_v12 = vadd.f32 %v2093_v7, %v1866_v44  ;;  %1589 = vrot.lane.b32.xlu1 %v1562_v0, %s2245_s9 }
 0x14e   : > { %1573 = vst.msk [vmem:[%s2562_s8 + $0x40] sm:$0xff] %vm1568_vm2, %v1564_v10  ;;  %v1558_v13 = vadd.f32 %v2094_v11, %v1866_v44  ;;  %1593 = vrot.lane.b32.xlu0 %v1564_v10, %s2245_s9 }
 0x14f   : > { %v1567_v14 = vmax.f32 %v1559_v12, 0.0 }
 0x150   : > { %v1566_v15 = vmax.f32 %v1558_v13, 0.0 }
 0x151   : > { %1576 = vst.msk [vmem:[%s2562_s8 + $0x70] sm:$0xff] %vm1568_vm2, %v1567_v14  ;;  %1595 = vrot.lane.b32.xlu1 %v1565_v6, %s2245_s9 }
 0x152   : > { %1575 = vst.msk [vmem:[%s2562_s8 + $0x60] sm:$0xff] %vm1568_vm2, %v1566_v15  ;;  %1597 = vrot.lane.b32.xlu0 %v1566_v15, %s2245_s9 }
 0x155   : > { %1599 = vrot.lane.b32.xlu1 %v1567_v14, %s2245_s9 }
 0x1b7   : > { %v1588_v16 = vpop.permute.xlu0 %1587 }
 0x1b8   : > { %1868 = vst.msk [vmem:[%s2562_s8 + $0x18] sm:$0xff] %vm1568_vm2, %v1588_v16 }
 0x1bb   : > { %v1586_v17 = vpop.permute.xlu0 %1585  ;;  %v1592_v18 = vpop.permute.xlu1 %1591 }
 0x1bc   : > { %1867 = vst.msk [vmem:[%s2562_s8 + $0x8] sm:$0xff] %vm1568_vm2, %v1586_v17  ;;  %1870 = vst.msk [vmem:[%s2562_s8 + $0x38] sm:$0xff] %vm1568_vm2, %v1592_v18 }
 0x1bf   : > { %v1590_v19 = vpop.permute.xlu1 %1589 }
 0x1c0   : > { %1869 = vst.msk [vmem:[%s2562_s8 + $0x28] sm:$0xff] %vm1568_vm2, %v1590_v19  ;;  %v1594_v20 = vpop.permute.xlu0 %1593 }
 0x1c1   : > { %1871 = vst.msk [vmem:[%s2562_s8 + $0x48] sm:$0xff] %vm1568_vm2, %v1594_v20 }
 0x1c3   : > { %v1596_v21 = vpop.permute.xlu1 %1595 }
 0x1c4   : > { %1872 = vst.msk [vmem:[%s2562_s8 + $0x58] sm:$0xff] %vm1568_vm2, %v1596_v21  ;;  %v1598_v22 = vpop.permute.xlu0 %1597 }
 0x1c5   : > { %1873 = vst.msk [vmem:[%s2562_s8 + $0x68] sm:$0xff] %vm1568_vm2, %v1598_v22 }
 0x1c7   : > { %v1600_v23 = vpop.permute.xlu1 %1599 }
 0x1c8   : > { %1874 = vst.msk [vmem:[%s2562_s8 + $0x78] sm:$0xff] %vm1568_vm2, %v1600_v23 }
 0x1c9 PF: > { %s14_s14 = sadd.s32 1, %s2242_s14   ;;  %s2625_s12 = smov %s2238_s13 }
 0x1ca   : > { %p11_p3 = scmp.ge.s32.totalorder %s14_s14, 4   ;;  %s2626_s13 = smov %s2628_s16 }
 0x1cc   :  { %13 = sbr.rel (!%p11_p3) target bundleno = 2 (0x2), region = 71 }
 0x1d3   :  { %1650 = vsyncpa [#allocation3], 1 }
 0x1d4   :  { %1652 = vsyncpa [#allocation3 + $0x1], 1 }

// kernel: hyper_synthesis_ex_pallas.4
= control target key start
LH: loop header
LB: loop body
LE: loop exit
PB: predicated region body
PF: predicated region fallthrough
CT: control target
= control target key end

     0   :  { %s5578_s12 = smov 0   ;;  %s5580_s13 = smov 0   ;;  %s6739_s0 = inlined_call_operand.vmem [shape: f32[2,18,18,8], index: 0, kind: input, shape index: {}]   ;;  %s6740_s1 = inlined_call_operand.vmem [shape: f32[72,48], index: 1, kind: input, shape index: {}]   ;;  %s6741_s2 = inlined_call_operand.vmem [shape: f32[1,48], index: 2, kind: input, shape index: {}]   ;;  %s6742_s3 = inlined_call_operand.vmem [shape: f32[2,16,2,16,24], index: 3, kind: output, shape index: {}]  }
   0x1   :  { %s5582_s14 = smov 0  }
   0x2 LB: > { %s25_s15 = sadd.s32 1, %s5551_s13  ;;  %p3982_p0 = scmp.ge.s32.totalorder %s5555_s14, 1  ;;  %s5555_s14 = sphi %s5582_s14, %s13_s14   ;;  %s5551_s13 = sphi %s5580_s13, %s6853_s13   ;;  %s5547_s12 = sphi %s5578_s12, %s6852_s12  }
   0x3   : > { %p27_p1 = scmp.ge.s32.totalorder %s25_s15, 2  ;;  %p151_p2 = scmp.lt.s32.totalorder %s5555_s14, 3 }
   0x5   : > { %s6855_s15 = smov (%p27_p1, %s25_s15), 0  ;;  %p152_p3 = pnand %p3982_p0, %p151_p2 }
   0x7   : > { %155 = sbr.rel (%p152_p3) target bundleno = 644 (0x284), region = 32 }
   0xe   : > { %v5599_v0 = vld [vmem:[%s6740_s1 + $0x20] sm:$0xff]  ;;  %v264_v1 = vld [vmem:[%s6740_s1 + $0x8] sm:$0xff]  ;;  %p180_p4 = scmp.lt.s32.totalorder %s5547_s12, 1  ;;  %vm265_vm0 = vcmask 64512   ;;  %v2490_v9 = vld [vmem:[%s6740_s1 + $0x30] sm:$0xff]  ;;  %vm3687_vm1 = vcmask 195584  }
   0xf   : > { %v2101_v2 = vld [vmem:[%s6740_s1 + $0x28] sm:$0xff]  ;;  %4999 = vmatprep.subr.mxu0 %v5599_v0  ;;  %4799 = vmatprep.subr.mxu1 %v264_v1  ;;  %v231_v3 = vld [vmem:[%s6740_s1] sm:$0xff]  ;;  %v5637_v10 = vld [vmem:[%s6740_s1 + $0x10] sm:$0xff] }
  0x10   : > { %5000 = vmatpush3.msra.mxu0 %v5599_v0  ;;  %4800 = vmatpush3.msra.mxu1 %v264_v1  ;;  %s6857_s12 = smov (!%p180_p4, %s5547_s12), 1  ;;  %v5752_v28 = vld [vmem:[%s6740_s1 + $0x38] sm:$0xff] }
  0x11   : > { %5049 = vmatprep.subr.mxu0 %v2101_v2  ;;  %4849 = vmatprep.subr.mxu1 %v231_v3  ;;  %s5507_s24 = smul.u32 432, %s6857_s12  ;;  %v5913_v61 = vld [vmem:[%s6740_s1 + $0x18] sm:$0xff]  ;;  %s4501_s17 = sshll.u32 %s6857_s12, 9 }
  0x12   : > { %s6531_s20 = scalar_lea.vmem %s6742_s3, %s4501_s17  ;;  %s5557_s12 = smov 104  }
  0x13   : > { %s5618_s27 = scalar_lea.vmem %s6739_s0, %s5507_s24 }
  0x14   : > { %v232_v4 = vld [vmem:[%s5618_s27 + $0x1] sm:$0xff]  ;;  %v4146_v5 = vld [vmem:[%s5618_s27 + $0x19] sm:$0xff]  ;;  %v233_v6 = vld [vmem:[%s5618_s27 + $0x9] sm:$0xff] }
  0x15   : > { %4801 = vmatprep.mubr.msk.f32.mxu1 %vm265_vm0, %v232_v4  ;;  %5001 = vmatprep.mubr.msk.f32.mxu0 %vm265_vm0, %v4146_v5  ;;  %v4147_v7 = vld [vmem:[%s5618_s27 + $0x21] sm:$0xff]  ;;  %v5627_v8 = vld [vmem:[%s5618_s27 + $0x31] sm:$0xff]  ;;  %v5641_v11 = vld [vmem:[%s5618_s27 + $0x39] sm:$0xff] }
  0x16   : > { %4802 = vmatmul.mubr.msk.f32.vlgmr.msra.gmra.mrb[0].mxu1 %vm265_vm0, %v233_v6  ;;  %5002 = vmatmul.mubr.msk.f32.vlgmr.msra.gmra.mrb[0].mxu0 %vm265_vm0, %v4147_v7  ;;  %v5646_v12 = vld [vmem:[%s5618_s27 + $0x49] sm:$0xff]  ;;  %v5657_v13 = vld [vmem:[%s5618_s27 + $0x51] sm:$0xff]  ;;  %v5660_v14 = vld [vmem:[%s5618_s27 + $0x61] sm:$0xff] }
  0x17   : > { %5050 = vmatpush3.msra.mxu0 %v2101_v2  ;;  %4804 = vmatprep.mubr.msk.f32.mxu1 %vm265_vm0, %v4146_v5  ;;  %v5671_v15 = vld [vmem:[%s5618_s27 + $0x69] sm:$0xff]  ;;  %v5674_v16 = vld [vmem:[%s5618_s27 + $0x79] sm:$0xff]  ;;  %v5685_v17 = vld [vmem:[%s5618_s27 + $0x81] sm:$0xff] }
  0x18   : > { %4850 = vmatpush3.msra.mxu1 %v231_v3  ;;  %5004 = vmatprep.mubr.msk.f32.mxu0 %vm265_vm0, %v5627_v8  ;;  %v5688_v18 = vld [vmem:[%s5618_s27 + $0x91] sm:$0xff]  ;;  %v5699_v19 = vld [vmem:[%s5618_s27 + $0x99] sm:$0xff]  ;;  %v5702_v20 = vld [vmem:[%s5618_s27 + $0xa9] sm:$0xff] }
  0x19   : > { %5099 = vmatprep.subr.mxu0 %v2490_v9  ;;  %4899 = vmatprep.subr.mxu1 %v5637_v10  ;;  %v5713_v21 = vld [vmem:[%s5618_s27 + $0xb1] sm:$0xff]  ;;  %v5716_v22 = vld [vmem:[%s5618_s27 + $0xc1] sm:$0xff]  ;;  %v5727_v23 = vld [vmem:[%s5618_s27 + $0xc9] sm:$0xff] }
  0x1a   : > { %4805 = vmatmul.mubr.msk.f32.gmra.mrb[2].mxu1 %vm265_vm0, %v4147_v7  ;;  %5005 = vmatmul.mubr.msk.f32.gmra.mrb[2].mxu0 %vm265_vm0, %v5641_v11  ;;  %v5730_v24 = vld [vmem:[%s5618_s27 + $0x1a] sm:$0xff]  ;;  %v5741_v25 = vld [vmem:[%s5618_s27 + $0x22] sm:$0xff]  ;;  %v5747_v27 = vld [vmem:[%s5618_s27 + $0x32] sm:$0xff] }
  0x1b   : > { %4807 = vmatprep.mubr.msk.f32.mxu1 %vm265_vm0, %v5627_v8  ;;  %5007 = vmatprep.mubr.msk.f32.mxu0 %vm265_vm0, %v5646_v12  ;;  %v5744_v26 = vld [vmem:[%s5618_s27 + $0xd9] sm:$0xff]  ;;  %v5761_v29 = vld [vmem:[%s5618_s27 + $0xe1] sm:$0xff]  ;;  %v5769_v31 = vld [vmem:[%s5618_s27 + $0xf1] sm:$0xff] }
  0x1c   : > { %6788 = vst [vmem:[#allocation2_spill] sm:$0xff] %v5761_v29  ;;  %v5764_v30 = vld [vmem:[%s5618_s27 + $0x3a] sm:$0xff]  ;;  %6789 = vst [vmem:[#allocation3_spill] sm:$0xff] %v5769_v31  ;;  %v5772_v32 = vld [vmem:[%s5618_s27 + $0x4a] sm:$0xff] }
  0x1d   : > { %v5784_v33 = vld [vmem:[%s5618_s27 + $0xf9] sm:$0xff]  ;;  %v5790_v35 = vld [vmem:[%s5618_s27 + $0x109] sm:$0xff]  ;;  %v5804_v37 = vld [vmem:[%s5618_s27 + $0x111] sm:$0xff] }
  0x1e   : > { %4808 = vmatmul.mubr.msk.f32.gmra.mrb[4].mxu1 %vm265_vm0, %v5641_v11  ;;  %5008 = vmatmul.mubr.msk.f32.gmra.mrb[4].mxu0 %vm265_vm0, %v5657_v13  ;;  %6790 = vst [vmem:[#allocation4_spill] sm:$0xff] %v5784_v33  ;;  %v5787_v34 = vld [vmem:[%s5618_s27 + $0x52] sm:$0xff]  ;;  %6791 = vst [vmem:[#allocation5_spill] sm:$0xff] %v5790_v35  ;;  %v5793_v36 = vld [vmem:[%s5618_s27 + $0x62] sm:$0xff] }
  0x1f   : > { %4810 = vmatprep.mubr.msk.f32.mxu1 %vm265_vm0, %v5646_v12  ;;  %5010 = vmatprep.mubr.msk.f32.mxu0 %vm265_vm0, %v5660_v14  ;;  %6792 = vst [vmem:[#allocation6_spill] sm:$0xff] %v5804_v37  ;;  %v5807_v38 = vld [vmem:[%s5618_s27 + $0x6a] sm:$0xff]  ;;  %v5810_v39 = vld [vmem:[%s5618_s27 + $0x121] sm:$0xff]  ;;  %v5830_v43 = vld [vmem:[%s5618_s27 + $0x139] sm:$0xff] }
  0x20   : > { %6793 = vst [vmem:[#allocation7_spill] sm:$0xff] %v5810_v39  ;;  %v5813_v40 = vld [vmem:[%s5618_s27 + $0x7a] sm:$0xff]  ;;  %v5824_v41 = vld [vmem:[%s5618_s27 + $0x129] sm:$0xff]  ;;  %6795 = vst [vmem:[#allocation9_spill] sm:$0xff] %v5830_v43 }
  0x21   : > { %6794 = vst [vmem:[#allocation8_spill] sm:$0xff] %v5824_v41  ;;  %v5827_v42 = vld [vmem:[%s5618_s27 + $0x82] sm:$0xff]  ;;  %v5833_v44 = vld [vmem:[%s5618_s27 + $0x92] sm:$0xff]  ;;  %v5847_v46 = vld [vmem:[%s5618_s27 + $0x9a] sm:$0xff] }
  0x22   : > { %4811 = vmatmul.mubr.msk.f32.gmra.mrb[6].mxu1 %vm265_vm0, %v5657_v13  ;;  %5011 = vmatmul.mubr.msk.f32.gmra.mrb[6].mxu0 %vm265_vm0, %v5671_v15  ;;  %v5844_v45 = vld [vmem:[%s5618_s27 + $0x141] sm:$0xff]  ;;  %v5850_v47 = vld [vmem:[%s5618_s27 + $0x151] sm:$0xff]  ;;  %v5864_v49 = vld [vmem:[%s5618_s27 + $0x159] sm:$0xff] }
  0x23   : > { %4813 = vmatprep.mubr.msk.f32.mxu1 %vm265_vm0, %v5660_v14  ;;  %5013 = vmatprep.mubr.msk.f32.mxu0 %vm265_vm0, %v5674_v16  ;;  %6796 = vst [vmem:[#allocation10_spill] sm:$0xff] %v5844_v45  ;;  %6797 = vst [vmem:[#allocation11_spill] sm:$0xff] %v5850_v47  ;;  %v5853_v48 = vld [vmem:[%s5618_s27 + $0xaa] sm:$0xff]  ;;  %v5867_v50 = vld [vmem:[%s5618_s27 + $0xb2] sm:$0xff] }
  0x24   : > { %6798 = vst [vmem:[#allocation12_spill] sm:$0xff] %v5864_v49  ;;  %v5870_v51 = vld [vmem:[%s5618_s27 + $0x169] sm:$0xff]  ;;  %v5884_v53 = vld [vmem:[%s5618_s27 + $0x171] sm:$0xff]  ;;  %v199_v55 = vld [vmem:[%s5618_s27] sm:$0xff] }
  0x25   : > { %6799 = vst [vmem:[#allocation13_spill] sm:$0xff] %v5870_v51  ;;  %v5873_v52 = vld [vmem:[%s5618_s27 + $0xc2] sm:$0xff]  ;;  %6800 = vst [vmem:[#allocation14_spill] sm:$0xff] %v5884_v53  ;;  %v5887_v54 = vld [vmem:[%s5618_s27 + $0xca] sm:$0xff] }
  0x26   : > { %4814 = vmatmul.mubr.msk.f32.gmra.mrb[8].mxu1 %vm265_vm0, %v5671_v15  ;;  %5014 = vmatmul.mubr.msk.f32.gmra.mrb[8].mxu0 %vm265_vm0, %v5685_v17  ;;  %v5891_v56 = vld [vmem:[%s5618_s27 + $0xda] sm:$0xff]  ;;  %v200_v57 = vld [vmem:[%s5618_s27 + $0x8] sm:$0xff]  ;;  %v5908_v60 = vld [vmem:[%s5618_s27 + $0xf2] sm:$0xff] }
  0x27   : > { %4816 = vmatprep.mubr.msk.f32.mxu1 %vm265_vm0, %v5674_v16  ;;  %5016 = vmatprep.mubr.msk.f32.mxu0 %vm265_vm0, %v5688_v18  ;;  %v5902_v58 = vld [vmem:[%s5618_s27 + $0xe2] sm:$0xff]  ;;  %v5905_v59 = vld [vmem:[%s5618_s27 + $0x18] sm:$0xff]  ;;  %v5930_v1 = vld [vmem:[%s5618_s27 + $0x30] sm:$0xff] }
  0x28   : > { %6801 = vst [vmem:[#allocation15_spill] sm:$0xff] %v5905_v59  ;;  %v5922_v62 = vld [vmem:[%s5618_s27 + $0x20] sm:$0xff]  ;;  %6803 = vst [vmem:[#allocation17_spill] sm:$0xff] %v5930_v1  ;;  %v5933_v2 = vld [vmem:[%s5618_s27 + $0x10a] sm:$0xff] }
  0x29   : > { %6802 = vst [vmem:[#allocation16_spill] sm:$0xff] %v5922_v62  ;;  %v5925_v63 = vld [vmem:[%s5618_s27 + $0xfa] sm:$0xff]  ;;  %v5948_v4 = vld [vmem:[%s5618_s27 + $0x112] sm:$0xff]  ;;  %v5951_v5 = vld [vmem:[%s5618_s27 + $0x48] sm:$0xff] }
  0x2a   : > { %4817 = vmatmul.mubr.msk.f32.gmra.mrb[10].mxu1 %vm265_vm0, %v5685_v17  ;;  %5017 = vmatmul.mubr.msk.f32.gmra.mrb[10].mxu0 %vm265_vm0, %v5699_v19  ;;  %v5945_v3 = vld [vmem:[%s5618_s27 + $0x38] sm:$0xff]  ;;  %6805 = vst [vmem:[#allocation19_spill] sm:$0xff] %v5951_v5  ;;  %v5954_v6 = vld [vmem:[%s5618_s27 + $0x122] sm:$0xff]  ;;  %v5965_v7 = vld [vmem:[%s5618_s27 + $0x50] sm:$0xff] }
  0x2b   : > { %4819 = vmatprep.mubr.msk.f32.mxu1 %vm265_vm0, %v5688_v18  ;;  %5019 = vmatprep.mubr.msk.f32.mxu0 %vm265_vm0, %v5702_v20  ;;  %6804 = vst [vmem:[#allocation18_spill] sm:$0xff] %v5945_v3  ;;  %6806 = vst [vmem:[#allocation20_spill] sm:$0xff] %v5965_v7 }
  0x2e   : > { %4820 = vmatmul.mubr.msk.f32.gmra.mrb[12].mxu1 %vm265_vm0, %v5699_v19  ;;  %5020 = vmatmul.mubr.msk.f32.gmra.mrb[12].mxu0 %vm265_vm0, %v5713_v21 }
  0x2f   : > { %4822 = vmatprep.mubr.msk.f32.mxu1 %vm265_vm0, %v5702_v20  ;;  %5022 = vmatprep.mubr.msk.f32.mxu0 %vm265_vm0, %v5716_v22 }
  0x32   : > { %4823 = vmatmul.mubr.msk.f32.gmra.mrb[14].mxu1 %vm265_vm0, %v5713_v21  ;;  %5023 = vmatmul.mubr.msk.f32.gmra.mrb[14].mxu0 %vm265_vm0, %v5727_v23 }
  0x33   : > { %4825 = vmatprep.mubr.msk.f32.mxu1 %vm265_vm0, %v5716_v22  ;;  %5051 = vmatprep.mubr.msk.f32.mxu0 %vm265_vm0, %v5730_v24 }
  0x36   : > { %4826 = vmatmul.mubr.msk.f32.gmra.mrb[16].mxu1 %vm265_vm0, %v5727_v23  ;;  %5052 = vmatmul.mubr.msk.f32.vlgmr.msra.gmra.mrb[0].mxu0 %vm265_vm0, %v5741_v25 }
  0x37   : > { %5100 = vmatpush3.msra.mxu0 %v2490_v9  ;;  %4828 = vmatprep.mubr.msk.f32.mxu1 %vm265_vm0, %v5744_v26  ;;  %v5968_v9 = vld [vmem:[%s5618_s27 + $0x12a] sm:$0xff] }
  0x38   : > { %5054 = vmatprep.mubr.msk.f32.mxu0 %vm265_vm0, %v5747_v27  ;;  %5149 = vmatprep.subr.mxu0 %v5752_v28 }
  0x3a   : > { %4829 = vmatmul.mubr.msk.f32.gmra.mrb[18].mxu1 %vm265_vm0, %v5761_v29  ;;  %5055 = vmatmul.mubr.msk.f32.gmra.mrb[2].mxu0 %vm265_vm0, %v5764_v30  ;;  %v6065_v29 = vld [vmem:[%s5618_s27 + $0xd8] sm:$0xff] }
  0x3b   : > { %4831 = vmatprep.mubr.msk.f32.mxu1 %vm265_vm0, %v5769_v31  ;;  %5057 = vmatprep.mubr.msk.f32.mxu0 %vm265_vm0, %v5772_v32  ;;  %v6048_v31 = vld [vmem:[%s5618_s27 + $0x18a] sm:$0xff] }
  0x3c   : > { %6817 = vst [vmem:[#allocation31_spill] sm:$0xff] %v6048_v31 }
  0x3e   : > { %4832 = vmatmul.mubr.msk.f32.gmra.mrb[20].mxu1 %vm265_vm0, %v5784_v33  ;;  %5058 = vmatmul.mubr.msk.f32.gmra.mrb[4].mxu0 %vm265_vm0, %v5787_v34  ;;  %v6034_v33 = vld [vmem:[%s5618_s27 + $0x182] sm:$0xff] }
  0x3f   : > { %4834 = vmatprep.mubr.msk.f32.mxu1 %vm265_vm0, %v5790_v35  ;;  %5060 = vmatprep.mubr.msk.f32.mxu0 %vm265_vm0, %v5793_v36  ;;  %v6031_v35 = vld [vmem:[%s5618_s27 + $0xa8] sm:$0xff]  ;;  %6815 = vst [vmem:[#allocation29_spill] sm:$0xff] %v6034_v33 }
  0x40   : > { %6814 = vst [vmem:[#allocation28_spill] sm:$0xff] %v6031_v35 }
  0x42   : > { %4835 = vmatmul.mubr.msk.f32.gmra.mrb[22].mxu1 %vm265_vm0, %v5804_v37  ;;  %5061 = vmatmul.mubr.msk.f32.gmra.mrb[6].mxu0 %vm265_vm0, %v5807_v38  ;;  %v6028_v37 = vld [vmem:[%s5618_s27 + $0x172] sm:$0xff] }
  0x43   : > { %4837 = vmatprep.mubr.msk.f32.mxu1 %vm265_vm0, %v5810_v39  ;;  %5063 = vmatprep.mubr.msk.f32.mxu0 %vm265_vm0, %v5813_v40  ;;  %v6025_v39 = vld [vmem:[%s5618_s27 + $0x98] sm:$0xff]  ;;  %6813 = vst [vmem:[#allocation27_spill] sm:$0xff] %v6028_v37 }
  0x44   : > { %6812 = vst [vmem:[#allocation26_spill] sm:$0xff] %v6025_v39 }
  0x46   : > { %4838 = vmatmul.mubr.msk.f32.gmra.mrb[24].mxu1 %vm265_vm0, %v5824_v41  ;;  %5064 = vmatmul.mubr.msk.f32.gmra.mrb[8].mxu0 %vm265_vm0, %v5827_v42  ;;  %v6014_v41 = vld [vmem:[%s5618_s27 + $0x16a] sm:$0xff] }
  0x47   : > { %4840 = vmatprep.mubr.msk.f32.mxu1 %vm265_vm0, %v5830_v43  ;;  %5066 = vmatprep.mubr.msk.f32.mxu0 %vm265_vm0, %v5833_v44  ;;  %v6011_v43 = vld [vmem:[%s5618_s27 + $0x90] sm:$0xff] }
  0x48   : > { %6811 = vst [vmem:[#allocation25_spill] sm:$0xff] %v6011_v43 }
  0x4a   : > { %4841 = vmatmul.mubr.msk.f32.gmra.mrb[26].mxu1 %vm265_vm0, %v5844_v45  ;;  %5067 = vmatmul.mubr.msk.f32.gmra.mrb[10].mxu0 %vm265_vm0, %v5847_v46  ;;  %v6008_v45 = vld [vmem:[%s5618_s27 + $0x15a] sm:$0xff] }
  0x4b   : > { %4843 = vmatprep.mubr.msk.f32.mxu1 %vm265_vm0, %v5850_v47  ;;  %5069 = vmatprep.mubr.msk.f32.mxu0 %vm265_vm0, %v5853_v48  ;;  %v6005_v47 = vld [vmem:[%s5618_s27 + $0x80] sm:$0xff] }
  0x4c   : > { %6810 = vst [vmem:[#allocation24_spill] sm:$0xff] %v6005_v47 }
  0x4e   : > { %4844 = vmatmul.mubr.msk.f32.gmra.mrb[28].mxu1 %vm265_vm0, %v5864_v49  ;;  %5070 = vmatmul.mubr.msk.f32.gmra.mrb[12].mxu0 %vm265_vm0, %v5867_v50  ;;  %v5994_v49 = vld [vmem:[%s5618_s27 + $0x152] sm:$0xff] }
  0x4f   : > { %4846 = vmatprep.mubr.msk.f32.mxu1 %vm265_vm0, %v5870_v51  ;;  %5072 = vmatprep.mubr.msk.f32.mxu0 %vm265_vm0, %v5873_v52  ;;  %v5991_v51 = vld [vmem:[%s5618_s27 + $0x78] sm:$0xff] }
  0x50   : > { %6809 = vst [vmem:[#allocation23_spill] sm:$0xff] %v5991_v51 }
  0x52   : > { %4847 = vmatmul.mubr.msk.f32.gmra.mrb[30].mxu1 %vm265_vm0, %v5884_v53  ;;  %5073 = vmatmul.mubr.msk.f32.gmra.mrb[14].mxu0 %vm265_vm0, %v5887_v54  ;;  %v5988_v53 = vld [vmem:[%s5618_s27 + $0x142] sm:$0xff] }
  0x53   : > { %4851 = vmatprep.mubr.msk.f32.mxu1 %vm265_vm0, %v199_v55  ;;  %5075 = vmatprep.mubr.msk.f32.mxu0 %vm265_vm0, %v5891_v56  ;;  %v5974_v55 = vld [vmem:[%s5618_s27 + $0x13a] sm:$0xff] }
  0x56   : > { %4852 = vmatmul.mubr.msk.f32.vlgmr.msra.gmra.mrb[0].mxu1 %vm265_vm0, %v200_v57  ;;  %5076 = vmatmul.mubr.msk.f32.gmra.mrb[16].mxu0 %vm265_vm0, %v5902_v58  ;;  %v5985_v57 = vld [vmem:[%s5618_s27 + $0x68] sm:$0xff] }
  0x57   : > { %4854 = vmatprep.mubr.msk.f32.mxu1 %vm265_vm0, %v5905_v59  ;;  %4900 = vmatpush3.msra.mxu1 %v5637_v10  ;;  %v5971_v10 = vld [vmem:[%s5618_s27 + $0x60] sm:$0xff]  ;;  %6808 = vst [vmem:[#allocation22_spill] sm:$0xff] %v5985_v57 }
  0x58   : > { %5078 = vmatprep.mubr.msk.f32.mxu0 %vm265_vm0, %v5908_v60  ;;  %4949 = vmatprep.subr.mxu1 %v5913_v61  ;;  %6807 = vst [vmem:[#allocation21_spill] sm:$0xff] %v5971_v10  ;;  %v6051_v59 = vld [vmem:[%s5618_s27 + $0xc0] sm:$0xff] }
  0x5a   : > { %4855 = vmatmul.mubr.msk.f32.gmra.mrb[2].mxu1 %vm265_vm0, %v5922_v62  ;;  %5079 = vmatmul.mubr.msk.f32.gmra.mrb[18].mxu0 %vm265_vm0, %v5925_v63  ;;  %v6045_v62 = vld [vmem:[%s5618_s27 + $0xb0] sm:$0xff] }
  0x5b   : > { %4857 = vmatprep.mubr.msk.f32.mxu1 %vm265_vm0, %v5930_v1  ;;  %5081 = vmatprep.mubr.msk.f32.mxu0 %vm265_vm0, %v5933_v2  ;;  %6816 = vst [vmem:[#allocation30_spill] sm:$0xff] %v6045_v62 }
  0x5e   : > { %4858 = vmatmul.mubr.msk.f32.gmra.mrb[4].mxu1 %vm265_vm0, %v5945_v3  ;;  %5082 = vmatmul.mubr.msk.f32.gmra.mrb[20].mxu0 %vm265_vm0, %v5948_v4 }
  0x5f   : > { %4860 = vmatprep.mubr.msk.f32.mxu1 %vm265_vm0, %v5951_v5  ;;  %5084 = vmatprep.mubr.msk.f32.mxu0 %vm265_vm0, %v5954_v6 }
  0x62   : > { %4861 = vmatmul.mubr.msk.f32.gmra.mrb[6].mxu1 %vm265_vm0, %v5965_v7  ;;  %5085 = vmatmul.mubr.msk.f32.gmra.mrb[22].mxu0 %vm265_vm0, %v5968_v9 }
  0x63   : > { %4863 = vmatprep.mubr.msk.f32.mxu1 %vm265_vm0, %v5971_v10  ;;  %5087 = vmatprep.mubr.msk.f32.mxu0 %vm265_vm0, %v5974_v55 }
  0x66   : > { %4864 = vmatmul.mubr.msk.f32.gmra.mrb[8].mxu1 %vm265_vm0, %v5985_v57  ;;  %5088 = vmatmul.mubr.msk.f32.gmra.mrb[24].mxu0 %vm265_vm0, %v5988_v53 }
  0x67   : > { %4866 = vmatprep.mubr.msk.f32.mxu1 %vm265_vm0, %v5991_v51  ;;  %5090 = vmatprep.mubr.msk.f32.mxu0 %vm265_vm0, %v5994_v49 }
  0x6a   : > { %4867 = vmatmul.mubr.msk.f32.gmra.mrb[10].mxu1 %vm265_vm0, %v6005_v47  ;;  %5091 = vmatmul.mubr.msk.f32.gmra.mrb[26].mxu0 %vm265_vm0, %v6008_v45 }
  0x6b   : > { %4869 = vmatprep.mubr.msk.f32.mxu1 %vm265_vm0, %v6011_v43  ;;  %5093 = vmatprep.mubr.msk.f32.mxu0 %vm265_vm0, %v6014_v41 }
  0x6e   : > { %4870 = vmatmul.mubr.msk.f32.gmra.mrb[12].mxu1 %vm265_vm0, %v6025_v39  ;;  %5094 = vmatmul.mubr.msk.f32.gmra.mrb[28].mxu0 %vm265_vm0, %v6028_v37  ;;  %v6070_v37 = vld [vmem:[%s6740_s1 + $0x40] sm:$0xff] }
  0x6f   : > { %4872 = vmatprep.mubr.msk.f32.mxu1 %vm265_vm0, %v6031_v35  ;;  %5096 = vmatprep.mubr.msk.f32.mxu0 %vm265_vm0, %v6034_v33  ;;  %v6062_v33 = vld [vmem:[%s5618_s27 + $0xc8] sm:$0xff] }
  0x70   : > { %6818 = vst [vmem:[#allocation32_spill] sm:$0xff] %v6062_v33 }
  0x72   : > { %4873 = vmatmul.mubr.msk.f32.gmra.mrb[14].mxu1 %vm265_vm0, %v6045_v62  ;;  %5097 = vmatmul.mubr.msk.f32.gmra.mrb[30].mxu0 %vm265_vm0, %v6048_v31  ;;  %v6080_v31 = vld [vmem:[%s5618_s27 + $0xe0] sm:$0xff] }
  0x73   : > { %4875 = vmatprep.mubr.msk.f32.mxu1 %vm265_vm0, %v6051_v59  ;;  %5101 = vmatprep.mubr.msk.f32.mxu0 %vm265_vm0, %v5930_v1  ;;  %v6085_v1 = vld [vmem:[%s5618_s27 + $0xf0] sm:$0xff] }
  0x76   : > { %4876 = vmatmul.mubr.msk.f32.gmra.mrb[16].mxu1 %vm265_vm0, %v6062_v33  ;;  %5102 = vmatmul.mubr.msk.f32.vlgmr.msra.gmra.mrb[0].mxu0 %vm265_vm0, %v5945_v3  ;;  %v908_v3 = vld [vmem:[%s5618_s27 + $0x2] sm:$0xff] }
  0x77   : > { %5150 = vmatpush3.msra.mxu0 %v5752_v28  ;;  %4878 = vmatprep.mubr.msk.f32.mxu1 %vm265_vm0, %v6065_v29  ;;  %v6097_v28 = vld [vmem:[%s5618_s27 + $0xf8] sm:$0xff] }
  0x78   : > { %5104 = vmatprep.mubr.msk.f32.mxu0 %vm265_vm0, %v5951_v5  ;;  %5199 = vmatprep.subr.mxu0 %v6070_v37  ;;  %v6100_v5 = vld [vmem:[%s5618_s27 + $0x108] sm:$0xff] }
  0x7a   : > { %4879 = vmatmul.mubr.msk.f32.gmra.mrb[18].mxu1 %vm265_vm0, %v6080_v31  ;;  %5105 = vmatmul.mubr.msk.f32.gmra.mrb[2].mxu0 %vm265_vm0, %v5965_v7  ;;  %v6111_v7 = vld [vmem:[%s5618_s27 + $0x110] sm:$0xff] }
  0x7b   : > { %4881 = vmatprep.mubr.msk.f32.mxu1 %vm265_vm0, %v6085_v1  ;;  %5107 = vmatprep.mubr.msk.f32.mxu0 %vm265_vm0, %v5971_v10  ;;  %v6114_v10 = vld [vmem:[%s5618_s27 + $0x120] sm:$0xff] }
  0x7e   : > { %4882 = vmatmul.mubr.msk.f32.gmra.mrb[20].mxu1 %vm265_vm0, %v6097_v28  ;;  %5108 = vmatmul.mubr.msk.f32.gmra.mrb[4].mxu0 %vm265_vm0, %v5985_v57  ;;  %v6125_v57 = vld [vmem:[%s5618_s27 + $0x128] sm:$0xff] }
  0x7f   : > { %4884 = vmatprep.mubr.msk.f32.mxu1 %vm265_vm0, %v6100_v5  ;;  %5110 = vmatprep.mubr.msk.f32.mxu0 %vm265_vm0, %v5991_v51  ;;  %v6128_v51 = vld [vmem:[%s5618_s27 + $0x138] sm:$0xff] }
  0x82   : > { %4885 = vmatmul.mubr.msk.f32.gmra.mrb[22].mxu1 %vm265_vm0, %v6111_v7  ;;  %5111 = vmatmul.mubr.msk.f32.gmra.mrb[6].mxu0 %vm265_vm0, %v6005_v47  ;;  %v6139_v47 = vld [vmem:[%s5618_s27 + $0x140] sm:$0xff] }
  0x83   : > { %4887 = vmatprep.mubr.msk.f32.mxu1 %vm265_vm0, %v6114_v10  ;;  %5113 = vmatprep.mubr.msk.f32.mxu0 %vm265_vm0, %v6011_v43  ;;  %v6142_v43 = vld [vmem:[%s5618_s27 + $0x150] sm:$0xff] }
  0x86   : > { %4888 = vmatmul.mubr.msk.f32.gmra.mrb[24].mxu1 %vm265_vm0, %v6125_v57  ;;  %5114 = vmatmul.mubr.msk.f32.gmra.mrb[8].mxu0 %vm265_vm0, %v6025_v39  ;;  %v6153_v39 = vld [vmem:[%s5618_s27 + $0x158] sm:$0xff] }
  0x87   : > { %4890 = vmatprep.mubr.msk.f32.mxu1 %vm265_vm0, %v6128_v51  ;;  %5116 = vmatprep.mubr.msk.f32.mxu0 %vm265_vm0, %v6031_v35  ;;  %v6156_v35 = vld [vmem:[%s5618_s27 + $0x168] sm:$0xff] }
  0x8a   : > { %4891 = vmatmul.mubr.msk.f32.gmra.mrb[26].mxu1 %vm265_vm0, %v6139_v47  ;;  %5117 = vmatmul.mubr.msk.f32.gmra.mrb[10].mxu0 %vm265_vm0, %v6045_v62  ;;  %v6167_v62 = vld [vmem:[%s5618_s27 + $0x170] sm:$0xff] }
  0x8b   : > { %4893 = vmatprep.mubr.msk.f32.mxu1 %vm265_vm0, %v6142_v43  ;;  %5119 = vmatprep.mubr.msk.f32.mxu0 %vm265_vm0, %v6051_v59 }
  0x8e   : > { %4894 = vmatmul.mubr.msk.f32.gmra.mrb[28].mxu1 %vm265_vm0, %v6153_v39  ;;  %5120 = vmatmul.mubr.msk.f32.gmra.mrb[12].mxu0 %vm265_vm0, %v6062_v33  ;;  %v909_v33 = vld [vmem:[%s5618_s27 + $0xa] sm:$0xff] }
  0x8f   : > { %4896 = vmatprep.mubr.msk.f32.mxu1 %vm265_vm0, %v6156_v35  ;;  %5122 = vmatprep.mubr.msk.f32.mxu0 %vm265_vm0, %v6065_v29 }
  0x92   : > { %4897 = vmatmul.mubr.msk.f32.gmra.mrb[30].mxu1 %vm265_vm0, %v6167_v62  ;;  %5123 = vmatmul.mubr.msk.f32.gmra.mrb[14].mxu0 %vm265_vm0, %v6080_v31 }
  0x93   : > { %4901 = vmatprep.mubr.msk.f32.mxu1 %vm265_vm0, %v908_v3  ;;  %5125 = vmatprep.mubr.msk.f32.mxu0 %vm265_vm0, %v6085_v1  ;;  %v6835_v3 = vld [vmem:[#allocation22_spill] sm:$0xff] }
  0x96   : > { %4902 = vmatmul.mubr.msk.f32.vlgmr.msra.gmra.mrb[0].mxu1 %vm265_vm0, %v909_v33  ;;  %5126 = vmatmul.mubr.msk.f32.gmra.mrb[16].mxu0 %vm265_vm0, %v6097_v28  ;;  %v4304_v33 = vld [vmem:[%s5618_s27 + $0x198] sm:$0xff] }
  0x97   : > { %4904 = vmatprep.mubr.msk.f32.mxu1 %vm265_vm0, %v5730_v24  ;;  %4950 = vmatpush3.msra.mxu1 %v5913_v61  ;;  %v6220_v24 = vld [vmem:[%s5618_s27 + $0x180] sm:$0xff] }
  0x98   : > { %5128 = vmatprep.mubr.msk.f32.mxu0 %vm265_vm0, %v6100_v5  ;;  %5249 = vmatprep.subr.mxu1 %v5599_v0  ;;  %v4305_v61 = vld [vmem:[%s5618_s27 + $0x1a0] sm:$0xff] }
  0x9a   : > { %4905 = vmatmul.mubr.msk.f32.gmra.mrb[2].mxu1 %vm265_vm0, %v5741_v25  ;;  %5129 = vmatmul.mubr.msk.f32.gmra.mrb[18].mxu0 %vm265_vm0, %v6111_v7  ;;  %v6231_v25 = vld [vmem:[%s5618_s27 + $0x188] sm:$0xff] }
  0x9b   : > { %4907 = vmatprep.mubr.msk.f32.mxu1 %vm265_vm0, %v5747_v27  ;;  %5131 = vmatprep.mubr.msk.f32.mxu0 %vm265_vm0, %v6114_v10 }
  0x9e   : > { %4908 = vmatmul.mubr.msk.f32.gmra.mrb[4].mxu1 %vm265_vm0, %v5764_v30  ;;  %5132 = vmatmul.mubr.msk.f32.gmra.mrb[20].mxu0 %vm265_vm0, %v6125_v57 }
  0x9f   : > { %4910 = vmatprep.mubr.msk.f32.mxu1 %vm265_vm0, %v5772_v32  ;;  %5134 = vmatprep.mubr.msk.f32.mxu0 %vm265_vm0, %v6128_v51 }
  0xa2   : > { %4911 = vmatmul.mubr.msk.f32.gmra.mrb[6].mxu1 %vm265_vm0, %v5787_v34  ;;  %5135 = vmatmul.mubr.msk.f32.gmra.mrb[22].mxu0 %vm265_vm0, %v6139_v47 }
  0xa3   : > { %4913 = vmatprep.mubr.msk.f32.mxu1 %vm265_vm0, %v5793_v36  ;;  %5137 = vmatprep.mubr.msk.f32.mxu0 %vm265_vm0, %v6142_v43 }
  0xa6   : > { %4914 = vmatmul.mubr.msk.f32.gmra.mrb[8].mxu1 %vm265_vm0, %v5807_v38  ;;  %5138 = vmatmul.mubr.msk.f32.gmra.mrb[24].mxu0 %vm265_vm0, %v6153_v39 }
  0xa7   : > { %4916 = vmatprep.mubr.msk.f32.mxu1 %vm265_vm0, %v5813_v40  ;;  %5140 = vmatprep.mubr.msk.f32.mxu0 %vm265_vm0, %v6156_v35 }
  0xaa   : > { %4917 = vmatmul.mubr.msk.f32.gmra.mrb[10].mxu1 %vm265_vm0, %v5827_v42  ;;  %5141 = vmatmul.mubr.msk.f32.gmra.mrb[26].mxu0 %vm265_vm0, %v6167_v62 }
  0xab   : > { %4919 = vmatprep.mubr.msk.f32.mxu1 %vm265_vm0, %v5833_v44  ;;  %5143 = vmatprep.mubr.msk.f32.mxu0 %vm265_vm0, %v6220_v24 }
  0xae   : > { %4920 = vmatmul.mubr.msk.f32.gmra.mrb[12].mxu1 %vm265_vm0, %v5847_v46  ;;  %5144 = vmatmul.mubr.msk.f32.gmra.mrb[28].mxu0 %vm265_vm0, %v6231_v25 }
  0xaf   : > { %4922 = vmatprep.mubr.msk.f32.mxu1 %vm265_vm0, %v5853_v48  ;;  %5146 = vmatprep.mubr.msk.f32.mxu0 %vm265_vm0, %v4304_v33  ;;  %v6836_v33 = vld [vmem:[#allocation10_spill] sm:$0xff] }
  0xb2   : > { %4923 = vmatmul.mubr.msk.f32.gmra.mrb[14].mxu1 %vm265_vm0, %v5867_v50  ;;  %5147 = vmatmul.mubr.msk.f32.gmra.mrb[30].mxu0 %vm265_vm0, %v4305_v61  ;;  %v6837_v61 = vld [vmem:[#allocation23_spill] sm:$0xff] }
  0xb3   : > { %4925 = vmatprep.mubr.msk.f32.mxu1 %vm265_vm0, %v5873_v52  ;;  %5151 = vmatprep.mubr.msk.f32.mxu0 %vm265_vm0, %v5627_v8  ;;  %v6819_v8 = vld [vmem:[#allocation27_spill] sm:$0xff] }
  0xb6   : > { %4926 = vmatmul.mubr.msk.f32.gmra.mrb[16].mxu1 %vm265_vm0, %v5887_v54  ;;  %5152 = vmatmul.mubr.msk.f32.vlgmr.msra.gmra.mrb[0].mxu0 %vm265_vm0, %v5641_v11  ;;  %v6820_v11 = vld [vmem:[#allocation2_spill] sm:$0xff] }
  0xb7   : > { %5200 = vmatpush3.msra.mxu0 %v6070_v37  ;;  %4928 = vmatprep.mubr.msk.f32.mxu1 %vm265_vm0, %v5891_v56  ;;  %v6834_v37 = vld [vmem:[#allocation9_spill] sm:$0xff] }
  0xb8   : > { %5154 = vmatprep.mubr.msk.f32.mxu0 %vm265_vm0, %v5646_v12  ;;  %v6821_v12 = vld [vmem:[#allocation15_spill] sm:$0xff] }
  0xba   : > { %4929 = vmatmul.mubr.msk.f32.gmra.mrb[18].mxu1 %vm265_vm0, %v5902_v58  ;;  %5155 = vmatmul.mubr.msk.f32.gmra.mrb[2].mxu0 %vm265_vm0, %v5657_v13  ;;  %v6822_v13 = vld [vmem:[#allocation3_spill] sm:$0xff] }
  0xbb   : > { %4931 = vmatprep.mubr.msk.f32.mxu1 %vm265_vm0, %v5908_v60  ;;  %5157 = vmatprep.mubr.msk.f32.mxu0 %vm265_vm0, %v5660_v14  ;;  %v6823_v14 = vld [vmem:[#allocation16_spill] sm:$0xff] }
  0xbe   : > { %4932 = vmatmul.mubr.msk.f32.gmra.mrb[20].mxu1 %vm265_vm0, %v5925_v63  ;;  %5158 = vmatmul.mubr.msk.f32.gmra.mrb[4].mxu0 %vm265_vm0, %v5671_v15  ;;  %v6824_v15 = vld [vmem:[#allocation4_spill] sm:$0xff] }
  0xbf   : > { %4934 = vmatprep.mubr.msk.f32.mxu1 %vm265_vm0, %v5933_v2  ;;  %5160 = vmatprep.mubr.msk.f32.mxu0 %vm265_vm0, %v5674_v16  ;;  %v6825_v16 = vld [vmem:[#allocation17_spill] sm:$0xff] }
  0xc2   : > { %4935 = vmatmul.mubr.msk.f32.gmra.mrb[22].mxu1 %vm265_vm0, %v5948_v4  ;;  %5161 = vmatmul.mubr.msk.f32.gmra.mrb[6].mxu0 %vm265_vm0, %v5685_v17  ;;  %v6826_v17 = vld [vmem:[#allocation5_spill] sm:$0xff] }
  0xc3   : > { %4937 = vmatprep.mubr.msk.f32.mxu1 %vm265_vm0, %v5954_v6  ;;  %5163 = vmatprep.mubr.msk.f32.mxu0 %vm265_vm0, %v5688_v18  ;;  %v6827_v18 = vld [vmem:[#allocation18_spill] sm:$0xff] }
  0xc6   : > { %4938 = vmatmul.mubr.msk.f32.gmra.mrb[24].mxu1 %vm265_vm0, %v5968_v9  ;;  %5164 = vmatmul.mubr.msk.f32.gmra.mrb[8].mxu0 %vm265_vm0, %v5699_v19  ;;  %v6828_v19 = vld [vmem:[#allocation6_spill] sm:$0xff] }
  0xc7   : > { %4940 = vmatprep.mubr.msk.f32.mxu1 %vm265_vm0, %v5974_v55  ;;  %5166 = vmatprep.mubr.msk.f32.mxu0 %vm265_vm0, %v5702_v20  ;;  %v6829_v20 = vld [vmem:[#allocation19_spill] sm:$0xff] }
  0xca   : > { %4941 = vmatmul.mubr.msk.f32.gmra.mrb[26].mxu1 %vm265_vm0, %v5988_v53  ;;  %5167 = vmatmul.mubr.msk.f32.gmra.mrb[10].mxu0 %vm265_vm0, %v5713_v21  ;;  %v6830_v21 = vld [vmem:[#allocation7_spill] sm:$0xff] }
  0xcb   : > { %4943 = vmatprep.mubr.msk.f32.mxu1 %vm265_vm0, %v5994_v49  ;;  %5169 = vmatprep.mubr.msk.f32.mxu0 %vm265_vm0, %v5716_v22  ;;  %v6831_v22 = vld [vmem:[#allocation20_spill] sm:$0xff] }
  0xce   : > { %4944 = vmatmul.mubr.msk.f32.gmra.mrb[28].mxu1 %vm265_vm0, %v6008_v45  ;;  %5170 = vmatmul.mubr.msk.f32.gmra.mrb[12].mxu0 %vm265_vm0, %v5727_v23  ;;  %v6833_v23 = vld [vmem:[#allocation21_spill] sm:$0xff] }
  0xcf   : > { %4946 = vmatprep.mubr.msk.f32.mxu1 %vm265_vm0, %v6014_v41  ;;  %5172 = vmatprep.mubr.msk.f32.mxu0 %vm265_vm0, %v5744_v26 }
  0xd2   : > { %4947 = vmatmul.mubr.msk.f32.gmra.mrb[30].mxu1 %vm265_vm0, %v6819_v8  ;;  %5173 = vmatmul.mubr.msk.f32.gmra.mrb[14].mxu0 %vm265_vm0, %v6820_v11  ;;  %v6846_v8 = vld [vmem:[#allocation30_spill] sm:$0xff] }
  0xd3   : > { %4951 = vmatprep.mubr.msk.f32.mxu1 %vm265_vm0, %v6821_v12  ;;  %5175 = vmatprep.mubr.msk.f32.mxu0 %vm265_vm0, %v6822_v13  ;;  %v6838_v12 = vld [vmem:[#allocation11_spill] sm:$0xff] }
  0xd6   : > { %4952 = vmatmul.mubr.msk.f32.vlgmr.msra.gmra.mrb[0].mxu1 %vm265_vm0, %v6823_v14  ;;  %5176 = vmatmul.mubr.msk.f32.gmra.mrb[16].mxu0 %vm265_vm0, %v6824_v15  ;;  %v6839_v14 = vld [vmem:[#allocation24_spill] sm:$0xff] }
  0xd7   : > { %4954 = vmatprep.mubr.msk.f32.mxu1 %vm265_vm0, %v6825_v16  ;;  %5250 = vmatpush3.msra.mxu1 %v5599_v0  ;;  %v6832_v0 = vld [vmem:[#allocation8_spill] sm:$0xff] }
  0xd8   : > { %5178 = vmatprep.mubr.msk.f32.mxu0 %vm265_vm0, %v6826_v17  ;;  %v6840_v16 = vld [vmem:[#allocation12_spill] sm:$0xff] }
  0xda   : > { %4955 = vmatmul.mubr.msk.f32.gmra.mrb[2].mxu1 %vm265_vm0, %v6827_v18  ;;  %5179 = vmatmul.mubr.msk.f32.gmra.mrb[18].mxu0 %vm265_vm0, %v6828_v19  ;;  %v6841_v18 = vld [vmem:[#allocation25_spill] sm:$0xff] }
  0xdb   : > { %4957 = vmatprep.mubr.msk.f32.mxu1 %vm265_vm0, %v6829_v20  ;;  %5181 = vmatprep.mubr.msk.f32.mxu0 %vm265_vm0, %v6830_v21  ;;  %v6842_v20 = vld [vmem:[#allocation13_spill] sm:$0xff] }
  0xde   : > { %4958 = vmatmul.mubr.msk.f32.gmra.mrb[4].mxu1 %vm265_vm0, %v6831_v22  ;;  %5182 = vmatmul.mubr.msk.f32.gmra.mrb[20].mxu0 %vm265_vm0, %v6832_v0  ;;  %v6356_v22 = vld [vmem:[%s5618_s27 + $0x181] sm:$0xff] }
  0xdf   : > { %4960 = vmatprep.mubr.msk.f32.mxu1 %vm265_vm0, %v6833_v23  ;;  %5184 = vmatprep.mubr.msk.f32.mxu0 %vm265_vm0, %v6834_v37  ;;  %v6843_v23 = vld [vmem:[#allocation26_spill] sm:$0xff] }
  0xe2   : > { %4961 = vmatmul.mubr.msk.f32.gmra.mrb[6].mxu1 %vm265_vm0, %v6835_v3  ;;  %5185 = vmatmul.mubr.msk.f32.gmra.mrb[22].mxu0 %vm265_vm0, %v6836_v33  ;;  %v6844_v3 = vld [vmem:[#allocation14_spill] sm:$0xff] }
  0xe3   : > { %4963 = vmatprep.mubr.msk.f32.mxu1 %vm265_vm0, %v6837_v61  ;;  %5187 = vmatprep.mubr.msk.f32.mxu0 %vm265_vm0, %v6838_v12  ;;  %v6845_v61 = vld [vmem:[#allocation28_spill] sm:$0xff] }
  0xe6   : > { %4964 = vmatmul.mubr.msk.f32.gmra.mrb[8].mxu1 %vm265_vm0, %v6839_v14  ;;  %5188 = vmatmul.mubr.msk.f32.gmra.mrb[24].mxu0 %vm265_vm0, %v6840_v16  ;;  %v6367_v14 = vld [vmem:[%s5618_s27 + $0x189] sm:$0xff] }
  0xe7   : > { %4966 = vmatprep.mubr.msk.f32.mxu1 %vm265_vm0, %v6841_v18  ;;  %5190 = vmatprep.mubr.msk.f32.mxu0 %vm265_vm0, %v6842_v20  ;;  %v4368_v18 = vld [vmem:[%s5618_s27 + $0x199] sm:$0xff] }
  0xea   : > { %4967 = vmatmul.mubr.msk.f32.gmra.mrb[10].mxu1 %vm265_vm0, %v6843_v23  ;;  %5191 = vmatmul.mubr.msk.f32.gmra.mrb[26].mxu0 %vm265_vm0, %v6844_v3  ;;  %v4369_v23 = vld [vmem:[%s5618_s27 + $0x1a1] sm:$0xff]  ;;  %v6847_v3 = vld [vmem:[#allocation32_spill] sm:$0xff] }
  0xeb   : > { %4969 = vmatprep.mubr.msk.f32.mxu1 %vm265_vm0, %v6845_v61  ;;  %5193 = vmatprep.mubr.msk.f32.mxu0 %vm265_vm0, %v6356_v22 }
  0xee   : > { %4970 = vmatmul.mubr.msk.f32.gmra.mrb[12].mxu1 %vm265_vm0, %v6846_v8  ;;  %5194 = vmatmul.mubr.msk.f32.gmra.mrb[28].mxu0 %vm265_vm0, %v6367_v14 }
  0xef   : > { %4972 = vmatprep.mubr.msk.f32.mxu1 %vm265_vm0, %v6051_v59  ;;  %5196 = vmatprep.mubr.msk.f32.mxu0 %vm265_vm0, %v4368_v18 }
  0xf2   : > { %4973 = vmatmul.mubr.msk.f32.gmra.mrb[14].mxu1 %vm265_vm0, %v6847_v3  ;;  %5197 = vmatmul.mubr.msk.f32.gmra.mrb[30].mxu0 %vm265_vm0, %v4369_v23 }
  0xf3   : > { %4975 = vmatprep.mubr.msk.f32.mxu1 %vm265_vm0, %v6065_v29  ;;  %5201 = vmatprep.mubr.msk.f32.mxu0 %vm265_vm0, %v5747_v27  ;;  %v6849_v27 = vld [vmem:[#allocation29_spill] sm:$0xff] }
  0xf4   : > { %v4432_v29 = vld [vmem:[%s5618_s27 + $0x19a] sm:$0xff] }
  0xf6   : > { %4976 = vmatmul.mubr.msk.f32.gmra.mrb[16].mxu1 %vm265_vm0, %v6080_v31  ;;  %5202 = vmatmul.mubr.msk.f32.vlgmr.msra.gmra.mrb[0].mxu0 %vm265_vm0, %v5764_v30  ;;  %v6850_v30 = vld [vmem:[#allocation14_spill] sm:$0xff]  ;;  %v6851_v31 = vld [vmem:[#allocation31_spill] sm:$0xff] }
  0xf7   : > { %4978 = vmatprep.mubr.msk.f32.mxu1 %vm265_vm0, %v6085_v1  ;;  %5204 = vmatprep.mubr.msk.f32.mxu0 %vm265_vm0, %v5772_v32  ;;  %v4433_v32 = vld [vmem:[%s5618_s27 + $0x1a2] sm:$0xff] }
  0xfa   : > { %4979 = vmatmul.mubr.msk.f32.gmra.mrb[18].mxu1 %vm265_vm0, %v6097_v28  ;;  %5205 = vmatmul.mubr.msk.f32.gmra.mrb[2].mxu0 %vm265_vm0, %v5787_v34 }
  0xfb   : > { %4981 = vmatprep.mubr.msk.f32.mxu1 %vm265_vm0, %v6100_v5  ;;  %5207 = vmatprep.mubr.msk.f32.mxu0 %vm265_vm0, %v5793_v36 }
  0xfe   : > { %4982 = vmatmul.mubr.msk.f32.gmra.mrb[20].mxu1 %vm265_vm0, %v6111_v7  ;;  %5208 = vmatmul.mubr.msk.f32.gmra.mrb[4].mxu0 %vm265_vm0, %v5807_v38 }
  0xff   : > { %4984 = vmatprep.mubr.msk.f32.mxu1 %vm265_vm0, %v6114_v10  ;;  %5210 = vmatprep.mubr.msk.f32.mxu0 %vm265_vm0, %v5813_v40 }
 0x102   : > { %4985 = vmatmul.mubr.msk.f32.gmra.mrb[22].mxu1 %vm265_vm0, %v6125_v57  ;;  %5211 = vmatmul.mubr.msk.f32.gmra.mrb[6].mxu0 %vm265_vm0, %v5827_v42 }
 0x103   : > { %4987 = vmatprep.mubr.msk.f32.mxu1 %vm265_vm0, %v6128_v51  ;;  %5213 = vmatprep.mubr.msk.f32.mxu0 %vm265_vm0, %v5833_v44 }
 0x106   : > { %4988 = vmatmul.mubr.msk.f32.gmra.mrb[24].mxu1 %vm265_vm0, %v6139_v47  ;;  %5214 = vmatmul.mubr.msk.f32.gmra.mrb[8].mxu0 %vm265_vm0, %v5847_v46 }
 0x107   : > { %4990 = vmatprep.mubr.msk.f32.mxu1 %vm265_vm0, %v6142_v43  ;;  %5216 = vmatprep.mubr.msk.f32.mxu0 %vm265_vm0, %v5853_v48 }
 0x10a   : > { %4991 = vmatmul.mubr.msk.f32.gmra.mrb[26].mxu1 %vm265_vm0, %v6153_v39  ;;  %5217 = vmatmul.mubr.msk.f32.gmra.mrb[10].mxu0 %vm265_vm0, %v5867_v50 }
 0x10b   : > { %4993 = vmatprep.mubr.msk.f32.mxu1 %vm265_vm0, %v6156_v35  ;;  %5219 = vmatprep.mubr.msk.f32.mxu0 %vm265_vm0, %v5873_v52  ;;  %v6524_v52 = vld [vmem:[%s6741_s2] ss:$0 sm:$0xff] }
 0x10e   : > { %4994 = vmatmul.mubr.msk.f32.gmra.mrb[28].mxu1 %vm265_vm0, %v6167_v62  ;;  %5220 = vmatmul.mubr.msk.f32.gmra.mrb[12].mxu0 %vm265_vm0, %v5887_v54 }
 0x10f   : > { %4996 = vmatprep.mubr.msk.f32.mxu1 %vm265_vm0, %v6220_v24  ;;  %5222 = vmatprep.mubr.msk.f32.mxu0 %vm265_vm0, %v5891_v56 }
 0x112   : > { %4997 = vmatmul.mubr.msk.f32.gmra.mrb[30].mxu1 %vm265_vm0, %v6231_v25  ;;  %5223 = vmatmul.mubr.msk.f32.gmra.mrb[14].mxu0 %vm265_vm0, %v5902_v58 }
 0x113   : > { %5025 = vmatprep.mubr.msk.f32.mxu1 %vm265_vm0, %v5744_v26  ;;  %5225 = vmatprep.mubr.msk.f32.mxu0 %vm265_vm0, %v5908_v60  ;;  %v6848_v26 = vld [vmem:[#allocation27_spill] sm:$0xff] }
 0x116   : > { %5026 = vmatmul.mubr.msk.f32.vlgmr.msra.gmra.mrb[16].mxu1 %vm265_vm0, %v6820_v11  ;;  %5226 = vmatmul.mubr.msk.f32.gmra.mrb[16].mxu0 %vm265_vm0, %v5925_v63 }
 0x117   : > { %5028 = vmatprep.mubr.msk.f32.mxu1 %vm265_vm0, %v6822_v13  ;;  %5228 = vmatprep.mubr.msk.f32.mxu0 %vm265_vm0, %v5933_v2 }
 0x11a   : > { %5029 = vmatmul.mubr.msk.f32.gmra.mrb[18].mxu1 %vm265_vm0, %v6824_v15  ;;  %5229 = vmatmul.mubr.msk.f32.gmra.mrb[18].mxu0 %vm265_vm0, %v5948_v4 }
 0x11b   : > { %5031 = vmatprep.mubr.msk.f32.mxu1 %vm265_vm0, %v6826_v17  ;;  %5231 = vmatprep.mubr.msk.f32.mxu0 %vm265_vm0, %v5954_v6 }
 0x11e   : > { %5032 = vmatmul.mubr.msk.f32.gmra.mrb[20].mxu1 %vm265_vm0, %v6828_v19  ;;  %5232 = vmatmul.mubr.msk.f32.gmra.mrb[20].mxu0 %vm265_vm0, %v5968_v9 }
 0x11f   : > { %5034 = vmatprep.mubr.msk.f32.mxu1 %vm265_vm0, %v6830_v21  ;;  %5234 = vmatprep.mubr.msk.f32.mxu0 %vm265_vm0, %v5974_v55 }
 0x122   : > { %5035 = vmatmul.mubr.msk.f32.gmra.mrb[22].mxu1 %vm265_vm0, %v6832_v0  ;;  %5235 = vmatmul.mubr.msk.f32.gmra.mrb[22].mxu0 %vm265_vm0, %v5988_v53 }
 0x123   : > { %5037 = vmatprep.mubr.msk.f32.mxu1 %vm265_vm0, %v6834_v37  ;;  %5237 = vmatprep.mubr.msk.f32.mxu0 %vm265_vm0, %v5994_v49 }
 0x126   : > { %5038 = vmatmul.mubr.msk.f32.gmra.mrb[24].mxu1 %vm265_vm0, %v6836_v33  ;;  %5238 = vmatmul.mubr.msk.f32.gmra.mrb[24].mxu0 %vm265_vm0, %v6008_v45 }
 0x127   : > { %5040 = vmatprep.mubr.msk.f32.mxu1 %vm265_vm0, %v6838_v12  ;;  %5240 = vmatprep.mubr.msk.f32.mxu0 %vm265_vm0, %v6014_v41 }
 0x12a   : > { %5041 = vmatmul.mubr.msk.f32.gmra.mrb[26].mxu1 %vm265_vm0, %v6840_v16  ;;  %5241 = vmatmul.mubr.msk.f32.gmra.mrb[26].mxu0 %vm265_vm0, %v6848_v26 }
 0x12b   : > { %5043 = vmatprep.mubr.msk.f32.mxu1 %vm265_vm0, %v6842_v20  ;;  %5243 = vmatprep.mubr.msk.f32.mxu0 %vm265_vm0, %v6849_v27 }
 0x12e   : > { %5044 = vmatmul.mubr.msk.f32.gmra.mrb[28].mxu1 %vm265_vm0, %v6850_v30  ;;  %5244 = vmatmul.mubr.msk.f32.gmra.mrb[28].mxu0 %vm265_vm0, %v6851_v31 }
 0x12f   : > { %5046 = vmatprep.mubr.msk.f32.mxu1 %vm265_vm0, %v6356_v22  ;;  %5246 = vmatprep.mubr.msk.f32.mxu0 %vm265_vm0, %v4432_v29 }
 0x132   : > { %5047 = vmatmul.mubr.msk.f32.gmra.mrb[30].mxu1 %vm265_vm0, %v6367_v14  ;;  %5247 = vmatmul.mubr.msk.f32.gmra.mrb[30].mxu0 %vm265_vm0, %v4433_v32 }
 0x1a9   : > { %v4953_v34 = vpop.f32.mrb[0].mxu1 }
 0x1aa   : > { %v1492_v35 = vpop.f32.mrb[1].mxu1 }
 0x1ad   : > { %v4956_v36 = vpop.f32.mrb[2].mxu1 }
 0x1ae   : > { %v1502_v38 = vpop.f32.mrb[3].mxu1 }
 0x1b1   : > { %v4959_v39 = vpop.f32.mrb[4].mxu1 }
 0x1b2   : > { %v1512_v40 = vpop.f32.mrb[5].mxu1 }
 0x1b5   : > { %v4962_v41 = vpop.f32.mrb[6].mxu1 }
 0x1b6   : > { %v1522_v42 = vpop.f32.mrb[7].mxu1 }
 0x1b9   : > { %v4965_v43 = vpop.f32.mrb[8].mxu1 }
 0x1ba   : > { %v1532_v44 = vpop.f32.mrb[9].mxu1 }
 0x1bd   : > { %v6509_v45 = vpop.f32.mrb[10].mxu1 }
 0x1be   : > { %v6511_v46 = vpop.f32.mrb[11].mxu1 }
 0x1c1   : > { %v6513_v47 = vpop.f32.mrb[12].mxu1 }
 0x1c2   : > { %v6515_v48 = vpop.f32.mrb[13].mxu1 }
 0x1c5   : > { %v6517_v49 = vpop.f32.mrb[14].mxu1 }
 0x1c6   : > { %v6519_v50 = vpop.f32.mrb[15].mxu1 }
 0x1c9   : > { %v5203_v51 = vpop.f32.mrb[0].mxu0 }
 0x1ca   : > { %v5251_v53 = vadd.f32 %v5203_v51, %v4953_v34  ;;  %v3425_v54 = vpop.f32.mrb[1].mxu0 }
 0x1cb   : > { %v5252_v56 = vadd.f32 %v3425_v54, %v1492_v35 }
 0x1cc   : > { %v3624_v58 = vadd.f32 %v5251_v53, %v6524_v52 }
 0x1cd   : > { %v3623_v59 = vadd.f32 %v5252_v56, %v6524_v52  ;;  %v5206_v60 = vpop.f32.mrb[2].mxu0 }
 0x1ce   : > { %v5253_v62 = vadd.f32 %v5206_v60, %v4956_v36  ;;  %v3435_v63 = vpop.f32.mrb[3].mxu0  ;;  %v3656_v1 = vmax.f32 %v3624_v58, 0.0 }
 0x1cf   : > { %v3655_v2 = vmax.f32 %v3623_v59, 0.0  ;;  %v5254_v4 = vadd.f32 %v3435_v63, %v1502_v38 }
 0x1d0   : > { %3754 = vrot.lane.b32.xlu0 %v3656_v1, %s5557_s12  ;;  %3689 = vst.msk [vmem:[%s6531_s20 + $0x8] sm:$0xff] %vm3687_vm1, %v3656_v1  ;;  %v3626_v5 = vadd.f32 %v5253_v62, %v6524_v52 }
 0x1d1   : > { %3688 = vst.msk [vmem:[%s6531_s20] sm:$0xff] %vm3687_vm1, %v3655_v2  ;;  %v3625_v6 = vadd.f32 %v5254_v4, %v6524_v52  ;;  %v5209_v7 = vpop.f32.mrb[4].mxu0 }
 0x1d2   : > { %v5255_v9 = vadd.f32 %v5209_v7, %v4959_v39  ;;  %v3445_v10 = vpop.f32.mrb[5].mxu0  ;;  %v3658_v55 = vmax.f32 %v3626_v5, 0.0 }
 0x1d3   : > { %v3657_v57 = vmax.f32 %v3625_v6, 0.0  ;;  %v5256_v28 = vadd.f32 %v3445_v10, %v1512_v40 }
 0x1d4   : > { %v3628_v24 = vadd.f32 %v5255_v9, %v6524_v52  ;;  %3752 = vrot.lane.b32.xlu0 %v3655_v2, %s5557_s12  ;;  %3758 = vrot.lane.b32.xlu1 %v3658_v55, %s5557_s12  ;;  %3691 = vst.msk [vmem:[%s6531_s20 + $0x28] sm:$0xff] %vm3687_vm1, %v3658_v55 }
 0x1d5   : > { %3690 = vst.msk [vmem:[%s6531_s20 + $0x20] sm:$0xff] %vm3687_vm1, %v3657_v57  ;;  %v3627_v25 = vadd.f32 %v5256_v28, %v6524_v52  ;;  %v5212_v8 = vpop.f32.mrb[6].mxu0 }
 0x1d6   : > { %v3660_v11 = vmax.f32 %v3628_v24, 0.0  ;;  %v5257_v13 = vadd.f32 %v5212_v8, %v4962_v41  ;;  %v3455_v15 = vpop.f32.mrb[7].mxu0 }
 0x1d7   : > { %v3659_v17 = vmax.f32 %v3627_v25, 0.0  ;;  %v5258_v19 = vadd.f32 %v3455_v15, %v1522_v42 }
 0x1d8   : > { %3693 = vst.msk [vmem:[%s6531_s20 + $0x48] sm:$0xff] %vm3687_vm1, %v3660_v11  ;;  %v3630_v21 = vadd.f32 %v5257_v13, %v6524_v52  ;;  %3756 = vrot.lane.b32.xlu1 %v3657_v57, %s5557_s12 }
 0x1d9   : > { %3692 = vst.msk [vmem:[%s6531_s20 + $0x40] sm:$0xff] %vm3687_vm1, %v3659_v17  ;;  %v3629_v0 = vadd.f32 %v5258_v19, %v6524_v52  ;;  %v5215_v37 = vpop.f32.mrb[8].mxu0  ;;  %3760 = vrot.lane.b32.xlu0 %v3659_v17, %s5557_s12 }
 0x1da   : > { %v3662_v33 = vmax.f32 %v3630_v21, 0.0  ;;  %v5259_v12 = vadd.f32 %v5215_v37, %v4965_v43  ;;  %v3465_v16 = vpop.f32.mrb[9].mxu0 }
 0x1db   : > { %v3661_v20 = vmax.f32 %v3629_v0, 0.0  ;;  %v5260_v22 = vadd.f32 %v3465_v16, %v1532_v44 }
 0x1dc   : > { %3695 = vst.msk [vmem:[%s6531_s20 + $0x68] sm:$0xff] %vm3687_vm1, %v3662_v33  ;;  %v3632_v3 = vadd.f32 %v5259_v12, %v6524_v52  ;;  %3762 = vrot.lane.b32.xlu1 %v3660_v11, %s5557_s12 }
 0x1dd   : > { %3694 = vst.msk [vmem:[%s6531_s20 + $0x60] sm:$0xff] %vm3687_vm1, %v3661_v20  ;;  %v3631_v61 = vadd.f32 %v5260_v22, %v6524_v52  ;;  %v5218_v14 = vpop.f32.mrb[10].mxu0  ;;  %3764 = vrot.lane.b32.xlu0 %v3661_v20, %s5557_s12 }
 0x1de   : > { %v3664_v18 = vmax.f32 %v3632_v3, 0.0  ;;  %v5261_v23 = vadd.f32 %v5218_v14, %v6509_v45  ;;  %v3475_v26 = vpop.f32.mrb[11].mxu0 }
 0x1df   : > { %v3663_v27 = vmax.f32 %v3631_v61, 0.0  ;;  %v5262_v29 = vadd.f32 %v3475_v26, %v6511_v46 }
 0x1e0   : > { %3697 = vst.msk [vmem:[%s6531_s20 + $0x88] sm:$0xff] %vm3687_vm1, %v3664_v18  ;;  %v3634_v30 = vadd.f32 %v5261_v23, %v6524_v52  ;;  %3766 = vrot.lane.b32.xlu1 %v3662_v33, %s5557_s12 }
 0x1e1   : > { %3696 = vst.msk [vmem:[%s6531_s20 + $0x80] sm:$0xff] %vm3687_vm1, %v3663_v27  ;;  %v3633_v31 = vadd.f32 %v5262_v29, %v6524_v52  ;;  %v5221_v32 = vpop.f32.mrb[12].mxu0  ;;  %3768 = vrot.lane.b32.xlu0 %v3663_v27, %s5557_s12 }
 0x1e2   : > { %v3666_v34 = vmax.f32 %v3634_v30, 0.0  ;;  %v5263_v35 = vadd.f32 %v5221_v32, %v6513_v47  ;;  %v3485_v36 = vpop.f32.mrb[13].mxu0 }
 0x1e3   : > { %v3665_v38 = vmax.f32 %v3633_v31, 0.0  ;;  %v5264_v39 = vadd.f32 %v3485_v36, %v6515_v48 }
 0x1e4   : > { %3699 = vst.msk [vmem:[%s6531_s20 + $0xa8] sm:$0xff] %vm3687_vm1, %v3666_v34  ;;  %v3636_v40 = vadd.f32 %v5263_v35, %v6524_v52  ;;  %3770 = vrot.lane.b32.xlu1 %v3664_v18, %s5557_s12 }
 0x1e5   : > { %3698 = vst.msk [vmem:[%s6531_s20 + $0xa0] sm:$0xff] %vm3687_vm1, %v3665_v38  ;;  %v3635_v41 = vadd.f32 %v5264_v39, %v6524_v52  ;;  %v5224_v42 = vpop.f32.mrb[14].mxu0  ;;  %3772 = vrot.lane.b32.xlu0 %v3665_v38, %s5557_s12 }
 0x1e6   : > { %v3668_v43 = vmax.f32 %v3636_v40, 0.0  ;;  %v5265_v44 = vadd.f32 %v5224_v42, %v6517_v49  ;;  %v3495_v45 = vpop.f32.mrb[15].mxu0 }
 0x1e7   : > { %v3667_v46 = vmax.f32 %v3635_v41, 0.0  ;;  %v5266_v47 = vadd.f32 %v3495_v45, %v6519_v50 }
 0x1e8   : > { %3701 = vst.msk [vmem:[%s6531_s20 + $0xc8] sm:$0xff] %vm3687_vm1, %v3668_v43  ;;  %v3638_v48 = vadd.f32 %v5265_v44, %v6524_v52  ;;  %3774 = vrot.lane.b32.xlu1 %v3666_v34, %s5557_s12 }
 0x1e9   : > { %3700 = vst.msk [vmem:[%s6531_s20 + $0xc0] sm:$0xff] %vm3687_vm1, %v3667_v46  ;;  %v3637_v51 = vadd.f32 %v5266_v47, %v6524_v52  ;;  %v5227_v53 = vpop.f32.mrb[16].mxu0  ;;  %3776 = vrot.lane.b32.xlu0 %v3667_v46, %s5557_s12  ;;  %v5027_v49 = vpop.f32.mrb[16].mxu1 }
 0x1ea   : > { %v3670_v54 = vmax.f32 %v3638_v48, 0.0  ;;  %v5267_v56 = vadd.f32 %v5227_v53, %v5027_v49  ;;  %v1958_v58 = vpop.f32.mrb[17].mxu1  ;;  %v3505_v59 = vpop.f32.mrb[17].mxu0 }
 0x1eb   : > { %v3669_v50 = vmax.f32 %v3637_v51, 0.0  ;;  %v5268_v60 = vadd.f32 %v3505_v59, %v1958_v58 }
 0x1ec   : > { %3703 = vst.msk [vmem:[%s6531_s20 + $0xe8] sm:$0xff] %vm3687_vm1, %v3670_v54  ;;  %v3640_v62 = vadd.f32 %v5267_v56, %v6524_v52  ;;  %3778 = vrot.lane.b32.xlu1 %v3668_v43, %s5557_s12 }
 0x1ed   : > { %3702 = vst.msk [vmem:[%s6531_s20 + $0xe0] sm:$0xff] %vm3687_vm1, %v3669_v50  ;;  %v3639_v63 = vadd.f32 %v5268_v60, %v6524_v52  ;;  %v5230_v1 = vpop.f32.mrb[18].mxu0  ;;  %3780 = vrot.lane.b32.xlu0 %v3669_v50, %s5557_s12  ;;  %v5030_v2 = vpop.f32.mrb[18].mxu1 }
 0x1ee   : > { %v3672_v4 = vmax.f32 %v3640_v62, 0.0  ;;  %v5269_v5 = vadd.f32 %v5230_v1, %v5030_v2  ;;  %v1968_v6 = vpop.f32.mrb[19].mxu1  ;;  %v3515_v7 = vpop.f32.mrb[19].mxu0 }
 0x1ef   : > { %v3671_v9 = vmax.f32 %v3639_v63, 0.0  ;;  %v5270_v10 = vadd.f32 %v3515_v7, %v1968_v6 }
 0x1f0   : > { %3705 = vst.msk [vmem:[%s6531_s20 + $0x108] sm:$0xff] %vm3687_vm1, %v3672_v4  ;;  %v3642_v55 = vadd.f32 %v5269_v5, %v6524_v52  ;;  %3782 = vrot.lane.b32.xlu1 %v3670_v54, %s5557_s12 }
 0x1f1   : > { %3704 = vst.msk [vmem:[%s6531_s20 + $0x100] sm:$0xff] %vm3687_vm1, %v3671_v9  ;;  %v3641_v57 = vadd.f32 %v5270_v10, %v6524_v52  ;;  %v5233_v28 = vpop.f32.mrb[20].mxu0  ;;  %3784 = vrot.lane.b32.xlu0 %v3671_v9, %s5557_s12  ;;  %v5033_v24 = vpop.f32.mrb[20].mxu1 }
 0x1f2   : > { %v3674_v25 = vmax.f32 %v3642_v55, 0.0  ;;  %v5271_v8 = vadd.f32 %v5233_v28, %v5033_v24  ;;  %v1978_v11 = vpop.f32.mrb[21].mxu1  ;;  %v3525_v13 = vpop.f32.mrb[21].mxu0 }
 0x1f3   : > { %v3673_v15 = vmax.f32 %v3641_v57, 0.0  ;;  %v5272_v17 = vadd.f32 %v3525_v13, %v1978_v11 }
 0x1f4   : > { %3707 = vst.msk [vmem:[%s6531_s20 + $0x128] sm:$0xff] %vm3687_vm1, %v3674_v25  ;;  %v3644_v19 = vadd.f32 %v5271_v8, %v6524_v52  ;;  %3786 = vrot.lane.b32.xlu1 %v3672_v4, %s5557_s12 }
 0x1f5   : > { %3706 = vst.msk [vmem:[%s6531_s20 + $0x120] sm:$0xff] %vm3687_vm1, %v3673_v15  ;;  %v3643_v21 = vadd.f32 %v5272_v17, %v6524_v52  ;;  %v5236_v0 = vpop.f32.mrb[22].mxu0  ;;  %3788 = vrot.lane.b32.xlu0 %v3673_v15, %s5557_s12  ;;  %v5036_v37 = vpop.f32.mrb[22].mxu1 }
 0x1f6   : > { %v3676_v33 = vmax.f32 %v3644_v19, 0.0  ;;  %v5273_v12 = vadd.f32 %v5236_v0, %v5036_v37  ;;  %v1988_v16 = vpop.f32.mrb[23].mxu1  ;;  %v3535_v20 = vpop.f32.mrb[23].mxu0 }
 0x1f7   : > { %v3675_v22 = vmax.f32 %v3643_v21, 0.0  ;;  %v5274_v3 = vadd.f32 %v3535_v20, %v1988_v16 }
 0x1f8   : > { %3709 = vst.msk [vmem:[%s6531_s20 + $0x148] sm:$0xff] %vm3687_vm1, %v3676_v33  ;;  %v3646_v61 = vadd.f32 %v5273_v12, %v6524_v52  ;;  %3790 = vrot.lane.b32.xlu1 %v3674_v25, %s5557_s12 }
 0x1f9   : > { %3708 = vst.msk [vmem:[%s6531_s20 + $0x140] sm:$0xff] %vm3687_vm1, %v3675_v22  ;;  %v3645_v14 = vadd.f32 %v5274_v3, %v6524_v52  ;;  %v5239_v18 = vpop.f32.mrb[24].mxu0  ;;  %3792 = vrot.lane.b32.xlu0 %v3675_v22, %s5557_s12  ;;  %v5039_v23 = vpop.f32.mrb[24].mxu1 }
 0x1fa   : > { %v3678_v26 = vmax.f32 %v3646_v61, 0.0  ;;  %v5275_v27 = vadd.f32 %v5239_v18, %v5039_v23  ;;  %v1998_v29 = vpop.f32.mrb[25].mxu1  ;;  %v3545_v30 = vpop.f32.mrb[25].mxu0 }
 0x1fb   : > { %v3677_v31 = vmax.f32 %v3645_v14, 0.0  ;;  %v5276_v32 = vadd.f32 %v3545_v30, %v1998_v29 }
 0x1fc   : > { %3711 = vst.msk [vmem:[%s6531_s20 + $0x168] sm:$0xff] %vm3687_vm1, %v3678_v26  ;;  %v3648_v34 = vadd.f32 %v5275_v27, %v6524_v52  ;;  %3794 = vrot.lane.b32.xlu1 %v3676_v33, %s5557_s12 }
 0x1fd   : > { %3710 = vst.msk [vmem:[%s6531_s20 + $0x160] sm:$0xff] %vm3687_vm1, %v3677_v31  ;;  %v3647_v35 = vadd.f32 %v5276_v32, %v6524_v52  ;;  %v5242_v36 = vpop.f32.mrb[26].mxu0  ;;  %3796 = vrot.lane.b32.xlu0 %v3677_v31, %s5557_s12  ;;  %v5042_v38 = vpop.f32.mrb[26].mxu1 }
 0x1fe   : > { %v3680_v39 = vmax.f32 %v3648_v34, 0.0  ;;  %v5277_v40 = vadd.f32 %v5242_v36, %v5042_v38  ;;  %v2008_v41 = vpop.f32.mrb[27].mxu1  ;;  %v3555_v42 = vpop.f32.mrb[27].mxu0 }
 0x1ff   : > { %v3679_v43 = vmax.f32 %v3647_v35, 0.0  ;;  %v5278_v44 = vadd.f32 %v3555_v42, %v2008_v41 }
 0x200   : > { %3713 = vst.msk [vmem:[%s6531_s20 + $0x188] sm:$0xff] %vm3687_vm1, %v3680_v39  ;;  %v3650_v45 = vadd.f32 %v5277_v40, %v6524_v52  ;;  %3798 = vrot.lane.b32.xlu1 %v3678_v26, %s5557_s12 }
 0x201   : > { %3712 = vst.msk [vmem:[%s6531_s20 + $0x180] sm:$0xff] %vm3687_vm1, %v3679_v43  ;;  %v3649_v46 = vadd.f32 %v5278_v44, %v6524_v52  ;;  %v5245_v47 = vpop.f32.mrb[28].mxu0  ;;  %3800 = vrot.lane.b32.xlu0 %v3679_v43, %s5557_s12  ;;  %v5045_v48 = vpop.f32.mrb[28].mxu1 }
 0x202   : > { %v3682_v51 = vmax.f32 %v3650_v45, 0.0  ;;  %v5279_v53 = vadd.f32 %v5245_v47, %v5045_v48  ;;  %v2018_v49 = vpop.f32.mrb[29].mxu1  ;;  %v3565_v54 = vpop.f32.mrb[29].mxu0 }
 0x203   : > { %v3681_v56 = vmax.f32 %v3649_v46, 0.0  ;;  %v5280_v58 = vadd.f32 %v3565_v54, %v2018_v49 }
 0x204   : > { %3715 = vst.msk [vmem:[%s6531_s20 + $0x1a8] sm:$0xff] %vm3687_vm1, %v3682_v51  ;;  %v3652_v59 = vadd.f32 %v5279_v53, %v6524_v52  ;;  %3802 = vrot.lane.b32.xlu1 %v3680_v39, %s5557_s12 }
 0x205   : > { %3714 = vst.msk [vmem:[%s6531_s20 + $0x1a0] sm:$0xff] %vm3687_vm1, %v3681_v56  ;;  %v3651_v50 = vadd.f32 %v5280_v58, %v6524_v52  ;;  %v5248_v60 = vpop.f32.mrb[30].mxu0  ;;  %3804 = vrot.lane.b32.xlu0 %v3681_v56, %s5557_s12  ;;  %v5048_v62 = vpop.f32.mrb[30].mxu1 }
 0x206   : > { %v3684_v63 = vmax.f32 %v3652_v59, 0.0  ;;  %v5281_v1 = vadd.f32 %v5248_v60, %v5048_v62  ;;  %v2028_v2 = vpop.f32.mrb[31].mxu1  ;;  %v3575_v4 = vpop.f32.mrb[31].mxu0 }
 0x207   : > { %v3683_v5 = vmax.f32 %v3651_v50, 0.0  ;;  %v5282_v6 = vadd.f32 %v3575_v4, %v2028_v2 }
 0x208   : > { %3717 = vst.msk [vmem:[%s6531_s20 + $0x1c8] sm:$0xff] %vm3687_vm1, %v3684_v63  ;;  %v3654_v7 = vadd.f32 %v5281_v1, %v6524_v52  ;;  %3806 = vrot.lane.b32.xlu1 %v3682_v51, %s5557_s12 }
 0x209   : > { %3716 = vst.msk [vmem:[%s6531_s20 + $0x1c0] sm:$0xff] %vm3687_vm1, %v3683_v5  ;;  %v3653_v9 = vadd.f32 %v5282_v6, %v6524_v52  ;;  %3808 = vrot.lane.b32.xlu0 %v3683_v5, %s5557_s12 }
 0x20a   : > { %v3686_v10 = vmax.f32 %v3654_v7, 0.0 }
 0x20b   : > { %v3685_v55 = vmax.f32 %v3653_v9, 0.0 }
 0x20c   : > { %3719 = vst.msk [vmem:[%s6531_s20 + $0x1e8] sm:$0xff] %vm3687_vm1, %v3686_v10  ;;  %3810 = vrot.lane.b32.xlu1 %v3684_v63, %s5557_s12 }
 0x20d   : > { %3718 = vst.msk [vmem:[%s6531_s20 + $0x1e0] sm:$0xff] %vm3687_vm1, %v3685_v55  ;;  %3812 = vrot.lane.b32.xlu0 %v3685_v55, %s5557_s12 }
 0x210   : > { %3814 = vrot.lane.b32.xlu1 %v3686_v10, %s5557_s12 }
 0x242   : > { %v3755_v52 = vpop.permute.xlu0 %3754 }
 0x243   : > { %4468 = vst.msk [vmem:[%s6531_s20 + $0x18] sm:$0xff] %vm3687_vm1, %v3755_v52 }
 0x246   : > { %v3753_v57 = vpop.permute.xlu0 %3752  ;;  %v3759_v28 = vpop.permute.xlu1 %3758 }
 0x247   : > { %4467 = vst.msk [vmem:[%s6531_s20 + $0x10] sm:$0xff] %vm3687_vm1, %v3753_v57  ;;  %4470 = vst.msk [vmem:[%s6531_s20 + $0x38] sm:$0xff] %vm3687_vm1, %v3759_v28 }
 0x24a   : > { %v3757_v24 = vpop.permute.xlu1 %3756 }
 0x24b   : > { %4469 = vst.msk [vmem:[%s6531_s20 + $0x30] sm:$0xff] %vm3687_vm1, %v3757_v24  ;;  %v3761_v25 = vpop.permute.xlu0 %3760 }
 0x24c   : > { %4471 = vst.msk [vmem:[%s6531_s20 + $0x50] sm:$0xff] %vm3687_vm1, %v3761_v25 }
 0x24e   : > { %v3763_v8 = vpop.permute.xlu1 %3762 }
 0x24f   : > { %4472 = vst.msk [vmem:[%s6531_s20 + $0x58] sm:$0xff] %vm3687_vm1, %v3763_v8  ;;  %v3765_v11 = vpop.permute.xlu0 %3764 }
 0x250   : > { %4473 = vst.msk [vmem:[%s6531_s20 + $0x70] sm:$0xff] %vm3687_vm1, %v3765_v11 }
 0x252   : > { %v3767_v13 = vpop.permute.xlu1 %3766 }
 0x253   : > { %4474 = vst.msk [vmem:[%s6531_s20 + $0x78] sm:$0xff] %vm3687_vm1, %v3767_v13  ;;  %v3769_v15 = vpop.permute.xlu0 %3768 }
 0x254   : > { %4475 = vst.msk [vmem:[%s6531_s20 + $0x90] sm:$0xff] %vm3687_vm1, %v3769_v15 }
 0x256   : > { %v3771_v17 = vpop.permute.xlu1 %3770 }
 0x257   : > { %4476 = vst.msk [vmem:[%s6531_s20 + $0x98] sm:$0xff] %vm3687_vm1, %v3771_v17  ;;  %v3773_v19 = vpop.permute.xlu0 %3772 }
 0x258   : > { %4477 = vst.msk [vmem:[%s6531_s20 + $0xb0] sm:$0xff] %vm3687_vm1, %v3773_v19 }
 0x25a   : > { %v3775_v21 = vpop.permute.xlu1 %3774 }
 0x25b   : > { %4478 = vst.msk [vmem:[%s6531_s20 + $0xb8] sm:$0xff] %vm3687_vm1, %v3775_v21  ;;  %v3777_v0 = vpop.permute.xlu0 %3776 }
 0x25c   : > { %4479 = vst.msk [vmem:[%s6531_s20 + $0xd0] sm:$0xff] %vm3687_vm1, %v3777_v0 }
 0x25e   : > { %v3779_v37 = vpop.permute.xlu1 %3778 }
 0x25f   : > { %4480 = vst.msk [vmem:[%s6531_s20 + $0xd8] sm:$0xff] %vm3687_vm1, %v3779_v37  ;;  %v3781_v33 = vpop.permute.xlu0 %3780 }
 0x260   : > { %4481 = vst.msk [vmem:[%s6531_s20 + $0xf0] sm:$0xff] %vm3687_vm1, %v3781_v33 }
 0x262   : > { %v3783_v12 = vpop.permute.xlu1 %3782 }
 0x263   : > { %4482 = vst.msk [vmem:[%s6531_s20 + $0xf8] sm:$0xff] %vm3687_vm1, %v3783_v12  ;;  %v3785_v16 = vpop.permute.xlu0 %3784 }
 0x264   : > { %4483 = vst.msk [vmem:[%s6531_s20 + $0x110] sm:$0xff] %vm3687_vm1, %v3785_v16 }
 0x266   : > { %v3787_v20 = vpop.permute.xlu1 %3786 }
 0x267   : > { %4484 = vst.msk [vmem:[%s6531_s20 + $0x118] sm:$0xff] %vm3687_vm1, %v3787_v20  ;;  %v3789_v22 = vpop.permute.xlu0 %3788 }
 0x268   : > { %4485 = vst.msk [vmem:[%s6531_s20 + $0x130] sm:$0xff] %vm3687_vm1, %v3789_v22 }
 0x26a   : > { %v3791_v3 = vpop.permute.xlu1 %3790 }
 0x26b   : > { %4486 = vst.msk [vmem:[%s6531_s20 + $0x138] sm:$0xff] %vm3687_vm1, %v3791_v3  ;;  %v3793_v61 = vpop.permute.xlu0 %3792 }
 0x26c   : > { %4487 = vst.msk [vmem:[%s6531_s20 + $0x150] sm:$0xff] %vm3687_vm1, %v3793_v61 }
 0x26e   : > { %v3795_v14 = vpop.permute.xlu1 %3794 }
 0x26f   : > { %4488 = vst.msk [vmem:[%s6531_s20 + $0x158] sm:$0xff] %vm3687_vm1, %v3795_v14  ;;  %v3797_v18 = vpop.permute.xlu0 %3796 }
 0x270   : > { %4489 = vst.msk [vmem:[%s6531_s20 + $0x170] sm:$0xff] %vm3687_vm1, %v3797_v18 }
 0x272   : > { %v3799_v23 = vpop.permute.xlu1 %3798 }
 0x273   : > { %4490 = vst.msk [vmem:[%s6531_s20 + $0x178] sm:$0xff] %vm3687_vm1, %v3799_v23  ;;  %v3801_v26 = vpop.permute.xlu0 %3800 }
 0x274   : > { %4491 = vst.msk [vmem:[%s6531_s20 + $0x190] sm:$0xff] %vm3687_vm1, %v3801_v26 }
 0x276   : > { %v3803_v27 = vpop.permute.xlu1 %3802 }
 0x277   : > { %4492 = vst.msk [vmem:[%s6531_s20 + $0x198] sm:$0xff] %vm3687_vm1, %v3803_v27  ;;  %v3805_v29 = vpop.permute.xlu0 %3804 }
 0x278   : > { %4493 = vst.msk [vmem:[%s6531_s20 + $0x1b0] sm:$0xff] %vm3687_vm1, %v3805_v29 }
 0x27a   : > { %v3807_v30 = vpop.permute.xlu1 %3806 }
 0x27b   : > { %4494 = vst.msk [vmem:[%s6531_s20 + $0x1b8] sm:$0xff] %vm3687_vm1, %v3807_v30  ;;  %v3809_v31 = vpop.permute.xlu0 %3808 }
 0x27c   : > { %4495 = vst.msk [vmem:[%s6531_s20 + $0x1d0] sm:$0xff] %vm3687_vm1, %v3809_v31 }
 0x27e   : > { %v3811_v32 = vpop.permute.xlu1 %3810 }
 0x27f   : > { %4496 = vst.msk [vmem:[%s6531_s20 + $0x1d8] sm:$0xff] %vm3687_vm1, %v3811_v32  ;;  %v3813_v34 = vpop.permute.xlu0 %3812 }
 0x280   : > { %4497 = vst.msk [vmem:[%s6531_s20 + $0x1f0] sm:$0xff] %vm3687_vm1, %v3813_v34 }
 0x282   : > { %v3815_v35 = vpop.permute.xlu1 %3814 }
 0x283   : > { %4498 = vst.msk [vmem:[%s6531_s20 + $0x1f8] sm:$0xff] %vm3687_vm1, %v3815_v35 }
 0x284 PF: > { %s13_s14 = sadd.s32 1, %s5555_s14   ;;  %s6852_s12 = smov %s5551_s13 }
 0x285   : > { %p10_p5 = scmp.ge.s32.totalorder %s13_s14, 4   ;;  %s6853_s13 = smov %s6855_s15 }
 0x287   :  { %12 = sbr.rel (!%p10_p5) target bundleno = 2 (0x2), region = 66 }

// kernel: hyper_synthesis_ex_pallas.5
= control target key start
LH: loop header
LB: loop body
LE: loop exit
PB: predicated region body
PF: predicated region fallthrough
CT: control target
= control target key end

     0   :  { %s18489_s12 = smov 0   ;;  %s18491_s13 = smov 0   ;;  %s21840_s0 = inlined_call_operand.vmem [shape: f32[2,34,34,12], index: 0, kind: input, shape index: {}]   ;;  %s21841_s1 = inlined_call_operand.vmem [shape: f32[108,16], index: 1, kind: input, shape index: {}]   ;;  %s21842_s2 = inlined_call_operand.vmem [shape: f32[1,16], index: 2, kind: input, shape index: {}]   ;;  %s21843_s3 = inlined_call_operand.vmem [shape: f32[2,32,32,16], index: 3, kind: output, shape index: {}]  }
   0x1   :  { %s18493_s14 = smov 0  }
   0x2 LB: > { %s25_s15 = sadd.s32 1, %s18462_s13  ;;  %p12466_p0 = scmp.ge.s32.totalorder %s18466_s14, 1  ;;  %s18466_s14 = sphi %s18493_s14, %s13_s14   ;;  %s18462_s13 = sphi %s18491_s13, %s21878_s13   ;;  %s18458_s12 = sphi %s18489_s12, %s21877_s12  }
   0x3   : > { %p27_p1 = scmp.ge.s32.totalorder %s25_s15, 2  ;;  %p151_p2 = scmp.lt.s32.totalorder %s18466_s14, 3 }
   0x5   : > { %s21880_s15 = smov (%p27_p1, %s25_s15), 0  ;;  %p152_p3 = pnand %p12466_p0, %p151_p2 }
   0x7   : > { %155 = sbr.rel (%p152_p3) target bundleno = 1388 (0x56c), region = 32 }
   0xe   : > { %v457_v0 = vld [vmem:[%s21841_s1 + $0xc] sm:$0xff]  ;;  %v458_v1 = vld [vmem:[%s21841_s1 + $0x14] sm:$0xf]  ;;  %vm844_vm0 = vcmask 1043456   ;;  %vm18468_vm1 = vmmov 1   ;;  %p180_p4 = scmp.lt.s32.totalorder %s18458_s12, 1 }
   0xf   : > { %v5476_v2 = vld [vmem:[%s21841_s1 + $0x30] sm:$0xff]  ;;  %v17337_v3 = vpack.c.bf16 %v458_v1, %v457_v0  ;;  %vm18516_vm2 = vmpackc.low %vm844_vm0, %vm18468_vm1  ;;  %v5477_v5 = vld [vmem:[%s21841_s1 + $0x38] sm:$0xf]  ;;  %vm459_vm3 = vcmask 97280   ;;  %vm12236_vm4 = vcmask 130048  }
  0x10   : > { %v327_v6 = vld [vmem:[%s21841_s1] sm:$0xff]  ;;  %v18526_v7 = vpack.c.bf16 %v5477_v5, %v5476_v2  ;;  %v328_v8 = vld [vmem:[%s21841_s1 + $0x8] sm:$0xf]  ;;  %s21882_s12 = smov (!%p180_p4, %s18458_s12), 1  ;;  %v8180_v14 = vld [vmem:[%s21841_s1 + $0x50] sm:$0xf] }
  0x11   : > { %v6826_v9 = vld [vmem:[%s21841_s1 + $0x3c] sm:$0xff]  ;;  %v6827_v10 = vld [vmem:[%s21841_s1 + $0x44] sm:$0xf]  ;;  %17339 = vmatprep.subr.msk.bf16.mxu1 %vm18516_vm2, %v17337_v3  ;;  %v17343_v11 = vpack.c.bf16 %v328_v8, %v327_v6  ;;  %s18417_s5 = smul.u32 1360, %s21882_s12  ;;  %v8179_v13 = vld [vmem:[%s21841_s1 + $0x48] sm:$0xff]  ;;  %s14402_s6 = sshll.u32 %s21882_s12, 10 }
  0x12   : > { %21849 = vst [vmem:[#allocation2_spill] sm:$0xff] %v18526_v7  ;;  %v17367_v12 = vpack.c.bf16 %v6827_v10, %v6826_v9  ;;  %17363 = vmatprep.subr.msk.bf16.mxu0 %vm18516_vm2, %v18526_v7  ;;  %17342 = vmatpush3.bf16.msk.msra.mxu1 %vm18516_vm2, %v17337_v3  ;;  %v18573_v21 = vpack.c.bf16 %v8180_v14, %v8179_v13  ;;  %s21299_s12 = scalar_lea.vmem %s21843_s3, %s14402_s6 }
  0x13   : > { %17366 = vmatpush3.bf16.msk.msra.mxu0 %vm18516_vm2, %v18526_v7  ;;  %17345 = vmatprep.subr.msk.bf16.mxu1 %vm18516_vm2, %v17343_v11  ;;  %s18557_s8 = scalar_lea.vmem %s21840_s0, %s18417_s5 }
  0x14   : > { %17369 = vmatprep.subr.msk.bf16.mxu0 %vm18516_vm2, %v17367_v12  ;;  %v329_v15 = vld [vmem:[%s18557_s8 + $0x1] sm:$0xff]  ;;  %v13114_v16 = vld [vmem:[%s18557_s8 + $0x29] sm:$0xff]  ;;  %v13115_v18 = vld [vmem:[%s18557_s8 + $0x31] sm:$0xff] }
  0x15   : > { %v330_v17 = vld [vmem:[%s18557_s8 + $0x9] sm:$0xff]  ;;  %15577 = vmatprep.mubr.msk.f32.mxu1 %vm459_vm3, %v329_v15  ;;  %16361 = vmatprep.mubr.msk.f32.mxu0 %vm459_vm3, %v13114_v16  ;;  %v331_v19 = vld [vmem:[%s18557_s8 + $0x11] sm:$0xff]  ;;  %v13116_v20 = vld [vmem:[%s18557_s8 + $0x39] sm:$0xff] }
  0x16   : > { %15578 = vmatmul.mubr.msk.f32.vlgmr.msra.gmra.mrb[0].mxu1 %vm459_vm3, %v330_v17  ;;  %16362 = vmatmul.mubr.msk.f32.vlgmr.msra.gmra.mrb[0].mxu0 %vm459_vm3, %v13115_v18  ;;  %v332_v22 = vld [vmem:[%s18557_s8 + $0x19] sm:$0xff]  ;;  %v13117_v23 = vld [vmem:[%s18557_s8 + $0x41] sm:$0xff]  ;;  %v13118_v24 = vld [vmem:[%s18557_s8 + $0x51] sm:$0xff] }
  0x17   : > { %17348 = vmatpush3.bf16.msk.msra.mxu1 %vm18516_vm2, %v17343_v11  ;;  %17372 = vmatpush3.bf16.msk.msra.mxu0 %vm18516_vm2, %v17367_v12  ;;  %v13119_v25 = vld [vmem:[%s18557_s8 + $0x59] sm:$0xff]  ;;  %v13120_v26 = vld [vmem:[%s18557_s8 + $0x61] sm:$0xff]  ;;  %v13121_v27 = vld [vmem:[%s18557_s8 + $0x69] sm:$0xff] }
  0x18   : > { %15580 = vmatprep.mubr.msk.f32.mxu1 %vm459_vm3, %v331_v19  ;;  %16364 = vmatprep.mubr.msk.f32.mxu0 %vm459_vm3, %v13116_v20  ;;  %v13122_v28 = vld [vmem:[%s18557_s8 + $0x79] sm:$0xff]  ;;  %v13123_v29 = vld [vmem:[%s18557_s8 + $0x81] sm:$0xff]  ;;  %v13124_v30 = vld [vmem:[%s18557_s8 + $0x89] sm:$0xff] }
  0x19   : > { %17375 = vmatprep.subr.msk.bf16.mxu0 %vm18516_vm2, %v18573_v21  ;;  %v13125_v31 = vld [vmem:[%s18557_s8 + $0x91] sm:$0xff]  ;;  %v13126_v32 = vld [vmem:[%s18557_s8 + $0xa1] sm:$0xff]  ;;  %v13127_v33 = vld [vmem:[%s18557_s8 + $0xa9] sm:$0xff] }
  0x1a   : > { %15581 = vmatmul.mubr.msk.f32.gmra.mrb[2].mxu1 %vm459_vm3, %v332_v22  ;;  %16365 = vmatmul.mubr.msk.f32.gmra.mrb[2].mxu0 %vm459_vm3, %v13117_v23  ;;  %v13128_v34 = vld [vmem:[%s18557_s8 + $0xb1] sm:$0xff]  ;;  %v13129_v35 = vld [vmem:[%s18557_s8 + $0xb9] sm:$0xff]  ;;  %v13130_v36 = vld [vmem:[%s18557_s8 + $0xc9] sm:$0xff] }
  0x1b   : > { %15583 = vmatprep.mubr.msk.f32.mxu1 %vm459_vm3, %v13114_v16  ;;  %16367 = vmatprep.mubr.msk.f32.mxu0 %vm459_vm3, %v13118_v24  ;;  %v13131_v37 = vld [vmem:[%s18557_s8 + $0xd1] sm:$0xff]  ;;  %v13132_v38 = vld [vmem:[%s18557_s8 + $0xd9] sm:$0xff]  ;;  %v13133_v39 = vld [vmem:[%s18557_s8 + $0xe1] sm:$0xff] }
  0x1c   : > { %v13134_v40 = vld [vmem:[%s18557_s8 + $0xf1] sm:$0xff]  ;;  %v13135_v41 = vld [vmem:[%s18557_s8 + $0xf9] sm:$0xff]  ;;  %v13136_v42 = vld [vmem:[%s18557_s8 + $0x101] sm:$0xff] }
  0x1d   : > { %v13137_v43 = vld [vmem:[%s18557_s8 + $0x109] sm:$0xff]  ;;  %v13138_v44 = vld [vmem:[%s18557_s8 + $0x119] sm:$0xff]  ;;  %v13139_v45 = vld [vmem:[%s18557_s8 + $0x121] sm:$0xff] }
  0x1e   : > { %15584 = vmatmul.mubr.msk.f32.gmra.mrb[4].mxu1 %vm459_vm3, %v13115_v18  ;;  %16368 = vmatmul.mubr.msk.f32.gmra.mrb[4].mxu0 %vm459_vm3, %v13119_v25  ;;  %v13140_v46 = vld [vmem:[%s18557_s8 + $0x129] sm:$0xff]  ;;  %v13141_v47 = vld [vmem:[%s18557_s8 + $0x131] sm:$0xff]  ;;  %v13142_v48 = vld [vmem:[%s18557_s8 + $0x141] sm:$0xff] }
  0x1f   : > { %15586 = vmatprep.mubr.msk.f32.mxu1 %vm459_vm3, %v13116_v20  ;;  %16370 = vmatprep.mubr.msk.f32.mxu0 %vm459_vm3, %v13120_v26  ;;  %v13143_v49 = vld [vmem:[%s18557_s8 + $0x149] sm:$0xff]  ;;  %v13144_v50 = vld [vmem:[%s18557_s8 + $0x151] sm:$0xff]  ;;  %v13145_v51 = vld [vmem:[%s18557_s8 + $0x159] sm:$0xff] }
  0x20   : > { %v13146_v52 = vld [vmem:[%s18557_s8 + $0x169] sm:$0xff]  ;;  %v13147_v53 = vld [vmem:[%s18557_s8 + $0x171] sm:$0xff]  ;;  %v13148_v54 = vld [vmem:[%s18557_s8 + $0x179] sm:$0xff] }
  0x21   : > { %v13149_v55 = vld [vmem:[%s18557_s8 + $0x181] sm:$0xff]  ;;  %v13150_v56 = vld [vmem:[%s18557_s8 + $0x191] sm:$0xff]  ;;  %v13151_v57 = vld [vmem:[%s18557_s8 + $0x199] sm:$0xff] }
  0x22   : > { %15587 = vmatmul.mubr.msk.f32.gmra.mrb[6].mxu1 %vm459_vm3, %v13117_v23  ;;  %16371 = vmatmul.mubr.msk.f32.gmra.mrb[6].mxu0 %vm459_vm3, %v13121_v27  ;;  %v13152_v58 = vld [vmem:[%s18557_s8 + $0x1a1] sm:$0xff]  ;;  %v13153_v59 = vld [vmem:[%s18557_s8 + $0x1a9] sm:$0xff]  ;;  %v13154_v60 = vld [vmem:[%s18557_s8 + $0x1b9] sm:$0xff] }
  0x23   : > { %15589 = vmatprep.mubr.msk.f32.mxu1 %vm459_vm3, %v13118_v24  ;;  %16373 = vmatprep.mubr.msk.f32.mxu0 %vm459_vm3, %v13122_v28  ;;  %v13155_v61 = vld [vmem:[%s18557_s8 + $0x1c1] sm:$0xff]  ;;  %v13156_v62 = vld [vmem:[%s18557_s8 + $0x1c9] sm:$0xff]  ;;  %v13157_v63 = vld [vmem:[%s18557_s8 + $0x1d1] sm:$0xff] }
  0x24   : > { %v13158_v0 = vld [vmem:[%s18557_s8 + $0x1e1] sm:$0xff]  ;;  %v13159_v1 = vld [vmem:[%s18557_s8 + $0x1e9] sm:$0xff]  ;;  %v13160_v2 = vld [vmem:[%s18557_s8 + $0x1f1] sm:$0xff] }
  0x25   : > { %v13161_v3 = vld [vmem:[%s18557_s8 + $0x1f9] sm:$0xff]  ;;  %v13162_v5 = vld [vmem:[%s18557_s8 + $0x209] sm:$0xff]  ;;  %v13163_v6 = vld [vmem:[%s18557_s8 + $0x211] sm:$0xff] }
  0x26   : > { %15590 = vmatmul.mubr.msk.f32.gmra.mrb[8].mxu1 %vm459_vm3, %v13119_v25  ;;  %16374 = vmatmul.mubr.msk.f32.gmra.mrb[8].mxu0 %vm459_vm3, %v13123_v29  ;;  %v13164_v8 = vld [vmem:[%s18557_s8 + $0x219] sm:$0xff]  ;;  %v13165_v9 = vld [vmem:[%s18557_s8 + $0x221] sm:$0xff]  ;;  %v13166_v10 = vld [vmem:[%s18557_s8 + $0x231] sm:$0xff] }
  0x27   : > { %15592 = vmatprep.mubr.msk.f32.mxu1 %vm459_vm3, %v13120_v26  ;;  %16376 = vmatprep.mubr.msk.f32.mxu0 %vm459_vm3, %v13124_v30  ;;  %v13167_v11 = vld [vmem:[%s18557_s8 + $0x239] sm:$0xff]  ;;  %v13168_v12 = vld [vmem:[%s18557_s8 + $0x241] sm:$0xff]  ;;  %v13169_v13 = vld [vmem:[%s18557_s8 + $0x249] sm:$0xff] }
  0x28   : > { %v13170_v14 = vld [vmem:[%s18557_s8 + $0x259] sm:$0xff]  ;;  %v13171_v15 = vld [vmem:[%s18557_s8 + $0x261] sm:$0xff]  ;;  %v13172_v16 = vld [vmem:[%s18557_s8 + $0x269] sm:$0xff] }
  0x29   : > { %v13173_v17 = vld [vmem:[%s18557_s8 + $0x271] sm:$0xff]  ;;  %v13174_v18 = vld [vmem:[%s18557_s8 + $0x281] sm:$0xff]  ;;  %v13175_v19 = vld [vmem:[%s18557_s8 + $0x289] sm:$0xff] }
  0x2a   : > { %15593 = vmatmul.mubr.msk.f32.gmra.mrb[10].mxu1 %vm459_vm3, %v13121_v27  ;;  %16377 = vmatmul.mubr.msk.f32.gmra.mrb[10].mxu0 %vm459_vm3, %v13125_v31  ;;  %v13176_v20 = vld [vmem:[%s18557_s8 + $0x291] sm:$0xff]  ;;  %v13177_v22 = vld [vmem:[%s18557_s8 + $0x299] sm:$0xff] }
  0x2b   : > { %15595 = vmatprep.mubr.msk.f32.mxu1 %vm459_vm3, %v13122_v28  ;;  %16379 = vmatprep.mubr.msk.f32.mxu0 %vm459_vm3, %v13126_v32  ;;  %v13371_v23 = vld [vmem:[%s18557_s8 + $0x2a] sm:$0xff]  ;;  %v13372_v24 = vld [vmem:[%s18557_s8 + $0x32] sm:$0xff]  ;;  %v2774_v26 = vld [vmem:[%s21841_s1 + $0x20] sm:$0xf] }
  0x2c   : > { %v2773_v25 = vld [vmem:[%s21841_s1 + $0x18] sm:$0xff]  ;;  %v19491_v7 = vld [vmem:[%s18557_s8 + $0x290] sm:$0xff] }
  0x2d   : > { %v18780_v27 = vpack.c.bf16 %v2774_v26, %v2773_v25  ;;  %v13373_v28 = vld [vmem:[%s18557_s8 + $0x3a] sm:$0xff]  ;;  %v13403_v25 = vld [vmem:[%s18557_s8 + $0x16a] sm:$0xff] }
  0x2e   : > { %15596 = vmatmul.mubr.msk.f32.gmra.mrb[12].mxu1 %vm459_vm3, %v13123_v29  ;;  %16380 = vmatmul.mubr.msk.f32.gmra.mrb[12].mxu0 %vm459_vm3, %v13127_v33  ;;  %v13374_v29 = vld [vmem:[%s18557_s8 + $0x42] sm:$0xff]  ;;  %v12862_v4 = vld [vmem:[%s18557_s8 + $0x58] sm:$0xff] }
  0x2f   : > { %15598 = vmatprep.mubr.msk.f32.mxu1 %vm459_vm3, %v13124_v30  ;;  %16382 = vmatprep.mubr.msk.f32.mxu0 %vm459_vm3, %v13128_v34  ;;  %v397_v30 = vld [vmem:[%s18557_s8 + $0x2a9] sm:$0xff] }
  0x30   : > { %17351 = vmatprep.subr.msk.bf16.mxu1 %vm18516_vm2, %v18780_v27  ;;  %v426_v26 = vld [vmem:[%s18557_s8 + $0x3c9] sm:$0xff] }
  0x32   : > { %15599 = vmatmul.mubr.msk.f32.gmra.mrb[14].mxu1 %vm459_vm3, %v13125_v31  ;;  %16383 = vmatmul.mubr.msk.f32.gmra.mrb[14].mxu0 %vm459_vm3, %v13129_v35  ;;  %v13375_v31 = vld [vmem:[%s18557_s8 + $0x52] sm:$0xff] }
  0x33   : > { %15601 = vmatprep.mubr.msk.f32.mxu1 %vm459_vm3, %v13126_v32  ;;  %16385 = vmatprep.mubr.msk.f32.mxu0 %vm459_vm3, %v13130_v36  ;;  %v13376_v32 = vld [vmem:[%s18557_s8 + $0x5a] sm:$0xff] }
  0x36   : > { %15602 = vmatmul.mubr.msk.f32.gmra.mrb[16].mxu1 %vm459_vm3, %v13127_v33  ;;  %16386 = vmatmul.mubr.msk.f32.gmra.mrb[16].mxu0 %vm459_vm3, %v13131_v37  ;;  %v399_v33 = vld [vmem:[%s18557_s8 + $0x2b9] sm:$0xff] }
  0x37   : > { %15604 = vmatprep.mubr.msk.f32.mxu1 %vm459_vm3, %v13128_v34  ;;  %16388 = vmatprep.mubr.msk.f32.mxu0 %vm459_vm3, %v13132_v38  ;;  %v13377_v34 = vld [vmem:[%s18557_s8 + $0x62] sm:$0xff] }
  0x3a   : > { %15605 = vmatmul.mubr.msk.f32.gmra.mrb[18].mxu1 %vm459_vm3, %v13129_v35  ;;  %16389 = vmatmul.mubr.msk.f32.gmra.mrb[18].mxu0 %vm459_vm3, %v13133_v39  ;;  %v400_v35 = vld [vmem:[%s18557_s8 + $0x2c1] sm:$0xff] }
  0x3b   : > { %15607 = vmatprep.mubr.msk.f32.mxu1 %vm459_vm3, %v13130_v36  ;;  %16391 = vmatprep.mubr.msk.f32.mxu0 %vm459_vm3, %v13134_v40  ;;  %v13378_v36 = vld [vmem:[%s18557_s8 + $0x6a] sm:$0xff] }
  0x3e   : > { %15608 = vmatmul.mubr.msk.f32.gmra.mrb[20].mxu1 %vm459_vm3, %v13131_v37  ;;  %16392 = vmatmul.mubr.msk.f32.gmra.mrb[20].mxu0 %vm459_vm3, %v13135_v41  ;;  %v401_v37 = vld [vmem:[%s18557_s8 + $0x2d1] sm:$0xff] }
  0x3f   : > { %15610 = vmatprep.mubr.msk.f32.mxu1 %vm459_vm3, %v13132_v38  ;;  %16394 = vmatprep.mubr.msk.f32.mxu0 %vm459_vm3, %v13136_v42  ;;  %v13379_v38 = vld [vmem:[%s18557_s8 + $0x7a] sm:$0xff] }
  0x42   : > { %15611 = vmatmul.mubr.msk.f32.gmra.mrb[22].mxu1 %vm459_vm3, %v13133_v39  ;;  %16395 = vmatmul.mubr.msk.f32.gmra.mrb[22].mxu0 %vm459_vm3, %v13137_v43  ;;  %v402_v39 = vld [vmem:[%s18557_s8 + $0x2d9] sm:$0xff] }
  0x43   : > { %15613 = vmatprep.mubr.msk.f32.mxu1 %vm459_vm3, %v13134_v40  ;;  %16397 = vmatprep.mubr.msk.f32.mxu0 %vm459_vm3, %v13138_v44  ;;  %v13380_v40 = vld [vmem:[%s18557_s8 + $0x82] sm:$0xff] }
  0x46   : > { %15614 = vmatmul.mubr.msk.f32.gmra.mrb[24].mxu1 %vm459_vm3, %v13135_v41  ;;  %16398 = vmatmul.mubr.msk.f32.gmra.mrb[24].mxu0 %vm459_vm3, %v13139_v45  ;;  %v403_v41 = vld [vmem:[%s18557_s8 + $0x2e1] sm:$0xff] }
  0x47   : > { %15616 = vmatprep.mubr.msk.f32.mxu1 %vm459_vm3, %v13136_v42  ;;  %16400 = vmatprep.mubr.msk.f32.mxu0 %vm459_vm3, %v13140_v46  ;;  %v13381_v42 = vld [vmem:[%s18557_s8 + $0x8a] sm:$0xff] }
  0x4a   : > { %15617 = vmatmul.mubr.msk.f32.gmra.mrb[26].mxu1 %vm459_vm3, %v13137_v43  ;;  %16401 = vmatmul.mubr.msk.f32.gmra.mrb[26].mxu0 %vm459_vm3, %v13141_v47  ;;  %v404_v43 = vld [vmem:[%s18557_s8 + $0x2e9] sm:$0xff] }
  0x4b   : > { %15619 = vmatprep.mubr.msk.f32.mxu1 %vm459_vm3, %v13138_v44  ;;  %16403 = vmatprep.mubr.msk.f32.mxu0 %vm459_vm3, %v13142_v48  ;;  %v13382_v44 = vld [vmem:[%s18557_s8 + $0x92] sm:$0xff] }
  0x4e   : > { %15620 = vmatmul.mubr.msk.f32.gmra.mrb[28].mxu1 %vm459_vm3, %v13139_v45  ;;  %16404 = vmatmul.mubr.msk.f32.gmra.mrb[28].mxu0 %vm459_vm3, %v13143_v49  ;;  %v405_v45 = vld [vmem:[%s18557_s8 + $0x2f9] sm:$0xff] }
  0x4f   : > { %15622 = vmatprep.mubr.msk.f32.mxu1 %vm459_vm3, %v13140_v46  ;;  %16406 = vmatprep.mubr.msk.f32.mxu0 %vm459_vm3, %v13144_v50  ;;  %v13383_v46 = vld [vmem:[%s18557_s8 + $0xa2] sm:$0xff] }
  0x52   : > { %15623 = vmatmul.mubr.msk.f32.gmra.mrb[30].mxu1 %vm459_vm3, %v13141_v47  ;;  %16407 = vmatmul.mubr.msk.f32.gmra.mrb[30].mxu0 %vm459_vm3, %v13145_v51  ;;  %v406_v47 = vld [vmem:[%s18557_s8 + $0x301] sm:$0xff] }
  0x53   : > { %15625 = vmatprep.mubr.msk.f32.mxu1 %vm459_vm3, %v13142_v48  ;;  %16409 = vmatprep.mubr.msk.f32.mxu0 %vm459_vm3, %v13146_v52  ;;  %v13384_v48 = vld [vmem:[%s18557_s8 + $0xaa] sm:$0xff] }
  0x56   : > { %15626 = vmatmul.mubr.msk.f32.gmra.mrb[32].mxu1 %vm459_vm3, %v13143_v49  ;;  %16410 = vmatmul.mubr.msk.f32.gmra.mrb[32].mxu0 %vm459_vm3, %v13147_v53  ;;  %v407_v49 = vld [vmem:[%s18557_s8 + $0x309] sm:$0xff] }
  0x57   : > { %15628 = vmatprep.mubr.msk.f32.mxu1 %vm459_vm3, %v13144_v50  ;;  %16412 = vmatprep.mubr.msk.f32.mxu0 %vm459_vm3, %v13148_v54  ;;  %v13385_v50 = vld [vmem:[%s18557_s8 + $0xb2] sm:$0xff] }
  0x5a   : > { %15629 = vmatmul.mubr.msk.f32.gmra.mrb[34].mxu1 %vm459_vm3, %v13145_v51  ;;  %16413 = vmatmul.mubr.msk.f32.gmra.mrb[34].mxu0 %vm459_vm3, %v13149_v55  ;;  %v408_v51 = vld [vmem:[%s18557_s8 + $0x311] sm:$0xff] }
  0x5b   : > { %15631 = vmatprep.mubr.msk.f32.mxu1 %vm459_vm3, %v13146_v52  ;;  %16415 = vmatprep.mubr.msk.f32.mxu0 %vm459_vm3, %v13150_v56  ;;  %v13386_v52 = vld [vmem:[%s18557_s8 + $0xba] sm:$0xff] }
  0x5e   : > { %15632 = vmatmul.mubr.msk.f32.gmra.mrb[36].mxu1 %vm459_vm3, %v13147_v53  ;;  %16416 = vmatmul.mubr.msk.f32.gmra.mrb[36].mxu0 %vm459_vm3, %v13151_v57  ;;  %v409_v53 = vld [vmem:[%s18557_s8 + $0x321] sm:$0xff] }
  0x5f   : > { %15634 = vmatprep.mubr.msk.f32.mxu1 %vm459_vm3, %v13148_v54  ;;  %16418 = vmatprep.mubr.msk.f32.mxu0 %vm459_vm3, %v13152_v58  ;;  %v13387_v54 = vld [vmem:[%s18557_s8 + $0xca] sm:$0xff] }
  0x62   : > { %15635 = vmatmul.mubr.msk.f32.gmra.mrb[38].mxu1 %vm459_vm3, %v13149_v55  ;;  %16419 = vmatmul.mubr.msk.f32.gmra.mrb[38].mxu0 %vm459_vm3, %v13153_v59  ;;  %v410_v55 = vld [vmem:[%s18557_s8 + $0x329] sm:$0xff] }
  0x63   : > { %15637 = vmatprep.mubr.msk.f32.mxu1 %vm459_vm3, %v13150_v56  ;;  %16421 = vmatprep.mubr.msk.f32.mxu0 %vm459_vm3, %v13154_v60  ;;  %v13388_v56 = vld [vmem:[%s18557_s8 + $0xd2] sm:$0xff] }
  0x66   : > { %15638 = vmatmul.mubr.msk.f32.gmra.mrb[40].mxu1 %vm459_vm3, %v13151_v57  ;;  %16422 = vmatmul.mubr.msk.f32.gmra.mrb[40].mxu0 %vm459_vm3, %v13155_v61  ;;  %v411_v57 = vld [vmem:[%s18557_s8 + $0x331] sm:$0xff] }
  0x67   : > { %15640 = vmatprep.mubr.msk.f32.mxu1 %vm459_vm3, %v13152_v58  ;;  %16424 = vmatprep.mubr.msk.f32.mxu0 %vm459_vm3, %v13156_v62  ;;  %v13389_v58 = vld [vmem:[%s18557_s8 + $0xda] sm:$0xff] }
  0x6a   : > { %15641 = vmatmul.mubr.msk.f32.gmra.mrb[42].mxu1 %vm459_vm3, %v13153_v59  ;;  %16425 = vmatmul.mubr.msk.f32.gmra.mrb[42].mxu0 %vm459_vm3, %v13157_v63  ;;  %v412_v59 = vld [vmem:[%s18557_s8 + $0x339] sm:$0xff] }
  0x6b   : > { %15643 = vmatprep.mubr.msk.f32.mxu1 %vm459_vm3, %v13154_v60  ;;  %16427 = vmatprep.mubr.msk.f32.mxu0 %vm459_vm3, %v13158_v0  ;;  %v13390_v60 = vld [vmem:[%s18557_s8 + $0xe2] sm:$0xff] }
  0x6e   : > { %15644 = vmatmul.mubr.msk.f32.gmra.mrb[44].mxu1 %vm459_vm3, %v13155_v61  ;;  %16428 = vmatmul.mubr.msk.f32.gmra.mrb[44].mxu0 %vm459_vm3, %v13159_v1  ;;  %v413_v61 = vld [vmem:[%s18557_s8 + $0x349] sm:$0xff] }
  0x6f   : > { %15646 = vmatprep.mubr.msk.f32.mxu1 %vm459_vm3, %v13156_v62  ;;  %16430 = vmatprep.mubr.msk.f32.mxu0 %vm459_vm3, %v13160_v2  ;;  %v13391_v62 = vld [vmem:[%s18557_s8 + $0xf2] sm:$0xff] }
  0x72   : > { %15647 = vmatmul.mubr.msk.f32.gmra.mrb[46].mxu1 %vm459_vm3, %v13157_v63  ;;  %16431 = vmatmul.mubr.msk.f32.gmra.mrb[46].mxu0 %vm459_vm3, %v13161_v3  ;;  %v414_v63 = vld [vmem:[%s18557_s8 + $0x351] sm:$0xff] }
  0x73   : > { %15649 = vmatprep.mubr.msk.f32.mxu1 %vm459_vm3, %v13158_v0  ;;  %16433 = vmatprep.mubr.msk.f32.mxu0 %vm459_vm3, %v13162_v5  ;;  %v13392_v0 = vld [vmem:[%s18557_s8 + $0xfa] sm:$0xff] }
  0x76   : > { %15650 = vmatmul.mubr.msk.f32.gmra.mrb[48].mxu1 %vm459_vm3, %v13159_v1  ;;  %16434 = vmatmul.mubr.msk.f32.gmra.mrb[48].mxu0 %vm459_vm3, %v13163_v6  ;;  %v415_v1 = vld [vmem:[%s18557_s8 + $0x359] sm:$0xff] }
  0x77   : > { %15652 = vmatprep.mubr.msk.f32.mxu1 %vm459_vm3, %v13160_v2  ;;  %16436 = vmatprep.mubr.msk.f32.mxu0 %vm459_vm3, %v13164_v8  ;;  %v13393_v2 = vld [vmem:[%s18557_s8 + $0x102] sm:$0xff] }
  0x7a   : > { %15653 = vmatmul.mubr.msk.f32.gmra.mrb[50].mxu1 %vm459_vm3, %v13161_v3  ;;  %16437 = vmatmul.mubr.msk.f32.gmra.mrb[50].mxu0 %vm459_vm3, %v13165_v9  ;;  %v416_v3 = vld [vmem:[%s18557_s8 + $0x361] sm:$0xff] }
  0x7b   : > { %15655 = vmatprep.mubr.msk.f32.mxu1 %vm459_vm3, %v13162_v5  ;;  %16439 = vmatprep.mubr.msk.f32.mxu0 %vm459_vm3, %v13166_v10  ;;  %v13394_v5 = vld [vmem:[%s18557_s8 + $0x10a] sm:$0xff] }
  0x7e   : > { %15656 = vmatmul.mubr.msk.f32.gmra.mrb[52].mxu1 %vm459_vm3, %v13163_v6  ;;  %16440 = vmatmul.mubr.msk.f32.gmra.mrb[52].mxu0 %vm459_vm3, %v13167_v11  ;;  %v417_v6 = vld [vmem:[%s18557_s8 + $0x371] sm:$0xff] }
  0x7f   : > { %15658 = vmatprep.mubr.msk.f32.mxu1 %vm459_vm3, %v13164_v8  ;;  %16442 = vmatprep.mubr.msk.f32.mxu0 %vm459_vm3, %v13168_v12  ;;  %v13395_v8 = vld [vmem:[%s18557_s8 + $0x11a] sm:$0xff] }
  0x82   : > { %15659 = vmatmul.mubr.msk.f32.gmra.mrb[54].mxu1 %vm459_vm3, %v13165_v9  ;;  %16443 = vmatmul.mubr.msk.f32.gmra.mrb[54].mxu0 %vm459_vm3, %v13169_v13  ;;  %v418_v9 = vld [vmem:[%s18557_s8 + $0x379] sm:$0xff] }
  0x83   : > { %15661 = vmatprep.mubr.msk.f32.mxu1 %vm459_vm3, %v13166_v10  ;;  %16445 = vmatprep.mubr.msk.f32.mxu0 %vm459_vm3, %v13170_v14  ;;  %v13396_v10 = vld [vmem:[%s18557_s8 + $0x122] sm:$0xff] }
  0x86   : > { %15662 = vmatmul.mubr.msk.f32.gmra.mrb[56].mxu1 %vm459_vm3, %v13167_v11  ;;  %16446 = vmatmul.mubr.msk.f32.gmra.mrb[56].mxu0 %vm459_vm3, %v13171_v15  ;;  %v419_v11 = vld [vmem:[%s18557_s8 + $0x381] sm:$0xff] }
  0x87   : > { %15664 = vmatprep.mubr.msk.f32.mxu1 %vm459_vm3, %v13168_v12  ;;  %16448 = vmatprep.mubr.msk.f32.mxu0 %vm459_vm3, %v13172_v16  ;;  %v13397_v12 = vld [vmem:[%s18557_s8 + $0x12a] sm:$0xff] }
  0x8a   : > { %15665 = vmatmul.mubr.msk.f32.gmra.mrb[58].mxu1 %vm459_vm3, %v13169_v13  ;;  %16449 = vmatmul.mubr.msk.f32.gmra.mrb[58].mxu0 %vm459_vm3, %v13173_v17  ;;  %v420_v13 = vld [vmem:[%s18557_s8 + $0x389] sm:$0xff] }
  0x8b   : > { %15667 = vmatprep.mubr.msk.f32.mxu1 %vm459_vm3, %v13170_v14  ;;  %16451 = vmatprep.mubr.msk.f32.mxu0 %vm459_vm3, %v13174_v18  ;;  %v13398_v14 = vld [vmem:[%s18557_s8 + $0x132] sm:$0xff] }
  0x8e   : > { %15668 = vmatmul.mubr.msk.f32.gmra.mrb[60].mxu1 %vm459_vm3, %v13171_v15  ;;  %16452 = vmatmul.mubr.msk.f32.gmra.mrb[60].mxu0 %vm459_vm3, %v13175_v19  ;;  %v421_v15 = vld [vmem:[%s18557_s8 + $0x399] sm:$0xff] }
  0x8f   : > { %15670 = vmatprep.mubr.msk.f32.mxu1 %vm459_vm3, %v13172_v16  ;;  %16454 = vmatprep.mubr.msk.f32.mxu0 %vm459_vm3, %v13176_v20  ;;  %v13399_v16 = vld [vmem:[%s18557_s8 + $0x142] sm:$0xff] }
  0x92   : > { %15671 = vmatmul.mubr.msk.f32.gmra.mrb[62].mxu1 %vm459_vm3, %v13173_v17  ;;  %16455 = vmatmul.mubr.msk.f32.gmra.mrb[62].mxu0 %vm459_vm3, %v13177_v22  ;;  %v422_v17 = vld [vmem:[%s18557_s8 + $0x3a1] sm:$0xff] }
  0x93   : > { %15673 = vmatprep.mubr.msk.f32.mxu1 %vm459_vm3, %v13174_v18  ;;  %16557 = vmatprep.mubr.msk.f32.mxu0 %vm459_vm3, %v13371_v23  ;;  %v13400_v18 = vld [vmem:[%s18557_s8 + $0x14a] sm:$0xff]  ;;  %v13402_v23 = vld [vmem:[%s18557_s8 + $0x15a] sm:$0xff] }
  0x96   : > { %15674 = vmatmul.mubr.msk.f32.gmra.mrb[64].mxu1 %vm459_vm3, %v13175_v19  ;;  %16558 = vmatmul.mubr.msk.f32.vlgmr.msra.gmra.mrb[0].mxu0 %vm459_vm3, %v13372_v24  ;;  %v423_v19 = vld [vmem:[%s18557_s8 + $0x3a9] sm:$0xff]  ;;  %v425_v24 = vld [vmem:[%s18557_s8 + $0x3c1] sm:$0xff] }
  0x97   : > { %17378 = vmatpush3.bf16.msk.msra.mxu0 %vm18516_vm2, %v18573_v21  ;;  %15676 = vmatprep.mubr.msk.f32.mxu1 %vm459_vm3, %v13176_v20  ;;  %v398_v21 = vld [vmem:[%s18557_s8 + $0x2b1] sm:$0xff] }
  0x98   : > { %16560 = vmatprep.mubr.msk.f32.mxu0 %vm459_vm3, %v13373_v28  ;;  %v13401_v20 = vld [vmem:[%s18557_s8 + $0x152] sm:$0xff] }
  0x99   : > { %v13404_v28 = vld [vmem:[%s18557_s8 + $0x172] sm:$0xff] }
  0x9a   : > { %15677 = vmatmul.mubr.msk.f32.gmra.mrb[66].mxu1 %vm459_vm3, %v13177_v22  ;;  %16561 = vmatmul.mubr.msk.f32.gmra.mrb[2].mxu0 %vm459_vm3, %v13374_v29  ;;  %v424_v22 = vld [vmem:[%s18557_s8 + $0x3b1] sm:$0xff] }
  0x9b   : > { %15679 = vmatprep.mubr.msk.f32.mxu1 %vm459_vm3, %v397_v30  ;;  %16563 = vmatprep.mubr.msk.f32.mxu0 %vm459_vm3, %v13375_v31  ;;  %v427_v29 = vld [vmem:[%s18557_s8 + $0x3d1] sm:$0xff]  ;;  %v13405_v30 = vld [vmem:[%s18557_s8 + $0x17a] sm:$0xff] }
  0x9c   : > { %v428_v31 = vld [vmem:[%s18557_s8 + $0x3d9] sm:$0xff] }
  0x9e   : > { %15680 = vmatmul.mubr.msk.f32.gmra.mrb[68].mxu1 %vm459_vm3, %v398_v21  ;;  %16564 = vmatmul.mubr.msk.f32.gmra.mrb[4].mxu0 %vm459_vm3, %v13376_v32  ;;  %v13406_v21 = vld [vmem:[%s18557_s8 + $0x182] sm:$0xff] }
  0x9f   : > { %15682 = vmatprep.mubr.msk.f32.mxu1 %vm459_vm3, %v399_v33  ;;  %16566 = vmatprep.mubr.msk.f32.mxu0 %vm459_vm3, %v13377_v34  ;;  %v429_v32 = vld [vmem:[%s18557_s8 + $0x3e9] sm:$0xff]  ;;  %v13407_v33 = vld [vmem:[%s18557_s8 + $0x192] sm:$0xff] }
  0xa0   : > { %v430_v34 = vld [vmem:[%s18557_s8 + $0x3f1] sm:$0xff] }
  0xa2   : > { %15683 = vmatmul.mubr.msk.f32.gmra.mrb[70].mxu1 %vm459_vm3, %v400_v35  ;;  %16567 = vmatmul.mubr.msk.f32.gmra.mrb[6].mxu0 %vm459_vm3, %v13378_v36  ;;  %v13408_v35 = vld [vmem:[%s18557_s8 + $0x19a] sm:$0xff] }
  0xa3   : > { %15685 = vmatprep.mubr.msk.f32.mxu1 %vm459_vm3, %v401_v37  ;;  %16569 = vmatprep.mubr.msk.f32.mxu0 %vm459_vm3, %v13379_v38  ;;  %v431_v36 = vld [vmem:[%s18557_s8 + $0x3f9] sm:$0xff]  ;;  %v13409_v37 = vld [vmem:[%s18557_s8 + $0x1a2] sm:$0xff] }
  0xa4   : > { %v432_v38 = vld [vmem:[%s18557_s8 + $0x401] sm:$0xff] }
  0xa6   : > { %15686 = vmatmul.mubr.msk.f32.gmra.mrb[72].mxu1 %vm459_vm3, %v402_v39  ;;  %16570 = vmatmul.mubr.msk.f32.gmra.mrb[8].mxu0 %vm459_vm3, %v13380_v40  ;;  %v13410_v39 = vld [vmem:[%s18557_s8 + $0x1aa] sm:$0xff] }
  0xa7   : > { %15688 = vmatprep.mubr.msk.f32.mxu1 %vm459_vm3, %v403_v41  ;;  %16572 = vmatprep.mubr.msk.f32.mxu0 %vm459_vm3, %v13381_v42  ;;  %v433_v40 = vld [vmem:[%s18557_s8 + $0x411] sm:$0xff]  ;;  %v13411_v41 = vld [vmem:[%s18557_s8 + $0x1ba] sm:$0xff] }
  0xa8   : > { %v434_v42 = vld [vmem:[%s18557_s8 + $0x419] sm:$0xff] }
  0xaa   : > { %15689 = vmatmul.mubr.msk.f32.gmra.mrb[74].mxu1 %vm459_vm3, %v404_v43  ;;  %16573 = vmatmul.mubr.msk.f32.gmra.mrb[10].mxu0 %vm459_vm3, %v13382_v44  ;;  %v13412_v43 = vld [vmem:[%s18557_s8 + $0x1c2] sm:$0xff] }
  0xab   : > { %15691 = vmatprep.mubr.msk.f32.mxu1 %vm459_vm3, %v405_v45  ;;  %16575 = vmatprep.mubr.msk.f32.mxu0 %vm459_vm3, %v13383_v46  ;;  %v435_v44 = vld [vmem:[%s18557_s8 + $0x421] sm:$0xff]  ;;  %v13413_v45 = vld [vmem:[%s18557_s8 + $0x1ca] sm:$0xff] }
  0xac   : > { %v436_v46 = vld [vmem:[%s18557_s8 + $0x429] sm:$0xff] }
  0xae   : > { %15692 = vmatmul.mubr.msk.f32.gmra.mrb[76].mxu1 %vm459_vm3, %v406_v47  ;;  %16576 = vmatmul.mubr.msk.f32.gmra.mrb[12].mxu0 %vm459_vm3, %v13384_v48  ;;  %v13414_v47 = vld [vmem:[%s18557_s8 + $0x1d2] sm:$0xff] }
  0xaf   : > { %15694 = vmatprep.mubr.msk.f32.mxu1 %vm459_vm3, %v407_v49  ;;  %16578 = vmatprep.mubr.msk.f32.mxu0 %vm459_vm3, %v13385_v50  ;;  %v437_v48 = vld [vmem:[%s18557_s8 + $0x439] sm:$0xff]  ;;  %v13415_v49 = vld [vmem:[%s18557_s8 + $0x1e2] sm:$0xff] }
  0xb0   : > { %v438_v50 = vld [vmem:[%s18557_s8 + $0x441] sm:$0xff] }
  0xb2   : > { %15695 = vmatmul.mubr.msk.f32.gmra.mrb[78].mxu1 %vm459_vm3, %v408_v51  ;;  %16579 = vmatmul.mubr.msk.f32.gmra.mrb[14].mxu0 %vm459_vm3, %v13386_v52  ;;  %v13416_v51 = vld [vmem:[%s18557_s8 + $0x1ea] sm:$0xff] }
  0xb3   : > { %15697 = vmatprep.mubr.msk.f32.mxu1 %vm459_vm3, %v409_v53  ;;  %16581 = vmatprep.mubr.msk.f32.mxu0 %vm459_vm3, %v13387_v54  ;;  %v439_v52 = vld [vmem:[%s18557_s8 + $0x449] sm:$0xff]  ;;  %v13417_v53 = vld [vmem:[%s18557_s8 + $0x1f2] sm:$0xff] }
  0xb4   : > { %v440_v54 = vld [vmem:[%s18557_s8 + $0x451] sm:$0xff] }
  0xb6   : > { %15698 = vmatmul.mubr.msk.f32.gmra.mrb[80].mxu1 %vm459_vm3, %v410_v55  ;;  %16582 = vmatmul.mubr.msk.f32.gmra.mrb[16].mxu0 %vm459_vm3, %v13388_v56  ;;  %v13418_v55 = vld [vmem:[%s18557_s8 + $0x1fa] sm:$0xff] }
  0xb7   : > { %15700 = vmatprep.mubr.msk.f32.mxu1 %vm459_vm3, %v411_v57  ;;  %16584 = vmatprep.mubr.msk.f32.mxu0 %vm459_vm3, %v13389_v58  ;;  %v441_v56 = vld [vmem:[%s18557_s8 + $0x461] sm:$0xff]  ;;  %v13419_v57 = vld [vmem:[%s18557_s8 + $0x20a] sm:$0xff] }
  0xb8   : > { %v442_v58 = vld [vmem:[%s18557_s8 + $0x469] sm:$0xff] }
  0xba   : > { %15701 = vmatmul.mubr.msk.f32.gmra.mrb[82].mxu1 %vm459_vm3, %v412_v59  ;;  %16585 = vmatmul.mubr.msk.f32.gmra.mrb[18].mxu0 %vm459_vm3, %v13390_v60  ;;  %v13420_v59 = vld [vmem:[%s18557_s8 + $0x212] sm:$0xff] }
  0xbb   : > { %15703 = vmatprep.mubr.msk.f32.mxu1 %vm459_vm3, %v413_v61  ;;  %16587 = vmatprep.mubr.msk.f32.mxu0 %vm459_vm3, %v13391_v62  ;;  %v443_v60 = vld [vmem:[%s18557_s8 + $0x471] sm:$0xff]  ;;  %v13421_v61 = vld [vmem:[%s18557_s8 + $0x21a] sm:$0xff] }
  0xbc   : > { %v444_v62 = vld [vmem:[%s18557_s8 + $0x479] sm:$0xff] }
  0xbe   : > { %15704 = vmatmul.mubr.msk.f32.gmra.mrb[84].mxu1 %vm459_vm3, %v414_v63  ;;  %16588 = vmatmul.mubr.msk.f32.gmra.mrb[20].mxu0 %vm459_vm3, %v13392_v0  ;;  %v13422_v63 = vld [vmem:[%s18557_s8 + $0x222] sm:$0xff] }
  0xbf   : > { %15706 = vmatprep.mubr.msk.f32.mxu1 %vm459_vm3, %v415_v1  ;;  %16590 = vmatprep.mubr.msk.f32.mxu0 %vm459_vm3, %v13393_v2  ;;  %v445_v0 = vld [vmem:[%s18557_s8 + $0x489] sm:$0xff]  ;;  %v13423_v1 = vld [vmem:[%s18557_s8 + $0x232] sm:$0xff] }
  0xc0   : > { %v446_v2 = vld [vmem:[%s18557_s8 + $0x491] sm:$0xff] }
  0xc2   : > { %15707 = vmatmul.mubr.msk.f32.gmra.mrb[86].mxu1 %vm459_vm3, %v416_v3  ;;  %16591 = vmatmul.mubr.msk.f32.gmra.mrb[22].mxu0 %vm459_vm3, %v13394_v5  ;;  %v13424_v3 = vld [vmem:[%s18557_s8 + $0x23a] sm:$0xff] }
  0xc3   : > { %15709 = vmatprep.mubr.msk.f32.mxu1 %vm459_vm3, %v417_v6  ;;  %16593 = vmatprep.mubr.msk.f32.mxu0 %vm459_vm3, %v13395_v8  ;;  %v447_v5 = vld [vmem:[%s18557_s8 + $0x499] sm:$0xff]  ;;  %v13425_v6 = vld [vmem:[%s18557_s8 + $0x242] sm:$0xff] }
  0xc4   : > { %v448_v8 = vld [vmem:[%s18557_s8 + $0x4a1] sm:$0xff] }
  0xc6   : > { %15710 = vmatmul.mubr.msk.f32.gmra.mrb[88].mxu1 %vm459_vm3, %v418_v9  ;;  %16594 = vmatmul.mubr.msk.f32.gmra.mrb[24].mxu0 %vm459_vm3, %v13396_v10  ;;  %v13426_v9 = vld [vmem:[%s18557_s8 + $0x24a] sm:$0xff] }
  0xc7   : > { %15712 = vmatprep.mubr.msk.f32.mxu1 %vm459_vm3, %v419_v11  ;;  %16596 = vmatprep.mubr.msk.f32.mxu0 %vm459_vm3, %v13397_v12  ;;  %v449_v10 = vld [vmem:[%s18557_s8 + $0x4b1] sm:$0xff]  ;;  %v13427_v11 = vld [vmem:[%s18557_s8 + $0x25a] sm:$0xff] }
  0xc8   : > { %v450_v12 = vld [vmem:[%s18557_s8 + $0x4b9] sm:$0xff] }
  0xca   : > { %15713 = vmatmul.mubr.msk.f32.gmra.mrb[90].mxu1 %vm459_vm3, %v420_v13  ;;  %16597 = vmatmul.mubr.msk.f32.gmra.mrb[26].mxu0 %vm459_vm3, %v13398_v14  ;;  %v13428_v13 = vld [vmem:[%s18557_s8 + $0x262] sm:$0xff] }
  0xcb   : > { %15715 = vmatprep.mubr.msk.f32.mxu1 %vm459_vm3, %v421_v15  ;;  %16599 = vmatprep.mubr.msk.f32.mxu0 %vm459_vm3, %v13399_v16  ;;  %v451_v14 = vld [vmem:[%s18557_s8 + $0x4c1] sm:$0xff]  ;;  %v13429_v15 = vld [vmem:[%s18557_s8 + $0x26a] sm:$0xff] }
  0xcc   : > { %v452_v16 = vld [vmem:[%s18557_s8 + $0x4c9] sm:$0xff] }
  0xce   : > { %15716 = vmatmul.mubr.msk.f32.gmra.mrb[92].mxu1 %vm459_vm3, %v422_v17  ;;  %16600 = vmatmul.mubr.msk.f32.gmra.mrb[28].mxu0 %vm459_vm3, %v13400_v18  ;;  %v13430_v17 = vld [vmem:[%s18557_s8 + $0x272] sm:$0xff] }
  0xcf   : > { %15718 = vmatprep.mubr.msk.f32.mxu1 %vm459_vm3, %v423_v19  ;;  %16602 = vmatprep.mubr.msk.f32.mxu0 %vm459_vm3, %v13401_v20  ;;  %v453_v18 = vld [vmem:[%s18557_s8 + $0x4d9] sm:$0xff]  ;;  %v13431_v19 = vld [vmem:[%s18557_s8 + $0x282] sm:$0xff] }
  0xd0   : > { %v454_v20 = vld [vmem:[%s18557_s8 + $0x4e1] sm:$0xff] }
  0xd2   : > { %15719 = vmatmul.mubr.msk.f32.gmra.mrb[94].mxu1 %vm459_vm3, %v424_v22  ;;  %16603 = vmatmul.mubr.msk.f32.gmra.mrb[30].mxu0 %vm459_vm3, %v13402_v23  ;;  %v13432_v22 = vld [vmem:[%s18557_s8 + $0x28a] sm:$0xff] }
  0xd3   : > { %15721 = vmatprep.mubr.msk.f32.mxu1 %vm459_vm3, %v425_v24  ;;  %16605 = vmatprep.mubr.msk.f32.mxu0 %vm459_vm3, %v13403_v25  ;;  %v455_v23 = vld [vmem:[%s18557_s8 + $0x4e9] sm:$0xff]  ;;  %v13433_v24 = vld [vmem:[%s18557_s8 + $0x292] sm:$0xff] }
  0xd4   : > { %v456_v25 = vld [vmem:[%s18557_s8 + $0x4f1] sm:$0xff] }
  0xd6   : > { %15722 = vmatmul.mubr.msk.f32.gmra.mrb[96].mxu1 %vm459_vm3, %v426_v26  ;;  %16606 = vmatmul.mubr.msk.f32.gmra.mrb[32].mxu0 %vm459_vm3, %v13404_v28  ;;  %v13434_v26 = vld [vmem:[%s18557_s8 + $0x29a] sm:$0xff] }
  0xd7   : > { %15724 = vmatprep.mubr.msk.f32.mxu1 %vm459_vm3, %v427_v29  ;;  %16608 = vmatprep.mubr.msk.f32.mxu0 %vm459_vm3, %v13405_v30  ;;  %v199_v28 = vld [vmem:[%s18557_s8] sm:$0xff]  ;;  %v13435_v29 = vld [vmem:[%s18557_s8 + $0x2aa] sm:$0xff] }
  0xd8   : > { %v200_v30 = vld [vmem:[%s18557_s8 + $0x8] sm:$0xff] }
  0xda   : > { %15725 = vmatmul.mubr.msk.f32.gmra.mrb[98].mxu1 %vm459_vm3, %v428_v31  ;;  %16609 = vmatmul.mubr.msk.f32.gmra.mrb[34].mxu0 %vm459_vm3, %v13406_v21  ;;  %v13436_v31 = vld [vmem:[%s18557_s8 + $0x2b2] sm:$0xff] }
  0xdb   : > { %15727 = vmatprep.mubr.msk.f32.mxu1 %vm459_vm3, %v429_v32  ;;  %16611 = vmatprep.mubr.msk.f32.mxu0 %vm459_vm3, %v13407_v33  ;;  %v9529_v21 = vld [vmem:[%s21841_s1 + $0x54] sm:$0xff]  ;;  %v9530_v32 = vld [vmem:[%s21841_s1 + $0x5c] sm:$0xf] }
  0xdc   : > { %v201_v33 = vld [vmem:[%s18557_s8 + $0x10] sm:$0xff] }
  0xde   : > { %15728 = vmatmul.mubr.msk.f32.gmra.mrb[100].mxu1 %vm459_vm3, %v430_v34  ;;  %16612 = vmatmul.mubr.msk.f32.gmra.mrb[36].mxu0 %vm459_vm3, %v13408_v35  ;;  %v19049_v34 = vpack.c.bf16 %v9530_v32, %v9529_v21  ;;  %v13437_v35 = vld [vmem:[%s18557_s8 + $0x2ba] sm:$0xff] }
  0xdf   : > { %15730 = vmatprep.mubr.msk.f32.mxu1 %vm459_vm3, %v431_v36  ;;  %16614 = vmatprep.mubr.msk.f32.mxu0 %vm459_vm3, %v13409_v37  ;;  %v202_v36 = vld [vmem:[%s18557_s8 + $0x18] sm:$0xff]  ;;  %v13438_v37 = vld [vmem:[%s18557_s8 + $0x2c2] sm:$0xff] }
  0xe0   : > { %17381 = vmatprep.subr.msk.bf16.mxu0 %vm18516_vm2, %v19049_v34  ;;  %v13466_v21 = vld [vmem:[%s18557_s8 + $0x3da] sm:$0xff] }
  0xe1   : > { %v19248_v32 = vld [vmem:[%s18557_s8 + $0x140] sm:$0xff] }
  0xe2   : > { %15731 = vmatmul.mubr.msk.f32.gmra.mrb[102].mxu1 %vm459_vm3, %v432_v38  ;;  %16615 = vmatmul.mubr.msk.f32.gmra.mrb[38].mxu0 %vm459_vm3, %v13410_v39  ;;  %v203_v38 = vld [vmem:[%s18557_s8 + $0x28] sm:$0xff]  ;;  %v13439_v39 = vld [vmem:[%s18557_s8 + $0x2d2] sm:$0xff] }
  0xe3   : > { %15733 = vmatprep.mubr.msk.f32.mxu1 %vm459_vm3, %v433_v40  ;;  %16617 = vmatprep.mubr.msk.f32.mxu0 %vm459_vm3, %v13411_v41  ;;  %v13440_v40 = vld [vmem:[%s18557_s8 + $0x2da] sm:$0xff] }
  0xe4   : > { %v205_v41 = vld [vmem:[%s18557_s8 + $0x38] sm:$0xff] }
  0xe6   : > { %15734 = vmatmul.mubr.msk.f32.gmra.mrb[104].mxu1 %vm459_vm3, %v434_v42  ;;  %16618 = vmatmul.mubr.msk.f32.gmra.mrb[40].mxu0 %vm459_vm3, %v13412_v43  ;;  %v13441_v42 = vld [vmem:[%s18557_s8 + $0x2e2] sm:$0xff] }
  0xe7   : > { %15736 = vmatprep.mubr.msk.f32.mxu1 %vm459_vm3, %v435_v44  ;;  %16620 = vmatprep.mubr.msk.f32.mxu0 %vm459_vm3, %v13413_v45  ;;  %v206_v43 = vld [vmem:[%s18557_s8 + $0x40] sm:$0xff]  ;;  %v13442_v44 = vld [vmem:[%s18557_s8 + $0x2ea] sm:$0xff] }
  0xe8   : > { %v19081_v45 = vld [vmem:[%s18557_s8 + $0x50] sm:$0xff] }
  0xea   : > { %15737 = vmatmul.mubr.msk.f32.gmra.mrb[106].mxu1 %vm459_vm3, %v436_v46  ;;  %16621 = vmatmul.mubr.msk.f32.gmra.mrb[42].mxu0 %vm459_vm3, %v13414_v47  ;;  %v13443_v46 = vld [vmem:[%s18557_s8 + $0x2fa] sm:$0xff] }
  0xeb   : > { %15739 = vmatprep.mubr.msk.f32.mxu1 %vm459_vm3, %v437_v48  ;;  %16623 = vmatprep.mubr.msk.f32.mxu0 %vm459_vm3, %v13415_v49  ;;  %v19090_v47 = vld [vmem:[%s18557_s8 + $0x58] sm:$0xff]  ;;  %v13444_v48 = vld [vmem:[%s18557_s8 + $0x302] sm:$0xff] }
  0xec   : > { %v19094_v49 = vld [vmem:[%s18557_s8 + $0x60] sm:$0xff] }
  0xee   : > { %15740 = vmatmul.mubr.msk.f32.gmra.mrb[108].mxu1 %vm459_vm3, %v438_v50  ;;  %16624 = vmatmul.mubr.msk.f32.gmra.mrb[44].mxu0 %vm459_vm3, %v13416_v51  ;;  %v13445_v50 = vld [vmem:[%s18557_s8 + $0x30a] sm:$0xff] }
  0xef   : > { %15742 = vmatprep.mubr.msk.f32.mxu1 %vm459_vm3, %v439_v52  ;;  %16626 = vmatprep.mubr.msk.f32.mxu0 %vm459_vm3, %v13417_v53  ;;  %v19104_v51 = vld [vmem:[%s18557_s8 + $0x68] sm:$0xff]  ;;  %v13446_v52 = vld [vmem:[%s18557_s8 + $0x312] sm:$0xff] }
  0xf0   : > { %v19108_v53 = vld [vmem:[%s18557_s8 + $0x78] sm:$0xff] }
  0xf2   : > { %15743 = vmatmul.mubr.msk.f32.gmra.mrb[110].mxu1 %vm459_vm3, %v440_v54  ;;  %16627 = vmatmul.mubr.msk.f32.gmra.mrb[46].mxu0 %vm459_vm3, %v13418_v55  ;;  %v13447_v54 = vld [vmem:[%s18557_s8 + $0x322] sm:$0xff] }
  0xf3   : > { %15745 = vmatprep.mubr.msk.f32.mxu1 %vm459_vm3, %v441_v56  ;;  %16629 = vmatprep.mubr.msk.f32.mxu0 %vm459_vm3, %v13419_v57  ;;  %v19118_v55 = vld [vmem:[%s18557_s8 + $0x80] sm:$0xff]  ;;  %v13448_v56 = vld [vmem:[%s18557_s8 + $0x32a] sm:$0xff] }
  0xf4   : > { %v19122_v57 = vld [vmem:[%s18557_s8 + $0x88] sm:$0xff] }
  0xf6   : > { %15746 = vmatmul.mubr.msk.f32.gmra.mrb[112].mxu1 %vm459_vm3, %v442_v58  ;;  %16630 = vmatmul.mubr.msk.f32.gmra.mrb[48].mxu0 %vm459_vm3, %v13420_v59  ;;  %v13449_v58 = vld [vmem:[%s18557_s8 + $0x332] sm:$0xff] }
  0xf7   : > { %15748 = vmatprep.mubr.msk.f32.mxu1 %vm459_vm3, %v443_v60  ;;  %16632 = vmatprep.mubr.msk.f32.mxu0 %vm459_vm3, %v13421_v61  ;;  %v19132_v59 = vld [vmem:[%s18557_s8 + $0x90] sm:$0xff]  ;;  %v13450_v60 = vld [vmem:[%s18557_s8 + $0x33a] sm:$0xff] }
  0xf8   : > { %v19136_v61 = vld [vmem:[%s18557_s8 + $0xa0] sm:$0xff] }
  0xfa   : > { %15749 = vmatmul.mubr.msk.f32.gmra.mrb[114].mxu1 %vm459_vm3, %v444_v62  ;;  %16633 = vmatmul.mubr.msk.f32.gmra.mrb[50].mxu0 %vm459_vm3, %v13422_v63  ;;  %v13451_v62 = vld [vmem:[%s18557_s8 + $0x34a] sm:$0xff] }
  0xfb   : > { %15751 = vmatprep.mubr.msk.f32.mxu1 %vm459_vm3, %v445_v0  ;;  %16635 = vmatprep.mubr.msk.f32.mxu0 %vm459_vm3, %v13423_v1  ;;  %v19146_v63 = vld [vmem:[%s18557_s8 + $0xa8] sm:$0xff]  ;;  %v13452_v0 = vld [vmem:[%s18557_s8 + $0x352] sm:$0xff] }
  0xfc   : > { %v19150_v1 = vld [vmem:[%s18557_s8 + $0xb0] sm:$0xff] }
  0xfe   : > { %15752 = vmatmul.mubr.msk.f32.gmra.mrb[116].mxu1 %vm459_vm3, %v446_v2  ;;  %16636 = vmatmul.mubr.msk.f32.gmra.mrb[52].mxu0 %vm459_vm3, %v13424_v3  ;;  %v13453_v2 = vld [vmem:[%s18557_s8 + $0x35a] sm:$0xff] }
  0xff   : > { %15754 = vmatprep.mubr.msk.f32.mxu1 %vm459_vm3, %v447_v5  ;;  %16638 = vmatprep.mubr.msk.f32.mxu0 %vm459_vm3, %v13425_v6  ;;  %v19160_v3 = vld [vmem:[%s18557_s8 + $0xb8] sm:$0xff]  ;;  %v13454_v5 = vld [vmem:[%s18557_s8 + $0x362] sm:$0xff] }
 0x100   : > { %v19164_v6 = vld [vmem:[%s18557_s8 + $0xc8] sm:$0xff] }
 0x102   : > { %15755 = vmatmul.mubr.msk.f32.gmra.mrb[118].mxu1 %vm459_vm3, %v448_v8  ;;  %16639 = vmatmul.mubr.msk.f32.gmra.mrb[54].mxu0 %vm459_vm3, %v13426_v9  ;;  %v13455_v8 = vld [vmem:[%s18557_s8 + $0x372] sm:$0xff] }
 0x103   : > { %15757 = vmatprep.mubr.msk.f32.mxu1 %vm459_vm3, %v449_v10  ;;  %16641 = vmatprep.mubr.msk.f32.mxu0 %vm459_vm3, %v13427_v11  ;;  %v19174_v9 = vld [vmem:[%s18557_s8 + $0xd0] sm:$0xff]  ;;  %v13456_v10 = vld [vmem:[%s18557_s8 + $0x37a] sm:$0xff] }
 0x104   : > { %v19178_v11 = vld [vmem:[%s18557_s8 + $0xd8] sm:$0xff] }
 0x106   : > { %15758 = vmatmul.mubr.msk.f32.gmra.mrb[120].mxu1 %vm459_vm3, %v450_v12  ;;  %16642 = vmatmul.mubr.msk.f32.gmra.mrb[56].mxu0 %vm459_vm3, %v13428_v13  ;;  %v13457_v12 = vld [vmem:[%s18557_s8 + $0x382] sm:$0xff] }
 0x107   : > { %15760 = vmatprep.mubr.msk.f32.mxu1 %vm459_vm3, %v451_v14  ;;  %16644 = vmatprep.mubr.msk.f32.mxu0 %vm459_vm3, %v13429_v15  ;;  %v19188_v13 = vld [vmem:[%s18557_s8 + $0xe0] sm:$0xff]  ;;  %v13458_v14 = vld [vmem:[%s18557_s8 + $0x38a] sm:$0xff] }
 0x108   : > { %v19192_v15 = vld [vmem:[%s18557_s8 + $0xf0] sm:$0xff] }
 0x10a   : > { %15761 = vmatmul.mubr.msk.f32.gmra.mrb[122].mxu1 %vm459_vm3, %v452_v16  ;;  %16645 = vmatmul.mubr.msk.f32.gmra.mrb[58].mxu0 %vm459_vm3, %v13430_v17  ;;  %v13459_v16 = vld [vmem:[%s18557_s8 + $0x39a] sm:$0xff] }
 0x10b   : > { %15763 = vmatprep.mubr.msk.f32.mxu1 %vm459_vm3, %v453_v18  ;;  %16647 = vmatprep.mubr.msk.f32.mxu0 %vm459_vm3, %v13431_v19  ;;  %v19202_v17 = vld [vmem:[%s18557_s8 + $0xf8] sm:$0xff]  ;;  %v13460_v18 = vld [vmem:[%s18557_s8 + $0x3a2] sm:$0xff] }
 0x10c   : > { %v19206_v19 = vld [vmem:[%s18557_s8 + $0x100] sm:$0xff] }
 0x10e   : > { %15764 = vmatmul.mubr.msk.f32.gmra.mrb[124].mxu1 %vm459_vm3, %v454_v20  ;;  %16648 = vmatmul.mubr.msk.f32.gmra.mrb[60].mxu0 %vm459_vm3, %v13432_v22  ;;  %v13461_v20 = vld [vmem:[%s18557_s8 + $0x3aa] sm:$0xff] }
 0x10f   : > { %15766 = vmatprep.mubr.msk.f32.mxu1 %vm459_vm3, %v455_v23  ;;  %16650 = vmatprep.mubr.msk.f32.mxu0 %vm459_vm3, %v13433_v24  ;;  %v19216_v22 = vld [vmem:[%s18557_s8 + $0x108] sm:$0xff]  ;;  %v13462_v23 = vld [vmem:[%s18557_s8 + $0x3b2] sm:$0xff] }
 0x110   : > { %v19220_v24 = vld [vmem:[%s18557_s8 + $0x118] sm:$0xff] }
 0x112   : > { %15767 = vmatmul.mubr.msk.f32.gmra.mrb[126].mxu1 %vm459_vm3, %v456_v25  ;;  %16651 = vmatmul.mubr.msk.f32.gmra.mrb[62].mxu0 %vm459_vm3, %v13434_v26  ;;  %v13463_v25 = vld [vmem:[%s18557_s8 + $0x3c2] sm:$0xff] }
 0x113   : > { %15773 = vmatprep.mubr.msk.f32.mxu1 %vm459_vm3, %v199_v28  ;;  %16653 = vmatprep.mubr.msk.f32.mxu0 %vm459_vm3, %v13435_v29  ;;  %v19230_v26 = vld [vmem:[%s18557_s8 + $0x120] sm:$0xff]  ;;  %v13464_v28 = vld [vmem:[%s18557_s8 + $0x3ca] sm:$0xff] }
 0x114   : > { %v19234_v29 = vld [vmem:[%s18557_s8 + $0x128] sm:$0xff] }
 0x116   : > { %15774 = vmatmul.mubr.msk.f32.vlgmr.msra.gmra.mrb[0].mxu1 %vm459_vm3, %v200_v30  ;;  %16654 = vmatmul.mubr.msk.f32.gmra.mrb[64].mxu0 %vm459_vm3, %v13436_v31  ;;  %v13465_v30 = vld [vmem:[%s18557_s8 + $0x3d2] sm:$0xff] }
 0x117   : > { %17354 = vmatpush3.bf16.msk.msra.mxu1 %vm18516_vm2, %v18780_v27  ;;  %15776 = vmatprep.mubr.msk.f32.mxu1 %vm459_vm3, %v201_v33  ;;  %v204_v27 = vld [vmem:[%s18557_s8 + $0x30] sm:$0xff] }
 0x118   : > { %16656 = vmatprep.mubr.msk.f32.mxu0 %vm459_vm3, %v13437_v35  ;;  %v19244_v31 = vld [vmem:[%s18557_s8 + $0x130] sm:$0xff]  ;;  %v19258_v35 = vld [vmem:[%s18557_s8 + $0x148] sm:$0xff] }
 0x119   : > { %v13467_v33 = vld [vmem:[%s18557_s8 + $0x3ea] sm:$0xff] }
 0x11a   : > { %15777 = vmatmul.mubr.msk.f32.gmra.mrb[2].mxu1 %vm459_vm3, %v202_v36  ;;  %16657 = vmatmul.mubr.msk.f32.gmra.mrb[66].mxu0 %vm459_vm3, %v13438_v37  ;;  %v13468_v36 = vld [vmem:[%s18557_s8 + $0x3f2] sm:$0xff] }
 0x11b   : > { %15779 = vmatprep.mubr.msk.f32.mxu1 %vm459_vm3, %v203_v38  ;;  %16659 = vmatprep.mubr.msk.f32.mxu0 %vm459_vm3, %v13439_v39  ;;  %v19262_v37 = vld [vmem:[%s18557_s8 + $0x150] sm:$0xff]  ;;  %v13469_v38 = vld [vmem:[%s18557_s8 + $0x3fa] sm:$0xff] }
 0x11c   : > { %v19272_v39 = vld [vmem:[%s18557_s8 + $0x158] sm:$0xff] }
 0x11e   : > { %15780 = vmatmul.mubr.msk.f32.gmra.mrb[4].mxu1 %vm459_vm3, %v204_v27  ;;  %16660 = vmatmul.mubr.msk.f32.gmra.mrb[68].mxu0 %vm459_vm3, %v13440_v40  ;;  %v13470_v27 = vld [vmem:[%s18557_s8 + $0x402] sm:$0xff] }
 0x11f   : > { %15782 = vmatprep.mubr.msk.f32.mxu1 %vm459_vm3, %v205_v41  ;;  %16662 = vmatprep.mubr.msk.f32.mxu0 %vm459_vm3, %v13441_v42  ;;  %v19276_v40 = vld [vmem:[%s18557_s8 + $0x168] sm:$0xff]  ;;  %v13471_v41 = vld [vmem:[%s18557_s8 + $0x412] sm:$0xff] }
 0x120   : > { %v19286_v42 = vld [vmem:[%s18557_s8 + $0x170] sm:$0xff] }
 0x122   : > { %15783 = vmatmul.mubr.msk.f32.gmra.mrb[6].mxu1 %vm459_vm3, %v206_v43  ;;  %16663 = vmatmul.mubr.msk.f32.gmra.mrb[70].mxu0 %vm459_vm3, %v13442_v44  ;;  %v13472_v43 = vld [vmem:[%s18557_s8 + $0x41a] sm:$0xff] }
 0x123   : > { %15785 = vmatprep.mubr.msk.f32.mxu1 %vm459_vm3, %v19081_v45  ;;  %16665 = vmatprep.mubr.msk.f32.mxu0 %vm459_vm3, %v13443_v46  ;;  %v19290_v44 = vld [vmem:[%s18557_s8 + $0x178] sm:$0xff]  ;;  %v13473_v46 = vld [vmem:[%s18557_s8 + $0x422] sm:$0xff] }
 0x126   : > { %15786 = vmatmul.mubr.msk.f32.gmra.mrb[8].mxu1 %vm459_vm3, %v19090_v47  ;;  %16666 = vmatmul.mubr.msk.f32.gmra.mrb[72].mxu0 %vm459_vm3, %v13444_v48  ;;  %v19300_v48 = vld [vmem:[%s18557_s8 + $0x180] sm:$0xff] }
 0x127   : > { %15788 = vmatprep.mubr.msk.f32.mxu1 %vm459_vm3, %v19094_v49  ;;  %16668 = vmatprep.mubr.msk.f32.mxu0 %vm459_vm3, %v13445_v50  ;;  %v13474_v50 = vld [vmem:[%s18557_s8 + $0x42a] sm:$0xff] }
 0x12a   : > { %15789 = vmatmul.mubr.msk.f32.gmra.mrb[10].mxu1 %vm459_vm3, %v19104_v51  ;;  %16669 = vmatmul.mubr.msk.f32.gmra.mrb[74].mxu0 %vm459_vm3, %v13446_v52  ;;  %v19304_v52 = vld [vmem:[%s18557_s8 + $0x190] sm:$0xff] }
 0x12b   : > { %15791 = vmatprep.mubr.msk.f32.mxu1 %vm459_vm3, %v19108_v53  ;;  %16671 = vmatprep.mubr.msk.f32.mxu0 %vm459_vm3, %v13447_v54  ;;  %v13475_v54 = vld [vmem:[%s18557_s8 + $0x43a] sm:$0xff] }
 0x12e   : > { %15792 = vmatmul.mubr.msk.f32.gmra.mrb[12].mxu1 %vm459_vm3, %v19118_v55  ;;  %16672 = vmatmul.mubr.msk.f32.gmra.mrb[76].mxu0 %vm459_vm3, %v13448_v56  ;;  %v19314_v56 = vld [vmem:[%s18557_s8 + $0x198] sm:$0xff] }
 0x12f   : > { %15794 = vmatprep.mubr.msk.f32.mxu1 %vm459_vm3, %v19122_v57  ;;  %16674 = vmatprep.mubr.msk.f32.mxu0 %vm459_vm3, %v13449_v58  ;;  %v13476_v58 = vld [vmem:[%s18557_s8 + $0x442] sm:$0xff] }
 0x132   : > { %15795 = vmatmul.mubr.msk.f32.gmra.mrb[14].mxu1 %vm459_vm3, %v19132_v59  ;;  %16675 = vmatmul.mubr.msk.f32.gmra.mrb[78].mxu0 %vm459_vm3, %v13450_v60  ;;  %v19318_v60 = vld [vmem:[%s18557_s8 + $0x1a0] sm:$0xff] }
 0x133   : > { %15797 = vmatprep.mubr.msk.f32.mxu1 %vm459_vm3, %v19136_v61  ;;  %16677 = vmatprep.mubr.msk.f32.mxu0 %vm459_vm3, %v13451_v62  ;;  %v13477_v62 = vld [vmem:[%s18557_s8 + $0x44a] sm:$0xff] }
 0x136   : > { %15798 = vmatmul.mubr.msk.f32.gmra.mrb[16].mxu1 %vm459_vm3, %v19146_v63  ;;  %16678 = vmatmul.mubr.msk.f32.gmra.mrb[80].mxu0 %vm459_vm3, %v13452_v0  ;;  %v19328_v0 = vld [vmem:[%s18557_s8 + $0x1a8] sm:$0xff] }
 0x137   : > { %15800 = vmatprep.mubr.msk.f32.mxu1 %vm459_vm3, %v19150_v1  ;;  %16680 = vmatprep.mubr.msk.f32.mxu0 %vm459_vm3, %v13453_v2  ;;  %v13478_v2 = vld [vmem:[%s18557_s8 + $0x452] sm:$0xff] }
 0x13a   : > { %15801 = vmatmul.mubr.msk.f32.gmra.mrb[18].mxu1 %vm459_vm3, %v19160_v3  ;;  %16681 = vmatmul.mubr.msk.f32.gmra.mrb[82].mxu0 %vm459_vm3, %v13454_v5  ;;  %v19332_v5 = vld [vmem:[%s18557_s8 + $0x1b8] sm:$0xff] }
 0x13b   : > { %15803 = vmatprep.mubr.msk.f32.mxu1 %vm459_vm3, %v19164_v6  ;;  %16683 = vmatprep.mubr.msk.f32.mxu0 %vm459_vm3, %v13455_v8  ;;  %v13479_v8 = vld [vmem:[%s18557_s8 + $0x462] sm:$0xff] }
 0x13e   : > { %15804 = vmatmul.mubr.msk.f32.gmra.mrb[20].mxu1 %vm459_vm3, %v19174_v9  ;;  %16684 = vmatmul.mubr.msk.f32.gmra.mrb[84].mxu0 %vm459_vm3, %v13456_v10  ;;  %v19342_v10 = vld [vmem:[%s18557_s8 + $0x1c0] sm:$0xff] }
 0x13f   : > { %15806 = vmatprep.mubr.msk.f32.mxu1 %vm459_vm3, %v19178_v11  ;;  %16686 = vmatprep.mubr.msk.f32.mxu0 %vm459_vm3, %v13457_v12  ;;  %v13480_v12 = vld [vmem:[%s18557_s8 + $0x46a] sm:$0xff] }
 0x142   : > { %15807 = vmatmul.mubr.msk.f32.gmra.mrb[22].mxu1 %vm459_vm3, %v19188_v13  ;;  %16687 = vmatmul.mubr.msk.f32.gmra.mrb[86].mxu0 %vm459_vm3, %v13458_v14  ;;  %v19346_v14 = vld [vmem:[%s18557_s8 + $0x1c8] sm:$0xff] }
 0x143   : > { %15809 = vmatprep.mubr.msk.f32.mxu1 %vm459_vm3, %v19192_v15  ;;  %16689 = vmatprep.mubr.msk.f32.mxu0 %vm459_vm3, %v13459_v16  ;;  %v13481_v16 = vld [vmem:[%s18557_s8 + $0x472] sm:$0xff] }
 0x146   : > { %15810 = vmatmul.mubr.msk.f32.gmra.mrb[24].mxu1 %vm459_vm3, %v19202_v17  ;;  %16690 = vmatmul.mubr.msk.f32.gmra.mrb[88].mxu0 %vm459_vm3, %v13460_v18  ;;  %v19356_v18 = vld [vmem:[%s18557_s8 + $0x1d0] sm:$0xff] }
 0x147   : > { %15812 = vmatprep.mubr.msk.f32.mxu1 %vm459_vm3, %v19206_v19  ;;  %16692 = vmatprep.mubr.msk.f32.mxu0 %vm459_vm3, %v13461_v20  ;;  %v13482_v20 = vld [vmem:[%s18557_s8 + $0x47a] sm:$0xff] }
 0x14a   : > { %15813 = vmatmul.mubr.msk.f32.gmra.mrb[26].mxu1 %vm459_vm3, %v19216_v22  ;;  %16693 = vmatmul.mubr.msk.f32.gmra.mrb[90].mxu0 %vm459_vm3, %v13462_v23  ;;  %v19360_v23 = vld [vmem:[%s18557_s8 + $0x1e0] sm:$0xff] }
 0x14b   : > { %15815 = vmatprep.mubr.msk.f32.mxu1 %vm459_vm3, %v19220_v24  ;;  %16695 = vmatprep.mubr.msk.f32.mxu0 %vm459_vm3, %v13463_v25  ;;  %v13483_v25 = vld [vmem:[%s18557_s8 + $0x48a] sm:$0xff] }
 0x14e   : > { %15816 = vmatmul.mubr.msk.f32.gmra.mrb[28].mxu1 %vm459_vm3, %v19230_v26  ;;  %16696 = vmatmul.mubr.msk.f32.gmra.mrb[92].mxu0 %vm459_vm3, %v13464_v28  ;;  %v19370_v28 = vld [vmem:[%s18557_s8 + $0x1e8] sm:$0xff] }
 0x14f   : > { %15818 = vmatprep.mubr.msk.f32.mxu1 %vm459_vm3, %v19234_v29  ;;  %16698 = vmatprep.mubr.msk.f32.mxu0 %vm459_vm3, %v13465_v30  ;;  %v13484_v30 = vld [vmem:[%s18557_s8 + $0x492] sm:$0xff] }
 0x152   : > { %15819 = vmatmul.mubr.msk.f32.gmra.mrb[30].mxu1 %vm459_vm3, %v19244_v31  ;;  %16699 = vmatmul.mubr.msk.f32.gmra.mrb[94].mxu0 %vm459_vm3, %v13466_v21  ;;  %v19374_v21 = vld [vmem:[%s18557_s8 + $0x1f0] sm:$0xff] }
 0x153   : > { %15821 = vmatprep.mubr.msk.f32.mxu1 %vm459_vm3, %v19248_v32  ;;  %16701 = vmatprep.mubr.msk.f32.mxu0 %vm459_vm3, %v13467_v33  ;;  %v13485_v33 = vld [vmem:[%s18557_s8 + $0x49a] sm:$0xff] }
 0x156   : > { %15822 = vmatmul.mubr.msk.f32.gmra.mrb[32].mxu1 %vm459_vm3, %v19258_v35  ;;  %16702 = vmatmul.mubr.msk.f32.gmra.mrb[96].mxu0 %vm459_vm3, %v13468_v36  ;;  %v19384_v36 = vld [vmem:[%s18557_s8 + $0x1f8] sm:$0xff] }
 0x157   : > { %15824 = vmatprep.mubr.msk.f32.mxu1 %vm459_vm3, %v19262_v37  ;;  %16704 = vmatprep.mubr.msk.f32.mxu0 %vm459_vm3, %v13469_v38  ;;  %v13486_v38 = vld [vmem:[%s18557_s8 + $0x4a2] sm:$0xff] }
 0x15a   : > { %15825 = vmatmul.mubr.msk.f32.gmra.mrb[34].mxu1 %vm459_vm3, %v19272_v39  ;;  %16705 = vmatmul.mubr.msk.f32.gmra.mrb[98].mxu0 %vm459_vm3, %v13470_v27  ;;  %v19388_v27 = vld [vmem:[%s18557_s8 + $0x208] sm:$0xff] }
 0x15b   : > { %15827 = vmatprep.mubr.msk.f32.mxu1 %vm459_vm3, %v19276_v40  ;;  %16707 = vmatprep.mubr.msk.f32.mxu0 %vm459_vm3, %v13471_v41  ;;  %v13487_v41 = vld [vmem:[%s18557_s8 + $0x4b2] sm:$0xff] }
 0x15e   : > { %15828 = vmatmul.mubr.msk.f32.gmra.mrb[36].mxu1 %vm459_vm3, %v19286_v42  ;;  %16708 = vmatmul.mubr.msk.f32.gmra.mrb[100].mxu0 %vm459_vm3, %v13472_v43  ;;  %v19398_v43 = vld [vmem:[%s18557_s8 + $0x210] sm:$0xff] }
 0x15f   : > { %15830 = vmatprep.mubr.msk.f32.mxu1 %vm459_vm3, %v19290_v44  ;;  %16710 = vmatprep.mubr.msk.f32.mxu0 %vm459_vm3, %v13473_v46  ;;  %v13488_v46 = vld [vmem:[%s18557_s8 + $0x4ba] sm:$0xff] }
 0x162   : > { %15831 = vmatmul.mubr.msk.f32.gmra.mrb[38].mxu1 %vm459_vm3, %v19300_v48  ;;  %16711 = vmatmul.mubr.msk.f32.gmra.mrb[102].mxu0 %vm459_vm3, %v13474_v50  ;;  %v19402_v50 = vld [vmem:[%s18557_s8 + $0x218] sm:$0xff] }
 0x163   : > { %15833 = vmatprep.mubr.msk.f32.mxu1 %vm459_vm3, %v19304_v52  ;;  %16713 = vmatprep.mubr.msk.f32.mxu0 %vm459_vm3, %v13475_v54  ;;  %v13489_v54 = vld [vmem:[%s18557_s8 + $0x4c2] sm:$0xff] }
 0x166   : > { %15834 = vmatmul.mubr.msk.f32.gmra.mrb[40].mxu1 %vm459_vm3, %v19314_v56  ;;  %16714 = vmatmul.mubr.msk.f32.gmra.mrb[104].mxu0 %vm459_vm3, %v13476_v58  ;;  %v19412_v58 = vld [vmem:[%s18557_s8 + $0x220] sm:$0xff] }
 0x167   : > { %15836 = vmatprep.mubr.msk.f32.mxu1 %vm459_vm3, %v19318_v60  ;;  %16716 = vmatprep.mubr.msk.f32.mxu0 %vm459_vm3, %v13477_v62  ;;  %v13490_v62 = vld [vmem:[%s18557_s8 + $0x4ca] sm:$0xff] }
 0x16a   : > { %15837 = vmatmul.mubr.msk.f32.gmra.mrb[42].mxu1 %vm459_vm3, %v19328_v0  ;;  %16717 = vmatmul.mubr.msk.f32.gmra.mrb[106].mxu0 %vm459_vm3, %v13478_v2  ;;  %v19416_v2 = vld [vmem:[%s18557_s8 + $0x230] sm:$0xff] }
 0x16b   : > { %15839 = vmatprep.mubr.msk.f32.mxu1 %vm459_vm3, %v19332_v5  ;;  %16719 = vmatprep.mubr.msk.f32.mxu0 %vm459_vm3, %v13479_v8  ;;  %v13491_v8 = vld [vmem:[%s18557_s8 + $0x4da] sm:$0xff] }
 0x16e   : > { %15840 = vmatmul.mubr.msk.f32.gmra.mrb[44].mxu1 %vm459_vm3, %v19342_v10  ;;  %16720 = vmatmul.mubr.msk.f32.gmra.mrb[108].mxu0 %vm459_vm3, %v13480_v12  ;;  %v19426_v12 = vld [vmem:[%s18557_s8 + $0x238] sm:$0xff] }
 0x16f   : > { %15842 = vmatprep.mubr.msk.f32.mxu1 %vm459_vm3, %v19346_v14  ;;  %16722 = vmatprep.mubr.msk.f32.mxu0 %vm459_vm3, %v13481_v16  ;;  %v13492_v16 = vld [vmem:[%s18557_s8 + $0x4e2] sm:$0xff] }
 0x172   : > { %15843 = vmatmul.mubr.msk.f32.gmra.mrb[46].mxu1 %vm459_vm3, %v19356_v18  ;;  %16723 = vmatmul.mubr.msk.f32.gmra.mrb[110].mxu0 %vm459_vm3, %v13482_v20  ;;  %v19430_v20 = vld [vmem:[%s18557_s8 + $0x240] sm:$0xff] }
 0x173   : > { %15845 = vmatprep.mubr.msk.f32.mxu1 %vm459_vm3, %v19360_v23  ;;  %16725 = vmatprep.mubr.msk.f32.mxu0 %vm459_vm3, %v13483_v25  ;;  %v13493_v25 = vld [vmem:[%s18557_s8 + $0x4ea] sm:$0xff] }
 0x176   : > { %15846 = vmatmul.mubr.msk.f32.gmra.mrb[48].mxu1 %vm459_vm3, %v19370_v28  ;;  %16726 = vmatmul.mubr.msk.f32.gmra.mrb[112].mxu0 %vm459_vm3, %v13484_v30  ;;  %v19440_v30 = vld [vmem:[%s18557_s8 + $0x248] sm:$0xff] }
 0x177   : > { %15848 = vmatprep.mubr.msk.f32.mxu1 %vm459_vm3, %v19374_v21  ;;  %16728 = vmatprep.mubr.msk.f32.mxu0 %vm459_vm3, %v13485_v33  ;;  %v13494_v33 = vld [vmem:[%s18557_s8 + $0x4f2] sm:$0xff] }
 0x17a   : > { %15849 = vmatmul.mubr.msk.f32.gmra.mrb[50].mxu1 %vm459_vm3, %v19384_v36  ;;  %16729 = vmatmul.mubr.msk.f32.gmra.mrb[114].mxu0 %vm459_vm3, %v13486_v38  ;;  %v19444_v38 = vld [vmem:[%s18557_s8 + $0x258] sm:$0xff] }
 0x17b   : > { %15851 = vmatprep.mubr.msk.f32.mxu1 %vm459_vm3, %v19388_v27  ;;  %16731 = vmatprep.mubr.msk.f32.mxu0 %vm459_vm3, %v13487_v41  ;;  %v13495_v41 = vld [vmem:[%s18557_s8 + $0x502] sm:$0xff] }
 0x17e   : > { %15852 = vmatmul.mubr.msk.f32.gmra.mrb[52].mxu1 %vm459_vm3, %v19398_v43  ;;  %16732 = vmatmul.mubr.msk.f32.gmra.mrb[116].mxu0 %vm459_vm3, %v13488_v46  ;;  %v19454_v46 = vld [vmem:[%s18557_s8 + $0x260] sm:$0xff] }
 0x17f   : > { %15854 = vmatprep.mubr.msk.f32.mxu1 %vm459_vm3, %v19402_v50  ;;  %16734 = vmatprep.mubr.msk.f32.mxu0 %vm459_vm3, %v13489_v54  ;;  %v13496_v54 = vld [vmem:[%s18557_s8 + $0x50a] sm:$0xff] }
 0x182   : > { %15855 = vmatmul.mubr.msk.f32.gmra.mrb[54].mxu1 %vm459_vm3, %v19412_v58  ;;  %16735 = vmatmul.mubr.msk.f32.gmra.mrb[118].mxu0 %vm459_vm3, %v13490_v62  ;;  %v19458_v62 = vld [vmem:[%s18557_s8 + $0x268] sm:$0xff] }
 0x183   : > { %15857 = vmatprep.mubr.msk.f32.mxu1 %vm459_vm3, %v19416_v2  ;;  %16737 = vmatprep.mubr.msk.f32.mxu0 %vm459_vm3, %v13491_v8  ;;  %v13497_v8 = vld [vmem:[%s18557_s8 + $0x512] sm:$0xff] }
 0x186   : > { %15858 = vmatmul.mubr.msk.f32.gmra.mrb[56].mxu1 %vm459_vm3, %v19426_v12  ;;  %16738 = vmatmul.mubr.msk.f32.gmra.mrb[120].mxu0 %vm459_vm3, %v13492_v16  ;;  %v19468_v16 = vld [vmem:[%s18557_s8 + $0x270] sm:$0xff] }
 0x187   : > { %15860 = vmatprep.mubr.msk.f32.mxu1 %vm459_vm3, %v19430_v20  ;;  %16740 = vmatprep.mubr.msk.f32.mxu0 %vm459_vm3, %v13493_v25  ;;  %v13498_v25 = vld [vmem:[%s18557_s8 + $0x51a] sm:$0xff] }
 0x18a   : > { %15861 = vmatmul.mubr.msk.f32.gmra.mrb[58].mxu1 %vm459_vm3, %v19440_v30  ;;  %16741 = vmatmul.mubr.msk.f32.gmra.mrb[122].mxu0 %vm459_vm3, %v13494_v33  ;;  %v19472_v33 = vld [vmem:[%s18557_s8 + $0x280] sm:$0xff] }
 0x18b   : > { %15863 = vmatprep.mubr.msk.f32.mxu1 %vm459_vm3, %v19444_v38  ;;  %16743 = vmatprep.mubr.msk.f32.mxu0 %vm459_vm3, %v13495_v41  ;;  %v19482_v41 = vld [vmem:[%s18557_s8 + $0x288] sm:$0xff] }
 0x18e   : > { %15864 = vmatmul.mubr.msk.f32.gmra.mrb[60].mxu1 %vm459_vm3, %v19454_v46  ;;  %16744 = vmatmul.mubr.msk.f32.gmra.mrb[124].mxu0 %vm459_vm3, %v13496_v54  ;;  %v4126_v54 = vld [vmem:[%s21841_s1 + $0x24] sm:$0xff] }
 0x18f   : > { %15866 = vmatprep.mubr.msk.f32.mxu1 %vm459_vm3, %v19458_v62  ;;  %16746 = vmatprep.mubr.msk.f32.mxu0 %vm459_vm3, %v13497_v8  ;;  %v4127_v8 = vld [vmem:[%s21841_s1 + $0x2c] sm:$0xf] }
 0x192   : > { %15867 = vmatmul.mubr.msk.f32.gmra.mrb[62].mxu1 %vm459_vm3, %v19468_v16  ;;  %16747 = vmatmul.mubr.msk.f32.gmra.mrb[126].mxu0 %vm459_vm3, %v13498_v25  ;;  %v19493_v25 = vpack.c.bf16 %v4127_v8, %v4126_v54  ;;  %v19510_v54 = vld [vmem:[%s18557_s8 + $0x2a8] sm:$0xff] }
 0x193   : > { %15869 = vmatprep.mubr.msk.f32.mxu1 %vm459_vm3, %v19472_v33  ;;  %16753 = vmatprep.mubr.msk.f32.mxu0 %vm459_vm3, %v19081_v45  ;;  %v19505_v45 = vld [vmem:[%s18557_s8 + $0x298] sm:$0xff]  ;;  %v2645_v8 = vld [vmem:[%s18557_s8 + $0x2] sm:$0xff] }
 0x194   : > { %17357 = vmatprep.subr.msk.bf16.mxu1 %vm18516_vm2, %v19493_v25 }
 0x196   : > { %15870 = vmatmul.mubr.msk.f32.gmra.mrb[64].mxu1 %vm459_vm3, %v19482_v41  ;;  %16754 = vmatmul.mubr.msk.f32.vlgmr.msra.gmra.mrb[0].mxu0 %vm459_vm3, %v19090_v47  ;;  %v19527_v47 = vld [vmem:[%s18557_s8 + $0x2b8] sm:$0xff] }
 0x197   : > { %17384 = vmatpush3.bf16.msk.msra.mxu0 %vm18516_vm2, %v19049_v34  ;;  %15872 = vmatprep.mubr.msk.f32.mxu1 %vm459_vm3, %v19491_v7  ;;  %v19524_v34 = vld [vmem:[%s18557_s8 + $0x2b0] sm:$0xff] }
 0x198   : > { %16756 = vmatprep.mubr.msk.f32.mxu0 %vm459_vm3, %v19094_v49  ;;  %v19538_v49 = vld [vmem:[%s18557_s8 + $0x2c0] sm:$0xff] }
 0x19a   : > { %15873 = vmatmul.mubr.msk.f32.gmra.mrb[66].mxu1 %vm459_vm3, %v19505_v45  ;;  %16757 = vmatmul.mubr.msk.f32.gmra.mrb[2].mxu0 %vm459_vm3, %v19104_v51  ;;  %v19541_v51 = vld [vmem:[%s18557_s8 + $0x2d0] sm:$0xff] }
 0x19b   : > { %15875 = vmatprep.mubr.msk.f32.mxu1 %vm459_vm3, %v19510_v54  ;;  %16759 = vmatprep.mubr.msk.f32.mxu0 %vm459_vm3, %v19108_v53  ;;  %v19552_v53 = vld [vmem:[%s18557_s8 + $0x2d8] sm:$0xff] }
 0x19e   : > { %15876 = vmatmul.mubr.msk.f32.gmra.mrb[68].mxu1 %vm459_vm3, %v19524_v34  ;;  %16760 = vmatmul.mubr.msk.f32.gmra.mrb[4].mxu0 %vm459_vm3, %v19118_v55  ;;  %v19555_v55 = vld [vmem:[%s18557_s8 + $0x2e0] sm:$0xff] }
 0x19f   : > { %15878 = vmatprep.mubr.msk.f32.mxu1 %vm459_vm3, %v19527_v47  ;;  %16762 = vmatprep.mubr.msk.f32.mxu0 %vm459_vm3, %v19122_v57  ;;  %v19566_v57 = vld [vmem:[%s18557_s8 + $0x2e8] sm:$0xff] }
 0x1a2   : > { %15879 = vmatmul.mubr.msk.f32.gmra.mrb[70].mxu1 %vm459_vm3, %v19538_v49  ;;  %16763 = vmatmul.mubr.msk.f32.gmra.mrb[6].mxu0 %vm459_vm3, %v19132_v59  ;;  %v19569_v59 = vld [vmem:[%s18557_s8 + $0x2f8] sm:$0xff] }
 0x1a3   : > { %15881 = vmatprep.mubr.msk.f32.mxu1 %vm459_vm3, %v19541_v51  ;;  %16765 = vmatprep.mubr.msk.f32.mxu0 %vm459_vm3, %v19136_v61  ;;  %v19580_v61 = vld [vmem:[%s18557_s8 + $0x300] sm:$0xff] }
 0x1a6   : > { %15882 = vmatmul.mubr.msk.f32.gmra.mrb[72].mxu1 %vm459_vm3, %v19552_v53  ;;  %16766 = vmatmul.mubr.msk.f32.gmra.mrb[8].mxu0 %vm459_vm3, %v19146_v63  ;;  %v19583_v63 = vld [vmem:[%s18557_s8 + $0x308] sm:$0xff] }
 0x1a7   : > { %15884 = vmatprep.mubr.msk.f32.mxu1 %vm459_vm3, %v19555_v55  ;;  %16768 = vmatprep.mubr.msk.f32.mxu0 %vm459_vm3, %v19150_v1  ;;  %v19594_v1 = vld [vmem:[%s18557_s8 + $0x310] sm:$0xff] }
 0x1aa   : > { %15885 = vmatmul.mubr.msk.f32.gmra.mrb[74].mxu1 %vm459_vm3, %v19566_v57  ;;  %16769 = vmatmul.mubr.msk.f32.gmra.mrb[10].mxu0 %vm459_vm3, %v19160_v3  ;;  %v19597_v3 = vld [vmem:[%s18557_s8 + $0x320] sm:$0xff] }
 0x1ab   : > { %15887 = vmatprep.mubr.msk.f32.mxu1 %vm459_vm3, %v19569_v59  ;;  %16771 = vmatprep.mubr.msk.f32.mxu0 %vm459_vm3, %v19164_v6  ;;  %v19608_v6 = vld [vmem:[%s18557_s8 + $0x328] sm:$0xff] }
 0x1ae   : > { %15888 = vmatmul.mubr.msk.f32.gmra.mrb[76].mxu1 %vm459_vm3, %v19580_v61  ;;  %16772 = vmatmul.mubr.msk.f32.gmra.mrb[12].mxu0 %vm459_vm3, %v19174_v9  ;;  %v19611_v9 = vld [vmem:[%s18557_s8 + $0x330] sm:$0xff] }
 0x1af   : > { %15890 = vmatprep.mubr.msk.f32.mxu1 %vm459_vm3, %v19583_v63  ;;  %16774 = vmatprep.mubr.msk.f32.mxu0 %vm459_vm3, %v19178_v11  ;;  %v19622_v11 = vld [vmem:[%s18557_s8 + $0x338] sm:$0xff] }
 0x1b2   : > { %15891 = vmatmul.mubr.msk.f32.gmra.mrb[78].mxu1 %vm459_vm3, %v19594_v1  ;;  %16775 = vmatmul.mubr.msk.f32.gmra.mrb[14].mxu0 %vm459_vm3, %v19188_v13  ;;  %v19625_v13 = vld [vmem:[%s18557_s8 + $0x348] sm:$0xff] }
 0x1b3   : > { %15893 = vmatprep.mubr.msk.f32.mxu1 %vm459_vm3, %v19597_v3  ;;  %16777 = vmatprep.mubr.msk.f32.mxu0 %vm459_vm3, %v19192_v15  ;;  %v19636_v15 = vld [vmem:[%s18557_s8 + $0x350] sm:$0xff] }
 0x1b6   : > { %15894 = vmatmul.mubr.msk.f32.gmra.mrb[80].mxu1 %vm459_vm3, %v19608_v6  ;;  %16778 = vmatmul.mubr.msk.f32.gmra.mrb[16].mxu0 %vm459_vm3, %v19202_v17  ;;  %v19639_v17 = vld [vmem:[%s18557_s8 + $0x358] sm:$0xff] }
 0x1b7   : > { %15896 = vmatprep.mubr.msk.f32.mxu1 %vm459_vm3, %v19611_v9  ;;  %16780 = vmatprep.mubr.msk.f32.mxu0 %vm459_vm3, %v19206_v19  ;;  %v19650_v19 = vld [vmem:[%s18557_s8 + $0x360] sm:$0xff] }
 0x1ba   : > { %15897 = vmatmul.mubr.msk.f32.gmra.mrb[82].mxu1 %vm459_vm3, %v19622_v11  ;;  %16781 = vmatmul.mubr.msk.f32.gmra.mrb[18].mxu0 %vm459_vm3, %v19216_v22  ;;  %v19653_v22 = vld [vmem:[%s18557_s8 + $0x370] sm:$0xff] }
 0x1bb   : > { %15899 = vmatprep.mubr.msk.f32.mxu1 %vm459_vm3, %v19625_v13  ;;  %16783 = vmatprep.mubr.msk.f32.mxu0 %vm459_vm3, %v19220_v24  ;;  %v19664_v24 = vld [vmem:[%s18557_s8 + $0x378] sm:$0xff] }
 0x1be   : > { %15900 = vmatmul.mubr.msk.f32.gmra.mrb[84].mxu1 %vm459_vm3, %v19636_v15  ;;  %16784 = vmatmul.mubr.msk.f32.gmra.mrb[20].mxu0 %vm459_vm3, %v19230_v26  ;;  %v19667_v26 = vld [vmem:[%s18557_s8 + $0x380] sm:$0xff] }
 0x1bf   : > { %15902 = vmatprep.mubr.msk.f32.mxu1 %vm459_vm3, %v19639_v17  ;;  %16786 = vmatprep.mubr.msk.f32.mxu0 %vm459_vm3, %v19234_v29  ;;  %v19678_v29 = vld [vmem:[%s18557_s8 + $0x388] sm:$0xff] }
 0x1c2   : > { %15903 = vmatmul.mubr.msk.f32.gmra.mrb[86].mxu1 %vm459_vm3, %v19650_v19  ;;  %16787 = vmatmul.mubr.msk.f32.gmra.mrb[22].mxu0 %vm459_vm3, %v19244_v31  ;;  %v19681_v31 = vld [vmem:[%s18557_s8 + $0x398] sm:$0xff] }
 0x1c3   : > { %15905 = vmatprep.mubr.msk.f32.mxu1 %vm459_vm3, %v19653_v22  ;;  %16789 = vmatprep.mubr.msk.f32.mxu0 %vm459_vm3, %v19248_v32  ;;  %v19692_v32 = vld [vmem:[%s18557_s8 + $0x3a0] sm:$0xff] }
 0x1c6   : > { %15906 = vmatmul.mubr.msk.f32.gmra.mrb[88].mxu1 %vm459_vm3, %v19664_v24  ;;  %16790 = vmatmul.mubr.msk.f32.gmra.mrb[24].mxu0 %vm459_vm3, %v19258_v35  ;;  %v19695_v35 = vld [vmem:[%s18557_s8 + $0x3a8] sm:$0xff] }
 0x1c7   : > { %15908 = vmatprep.mubr.msk.f32.mxu1 %vm459_vm3, %v19667_v26  ;;  %16792 = vmatprep.mubr.msk.f32.mxu0 %vm459_vm3, %v19262_v37  ;;  %v19706_v37 = vld [vmem:[%s18557_s8 + $0x3b0] sm:$0xff] }
 0x1ca   : > { %15909 = vmatmul.mubr.msk.f32.gmra.mrb[90].mxu1 %vm459_vm3, %v19678_v29  ;;  %16793 = vmatmul.mubr.msk.f32.gmra.mrb[26].mxu0 %vm459_vm3, %v19272_v39  ;;  %v19709_v39 = vld [vmem:[%s18557_s8 + $0x3c0] sm:$0xff] }
 0x1cb   : > { %15911 = vmatprep.mubr.msk.f32.mxu1 %vm459_vm3, %v19681_v31  ;;  %16795 = vmatprep.mubr.msk.f32.mxu0 %vm459_vm3, %v19276_v40  ;;  %v19720_v40 = vld [vmem:[%s18557_s8 + $0x3c8] sm:$0xff] }
 0x1ce   : > { %15912 = vmatmul.mubr.msk.f32.gmra.mrb[92].mxu1 %vm459_vm3, %v19692_v32  ;;  %16796 = vmatmul.mubr.msk.f32.gmra.mrb[28].mxu0 %vm459_vm3, %v19286_v42  ;;  %v19723_v42 = vld [vmem:[%s18557_s8 + $0x3d0] sm:$0xff] }
 0x1cf   : > { %15914 = vmatprep.mubr.msk.f32.mxu1 %vm459_vm3, %v19695_v35  ;;  %16798 = vmatprep.mubr.msk.f32.mxu0 %vm459_vm3, %v19290_v44  ;;  %v19734_v44 = vld [vmem:[%s18557_s8 + $0x3d8] sm:$0xff] }
 0x1d2   : > { %15915 = vmatmul.mubr.msk.f32.gmra.mrb[94].mxu1 %vm459_vm3, %v19706_v37  ;;  %16799 = vmatmul.mubr.msk.f32.gmra.mrb[30].mxu0 %vm459_vm3, %v19300_v48  ;;  %v19737_v48 = vld [vmem:[%s18557_s8 + $0x3e8] sm:$0xff] }
 0x1d3   : > { %15917 = vmatprep.mubr.msk.f32.mxu1 %vm459_vm3, %v19709_v39  ;;  %16801 = vmatprep.mubr.msk.f32.mxu0 %vm459_vm3, %v19304_v52  ;;  %v19748_v52 = vld [vmem:[%s18557_s8 + $0x3f0] sm:$0xff] }
 0x1d6   : > { %15918 = vmatmul.mubr.msk.f32.gmra.mrb[96].mxu1 %vm459_vm3, %v19720_v40  ;;  %16802 = vmatmul.mubr.msk.f32.gmra.mrb[32].mxu0 %vm459_vm3, %v19314_v56  ;;  %v19751_v56 = vld [vmem:[%s18557_s8 + $0x3f8] sm:$0xff] }
 0x1d7   : > { %15920 = vmatprep.mubr.msk.f32.mxu1 %vm459_vm3, %v19723_v42  ;;  %16804 = vmatprep.mubr.msk.f32.mxu0 %vm459_vm3, %v19318_v60  ;;  %v19762_v60 = vld [vmem:[%s18557_s8 + $0x400] sm:$0xff] }
 0x1da   : > { %15921 = vmatmul.mubr.msk.f32.gmra.mrb[98].mxu1 %vm459_vm3, %v19734_v44  ;;  %16805 = vmatmul.mubr.msk.f32.gmra.mrb[34].mxu0 %vm459_vm3, %v19328_v0  ;;  %v19765_v0 = vld [vmem:[%s18557_s8 + $0x410] sm:$0xff] }
 0x1db   : > { %15923 = vmatprep.mubr.msk.f32.mxu1 %vm459_vm3, %v19737_v48  ;;  %16807 = vmatprep.mubr.msk.f32.mxu0 %vm459_vm3, %v19332_v5  ;;  %v19776_v5 = vld [vmem:[%s18557_s8 + $0x418] sm:$0xff] }
 0x1de   : > { %15924 = vmatmul.mubr.msk.f32.gmra.mrb[100].mxu1 %vm459_vm3, %v19748_v52  ;;  %16808 = vmatmul.mubr.msk.f32.gmra.mrb[36].mxu0 %vm459_vm3, %v19342_v10  ;;  %v19779_v10 = vld [vmem:[%s18557_s8 + $0x420] sm:$0xff] }
 0x1df   : > { %15926 = vmatprep.mubr.msk.f32.mxu1 %vm459_vm3, %v19751_v56  ;;  %16810 = vmatprep.mubr.msk.f32.mxu0 %vm459_vm3, %v19346_v14  ;;  %v19790_v14 = vld [vmem:[%s18557_s8 + $0x428] sm:$0xff] }
 0x1e2   : > { %15927 = vmatmul.mubr.msk.f32.gmra.mrb[102].mxu1 %vm459_vm3, %v19762_v60  ;;  %16811 = vmatmul.mubr.msk.f32.gmra.mrb[38].mxu0 %vm459_vm3, %v19356_v18  ;;  %v19793_v18 = vld [vmem:[%s18557_s8 + $0x438] sm:$0xff] }
 0x1e3   : > { %15929 = vmatprep.mubr.msk.f32.mxu1 %vm459_vm3, %v19765_v0  ;;  %16813 = vmatprep.mubr.msk.f32.mxu0 %vm459_vm3, %v19360_v23  ;;  %v19804_v23 = vld [vmem:[%s18557_s8 + $0x440] sm:$0xff] }
 0x1e6   : > { %15930 = vmatmul.mubr.msk.f32.gmra.mrb[104].mxu1 %vm459_vm3, %v19776_v5  ;;  %16814 = vmatmul.mubr.msk.f32.gmra.mrb[40].mxu0 %vm459_vm3, %v19370_v28  ;;  %v19807_v28 = vld [vmem:[%s18557_s8 + $0x448] sm:$0xff] }
 0x1e7   : > { %15932 = vmatprep.mubr.msk.f32.mxu1 %vm459_vm3, %v19779_v10  ;;  %16816 = vmatprep.mubr.msk.f32.mxu0 %vm459_vm3, %v19374_v21  ;;  %v19818_v21 = vld [vmem:[%s18557_s8 + $0x450] sm:$0xff] }
 0x1ea   : > { %15933 = vmatmul.mubr.msk.f32.gmra.mrb[106].mxu1 %vm459_vm3, %v19790_v14  ;;  %16817 = vmatmul.mubr.msk.f32.gmra.mrb[42].mxu0 %vm459_vm3, %v19384_v36  ;;  %v19821_v36 = vld [vmem:[%s18557_s8 + $0x460] sm:$0xff] }
 0x1eb   : > { %15935 = vmatprep.mubr.msk.f32.mxu1 %vm459_vm3, %v19793_v18  ;;  %16819 = vmatprep.mubr.msk.f32.mxu0 %vm459_vm3, %v19388_v27  ;;  %v19832_v27 = vld [vmem:[%s18557_s8 + $0x468] sm:$0xff] }
 0x1ee   : > { %15936 = vmatmul.mubr.msk.f32.gmra.mrb[108].mxu1 %vm459_vm3, %v19804_v23  ;;  %16820 = vmatmul.mubr.msk.f32.gmra.mrb[44].mxu0 %vm459_vm3, %v19398_v43  ;;  %v19835_v43 = vld [vmem:[%s18557_s8 + $0x470] sm:$0xff] }
 0x1ef   : > { %15938 = vmatprep.mubr.msk.f32.mxu1 %vm459_vm3, %v19807_v28  ;;  %16822 = vmatprep.mubr.msk.f32.mxu0 %vm459_vm3, %v19402_v50  ;;  %v19846_v50 = vld [vmem:[%s18557_s8 + $0x478] sm:$0xff] }
 0x1f2   : > { %15939 = vmatmul.mubr.msk.f32.gmra.mrb[110].mxu1 %vm459_vm3, %v19818_v21  ;;  %16823 = vmatmul.mubr.msk.f32.gmra.mrb[46].mxu0 %vm459_vm3, %v19412_v58  ;;  %v19849_v58 = vld [vmem:[%s18557_s8 + $0x488] sm:$0xff] }
 0x1f3   : > { %15941 = vmatprep.mubr.msk.f32.mxu1 %vm459_vm3, %v19821_v36  ;;  %16825 = vmatprep.mubr.msk.f32.mxu0 %vm459_vm3, %v19416_v2  ;;  %v19860_v2 = vld [vmem:[%s18557_s8 + $0x490] sm:$0xff] }
 0x1f6   : > { %15942 = vmatmul.mubr.msk.f32.gmra.mrb[112].mxu1 %vm459_vm3, %v19832_v27  ;;  %16826 = vmatmul.mubr.msk.f32.gmra.mrb[48].mxu0 %vm459_vm3, %v19426_v12  ;;  %v19863_v12 = vld [vmem:[%s18557_s8 + $0x498] sm:$0xff] }
 0x1f7   : > { %15944 = vmatprep.mubr.msk.f32.mxu1 %vm459_vm3, %v19835_v43  ;;  %16828 = vmatprep.mubr.msk.f32.mxu0 %vm459_vm3, %v19430_v20  ;;  %v19874_v20 = vld [vmem:[%s18557_s8 + $0x4a0] sm:$0xff] }
 0x1fa   : > { %15945 = vmatmul.mubr.msk.f32.gmra.mrb[114].mxu1 %vm459_vm3, %v19846_v50  ;;  %16829 = vmatmul.mubr.msk.f32.gmra.mrb[50].mxu0 %vm459_vm3, %v19440_v30  ;;  %v19877_v30 = vld [vmem:[%s18557_s8 + $0x4b0] sm:$0xff] }
 0x1fb   : > { %15947 = vmatprep.mubr.msk.f32.mxu1 %vm459_vm3, %v19849_v58  ;;  %16831 = vmatprep.mubr.msk.f32.mxu0 %vm459_vm3, %v19444_v38  ;;  %v19888_v38 = vld [vmem:[%s18557_s8 + $0x4b8] sm:$0xff] }
 0x1fe   : > { %15948 = vmatmul.mubr.msk.f32.gmra.mrb[116].mxu1 %vm459_vm3, %v19860_v2  ;;  %16832 = vmatmul.mubr.msk.f32.gmra.mrb[52].mxu0 %vm459_vm3, %v19454_v46  ;;  %v19891_v46 = vld [vmem:[%s18557_s8 + $0x4c0] sm:$0xff] }
 0x1ff   : > { %15950 = vmatprep.mubr.msk.f32.mxu1 %vm459_vm3, %v19863_v12  ;;  %16834 = vmatprep.mubr.msk.f32.mxu0 %vm459_vm3, %v19458_v62  ;;  %v19902_v62 = vld [vmem:[%s18557_s8 + $0x4c8] sm:$0xff] }
 0x202   : > { %15951 = vmatmul.mubr.msk.f32.gmra.mrb[118].mxu1 %vm459_vm3, %v19874_v20  ;;  %16835 = vmatmul.mubr.msk.f32.gmra.mrb[54].mxu0 %vm459_vm3, %v19468_v16  ;;  %v19905_v16 = vld [vmem:[%s18557_s8 + $0x4d8] sm:$0xff] }
 0x203   : > { %15953 = vmatprep.mubr.msk.f32.mxu1 %vm459_vm3, %v19877_v30  ;;  %16837 = vmatprep.mubr.msk.f32.mxu0 %vm459_vm3, %v19472_v33  ;;  %v19916_v33 = vld [vmem:[%s18557_s8 + $0x4e0] sm:$0xff] }
 0x206   : > { %15954 = vmatmul.mubr.msk.f32.gmra.mrb[120].mxu1 %vm459_vm3, %v19888_v38  ;;  %16838 = vmatmul.mubr.msk.f32.gmra.mrb[56].mxu0 %vm459_vm3, %v19482_v41  ;;  %v19930_v41 = vld [vmem:[%s18557_s8 + $0x4f0] sm:$0xff] }
 0x207   : > { %15956 = vmatprep.mubr.msk.f32.mxu1 %vm459_vm3, %v19891_v46  ;;  %16840 = vmatprep.mubr.msk.f32.mxu0 %vm459_vm3, %v19491_v7  ;;  %v19919_v7 = vld [vmem:[%s18557_s8 + $0x4e8] sm:$0xff]  ;;  %21850 = vst [vmem:[#allocation3_spill] sm:$0xff] %v19930_v41 }
 0x20a   : > { %15957 = vmatmul.mubr.msk.f32.gmra.mrb[122].mxu1 %vm459_vm3, %v19902_v62  ;;  %16841 = vmatmul.mubr.msk.f32.gmra.mrb[58].mxu0 %vm459_vm3, %v19505_v45  ;;  %v2646_v45 = vld [vmem:[%s18557_s8 + $0xa] sm:$0xff] }
 0x20b   : > { %15959 = vmatprep.mubr.msk.f32.mxu1 %vm459_vm3, %v19905_v16  ;;  %16843 = vmatprep.mubr.msk.f32.mxu0 %vm459_vm3, %v19510_v54  ;;  %v10879_v54 = vld [vmem:[%s21841_s1 + $0x60] sm:$0xff] }
 0x20e   : > { %15960 = vmatmul.mubr.msk.f32.gmra.mrb[124].mxu1 %vm459_vm3, %v19916_v33  ;;  %16844 = vmatmul.mubr.msk.f32.gmra.mrb[60].mxu0 %vm459_vm3, %v19524_v34  ;;  %v10880_v34 = vld [vmem:[%s21841_s1 + $0x68] sm:$0xf] }
 0x20f   : > { %15962 = vmatprep.mubr.msk.f32.mxu1 %vm459_vm3, %v19919_v7  ;;  %16846 = vmatprep.mubr.msk.f32.mxu0 %vm459_vm3, %v19527_v47  ;;  %v2647_v47 = vld [vmem:[%s18557_s8 + $0x12] sm:$0xff] }
 0x212   : > { %15963 = vmatmul.mubr.msk.f32.gmra.mrb[126].mxu1 %vm459_vm3, %v19930_v41  ;;  %16847 = vmatmul.mubr.msk.f32.gmra.mrb[62].mxu0 %vm459_vm3, %v19538_v49  ;;  %v19948_v41 = vpack.c.bf16 %v10880_v34, %v10879_v54  ;;  %v2648_v49 = vld [vmem:[%s18557_s8 + $0x1a] sm:$0xff]  ;;  %v13749_v54 = vld [vmem:[%s18557_s8 + $0x508] sm:$0xff]  ;;  %v13750_v34 = vld [vmem:[%s18557_s8 + $0x510] sm:$0xff] }
 0x213   : > { %15969 = vmatprep.mubr.msk.f32.mxu1 %vm459_vm3, %v2645_v8  ;;  %16849 = vmatprep.mubr.msk.f32.mxu0 %vm459_vm3, %v19541_v51  ;;  %v2649_v51 = vld [vmem:[%s18557_s8 + $0x2a] sm:$0xff]  ;;  %v21851_v8 = vld [vmem:[#allocation2_spill] sm:$0xff] }
 0x214   : > { %17387 = vmatprep.subr.msk.bf16.mxu0 %vm18516_vm2, %v19948_v41 }
 0x216   : > { %15970 = vmatmul.mubr.msk.f32.vlgmr.msra.gmra.mrb[0].mxu1 %vm459_vm3, %v2646_v45  ;;  %16850 = vmatmul.mubr.msk.f32.gmra.mrb[64].mxu0 %vm459_vm3, %v19552_v53  ;;  %v2651_v53 = vld [vmem:[%s18557_s8 + $0x3a] sm:$0xff]  ;;  %v21852_v45 = vld [vmem:[#allocation3_spill] sm:$0xff] }
 0x217   : > { %17360 = vmatpush3.bf16.msk.msra.mxu1 %vm18516_vm2, %v19493_v25  ;;  %15972 = vmatprep.mubr.msk.f32.mxu1 %vm459_vm3, %v2647_v47  ;;  %v2650_v25 = vld [vmem:[%s18557_s8 + $0x32] sm:$0xff]  ;;  %v2704_v47 = vld [vmem:[%s18557_s8 + $0x24a] sm:$0xff] }
 0x218   : > { %16852 = vmatprep.mubr.msk.f32.mxu0 %vm459_vm3, %v19555_v55  ;;  %17391 = vmatprep.subr.msk.bf16.mxu1 %vm18516_vm2, %v21851_v8  ;;  %v2652_v55 = vld [vmem:[%s18557_s8 + $0x42] sm:$0xff] }
 0x21a   : > { %15973 = vmatmul.mubr.msk.f32.gmra.mrb[2].mxu1 %vm459_vm3, %v2648_v49  ;;  %16853 = vmatmul.mubr.msk.f32.gmra.mrb[66].mxu0 %vm459_vm3, %v19566_v57  ;;  %v2653_v57 = vld [vmem:[%s18557_s8 + $0x52] sm:$0xff] }
 0x21b   : > { %15975 = vmatprep.mubr.msk.f32.mxu1 %vm459_vm3, %v2649_v51  ;;  %16855 = vmatprep.mubr.msk.f32.mxu0 %vm459_vm3, %v19569_v59  ;;  %v2654_v59 = vld [vmem:[%s18557_s8 + $0x5a] sm:$0xff] }
 0x21c   : > { %v13751_v49 = vld [vmem:[%s18557_s8 + $0x518] sm:$0xff] }
 0x21d   : > { %v2705_v51 = vld [vmem:[%s18557_s8 + $0x25a] sm:$0xff] }
 0x21e   : > { %15976 = vmatmul.mubr.msk.f32.gmra.mrb[4].mxu1 %vm459_vm3, %v2650_v25  ;;  %16856 = vmatmul.mubr.msk.f32.gmra.mrb[68].mxu0 %vm459_vm3, %v19580_v61  ;;  %v2655_v61 = vld [vmem:[%s18557_s8 + $0x62] sm:$0xff] }
 0x21f   : > { %15978 = vmatprep.mubr.msk.f32.mxu1 %vm459_vm3, %v2651_v53  ;;  %16858 = vmatprep.mubr.msk.f32.mxu0 %vm459_vm3, %v19583_v63  ;;  %v2656_v63 = vld [vmem:[%s18557_s8 + $0x6a] sm:$0xff]  ;;  %v2706_v53 = vld [vmem:[%s18557_s8 + $0x262] sm:$0xff] }
 0x220   : > { %v13752_v25 = vld [vmem:[%s18557_s8 + $0x528] sm:$0xff] }
 0x222   : > { %15979 = vmatmul.mubr.msk.f32.gmra.mrb[6].mxu1 %vm459_vm3, %v2652_v55  ;;  %16859 = vmatmul.mubr.msk.f32.gmra.mrb[70].mxu0 %vm459_vm3, %v19594_v1  ;;  %v2657_v1 = vld [vmem:[%s18557_s8 + $0x7a] sm:$0xff]  ;;  %v13753_v55 = vld [vmem:[%s18557_s8 + $0x530] sm:$0xff] }
 0x223   : > { %15981 = vmatprep.mubr.msk.f32.mxu1 %vm459_vm3, %v2653_v57  ;;  %16861 = vmatprep.mubr.msk.f32.mxu0 %vm459_vm3, %v19597_v3  ;;  %v2658_v3 = vld [vmem:[%s18557_s8 + $0x82] sm:$0xff]  ;;  %v2707_v57 = vld [vmem:[%s18557_s8 + $0x26a] sm:$0xff] }
 0x226   : > { %15982 = vmatmul.mubr.msk.f32.gmra.mrb[8].mxu1 %vm459_vm3, %v2654_v59  ;;  %16862 = vmatmul.mubr.msk.f32.gmra.mrb[72].mxu0 %vm459_vm3, %v19608_v6  ;;  %v2659_v6 = vld [vmem:[%s18557_s8 + $0x8a] sm:$0xff]  ;;  %v13754_v59 = vld [vmem:[%s18557_s8 + $0x538] sm:$0xff] }
 0x227   : > { %15984 = vmatprep.mubr.msk.f32.mxu1 %vm459_vm3, %v2655_v61  ;;  %16864 = vmatprep.mubr.msk.f32.mxu0 %vm459_vm3, %v19611_v9  ;;  %v2660_v9 = vld [vmem:[%s18557_s8 + $0x92] sm:$0xff] }
 0x228   : > { %v2708_v61 = vld [vmem:[%s18557_s8 + $0x272] sm:$0xff] }
 0x22a   : > { %15985 = vmatmul.mubr.msk.f32.gmra.mrb[10].mxu1 %vm459_vm3, %v2656_v63  ;;  %16865 = vmatmul.mubr.msk.f32.gmra.mrb[74].mxu0 %vm459_vm3, %v19622_v11  ;;  %v2661_v11 = vld [vmem:[%s18557_s8 + $0xa2] sm:$0xff] }
 0x22b   : > { %15987 = vmatprep.mubr.msk.f32.mxu1 %vm459_vm3, %v2657_v1  ;;  %16867 = vmatprep.mubr.msk.f32.mxu0 %vm459_vm3, %v19625_v13  ;;  %v2662_v13 = vld [vmem:[%s18557_s8 + $0xaa] sm:$0xff]  ;;  %v13755_v63 = vld [vmem:[%s18557_s8 + $0x540] sm:$0xff] }
 0x22c   : > { %v2709_v1 = vld [vmem:[%s18557_s8 + $0x282] sm:$0xff] }
 0x22e   : > { %15988 = vmatmul.mubr.msk.f32.gmra.mrb[12].mxu1 %vm459_vm3, %v2658_v3  ;;  %16868 = vmatmul.mubr.msk.f32.gmra.mrb[76].mxu0 %vm459_vm3, %v19636_v15  ;;  %v2663_v15 = vld [vmem:[%s18557_s8 + $0xb2] sm:$0xff] }
 0x22f   : > { %15990 = vmatprep.mubr.msk.f32.mxu1 %vm459_vm3, %v2659_v6  ;;  %16870 = vmatprep.mubr.msk.f32.mxu0 %vm459_vm3, %v19639_v17  ;;  %v2664_v17 = vld [vmem:[%s18557_s8 + $0xba] sm:$0xff]  ;;  %v13885_v3 = vld [vmem:[%s18557_s8 + $0x51] sm:$0xff] }
 0x230   : > { %v2710_v6 = vld [vmem:[%s18557_s8 + $0x28a] sm:$0xff] }
 0x232   : > { %15991 = vmatmul.mubr.msk.f32.gmra.mrb[14].mxu1 %vm459_vm3, %v2660_v9  ;;  %16871 = vmatmul.mubr.msk.f32.gmra.mrb[78].mxu0 %vm459_vm3, %v19650_v19  ;;  %v2665_v19 = vld [vmem:[%s18557_s8 + $0xca] sm:$0xff]  ;;  %v13886_v9 = vld [vmem:[%s18557_s8 + $0x59] sm:$0xff] }
 0x233   : > { %15993 = vmatprep.mubr.msk.f32.mxu1 %vm459_vm3, %v2661_v11  ;;  %16873 = vmatprep.mubr.msk.f32.mxu0 %vm459_vm3, %v19653_v22  ;;  %v2666_v22 = vld [vmem:[%s18557_s8 + $0xd2] sm:$0xff] }
 0x234   : > { %v2711_v11 = vld [vmem:[%s18557_s8 + $0x292] sm:$0xff] }
 0x236   : > { %15994 = vmatmul.mubr.msk.f32.gmra.mrb[16].mxu1 %vm459_vm3, %v2662_v13  ;;  %16874 = vmatmul.mubr.msk.f32.gmra.mrb[80].mxu0 %vm459_vm3, %v19664_v24  ;;  %v2667_v24 = vld [vmem:[%s18557_s8 + $0xda] sm:$0xff] }
 0x237   : > { %15996 = vmatprep.mubr.msk.f32.mxu1 %vm459_vm3, %v2663_v15  ;;  %16876 = vmatprep.mubr.msk.f32.mxu0 %vm459_vm3, %v19667_v26  ;;  %v2668_v26 = vld [vmem:[%s18557_s8 + $0xe2] sm:$0xff]  ;;  %v2712_v15 = vld [vmem:[%s18557_s8 + $0x29a] sm:$0xff] }
 0x238   : > { %v13887_v13 = vld [vmem:[%s18557_s8 + $0x61] sm:$0xff] }
 0x23a   : > { %15997 = vmatmul.mubr.msk.f32.gmra.mrb[18].mxu1 %vm459_vm3, %v2664_v17  ;;  %16877 = vmatmul.mubr.msk.f32.gmra.mrb[82].mxu0 %vm459_vm3, %v19678_v29  ;;  %v2669_v29 = vld [vmem:[%s18557_s8 + $0xf2] sm:$0xff]  ;;  %v13888_v17 = vld [vmem:[%s18557_s8 + $0x69] sm:$0xff] }
 0x23b   : > { %15999 = vmatprep.mubr.msk.f32.mxu1 %vm459_vm3, %v2665_v19  ;;  %16879 = vmatprep.mubr.msk.f32.mxu0 %vm459_vm3, %v19681_v31  ;;  %v2670_v31 = vld [vmem:[%s18557_s8 + $0xfa] sm:$0xff]  ;;  %v2713_v19 = vld [vmem:[%s18557_s8 + $0x2aa] sm:$0xff] }
 0x23e   : > { %16000 = vmatmul.mubr.msk.f32.gmra.mrb[20].mxu1 %vm459_vm3, %v2666_v22  ;;  %16880 = vmatmul.mubr.msk.f32.gmra.mrb[84].mxu0 %vm459_vm3, %v19692_v32  ;;  %v2671_v32 = vld [vmem:[%s18557_s8 + $0x102] sm:$0xff]  ;;  %v13889_v22 = vld [vmem:[%s18557_s8 + $0x79] sm:$0xff] }
 0x23f   : > { %16002 = vmatprep.mubr.msk.f32.mxu1 %vm459_vm3, %v2667_v24  ;;  %16882 = vmatprep.mubr.msk.f32.mxu0 %vm459_vm3, %v19695_v35  ;;  %v2672_v35 = vld [vmem:[%s18557_s8 + $0x10a] sm:$0xff]  ;;  %v13890_v24 = vld [vmem:[%s18557_s8 + $0x81] sm:$0xff] }
 0x242   : > { %16003 = vmatmul.mubr.msk.f32.gmra.mrb[22].mxu1 %vm459_vm3, %v2668_v26  ;;  %16883 = vmatmul.mubr.msk.f32.gmra.mrb[86].mxu0 %vm459_vm3, %v19706_v37  ;;  %v2673_v37 = vld [vmem:[%s18557_s8 + $0x11a] sm:$0xff] }
 0x243   : > { %16005 = vmatprep.mubr.msk.f32.mxu1 %vm459_vm3, %v2669_v29  ;;  %16885 = vmatprep.mubr.msk.f32.mxu0 %vm459_vm3, %v19709_v39  ;;  %v2674_v39 = vld [vmem:[%s18557_s8 + $0x122] sm:$0xff]  ;;  %v2715_v26 = vld [vmem:[%s18557_s8 + $0x2ba] sm:$0xff] }
 0x244   : > { %v13891_v29 = vld [vmem:[%s18557_s8 + $0x89] sm:$0xff] }
 0x246   : > { %16006 = vmatmul.mubr.msk.f32.gmra.mrb[24].mxu1 %vm459_vm3, %v2670_v31  ;;  %16886 = vmatmul.mubr.msk.f32.gmra.mrb[88].mxu0 %vm459_vm3, %v19720_v40  ;;  %v2675_v40 = vld [vmem:[%s18557_s8 + $0x12a] sm:$0xff]  ;;  %v2716_v31 = vld [vmem:[%s18557_s8 + $0x2c2] sm:$0xff] }
 0x247   : > { %16008 = vmatprep.mubr.msk.f32.mxu1 %vm459_vm3, %v2671_v32  ;;  %16888 = vmatprep.mubr.msk.f32.mxu0 %vm459_vm3, %v19723_v42  ;;  %v2676_v42 = vld [vmem:[%s18557_s8 + $0x132] sm:$0xff] }
 0x248   : > { %v13892_v32 = vld [vmem:[%s18557_s8 + $0x91] sm:$0xff] }
 0x24a   : > { %16009 = vmatmul.mubr.msk.f32.gmra.mrb[26].mxu1 %vm459_vm3, %v2672_v35  ;;  %16889 = vmatmul.mubr.msk.f32.gmra.mrb[90].mxu0 %vm459_vm3, %v19734_v44  ;;  %v2677_v44 = vld [vmem:[%s18557_s8 + $0x142] sm:$0xff]  ;;  %v2717_v35 = vld [vmem:[%s18557_s8 + $0x2d2] sm:$0xff] }
 0x24b   : > { %16011 = vmatprep.mubr.msk.f32.mxu1 %vm459_vm3, %v2673_v37  ;;  %16891 = vmatprep.mubr.msk.f32.mxu0 %vm459_vm3, %v19737_v48  ;;  %v2678_v48 = vld [vmem:[%s18557_s8 + $0x14a] sm:$0xff]  ;;  %v13893_v37 = vld [vmem:[%s18557_s8 + $0xa1] sm:$0xff] }
 0x24e   : > { %16012 = vmatmul.mubr.msk.f32.gmra.mrb[28].mxu1 %vm459_vm3, %v2674_v39  ;;  %16892 = vmatmul.mubr.msk.f32.gmra.mrb[92].mxu0 %vm459_vm3, %v19748_v52  ;;  %v2679_v52 = vld [vmem:[%s18557_s8 + $0x152] sm:$0xff]  ;;  %v2718_v39 = vld [vmem:[%s18557_s8 + $0x2da] sm:$0xff] }
 0x24f   : > { %16014 = vmatprep.mubr.msk.f32.mxu1 %vm459_vm3, %v2675_v40  ;;  %16894 = vmatprep.mubr.msk.f32.mxu0 %vm459_vm3, %v19751_v56  ;;  %v2680_v56 = vld [vmem:[%s18557_s8 + $0x15a] sm:$0xff]  ;;  %v13894_v40 = vld [vmem:[%s18557_s8 + $0xa9] sm:$0xff] }
 0x252   : > { %16015 = vmatmul.mubr.msk.f32.gmra.mrb[30].mxu1 %vm459_vm3, %v2676_v42  ;;  %16895 = vmatmul.mubr.msk.f32.gmra.mrb[94].mxu0 %vm459_vm3, %v19762_v60  ;;  %v2681_v60 = vld [vmem:[%s18557_s8 + $0x16a] sm:$0xff]  ;;  %v2719_v42 = vld [vmem:[%s18557_s8 + $0x2e2] sm:$0xff] }
 0x253   : > { %16017 = vmatprep.mubr.msk.f32.mxu1 %vm459_vm3, %v2677_v44  ;;  %16897 = vmatprep.mubr.msk.f32.mxu0 %vm459_vm3, %v19765_v0  ;;  %v2682_v0 = vld [vmem:[%s18557_s8 + $0x172] sm:$0xff] }
 0x254   : > { %v13895_v44 = vld [vmem:[%s18557_s8 + $0xb1] sm:$0xff] }
 0x256   : > { %16018 = vmatmul.mubr.msk.f32.gmra.mrb[32].mxu1 %vm459_vm3, %v2678_v48  ;;  %16898 = vmatmul.mubr.msk.f32.gmra.mrb[96].mxu0 %vm459_vm3, %v19776_v5  ;;  %v2683_v5 = vld [vmem:[%s18557_s8 + $0x17a] sm:$0xff]  ;;  %v2720_v48 = vld [vmem:[%s18557_s8 + $0x2ea] sm:$0xff] }
 0x257   : > { %16020 = vmatprep.mubr.msk.f32.mxu1 %vm459_vm3, %v2679_v52  ;;  %16900 = vmatprep.mubr.msk.f32.mxu0 %vm459_vm3, %v19779_v10  ;;  %v2684_v10 = vld [vmem:[%s18557_s8 + $0x182] sm:$0xff]  ;;  %v13896_v52 = vld [vmem:[%s18557_s8 + $0xb9] sm:$0xff] }
 0x25a   : > { %16021 = vmatmul.mubr.msk.f32.gmra.mrb[34].mxu1 %vm459_vm3, %v2680_v56  ;;  %16901 = vmatmul.mubr.msk.f32.gmra.mrb[98].mxu0 %vm459_vm3, %v19790_v14  ;;  %v2685_v14 = vld [vmem:[%s18557_s8 + $0x192] sm:$0xff]  ;;  %v2721_v56 = vld [vmem:[%s18557_s8 + $0x2fa] sm:$0xff] }
 0x25b   : > { %16023 = vmatprep.mubr.msk.f32.mxu1 %vm459_vm3, %v2681_v60  ;;  %16903 = vmatprep.mubr.msk.f32.mxu0 %vm459_vm3, %v19793_v18  ;;  %v2686_v18 = vld [vmem:[%s18557_s8 + $0x19a] sm:$0xff]  ;;  %v13897_v60 = vld [vmem:[%s18557_s8 + $0xc9] sm:$0xff] }
 0x25e   : > { %16024 = vmatmul.mubr.msk.f32.gmra.mrb[36].mxu1 %vm459_vm3, %v2682_v0  ;;  %16904 = vmatmul.mubr.msk.f32.gmra.mrb[100].mxu0 %vm459_vm3, %v19804_v23  ;;  %v2687_v23 = vld [vmem:[%s18557_s8 + $0x1a2] sm:$0xff] }
 0x25f   : > { %16026 = vmatprep.mubr.msk.f32.mxu1 %vm459_vm3, %v2683_v5  ;;  %16906 = vmatprep.mubr.msk.f32.mxu0 %vm459_vm3, %v19807_v28  ;;  %v2688_v28 = vld [vmem:[%s18557_s8 + $0x1aa] sm:$0xff]  ;;  %v2722_v0 = vld [vmem:[%s18557_s8 + $0x302] sm:$0xff] }
 0x260   : > { %v13898_v5 = vld [vmem:[%s18557_s8 + $0xd1] sm:$0xff] }
 0x262   : > { %16027 = vmatmul.mubr.msk.f32.gmra.mrb[38].mxu1 %vm459_vm3, %v2684_v10  ;;  %16907 = vmatmul.mubr.msk.f32.gmra.mrb[102].mxu0 %vm459_vm3, %v19818_v21  ;;  %v2689_v21 = vld [vmem:[%s18557_s8 + $0x1ba] sm:$0xff]  ;;  %v2723_v10 = vld [vmem:[%s18557_s8 + $0x30a] sm:$0xff] }
 0x263   : > { %16029 = vmatprep.mubr.msk.f32.mxu1 %vm459_vm3, %v2685_v14  ;;  %16909 = vmatprep.mubr.msk.f32.mxu0 %vm459_vm3, %v19821_v36  ;;  %v2690_v36 = vld [vmem:[%s18557_s8 + $0x1c2] sm:$0xff]  ;;  %v13899_v14 = vld [vmem:[%s18557_s8 + $0xd9] sm:$0xff] }
 0x266   : > { %16030 = vmatmul.mubr.msk.f32.gmra.mrb[40].mxu1 %vm459_vm3, %v2686_v18  ;;  %16910 = vmatmul.mubr.msk.f32.gmra.mrb[104].mxu0 %vm459_vm3, %v19832_v27  ;;  %v2691_v27 = vld [vmem:[%s18557_s8 + $0x1ca] sm:$0xff]  ;;  %v2724_v18 = vld [vmem:[%s18557_s8 + $0x312] sm:$0xff] }
 0x267   : > { %16032 = vmatprep.mubr.msk.f32.mxu1 %vm459_vm3, %v2687_v23  ;;  %16912 = vmatprep.mubr.msk.f32.mxu0 %vm459_vm3, %v19835_v43  ;;  %v2692_v43 = vld [vmem:[%s18557_s8 + $0x1d2] sm:$0xff]  ;;  %v13900_v23 = vld [vmem:[%s18557_s8 + $0xe1] sm:$0xff] }
 0x26a   : > { %16033 = vmatmul.mubr.msk.f32.gmra.mrb[42].mxu1 %vm459_vm3, %v2688_v28  ;;  %16913 = vmatmul.mubr.msk.f32.gmra.mrb[106].mxu0 %vm459_vm3, %v19846_v50  ;;  %v2693_v50 = vld [vmem:[%s18557_s8 + $0x1e2] sm:$0xff] }
 0x26b   : > { %16035 = vmatprep.mubr.msk.f32.mxu1 %vm459_vm3, %v2689_v21  ;;  %16915 = vmatprep.mubr.msk.f32.mxu0 %vm459_vm3, %v19849_v58  ;;  %v2694_v58 = vld [vmem:[%s18557_s8 + $0x1ea] sm:$0xff]  ;;  %v2725_v28 = vld [vmem:[%s18557_s8 + $0x322] sm:$0xff] }
 0x26c   : > { %v13901_v21 = vld [vmem:[%s18557_s8 + $0xf1] sm:$0xff] }
 0x26e   : > { %16036 = vmatmul.mubr.msk.f32.gmra.mrb[44].mxu1 %vm459_vm3, %v2690_v36  ;;  %16916 = vmatmul.mubr.msk.f32.gmra.mrb[108].mxu0 %vm459_vm3, %v19860_v2  ;;  %v2695_v2 = vld [vmem:[%s18557_s8 + $0x1f2] sm:$0xff]  ;;  %v2726_v36 = vld [vmem:[%s18557_s8 + $0x32a] sm:$0xff] }
 0x26f   : > { %16038 = vmatprep.mubr.msk.f32.mxu1 %vm459_vm3, %v2691_v27  ;;  %16918 = vmatprep.mubr.msk.f32.mxu0 %vm459_vm3, %v19863_v12  ;;  %v2696_v12 = vld [vmem:[%s18557_s8 + $0x1fa] sm:$0xff] }
 0x270   : > { %v13902_v27 = vld [vmem:[%s18557_s8 + $0xf9] sm:$0xff] }
 0x272   : > { %16039 = vmatmul.mubr.msk.f32.gmra.mrb[46].mxu1 %vm459_vm3, %v2692_v43  ;;  %16919 = vmatmul.mubr.msk.f32.gmra.mrb[110].mxu0 %vm459_vm3, %v19874_v20  ;;  %v2697_v20 = vld [vmem:[%s18557_s8 + $0x20a] sm:$0xff]  ;;  %v2727_v43 = vld [vmem:[%s18557_s8 + $0x332] sm:$0xff] }
 0x273   : > { %16041 = vmatprep.mubr.msk.f32.mxu1 %vm459_vm3, %v2693_v50  ;;  %16921 = vmatprep.mubr.msk.f32.mxu0 %vm459_vm3, %v19877_v30  ;;  %v2698_v30 = vld [vmem:[%s18557_s8 + $0x212] sm:$0xff]  ;;  %v13903_v50 = vld [vmem:[%s18557_s8 + $0x101] sm:$0xff] }
 0x276   : > { %16042 = vmatmul.mubr.msk.f32.gmra.mrb[48].mxu1 %vm459_vm3, %v2694_v58  ;;  %16922 = vmatmul.mubr.msk.f32.gmra.mrb[112].mxu0 %vm459_vm3, %v19888_v38  ;;  %v2699_v38 = vld [vmem:[%s18557_s8 + $0x21a] sm:$0xff] }
 0x277   : > { %16044 = vmatprep.mubr.msk.f32.mxu1 %vm459_vm3, %v2695_v2  ;;  %16924 = vmatprep.mubr.msk.f32.mxu0 %vm459_vm3, %v19891_v46  ;;  %v2700_v46 = vld [vmem:[%s18557_s8 + $0x222] sm:$0xff]  ;;  %v2728_v58 = vld [vmem:[%s18557_s8 + $0x33a] sm:$0xff] }
 0x278   : > { %v13904_v2 = vld [vmem:[%s18557_s8 + $0x109] sm:$0xff] }
 0x27a   : > { %16045 = vmatmul.mubr.msk.f32.gmra.mrb[50].mxu1 %vm459_vm3, %v2696_v12  ;;  %16925 = vmatmul.mubr.msk.f32.gmra.mrb[114].mxu0 %vm459_vm3, %v19902_v62  ;;  %v2701_v62 = vld [vmem:[%s18557_s8 + $0x232] sm:$0xff]  ;;  %v2729_v12 = vld [vmem:[%s18557_s8 + $0x34a] sm:$0xff] }
 0x27b   : > { %16047 = vmatprep.mubr.msk.f32.mxu1 %vm459_vm3, %v2697_v20  ;;  %16927 = vmatprep.mubr.msk.f32.mxu0 %vm459_vm3, %v19905_v16  ;;  %v13748_v16 = vld [vmem:[%s18557_s8 + $0x500] sm:$0xff] }
 0x27c   : > { %v13905_v20 = vld [vmem:[%s18557_s8 + $0x119] sm:$0xff] }
 0x27e   : > { %16048 = vmatmul.mubr.msk.f32.gmra.mrb[52].mxu1 %vm459_vm3, %v2698_v30  ;;  %16928 = vmatmul.mubr.msk.f32.gmra.mrb[116].mxu0 %vm459_vm3, %v19916_v33  ;;  %v2702_v33 = vld [vmem:[%s18557_s8 + $0x23a] sm:$0xff]  ;;  %v2730_v30 = vld [vmem:[%s18557_s8 + $0x352] sm:$0xff] }
 0x27f   : > { %16050 = vmatprep.mubr.msk.f32.mxu1 %vm459_vm3, %v2699_v38  ;;  %16930 = vmatprep.mubr.msk.f32.mxu0 %vm459_vm3, %v19919_v7  ;;  %v2703_v7 = vld [vmem:[%s18557_s8 + $0x242] sm:$0xff] }
 0x280   : > { %v13906_v38 = vld [vmem:[%s18557_s8 + $0x121] sm:$0xff] }
 0x282   : > { %16051 = vmatmul.mubr.msk.f32.gmra.mrb[54].mxu1 %vm459_vm3, %v2700_v46  ;;  %16931 = vmatmul.mubr.msk.f32.gmra.mrb[118].mxu0 %vm459_vm3, %v21852_v45  ;;  %v2731_v46 = vld [vmem:[%s18557_s8 + $0x35a] sm:$0xff]  ;;  %v13908_v45 = vld [vmem:[%s18557_s8 + $0x131] sm:$0xff] }
 0x283   : > { %16053 = vmatprep.mubr.msk.f32.mxu1 %vm459_vm3, %v2701_v62  ;;  %16933 = vmatprep.mubr.msk.f32.mxu0 %vm459_vm3, %v13748_v16  ;;  %v13907_v62 = vld [vmem:[%s18557_s8 + $0x129] sm:$0xff] }
 0x284   : > { %v2732_v16 = vld [vmem:[%s18557_s8 + $0x362] sm:$0xff] }
 0x286   : > { %16054 = vmatmul.mubr.msk.f32.gmra.mrb[56].mxu1 %vm459_vm3, %v2702_v33  ;;  %16934 = vmatmul.mubr.msk.f32.gmra.mrb[120].mxu0 %vm459_vm3, %v13749_v54  ;;  %v2733_v33 = vld [vmem:[%s18557_s8 + $0x372] sm:$0xff]  ;;  %v13909_v54 = vld [vmem:[%s18557_s8 + $0x141] sm:$0xff] }
 0x287   : > { %16056 = vmatprep.mubr.msk.f32.mxu1 %vm459_vm3, %v2703_v7  ;;  %16936 = vmatprep.mubr.msk.f32.mxu0 %vm459_vm3, %v13750_v34  ;;  %v2734_v7 = vld [vmem:[%s18557_s8 + $0x37a] sm:$0xff]  ;;  %v13910_v34 = vld [vmem:[%s18557_s8 + $0x149] sm:$0xff] }
 0x28a   : > { %16057 = vmatmul.mubr.msk.f32.gmra.mrb[58].mxu1 %vm459_vm3, %v2704_v47  ;;  %16937 = vmatmul.mubr.msk.f32.gmra.mrb[122].mxu0 %vm459_vm3, %v13751_v49  ;;  %v2735_v47 = vld [vmem:[%s18557_s8 + $0x382] sm:$0xff]  ;;  %v13911_v49 = vld [vmem:[%s18557_s8 + $0x151] sm:$0xff] }
 0x28b   : > { %16059 = vmatprep.mubr.msk.f32.mxu1 %vm459_vm3, %v2705_v51  ;;  %16939 = vmatprep.mubr.msk.f32.mxu0 %vm459_vm3, %v13752_v25  ;;  %v2736_v51 = vld [vmem:[%s18557_s8 + $0x38a] sm:$0xff]  ;;  %v13912_v25 = vld [vmem:[%s18557_s8 + $0x159] sm:$0xff] }
 0x28e   : > { %16060 = vmatmul.mubr.msk.f32.gmra.mrb[60].mxu1 %vm459_vm3, %v2706_v53  ;;  %16940 = vmatmul.mubr.msk.f32.gmra.mrb[124].mxu0 %vm459_vm3, %v13753_v55  ;;  %v2737_v53 = vld [vmem:[%s18557_s8 + $0x39a] sm:$0xff]  ;;  %v13913_v55 = vld [vmem:[%s18557_s8 + $0x169] sm:$0xff] }
 0x28f   : > { %16062 = vmatprep.mubr.msk.f32.mxu1 %vm459_vm3, %v2707_v57  ;;  %16942 = vmatprep.mubr.msk.f32.mxu0 %vm459_vm3, %v13754_v59  ;;  %v2738_v57 = vld [vmem:[%s18557_s8 + $0x3a2] sm:$0xff]  ;;  %v13914_v59 = vld [vmem:[%s18557_s8 + $0x171] sm:$0xff] }
 0x292   : > { %16063 = vmatmul.mubr.msk.f32.gmra.mrb[62].mxu1 %vm459_vm3, %v2708_v61  ;;  %16943 = vmatmul.mubr.msk.f32.gmra.mrb[126].mxu0 %vm459_vm3, %v13755_v63  ;;  %v2739_v61 = vld [vmem:[%s18557_s8 + $0x3aa] sm:$0xff]  ;;  %v13915_v63 = vld [vmem:[%s18557_s8 + $0x179] sm:$0xff] }
 0x293   : > { %16065 = vmatprep.mubr.msk.f32.mxu1 %vm459_vm3, %v2709_v1  ;;  %16949 = vmatprep.mubr.msk.f32.mxu0 %vm459_vm3, %v13885_v3  ;;  %v2740_v1 = vld [vmem:[%s18557_s8 + $0x3b2] sm:$0xff]  ;;  %v13916_v3 = vld [vmem:[%s18557_s8 + $0x181] sm:$0xff] }
 0x296   : > { %16066 = vmatmul.mubr.msk.f32.gmra.mrb[64].mxu1 %vm459_vm3, %v2710_v6  ;;  %16950 = vmatmul.mubr.msk.f32.vlgmr.msra.gmra.mrb[0].mxu0 %vm459_vm3, %v13886_v9  ;;  %v2741_v6 = vld [vmem:[%s18557_s8 + $0x3c2] sm:$0xff]  ;;  %v13917_v9 = vld [vmem:[%s18557_s8 + $0x191] sm:$0xff] }
 0x297   : > { %17390 = vmatpush3.bf16.msk.msra.mxu0 %vm18516_vm2, %v19948_v41  ;;  %16068 = vmatprep.mubr.msk.f32.mxu1 %vm459_vm3, %v2711_v11  ;;  %v2714_v41 = vld [vmem:[%s18557_s8 + $0x2b2] sm:$0xff]  ;;  %v2742_v11 = vld [vmem:[%s18557_s8 + $0x3ca] sm:$0xff] }
 0x298   : > { %16952 = vmatprep.mubr.msk.f32.mxu0 %vm459_vm3, %v13887_v13  ;;  %v13918_v13 = vld [vmem:[%s18557_s8 + $0x199] sm:$0xff] }
 0x29a   : > { %16069 = vmatmul.mubr.msk.f32.gmra.mrb[66].mxu1 %vm459_vm3, %v2712_v15  ;;  %16953 = vmatmul.mubr.msk.f32.gmra.mrb[2].mxu0 %vm459_vm3, %v13888_v17  ;;  %v2743_v15 = vld [vmem:[%s18557_s8 + $0x3d2] sm:$0xff]  ;;  %v13919_v17 = vld [vmem:[%s18557_s8 + $0x1a1] sm:$0xff] }
 0x29b   : > { %16071 = vmatprep.mubr.msk.f32.mxu1 %vm459_vm3, %v2713_v19  ;;  %16955 = vmatprep.mubr.msk.f32.mxu0 %vm459_vm3, %v13889_v22  ;;  %v2744_v19 = vld [vmem:[%s18557_s8 + $0x3da] sm:$0xff]  ;;  %v13920_v22 = vld [vmem:[%s18557_s8 + $0x1a9] sm:$0xff] }
 0x29e   : > { %16072 = vmatmul.mubr.msk.f32.gmra.mrb[68].mxu1 %vm459_vm3, %v2714_v41  ;;  %16956 = vmatmul.mubr.msk.f32.gmra.mrb[4].mxu0 %vm459_vm3, %v13890_v24  ;;  %v2745_v41 = vld [vmem:[%s18557_s8 + $0x3ea] sm:$0xff]  ;;  %v13921_v24 = vld [vmem:[%s18557_s8 + $0x1b9] sm:$0xff] }
 0x29f   : > { %16074 = vmatprep.mubr.msk.f32.mxu1 %vm459_vm3, %v2715_v26  ;;  %16958 = vmatprep.mubr.msk.f32.mxu0 %vm459_vm3, %v13891_v29  ;;  %v2746_v26 = vld [vmem:[%s18557_s8 + $0x3f2] sm:$0xff]  ;;  %v13922_v29 = vld [vmem:[%s18557_s8 + $0x1c1] sm:$0xff] }
 0x2a2   : > { %16075 = vmatmul.mubr.msk.f32.gmra.mrb[70].mxu1 %vm459_vm3, %v2716_v31  ;;  %16959 = vmatmul.mubr.msk.f32.gmra.mrb[6].mxu0 %vm459_vm3, %v13892_v32  ;;  %v2747_v31 = vld [vmem:[%s18557_s8 + $0x3fa] sm:$0xff]  ;;  %v13923_v32 = vld [vmem:[%s18557_s8 + $0x1c9] sm:$0xff] }
 0x2a3   : > { %16077 = vmatprep.mubr.msk.f32.mxu1 %vm459_vm3, %v2717_v35  ;;  %16961 = vmatprep.mubr.msk.f32.mxu0 %vm459_vm3, %v13893_v37  ;;  %v2748_v35 = vld [vmem:[%s18557_s8 + $0x402] sm:$0xff]  ;;  %v13924_v37 = vld [vmem:[%s18557_s8 + $0x1d1] sm:$0xff] }
 0x2a6   : > { %16078 = vmatmul.mubr.msk.f32.gmra.mrb[72].mxu1 %vm459_vm3, %v2718_v39  ;;  %16962 = vmatmul.mubr.msk.f32.gmra.mrb[8].mxu0 %vm459_vm3, %v13894_v40  ;;  %v2749_v39 = vld [vmem:[%s18557_s8 + $0x412] sm:$0xff]  ;;  %v13925_v40 = vld [vmem:[%s18557_s8 + $0x1e1] sm:$0xff] }
 0x2a7   : > { %16080 = vmatprep.mubr.msk.f32.mxu1 %vm459_vm3, %v2719_v42  ;;  %16964 = vmatprep.mubr.msk.f32.mxu0 %vm459_vm3, %v13895_v44  ;;  %v2750_v42 = vld [vmem:[%s18557_s8 + $0x41a] sm:$0xff]  ;;  %v13926_v44 = vld [vmem:[%s18557_s8 + $0x1e9] sm:$0xff] }
 0x2aa   : > { %16081 = vmatmul.mubr.msk.f32.gmra.mrb[74].mxu1 %vm459_vm3, %v2720_v48  ;;  %16965 = vmatmul.mubr.msk.f32.gmra.mrb[10].mxu0 %vm459_vm3, %v13896_v52  ;;  %v2751_v48 = vld [vmem:[%s18557_s8 + $0x422] sm:$0xff]  ;;  %v13927_v52 = vld [vmem:[%s18557_s8 + $0x1f1] sm:$0xff] }
 0x2ab   : > { %16083 = vmatprep.mubr.msk.f32.mxu1 %vm459_vm3, %v2721_v56  ;;  %16967 = vmatprep.mubr.msk.f32.mxu0 %vm459_vm3, %v13897_v60  ;;  %v2752_v56 = vld [vmem:[%s18557_s8 + $0x42a] sm:$0xff]  ;;  %v13928_v60 = vld [vmem:[%s18557_s8 + $0x1f9] sm:$0xff] }
 0x2ae   : > { %16084 = vmatmul.mubr.msk.f32.gmra.mrb[76].mxu1 %vm459_vm3, %v2722_v0  ;;  %16968 = vmatmul.mubr.msk.f32.gmra.mrb[12].mxu0 %vm459_vm3, %v13898_v5  ;;  %v2753_v0 = vld [vmem:[%s18557_s8 + $0x43a] sm:$0xff]  ;;  %v13929_v5 = vld [vmem:[%s18557_s8 + $0x209] sm:$0xff] }
 0x2af   : > { %16086 = vmatprep.mubr.msk.f32.mxu1 %vm459_vm3, %v2723_v10  ;;  %16970 = vmatprep.mubr.msk.f32.mxu0 %vm459_vm3, %v13899_v14  ;;  %v2754_v10 = vld [vmem:[%s18557_s8 + $0x442] sm:$0xff]  ;;  %v13930_v14 = vld [vmem:[%s18557_s8 + $0x211] sm:$0xff] }
 0x2b2   : > { %16087 = vmatmul.mubr.msk.f32.gmra.mrb[78].mxu1 %vm459_vm3, %v2724_v18  ;;  %16971 = vmatmul.mubr.msk.f32.gmra.mrb[14].mxu0 %vm459_vm3, %v13900_v23  ;;  %v2755_v18 = vld [vmem:[%s18557_s8 + $0x44a] sm:$0xff]  ;;  %v13931_v23 = vld [vmem:[%s18557_s8 + $0x219] sm:$0xff] }
 0x2b3   : > { %16089 = vmatprep.mubr.msk.f32.mxu1 %vm459_vm3, %v2725_v28  ;;  %16973 = vmatprep.mubr.msk.f32.mxu0 %vm459_vm3, %v13901_v21  ;;  %v2756_v28 = vld [vmem:[%s18557_s8 + $0x452] sm:$0xff]  ;;  %v13932_v21 = vld [vmem:[%s18557_s8 + $0x221] sm:$0xff] }
 0x2b6   : > { %16090 = vmatmul.mubr.msk.f32.gmra.mrb[80].mxu1 %vm459_vm3, %v2726_v36  ;;  %16974 = vmatmul.mubr.msk.f32.gmra.mrb[16].mxu0 %vm459_vm3, %v13902_v27  ;;  %v2757_v36 = vld [vmem:[%s18557_s8 + $0x462] sm:$0xff]  ;;  %v13933_v27 = vld [vmem:[%s18557_s8 + $0x231] sm:$0xff] }
 0x2b7   : > { %16092 = vmatprep.mubr.msk.f32.mxu1 %vm459_vm3, %v2727_v43  ;;  %16976 = vmatprep.mubr.msk.f32.mxu0 %vm459_vm3, %v13903_v50  ;;  %v2758_v43 = vld [vmem:[%s18557_s8 + $0x46a] sm:$0xff]  ;;  %v13934_v50 = vld [vmem:[%s18557_s8 + $0x239] sm:$0xff] }
 0x2ba   : > { %16093 = vmatmul.mubr.msk.f32.gmra.mrb[82].mxu1 %vm459_vm3, %v2728_v58  ;;  %16977 = vmatmul.mubr.msk.f32.gmra.mrb[18].mxu0 %vm459_vm3, %v13904_v2  ;;  %v2759_v58 = vld [vmem:[%s18557_s8 + $0x472] sm:$0xff]  ;;  %v13935_v2 = vld [vmem:[%s18557_s8 + $0x241] sm:$0xff] }
 0x2bb   : > { %16095 = vmatprep.mubr.msk.f32.mxu1 %vm459_vm3, %v2729_v12  ;;  %16979 = vmatprep.mubr.msk.f32.mxu0 %vm459_vm3, %v13905_v20  ;;  %v2760_v12 = vld [vmem:[%s18557_s8 + $0x47a] sm:$0xff]  ;;  %v13936_v20 = vld [vmem:[%s18557_s8 + $0x249] sm:$0xff] }
 0x2be   : > { %16096 = vmatmul.mubr.msk.f32.gmra.mrb[84].mxu1 %vm459_vm3, %v2730_v30  ;;  %16980 = vmatmul.mubr.msk.f32.gmra.mrb[20].mxu0 %vm459_vm3, %v13906_v38  ;;  %v2761_v30 = vld [vmem:[%s18557_s8 + $0x48a] sm:$0xff]  ;;  %v13937_v38 = vld [vmem:[%s18557_s8 + $0x259] sm:$0xff] }
 0x2bf   : > { %16098 = vmatprep.mubr.msk.f32.mxu1 %vm459_vm3, %v2731_v46  ;;  %16982 = vmatprep.mubr.msk.f32.mxu0 %vm459_vm3, %v13907_v62  ;;  %v2762_v46 = vld [vmem:[%s18557_s8 + $0x492] sm:$0xff]  ;;  %v13938_v62 = vld [vmem:[%s18557_s8 + $0x261] sm:$0xff] }
 0x2c2   : > { %16099 = vmatmul.mubr.msk.f32.gmra.mrb[86].mxu1 %vm459_vm3, %v2732_v16  ;;  %16983 = vmatmul.mubr.msk.f32.gmra.mrb[22].mxu0 %vm459_vm3, %v13908_v45  ;;  %v2763_v16 = vld [vmem:[%s18557_s8 + $0x49a] sm:$0xff]  ;;  %v13939_v45 = vld [vmem:[%s18557_s8 + $0x269] sm:$0xff] }
 0x2c3   : > { %16101 = vmatprep.mubr.msk.f32.mxu1 %vm459_vm3, %v2733_v33  ;;  %16985 = vmatprep.mubr.msk.f32.mxu0 %vm459_vm3, %v13909_v54  ;;  %v2764_v33 = vld [vmem:[%s18557_s8 + $0x4a2] sm:$0xff]  ;;  %v13940_v54 = vld [vmem:[%s18557_s8 + $0x271] sm:$0xff] }
 0x2c6   : > { %16102 = vmatmul.mubr.msk.f32.gmra.mrb[88].mxu1 %vm459_vm3, %v2734_v7  ;;  %16986 = vmatmul.mubr.msk.f32.gmra.mrb[24].mxu0 %vm459_vm3, %v13910_v34  ;;  %v2765_v7 = vld [vmem:[%s18557_s8 + $0x4b2] sm:$0xff]  ;;  %v13941_v34 = vld [vmem:[%s18557_s8 + $0x281] sm:$0xff] }
 0x2c7   : > { %16104 = vmatprep.mubr.msk.f32.mxu1 %vm459_vm3, %v2735_v47  ;;  %16988 = vmatprep.mubr.msk.f32.mxu0 %vm459_vm3, %v13911_v49  ;;  %v2766_v47 = vld [vmem:[%s18557_s8 + $0x4ba] sm:$0xff]  ;;  %v13942_v49 = vld [vmem:[%s18557_s8 + $0x289] sm:$0xff] }
 0x2ca   : > { %16105 = vmatmul.mubr.msk.f32.gmra.mrb[90].mxu1 %vm459_vm3, %v2736_v51  ;;  %16989 = vmatmul.mubr.msk.f32.gmra.mrb[26].mxu0 %vm459_vm3, %v13912_v25  ;;  %v2767_v51 = vld [vmem:[%s18557_s8 + $0x4c2] sm:$0xff]  ;;  %v13943_v25 = vld [vmem:[%s18557_s8 + $0x291] sm:$0xff] }
 0x2cb   : > { %16107 = vmatprep.mubr.msk.f32.mxu1 %vm459_vm3, %v2737_v53  ;;  %16991 = vmatprep.mubr.msk.f32.mxu0 %vm459_vm3, %v13913_v55  ;;  %v2768_v53 = vld [vmem:[%s18557_s8 + $0x4ca] sm:$0xff]  ;;  %v13944_v55 = vld [vmem:[%s18557_s8 + $0x299] sm:$0xff] }
 0x2ce   : > { %16108 = vmatmul.mubr.msk.f32.gmra.mrb[92].mxu1 %vm459_vm3, %v2738_v57  ;;  %16992 = vmatmul.mubr.msk.f32.gmra.mrb[28].mxu0 %vm459_vm3, %v13914_v59  ;;  %v2769_v57 = vld [vmem:[%s18557_s8 + $0x4da] sm:$0xff]  ;;  %v13945_v59 = vld [vmem:[%s18557_s8 + $0x2a9] sm:$0xff] }
 0x2cf   : > { %16110 = vmatprep.mubr.msk.f32.mxu1 %vm459_vm3, %v2739_v61  ;;  %16994 = vmatprep.mubr.msk.f32.mxu0 %vm459_vm3, %v13915_v63  ;;  %v2770_v61 = vld [vmem:[%s18557_s8 + $0x4e2] sm:$0xff]  ;;  %v13946_v63 = vld [vmem:[%s18557_s8 + $0x2b1] sm:$0xff] }
 0x2d2   : > { %16111 = vmatmul.mubr.msk.f32.gmra.mrb[94].mxu1 %vm459_vm3, %v2740_v1  ;;  %16995 = vmatmul.mubr.msk.f32.gmra.mrb[30].mxu0 %vm459_vm3, %v13916_v3  ;;  %v2771_v1 = vld [vmem:[%s18557_s8 + $0x4ea] sm:$0xff]  ;;  %v13947_v3 = vld [vmem:[%s18557_s8 + $0x2b9] sm:$0xff] }
 0x2d3   : > { %16113 = vmatprep.mubr.msk.f32.mxu1 %vm459_vm3, %v2741_v6  ;;  %16997 = vmatprep.mubr.msk.f32.mxu0 %vm459_vm3, %v13917_v9  ;;  %v2772_v6 = vld [vmem:[%s18557_s8 + $0x4f2] sm:$0xff]  ;;  %v13948_v9 = vld [vmem:[%s18557_s8 + $0x2c1] sm:$0xff] }
 0x2d6   : > { %16114 = vmatmul.mubr.msk.f32.gmra.mrb[96].mxu1 %vm459_vm3, %v2742_v11  ;;  %16998 = vmatmul.mubr.msk.f32.gmra.mrb[32].mxu0 %vm459_vm3, %v13918_v13  ;;  %v12857_v11 = vld [vmem:[%s18557_s8 + $0x28] sm:$0xff]  ;;  %v13949_v13 = vld [vmem:[%s18557_s8 + $0x2d1] sm:$0xff] }
 0x2d7   : > { %16116 = vmatprep.mubr.msk.f32.mxu1 %vm459_vm3, %v2743_v15  ;;  %17000 = vmatprep.mubr.msk.f32.mxu0 %vm459_vm3, %v13919_v17  ;;  %v12858_v15 = vld [vmem:[%s18557_s8 + $0x30] sm:$0xff]  ;;  %v13950_v17 = vld [vmem:[%s18557_s8 + $0x2d9] sm:$0xff] }
 0x2da   : > { %16117 = vmatmul.mubr.msk.f32.gmra.mrb[98].mxu1 %vm459_vm3, %v2744_v19  ;;  %17001 = vmatmul.mubr.msk.f32.gmra.mrb[34].mxu0 %vm459_vm3, %v13920_v22  ;;  %v12859_v19 = vld [vmem:[%s18557_s8 + $0x38] sm:$0xff]  ;;  %v13951_v22 = vld [vmem:[%s18557_s8 + $0x2e1] sm:$0xff] }
 0x2db   : > { %16119 = vmatprep.mubr.msk.f32.mxu1 %vm459_vm3, %v2745_v41  ;;  %17003 = vmatprep.mubr.msk.f32.mxu0 %vm459_vm3, %v13921_v24  ;;  %v12860_v41 = vld [vmem:[%s18557_s8 + $0x40] sm:$0xff]  ;;  %v13952_v24 = vld [vmem:[%s18557_s8 + $0x2e9] sm:$0xff] }
 0x2de   : > { %16120 = vmatmul.mubr.msk.f32.gmra.mrb[100].mxu1 %vm459_vm3, %v2746_v26  ;;  %17004 = vmatmul.mubr.msk.f32.gmra.mrb[36].mxu0 %vm459_vm3, %v13922_v29  ;;  %v12861_v26 = vld [vmem:[%s18557_s8 + $0x50] sm:$0xff]  ;;  %v13953_v29 = vld [vmem:[%s18557_s8 + $0x2f9] sm:$0xff] }
 0x2df   : > { %16122 = vmatprep.mubr.msk.f32.mxu1 %vm459_vm3, %v2747_v31  ;;  %17006 = vmatprep.mubr.msk.f32.mxu0 %vm459_vm3, %v13923_v32  ;;  %v12863_v31 = vld [vmem:[%s18557_s8 + $0x60] sm:$0xff]  ;;  %v13955_v32 = vld [vmem:[%s18557_s8 + $0x309] sm:$0xff] }
 0x2e2   : > { %16123 = vmatmul.mubr.msk.f32.gmra.mrb[102].mxu1 %vm459_vm3, %v2748_v35  ;;  %17007 = vmatmul.mubr.msk.f32.gmra.mrb[38].mxu0 %vm459_vm3, %v13924_v37  ;;  %v12864_v35 = vld [vmem:[%s18557_s8 + $0x68] sm:$0xff]  ;;  %v13956_v37 = vld [vmem:[%s18557_s8 + $0x311] sm:$0xff] }
 0x2e3   : > { %16125 = vmatprep.mubr.msk.f32.mxu1 %vm459_vm3, %v2749_v39  ;;  %17009 = vmatprep.mubr.msk.f32.mxu0 %vm459_vm3, %v13925_v40  ;;  %v12865_v39 = vld [vmem:[%s18557_s8 + $0x78] sm:$0xff]  ;;  %v13957_v40 = vld [vmem:[%s18557_s8 + $0x321] sm:$0xff] }
 0x2e6   : > { %16126 = vmatmul.mubr.msk.f32.gmra.mrb[104].mxu1 %vm459_vm3, %v2750_v42  ;;  %17010 = vmatmul.mubr.msk.f32.gmra.mrb[40].mxu0 %vm459_vm3, %v13926_v44  ;;  %v12866_v42 = vld [vmem:[%s18557_s8 + $0x80] sm:$0xff]  ;;  %v13958_v44 = vld [vmem:[%s18557_s8 + $0x329] sm:$0xff] }
 0x2e7   : > { %16128 = vmatprep.mubr.msk.f32.mxu1 %vm459_vm3, %v2751_v48  ;;  %17012 = vmatprep.mubr.msk.f32.mxu0 %vm459_vm3, %v13927_v52  ;;  %v12867_v48 = vld [vmem:[%s18557_s8 + $0x88] sm:$0xff]  ;;  %v13959_v52 = vld [vmem:[%s18557_s8 + $0x331] sm:$0xff] }
 0x2ea   : > { %16129 = vmatmul.mubr.msk.f32.gmra.mrb[106].mxu1 %vm459_vm3, %v2752_v56  ;;  %17013 = vmatmul.mubr.msk.f32.gmra.mrb[42].mxu0 %vm459_vm3, %v13928_v60  ;;  %v12868_v56 = vld [vmem:[%s18557_s8 + $0x90] sm:$0xff]  ;;  %v13960_v60 = vld [vmem:[%s18557_s8 + $0x339] sm:$0xff] }
 0x2eb   : > { %16131 = vmatprep.mubr.msk.f32.mxu1 %vm459_vm3, %v2753_v0  ;;  %17015 = vmatprep.mubr.msk.f32.mxu0 %vm459_vm3, %v13929_v5  ;;  %v12869_v0 = vld [vmem:[%s18557_s8 + $0xa0] sm:$0xff]  ;;  %v13961_v5 = vld [vmem:[%s18557_s8 + $0x349] sm:$0xff] }
 0x2ee   : > { %16132 = vmatmul.mubr.msk.f32.gmra.mrb[108].mxu1 %vm459_vm3, %v2754_v10  ;;  %17016 = vmatmul.mubr.msk.f32.gmra.mrb[44].mxu0 %vm459_vm3, %v13930_v14  ;;  %v12870_v10 = vld [vmem:[%s18557_s8 + $0xa8] sm:$0xff]  ;;  %v13962_v14 = vld [vmem:[%s18557_s8 + $0x351] sm:$0xff] }
 0x2ef   : > { %16134 = vmatprep.mubr.msk.f32.mxu1 %vm459_vm3, %v2755_v18  ;;  %17018 = vmatprep.mubr.msk.f32.mxu0 %vm459_vm3, %v13931_v23  ;;  %v12871_v18 = vld [vmem:[%s18557_s8 + $0xb0] sm:$0xff]  ;;  %v13963_v23 = vld [vmem:[%s18557_s8 + $0x359] sm:$0xff] }
 0x2f2   : > { %16135 = vmatmul.mubr.msk.f32.gmra.mrb[110].mxu1 %vm459_vm3, %v2756_v28  ;;  %17019 = vmatmul.mubr.msk.f32.gmra.mrb[46].mxu0 %vm459_vm3, %v13932_v21  ;;  %v12872_v28 = vld [vmem:[%s18557_s8 + $0xb8] sm:$0xff]  ;;  %v13964_v21 = vld [vmem:[%s18557_s8 + $0x361] sm:$0xff] }
 0x2f3   : > { %16137 = vmatprep.mubr.msk.f32.mxu1 %vm459_vm3, %v2757_v36  ;;  %17021 = vmatprep.mubr.msk.f32.mxu0 %vm459_vm3, %v13933_v27  ;;  %v12873_v36 = vld [vmem:[%s18557_s8 + $0xc8] sm:$0xff]  ;;  %v13965_v27 = vld [vmem:[%s18557_s8 + $0x371] sm:$0xff] }
 0x2f6   : > { %16138 = vmatmul.mubr.msk.f32.gmra.mrb[112].mxu1 %vm459_vm3, %v2758_v43  ;;  %17022 = vmatmul.mubr.msk.f32.gmra.mrb[48].mxu0 %vm459_vm3, %v13934_v50  ;;  %v12874_v43 = vld [vmem:[%s18557_s8 + $0xd0] sm:$0xff]  ;;  %v13966_v50 = vld [vmem:[%s18557_s8 + $0x379] sm:$0xff] }
 0x2f7   : > { %16140 = vmatprep.mubr.msk.f32.mxu1 %vm459_vm3, %v2759_v58  ;;  %17024 = vmatprep.mubr.msk.f32.mxu0 %vm459_vm3, %v13935_v2  ;;  %v12875_v58 = vld [vmem:[%s18557_s8 + $0xd8] sm:$0xff]  ;;  %v13967_v2 = vld [vmem:[%s18557_s8 + $0x381] sm:$0xff] }
 0x2fa   : > { %16141 = vmatmul.mubr.msk.f32.gmra.mrb[114].mxu1 %vm459_vm3, %v2760_v12  ;;  %17025 = vmatmul.mubr.msk.f32.gmra.mrb[50].mxu0 %vm459_vm3, %v13936_v20  ;;  %v12876_v12 = vld [vmem:[%s18557_s8 + $0xe0] sm:$0xff]  ;;  %v13968_v20 = vld [vmem:[%s18557_s8 + $0x389] sm:$0xff] }
 0x2fb   : > { %16143 = vmatprep.mubr.msk.f32.mxu1 %vm459_vm3, %v2761_v30  ;;  %17027 = vmatprep.mubr.msk.f32.mxu0 %vm459_vm3, %v13937_v38  ;;  %v12877_v30 = vld [vmem:[%s18557_s8 + $0xf0] sm:$0xff]  ;;  %v13969_v38 = vld [vmem:[%s18557_s8 + $0x399] sm:$0xff] }
 0x2fe   : > { %16144 = vmatmul.mubr.msk.f32.gmra.mrb[116].mxu1 %vm459_vm3, %v2762_v46  ;;  %17028 = vmatmul.mubr.msk.f32.gmra.mrb[52].mxu0 %vm459_vm3, %v13938_v62  ;;  %v12878_v46 = vld [vmem:[%s18557_s8 + $0xf8] sm:$0xff]  ;;  %v13970_v62 = vld [vmem:[%s18557_s8 + $0x3a1] sm:$0xff] }
 0x2ff   : > { %16146 = vmatprep.mubr.msk.f32.mxu1 %vm459_vm3, %v2763_v16  ;;  %17030 = vmatprep.mubr.msk.f32.mxu0 %vm459_vm3, %v13939_v45  ;;  %v12879_v16 = vld [vmem:[%s18557_s8 + $0x100] sm:$0xff]  ;;  %v13971_v45 = vld [vmem:[%s18557_s8 + $0x3a9] sm:$0xff] }
 0x302   : > { %16147 = vmatmul.mubr.msk.f32.gmra.mrb[118].mxu1 %vm459_vm3, %v2764_v33  ;;  %17031 = vmatmul.mubr.msk.f32.gmra.mrb[54].mxu0 %vm459_vm3, %v13940_v54  ;;  %v12880_v33 = vld [vmem:[%s18557_s8 + $0x108] sm:$0xff]  ;;  %v13972_v54 = vld [vmem:[%s18557_s8 + $0x3b1] sm:$0xff] }
 0x303   : > { %16149 = vmatprep.mubr.msk.f32.mxu1 %vm459_vm3, %v2765_v7  ;;  %17033 = vmatprep.mubr.msk.f32.mxu0 %vm459_vm3, %v13941_v34  ;;  %v12881_v7 = vld [vmem:[%s18557_s8 + $0x118] sm:$0xff]  ;;  %v13973_v34 = vld [vmem:[%s18557_s8 + $0x3c1] sm:$0xff] }
 0x306   : > { %16150 = vmatmul.mubr.msk.f32.gmra.mrb[120].mxu1 %vm459_vm3, %v2766_v47  ;;  %17034 = vmatmul.mubr.msk.f32.gmra.mrb[56].mxu0 %vm459_vm3, %v13942_v49  ;;  %v12882_v47 = vld [vmem:[%s18557_s8 + $0x120] sm:$0xff]  ;;  %v13974_v49 = vld [vmem:[%s18557_s8 + $0x3c9] sm:$0xff] }
 0x307   : > { %16152 = vmatprep.mubr.msk.f32.mxu1 %vm459_vm3, %v2767_v51  ;;  %17036 = vmatprep.mubr.msk.f32.mxu0 %vm459_vm3, %v13943_v25  ;;  %v12883_v51 = vld [vmem:[%s18557_s8 + $0x128] sm:$0xff]  ;;  %v13975_v25 = vld [vmem:[%s18557_s8 + $0x3d1] sm:$0xff] }
 0x30a   : > { %16153 = vmatmul.mubr.msk.f32.gmra.mrb[122].mxu1 %vm459_vm3, %v2768_v53  ;;  %17037 = vmatmul.mubr.msk.f32.gmra.mrb[58].mxu0 %vm459_vm3, %v13944_v55  ;;  %v12884_v53 = vld [vmem:[%s18557_s8 + $0x130] sm:$0xff]  ;;  %v13976_v55 = vld [vmem:[%s18557_s8 + $0x3d9] sm:$0xff] }
 0x30b   : > { %16155 = vmatprep.mubr.msk.f32.mxu1 %vm459_vm3, %v2769_v57  ;;  %17039 = vmatprep.mubr.msk.f32.mxu0 %vm459_vm3, %v13945_v59  ;;  %v12885_v57 = vld [vmem:[%s18557_s8 + $0x140] sm:$0xff]  ;;  %v13977_v59 = vld [vmem:[%s18557_s8 + $0x3e9] sm:$0xff] }
 0x30e   : > { %16156 = vmatmul.mubr.msk.f32.gmra.mrb[124].mxu1 %vm459_vm3, %v2770_v61  ;;  %17040 = vmatmul.mubr.msk.f32.gmra.mrb[60].mxu0 %vm459_vm3, %v13946_v63  ;;  %v12886_v61 = vld [vmem:[%s18557_s8 + $0x148] sm:$0xff]  ;;  %v13978_v63 = vld [vmem:[%s18557_s8 + $0x3f1] sm:$0xff] }
 0x30f   : > { %16158 = vmatprep.mubr.msk.f32.mxu1 %vm459_vm3, %v2771_v1  ;;  %17042 = vmatprep.mubr.msk.f32.mxu0 %vm459_vm3, %v13947_v3  ;;  %v12887_v1 = vld [vmem:[%s18557_s8 + $0x150] sm:$0xff]  ;;  %v13979_v3 = vld [vmem:[%s18557_s8 + $0x3f9] sm:$0xff] }
 0x312   : > { %16159 = vmatmul.mubr.msk.f32.gmra.mrb[126].mxu1 %vm459_vm3, %v2772_v6  ;;  %17043 = vmatmul.mubr.msk.f32.gmra.mrb[62].mxu0 %vm459_vm3, %v13948_v9  ;;  %v12888_v6 = vld [vmem:[%s18557_s8 + $0x158] sm:$0xff]  ;;  %v13980_v9 = vld [vmem:[%s18557_s8 + $0x401] sm:$0xff] }
 0x313   : > { %16165 = vmatprep.mubr.msk.f32.mxu1 %vm459_vm3, %v12857_v11  ;;  %17045 = vmatprep.mubr.msk.f32.mxu0 %vm459_vm3, %v13949_v13  ;;  %v12889_v11 = vld [vmem:[%s18557_s8 + $0x168] sm:$0xff]  ;;  %v13981_v13 = vld [vmem:[%s18557_s8 + $0x411] sm:$0xff] }
 0x316   : > { %16166 = vmatmul.mubr.msk.f32.vlgmr.msra.gmra.mrb[0].mxu1 %vm459_vm3, %v12858_v15  ;;  %17046 = vmatmul.mubr.msk.f32.gmra.mrb[64].mxu0 %vm459_vm3, %v13950_v17  ;;  %v12890_v15 = vld [vmem:[%s18557_s8 + $0x170] sm:$0xff]  ;;  %v13982_v17 = vld [vmem:[%s18557_s8 + $0x419] sm:$0xff] }
 0x317   : > { %17392 = vmatpush3.bf16.msk.msra.mxu1 %vm18516_vm2, %v21851_v8  ;;  %16168 = vmatprep.mubr.msk.f32.mxu1 %vm459_vm3, %v12859_v19  ;;  %v13954_v8 = vld [vmem:[%s18557_s8 + $0x301] sm:$0xff]  ;;  %v12891_v19 = vld [vmem:[%s18557_s8 + $0x178] sm:$0xff] }
 0x318   : > { %17048 = vmatprep.mubr.msk.f32.mxu0 %vm459_vm3, %v13951_v22  ;;  %v13983_v22 = vld [vmem:[%s18557_s8 + $0x421] sm:$0xff] }
 0x31a   : > { %16169 = vmatmul.mubr.msk.f32.gmra.mrb[2].mxu1 %vm459_vm3, %v12860_v41  ;;  %17049 = vmatmul.mubr.msk.f32.gmra.mrb[66].mxu0 %vm459_vm3, %v13952_v24  ;;  %v12892_v41 = vld [vmem:[%s18557_s8 + $0x180] sm:$0xff]  ;;  %v13984_v24 = vld [vmem:[%s18557_s8 + $0x429] sm:$0xff] }
 0x31b   : > { %16171 = vmatprep.mubr.msk.f32.mxu1 %vm459_vm3, %v12861_v26  ;;  %17051 = vmatprep.mubr.msk.f32.mxu0 %vm459_vm3, %v13953_v29  ;;  %v12893_v26 = vld [vmem:[%s18557_s8 + $0x190] sm:$0xff]  ;;  %v13985_v29 = vld [vmem:[%s18557_s8 + $0x439] sm:$0xff] }
 0x31e   : > { %16172 = vmatmul.mubr.msk.f32.gmra.mrb[4].mxu1 %vm459_vm3, %v12862_v4  ;;  %17052 = vmatmul.mubr.msk.f32.gmra.mrb[68].mxu0 %vm459_vm3, %v13954_v8  ;;  %v12894_v4 = vld [vmem:[%s18557_s8 + $0x198] sm:$0xff]  ;;  %v13986_v8 = vld [vmem:[%s18557_s8 + $0x441] sm:$0xff] }
 0x31f   : > { %16174 = vmatprep.mubr.msk.f32.mxu1 %vm459_vm3, %v12863_v31  ;;  %17054 = vmatprep.mubr.msk.f32.mxu0 %vm459_vm3, %v13955_v32  ;;  %v12895_v31 = vld [vmem:[%s18557_s8 + $0x1a0] sm:$0xff]  ;;  %v13987_v32 = vld [vmem:[%s18557_s8 + $0x449] sm:$0xff] }
 0x322   : > { %16175 = vmatmul.mubr.msk.f32.gmra.mrb[6].mxu1 %vm459_vm3, %v12864_v35  ;;  %17055 = vmatmul.mubr.msk.f32.gmra.mrb[70].mxu0 %vm459_vm3, %v13956_v37  ;;  %v12896_v35 = vld [vmem:[%s18557_s8 + $0x1a8] sm:$0xff]  ;;  %v13988_v37 = vld [vmem:[%s18557_s8 + $0x451] sm:$0xff] }
 0x323   : > { %16177 = vmatprep.mubr.msk.f32.mxu1 %vm459_vm3, %v12865_v39  ;;  %17057 = vmatprep.mubr.msk.f32.mxu0 %vm459_vm3, %v13957_v40  ;;  %v12897_v39 = vld [vmem:[%s18557_s8 + $0x1b8] sm:$0xff]  ;;  %v13989_v40 = vld [vmem:[%s18557_s8 + $0x461] sm:$0xff] }
 0x326   : > { %16178 = vmatmul.mubr.msk.f32.gmra.mrb[8].mxu1 %vm459_vm3, %v12866_v42  ;;  %17058 = vmatmul.mubr.msk.f32.gmra.mrb[72].mxu0 %vm459_vm3, %v13958_v44  ;;  %v12898_v42 = vld [vmem:[%s18557_s8 + $0x1c0] sm:$0xff]  ;;  %v13990_v44 = vld [vmem:[%s18557_s8 + $0x469] sm:$0xff] }
 0x327   : > { %16180 = vmatprep.mubr.msk.f32.mxu1 %vm459_vm3, %v12867_v48  ;;  %17060 = vmatprep.mubr.msk.f32.mxu0 %vm459_vm3, %v13959_v52  ;;  %v12899_v48 = vld [vmem:[%s18557_s8 + $0x1c8] sm:$0xff]  ;;  %v13991_v52 = vld [vmem:[%s18557_s8 + $0x471] sm:$0xff] }
 0x32a   : > { %16181 = vmatmul.mubr.msk.f32.gmra.mrb[10].mxu1 %vm459_vm3, %v12868_v56  ;;  %17061 = vmatmul.mubr.msk.f32.gmra.mrb[74].mxu0 %vm459_vm3, %v13960_v60  ;;  %v12900_v56 = vld [vmem:[%s18557_s8 + $0x1d0] sm:$0xff]  ;;  %v13992_v60 = vld [vmem:[%s18557_s8 + $0x479] sm:$0xff] }
 0x32b   : > { %16183 = vmatprep.mubr.msk.f32.mxu1 %vm459_vm3, %v12869_v0  ;;  %17063 = vmatprep.mubr.msk.f32.mxu0 %vm459_vm3, %v13961_v5  ;;  %v12901_v0 = vld [vmem:[%s18557_s8 + $0x1e0] sm:$0xff]  ;;  %v13993_v5 = vld [vmem:[%s18557_s8 + $0x489] sm:$0xff] }
 0x32e   : > { %16184 = vmatmul.mubr.msk.f32.gmra.mrb[12].mxu1 %vm459_vm3, %v12870_v10  ;;  %17064 = vmatmul.mubr.msk.f32.gmra.mrb[76].mxu0 %vm459_vm3, %v13962_v14  ;;  %v12902_v10 = vld [vmem:[%s18557_s8 + $0x1e8] sm:$0xff]  ;;  %v13994_v14 = vld [vmem:[%s18557_s8 + $0x491] sm:$0xff] }
 0x32f   : > { %16186 = vmatprep.mubr.msk.f32.mxu1 %vm459_vm3, %v12871_v18  ;;  %17066 = vmatprep.mubr.msk.f32.mxu0 %vm459_vm3, %v13963_v23  ;;  %v12903_v18 = vld [vmem:[%s18557_s8 + $0x1f0] sm:$0xff]  ;;  %v13995_v23 = vld [vmem:[%s18557_s8 + $0x499] sm:$0xff] }
 0x332   : > { %16187 = vmatmul.mubr.msk.f32.gmra.mrb[14].mxu1 %vm459_vm3, %v12872_v28  ;;  %17067 = vmatmul.mubr.msk.f32.gmra.mrb[78].mxu0 %vm459_vm3, %v13964_v21  ;;  %v12904_v28 = vld [vmem:[%s18557_s8 + $0x1f8] sm:$0xff]  ;;  %v13996_v21 = vld [vmem:[%s18557_s8 + $0x4a1] sm:$0xff] }
 0x333   : > { %16189 = vmatprep.mubr.msk.f32.mxu1 %vm459_vm3, %v12873_v36  ;;  %17069 = vmatprep.mubr.msk.f32.mxu0 %vm459_vm3, %v13965_v27  ;;  %v12905_v36 = vld [vmem:[%s18557_s8 + $0x208] sm:$0xff]  ;;  %v13997_v27 = vld [vmem:[%s18557_s8 + $0x4b1] sm:$0xff] }
 0x336   : > { %16190 = vmatmul.mubr.msk.f32.gmra.mrb[16].mxu1 %vm459_vm3, %v12874_v43  ;;  %17070 = vmatmul.mubr.msk.f32.gmra.mrb[80].mxu0 %vm459_vm3, %v13966_v50  ;;  %v12906_v43 = vld [vmem:[%s18557_s8 + $0x210] sm:$0xff]  ;;  %v13998_v50 = vld [vmem:[%s18557_s8 + $0x4b9] sm:$0xff] }
 0x337   : > { %16192 = vmatprep.mubr.msk.f32.mxu1 %vm459_vm3, %v12875_v58  ;;  %17072 = vmatprep.mubr.msk.f32.mxu0 %vm459_vm3, %v13967_v2  ;;  %v12907_v58 = vld [vmem:[%s18557_s8 + $0x218] sm:$0xff]  ;;  %v13999_v2 = vld [vmem:[%s18557_s8 + $0x4c1] sm:$0xff] }
 0x33a   : > { %16193 = vmatmul.mubr.msk.f32.gmra.mrb[18].mxu1 %vm459_vm3, %v12876_v12  ;;  %17073 = vmatmul.mubr.msk.f32.gmra.mrb[82].mxu0 %vm459_vm3, %v13968_v20  ;;  %v12908_v12 = vld [vmem:[%s18557_s8 + $0x220] sm:$0xff]  ;;  %v14000_v20 = vld [vmem:[%s18557_s8 + $0x4c9] sm:$0xff] }
 0x33b   : > { %16195 = vmatprep.mubr.msk.f32.mxu1 %vm459_vm3, %v12877_v30  ;;  %17075 = vmatprep.mubr.msk.f32.mxu0 %vm459_vm3, %v13969_v38  ;;  %v12909_v30 = vld [vmem:[%s18557_s8 + $0x230] sm:$0xff]  ;;  %v14001_v38 = vld [vmem:[%s18557_s8 + $0x4d9] sm:$0xff] }
 0x33e   : > { %16196 = vmatmul.mubr.msk.f32.gmra.mrb[20].mxu1 %vm459_vm3, %v12878_v46  ;;  %17076 = vmatmul.mubr.msk.f32.gmra.mrb[84].mxu0 %vm459_vm3, %v13970_v62  ;;  %v12910_v46 = vld [vmem:[%s18557_s8 + $0x238] sm:$0xff]  ;;  %v14002_v62 = vld [vmem:[%s18557_s8 + $0x4e1] sm:$0xff] }
 0x33f   : > { %16198 = vmatprep.mubr.msk.f32.mxu1 %vm459_vm3, %v12879_v16  ;;  %17078 = vmatprep.mubr.msk.f32.mxu0 %vm459_vm3, %v13971_v45  ;;  %v12911_v16 = vld [vmem:[%s18557_s8 + $0x240] sm:$0xff]  ;;  %v14003_v45 = vld [vmem:[%s18557_s8 + $0x4e9] sm:$0xff] }
 0x342   : > { %16199 = vmatmul.mubr.msk.f32.gmra.mrb[22].mxu1 %vm459_vm3, %v12880_v33  ;;  %17079 = vmatmul.mubr.msk.f32.gmra.mrb[86].mxu0 %vm459_vm3, %v13972_v54  ;;  %v12912_v33 = vld [vmem:[%s18557_s8 + $0x248] sm:$0xff]  ;;  %v14004_v54 = vld [vmem:[%s18557_s8 + $0x4f1] sm:$0xff] }
 0x343   : > { %16201 = vmatprep.mubr.msk.f32.mxu1 %vm459_vm3, %v12881_v7  ;;  %17081 = vmatprep.mubr.msk.f32.mxu0 %vm459_vm3, %v13973_v34  ;;  %v12913_v7 = vld [vmem:[%s18557_s8 + $0x258] sm:$0xff]  ;;  %v14005_v34 = vld [vmem:[%s18557_s8 + $0x501] sm:$0xff] }
 0x346   : > { %16202 = vmatmul.mubr.msk.f32.gmra.mrb[24].mxu1 %vm459_vm3, %v12882_v47  ;;  %17082 = vmatmul.mubr.msk.f32.gmra.mrb[88].mxu0 %vm459_vm3, %v13974_v49  ;;  %v12914_v47 = vld [vmem:[%s18557_s8 + $0x260] sm:$0xff]  ;;  %v14006_v49 = vld [vmem:[%s18557_s8 + $0x509] sm:$0xff] }
 0x347   : > { %16204 = vmatprep.mubr.msk.f32.mxu1 %vm459_vm3, %v12883_v51  ;;  %17084 = vmatprep.mubr.msk.f32.mxu0 %vm459_vm3, %v13975_v25  ;;  %v12915_v51 = vld [vmem:[%s18557_s8 + $0x268] sm:$0xff]  ;;  %v14007_v25 = vld [vmem:[%s18557_s8 + $0x511] sm:$0xff] }
 0x34a   : > { %16205 = vmatmul.mubr.msk.f32.gmra.mrb[26].mxu1 %vm459_vm3, %v12884_v53  ;;  %17085 = vmatmul.mubr.msk.f32.gmra.mrb[90].mxu0 %vm459_vm3, %v13976_v55  ;;  %v12916_v53 = vld [vmem:[%s18557_s8 + $0x270] sm:$0xff]  ;;  %v14008_v55 = vld [vmem:[%s18557_s8 + $0x519] sm:$0xff] }
 0x34b   : > { %16207 = vmatprep.mubr.msk.f32.mxu1 %vm459_vm3, %v12885_v57  ;;  %17087 = vmatprep.mubr.msk.f32.mxu0 %vm459_vm3, %v13977_v59  ;;  %v12917_v57 = vld [vmem:[%s18557_s8 + $0x280] sm:$0xff]  ;;  %v14009_v59 = vld [vmem:[%s18557_s8 + $0x529] sm:$0xff] }
 0x34e   : > { %16208 = vmatmul.mubr.msk.f32.gmra.mrb[28].mxu1 %vm459_vm3, %v12886_v61  ;;  %17088 = vmatmul.mubr.msk.f32.gmra.mrb[92].mxu0 %vm459_vm3, %v13978_v63  ;;  %v12918_v61 = vld [vmem:[%s18557_s8 + $0x288] sm:$0xff]  ;;  %v14010_v63 = vld [vmem:[%s18557_s8 + $0x531] sm:$0xff] }
 0x34f   : > { %16210 = vmatprep.mubr.msk.f32.mxu1 %vm459_vm3, %v12887_v1  ;;  %17090 = vmatprep.mubr.msk.f32.mxu0 %vm459_vm3, %v13979_v3  ;;  %v12919_v1 = vld [vmem:[%s18557_s8 + $0x290] sm:$0xff]  ;;  %v14011_v3 = vld [vmem:[%s18557_s8 + $0x539] sm:$0xff] }
 0x352   : > { %16211 = vmatmul.mubr.msk.f32.gmra.mrb[30].mxu1 %vm459_vm3, %v12888_v6  ;;  %17091 = vmatmul.mubr.msk.f32.gmra.mrb[94].mxu0 %vm459_vm3, %v13980_v9  ;;  %v12920_v6 = vld [vmem:[%s18557_s8 + $0x298] sm:$0xff]  ;;  %v14012_v9 = vld [vmem:[%s18557_s8 + $0x541] sm:$0xff] }
 0x353   : > { %16213 = vmatprep.mubr.msk.f32.mxu1 %vm459_vm3, %v12889_v11  ;;  %17093 = vmatprep.mubr.msk.f32.mxu0 %vm459_vm3, %v13981_v13  ;;  %v12921_v11 = vld [vmem:[%s18557_s8 + $0x2a8] sm:$0xff]  ;;  %v14142_v13 = vld [vmem:[%s18557_s8 + $0x52] sm:$0xff] }
 0x356   : > { %16214 = vmatmul.mubr.msk.f32.gmra.mrb[32].mxu1 %vm459_vm3, %v12890_v15  ;;  %17094 = vmatmul.mubr.msk.f32.gmra.mrb[96].mxu0 %vm459_vm3, %v13982_v17  ;;  %v12922_v15 = vld [vmem:[%s18557_s8 + $0x2b0] sm:$0xff]  ;;  %v14143_v17 = vld [vmem:[%s18557_s8 + $0x5a] sm:$0xff] }
 0x357   : > { %16216 = vmatprep.mubr.msk.f32.mxu1 %vm459_vm3, %v12891_v19  ;;  %17096 = vmatprep.mubr.msk.f32.mxu0 %vm459_vm3, %v13983_v22  ;;  %v12923_v19 = vld [vmem:[%s18557_s8 + $0x2b8] sm:$0xff]  ;;  %v14144_v22 = vld [vmem:[%s18557_s8 + $0x62] sm:$0xff] }
 0x35a   : > { %16217 = vmatmul.mubr.msk.f32.gmra.mrb[34].mxu1 %vm459_vm3, %v12892_v41  ;;  %17097 = vmatmul.mubr.msk.f32.gmra.mrb[98].mxu0 %vm459_vm3, %v13984_v24  ;;  %v12924_v41 = vld [vmem:[%s18557_s8 + $0x2c0] sm:$0xff]  ;;  %v14145_v24 = vld [vmem:[%s18557_s8 + $0x6a] sm:$0xff] }
 0x35b   : > { %16219 = vmatprep.mubr.msk.f32.mxu1 %vm459_vm3, %v12893_v26  ;;  %17099 = vmatprep.mubr.msk.f32.mxu0 %vm459_vm3, %v13985_v29  ;;  %v12925_v26 = vld [vmem:[%s18557_s8 + $0x2d0] sm:$0xff]  ;;  %v14146_v29 = vld [vmem:[%s18557_s8 + $0x7a] sm:$0xff] }
 0x35e   : > { %16220 = vmatmul.mubr.msk.f32.gmra.mrb[36].mxu1 %vm459_vm3, %v12894_v4  ;;  %17100 = vmatmul.mubr.msk.f32.gmra.mrb[100].mxu0 %vm459_vm3, %v13986_v8  ;;  %v12926_v4 = vld [vmem:[%s18557_s8 + $0x2d8] sm:$0xff]  ;;  %v14147_v8 = vld [vmem:[%s18557_s8 + $0x82] sm:$0xff] }
 0x35f   : > { %16222 = vmatprep.mubr.msk.f32.mxu1 %vm459_vm3, %v12895_v31  ;;  %17102 = vmatprep.mubr.msk.f32.mxu0 %vm459_vm3, %v13987_v32  ;;  %v12927_v31 = vld [vmem:[%s18557_s8 + $0x2e0] sm:$0xff]  ;;  %v14148_v32 = vld [vmem:[%s18557_s8 + $0x8a] sm:$0xff] }
 0x362   : > { %16223 = vmatmul.mubr.msk.f32.gmra.mrb[38].mxu1 %vm459_vm3, %v12896_v35  ;;  %17103 = vmatmul.mubr.msk.f32.gmra.mrb[102].mxu0 %vm459_vm3, %v13988_v37  ;;  %v12928_v35 = vld [vmem:[%s18557_s8 + $0x2e8] sm:$0xff]  ;;  %v14149_v37 = vld [vmem:[%s18557_s8 + $0x92] sm:$0xff] }
 0x363   : > { %16225 = vmatprep.mubr.msk.f32.mxu1 %vm459_vm3, %v12897_v39  ;;  %17105 = vmatprep.mubr.msk.f32.mxu0 %vm459_vm3, %v13989_v40  ;;  %v12929_v39 = vld [vmem:[%s18557_s8 + $0x2f8] sm:$0xff]  ;;  %v14150_v40 = vld [vmem:[%s18557_s8 + $0xa2] sm:$0xff] }
 0x366   : > { %16226 = vmatmul.mubr.msk.f32.gmra.mrb[40].mxu1 %vm459_vm3, %v12898_v42  ;;  %17106 = vmatmul.mubr.msk.f32.gmra.mrb[104].mxu0 %vm459_vm3, %v13990_v44  ;;  %v12930_v42 = vld [vmem:[%s18557_s8 + $0x300] sm:$0xff]  ;;  %v14151_v44 = vld [vmem:[%s18557_s8 + $0xaa] sm:$0xff] }
 0x367   : > { %16228 = vmatprep.mubr.msk.f32.mxu1 %vm459_vm3, %v12899_v48  ;;  %17108 = vmatprep.mubr.msk.f32.mxu0 %vm459_vm3, %v13991_v52  ;;  %v12931_v48 = vld [vmem:[%s18557_s8 + $0x308] sm:$0xff]  ;;  %v14152_v52 = vld [vmem:[%s18557_s8 + $0xb2] sm:$0xff] }
 0x36a   : > { %16229 = vmatmul.mubr.msk.f32.gmra.mrb[42].mxu1 %vm459_vm3, %v12900_v56  ;;  %17109 = vmatmul.mubr.msk.f32.gmra.mrb[106].mxu0 %vm459_vm3, %v13992_v60  ;;  %v12932_v56 = vld [vmem:[%s18557_s8 + $0x310] sm:$0xff]  ;;  %v14153_v60 = vld [vmem:[%s18557_s8 + $0xba] sm:$0xff] }
 0x36b   : > { %16231 = vmatprep.mubr.msk.f32.mxu1 %vm459_vm3, %v12901_v0  ;;  %17111 = vmatprep.mubr.msk.f32.mxu0 %vm459_vm3, %v13993_v5  ;;  %v12933_v0 = vld [vmem:[%s18557_s8 + $0x320] sm:$0xff]  ;;  %v14154_v5 = vld [vmem:[%s18557_s8 + $0xca] sm:$0xff] }
 0x36e   : > { %16232 = vmatmul.mubr.msk.f32.gmra.mrb[44].mxu1 %vm459_vm3, %v12902_v10  ;;  %17112 = vmatmul.mubr.msk.f32.gmra.mrb[108].mxu0 %vm459_vm3, %v13994_v14  ;;  %v12934_v10 = vld [vmem:[%s18557_s8 + $0x328] sm:$0xff]  ;;  %v14155_v14 = vld [vmem:[%s18557_s8 + $0xd2] sm:$0xff] }
 0x36f   : > { %16234 = vmatprep.mubr.msk.f32.mxu1 %vm459_vm3, %v12903_v18  ;;  %17114 = vmatprep.mubr.msk.f32.mxu0 %vm459_vm3, %v13995_v23  ;;  %v12935_v18 = vld [vmem:[%s18557_s8 + $0x330] sm:$0xff]  ;;  %v14156_v23 = vld [vmem:[%s18557_s8 + $0xda] sm:$0xff] }
 0x372   : > { %16235 = vmatmul.mubr.msk.f32.gmra.mrb[46].mxu1 %vm459_vm3, %v12904_v28  ;;  %17115 = vmatmul.mubr.msk.f32.gmra.mrb[110].mxu0 %vm459_vm3, %v13996_v21  ;;  %v12936_v28 = vld [vmem:[%s18557_s8 + $0x338] sm:$0xff]  ;;  %v14157_v21 = vld [vmem:[%s18557_s8 + $0xe2] sm:$0xff] }
 0x373   : > { %16237 = vmatprep.mubr.msk.f32.mxu1 %vm459_vm3, %v12905_v36  ;;  %17117 = vmatprep.mubr.msk.f32.mxu0 %vm459_vm3, %v13997_v27  ;;  %v12937_v36 = vld [vmem:[%s18557_s8 + $0x348] sm:$0xff]  ;;  %v14158_v27 = vld [vmem:[%s18557_s8 + $0xf2] sm:$0xff] }
 0x376   : > { %16238 = vmatmul.mubr.msk.f32.gmra.mrb[48].mxu1 %vm459_vm3, %v12906_v43  ;;  %17118 = vmatmul.mubr.msk.f32.gmra.mrb[112].mxu0 %vm459_vm3, %v13998_v50  ;;  %v12938_v43 = vld [vmem:[%s18557_s8 + $0x350] sm:$0xff]  ;;  %v14159_v50 = vld [vmem:[%s18557_s8 + $0xfa] sm:$0xff] }
 0x377   : > { %16240 = vmatprep.mubr.msk.f32.mxu1 %vm459_vm3, %v12907_v58  ;;  %17120 = vmatprep.mubr.msk.f32.mxu0 %vm459_vm3, %v13999_v2  ;;  %v12939_v58 = vld [vmem:[%s18557_s8 + $0x358] sm:$0xff]  ;;  %v14160_v2 = vld [vmem:[%s18557_s8 + $0x102] sm:$0xff] }
 0x37a   : > { %16241 = vmatmul.mubr.msk.f32.gmra.mrb[50].mxu1 %vm459_vm3, %v12908_v12  ;;  %17121 = vmatmul.mubr.msk.f32.gmra.mrb[114].mxu0 %vm459_vm3, %v14000_v20  ;;  %v12940_v12 = vld [vmem:[%s18557_s8 + $0x360] sm:$0xff]  ;;  %v14161_v20 = vld [vmem:[%s18557_s8 + $0x10a] sm:$0xff] }
 0x37b   : > { %16243 = vmatprep.mubr.msk.f32.mxu1 %vm459_vm3, %v12909_v30  ;;  %17123 = vmatprep.mubr.msk.f32.mxu0 %vm459_vm3, %v14001_v38  ;;  %v12941_v30 = vld [vmem:[%s18557_s8 + $0x370] sm:$0xff]  ;;  %v14162_v38 = vld [vmem:[%s18557_s8 + $0x11a] sm:$0xff] }
 0x37e   : > { %16244 = vmatmul.mubr.msk.f32.gmra.mrb[52].mxu1 %vm459_vm3, %v12910_v46  ;;  %17124 = vmatmul.mubr.msk.f32.gmra.mrb[116].mxu0 %vm459_vm3, %v14002_v62  ;;  %v12942_v46 = vld [vmem:[%s18557_s8 + $0x378] sm:$0xff]  ;;  %v14163_v62 = vld [vmem:[%s18557_s8 + $0x122] sm:$0xff] }
 0x37f   : > { %16246 = vmatprep.mubr.msk.f32.mxu1 %vm459_vm3, %v12911_v16  ;;  %17126 = vmatprep.mubr.msk.f32.mxu0 %vm459_vm3, %v14003_v45  ;;  %v12943_v16 = vld [vmem:[%s18557_s8 + $0x380] sm:$0xff]  ;;  %v14164_v45 = vld [vmem:[%s18557_s8 + $0x12a] sm:$0xff] }
 0x382   : > { %16247 = vmatmul.mubr.msk.f32.gmra.mrb[54].mxu1 %vm459_vm3, %v12912_v33  ;;  %17127 = vmatmul.mubr.msk.f32.gmra.mrb[118].mxu0 %vm459_vm3, %v14004_v54  ;;  %v12944_v33 = vld [vmem:[%s18557_s8 + $0x388] sm:$0xff]  ;;  %v14165_v54 = vld [vmem:[%s18557_s8 + $0x132] sm:$0xff] }
 0x383   : > { %16249 = vmatprep.mubr.msk.f32.mxu1 %vm459_vm3, %v12913_v7  ;;  %17129 = vmatprep.mubr.msk.f32.mxu0 %vm459_vm3, %v14005_v34  ;;  %v12945_v7 = vld [vmem:[%s18557_s8 + $0x398] sm:$0xff]  ;;  %v14166_v34 = vld [vmem:[%s18557_s8 + $0x142] sm:$0xff] }
 0x386   : > { %16250 = vmatmul.mubr.msk.f32.gmra.mrb[56].mxu1 %vm459_vm3, %v12914_v47  ;;  %17130 = vmatmul.mubr.msk.f32.gmra.mrb[120].mxu0 %vm459_vm3, %v14006_v49  ;;  %v12946_v47 = vld [vmem:[%s18557_s8 + $0x3a0] sm:$0xff]  ;;  %v14167_v49 = vld [vmem:[%s18557_s8 + $0x14a] sm:$0xff] }
 0x387   : > { %16252 = vmatprep.mubr.msk.f32.mxu1 %vm459_vm3, %v12915_v51  ;;  %17132 = vmatprep.mubr.msk.f32.mxu0 %vm459_vm3, %v14007_v25  ;;  %v12947_v51 = vld [vmem:[%s18557_s8 + $0x3a8] sm:$0xff]  ;;  %v14168_v25 = vld [vmem:[%s18557_s8 + $0x152] sm:$0xff] }
 0x38a   : > { %16253 = vmatmul.mubr.msk.f32.gmra.mrb[58].mxu1 %vm459_vm3, %v12916_v53  ;;  %17133 = vmatmul.mubr.msk.f32.gmra.mrb[122].mxu0 %vm459_vm3, %v14008_v55  ;;  %v12948_v53 = vld [vmem:[%s18557_s8 + $0x3b0] sm:$0xff]  ;;  %v14169_v55 = vld [vmem:[%s18557_s8 + $0x15a] sm:$0xff] }
 0x38b   : > { %16255 = vmatprep.mubr.msk.f32.mxu1 %vm459_vm3, %v12917_v57  ;;  %17135 = vmatprep.mubr.msk.f32.mxu0 %vm459_vm3, %v14009_v59  ;;  %v12949_v57 = vld [vmem:[%s18557_s8 + $0x3c0] sm:$0xff]  ;;  %v14170_v59 = vld [vmem:[%s18557_s8 + $0x16a] sm:$0xff] }
 0x38e   : > { %16256 = vmatmul.mubr.msk.f32.gmra.mrb[60].mxu1 %vm459_vm3, %v12918_v61  ;;  %17136 = vmatmul.mubr.msk.f32.gmra.mrb[124].mxu0 %vm459_vm3, %v14010_v63  ;;  %v12950_v61 = vld [vmem:[%s18557_s8 + $0x3c8] sm:$0xff]  ;;  %v14171_v63 = vld [vmem:[%s18557_s8 + $0x172] sm:$0xff] }
 0x38f   : > { %16258 = vmatprep.mubr.msk.f32.mxu1 %vm459_vm3, %v12919_v1  ;;  %17138 = vmatprep.mubr.msk.f32.mxu0 %vm459_vm3, %v14011_v3  ;;  %v12951_v1 = vld [vmem:[%s18557_s8 + $0x3d0] sm:$0xff]  ;;  %v14172_v3 = vld [vmem:[%s18557_s8 + $0x17a] sm:$0xff] }
 0x392   : > { %16259 = vmatmul.mubr.msk.f32.gmra.mrb[62].mxu1 %vm459_vm3, %v12920_v6  ;;  %17139 = vmatmul.mubr.msk.f32.gmra.mrb[126].mxu0 %vm459_vm3, %v14012_v9  ;;  %v12952_v6 = vld [vmem:[%s18557_s8 + $0x3d8] sm:$0xff]  ;;  %v14173_v9 = vld [vmem:[%s18557_s8 + $0x182] sm:$0xff] }
 0x393   : > { %16261 = vmatprep.mubr.msk.f32.mxu1 %vm459_vm3, %v12921_v11  ;;  %17145 = vmatprep.mubr.msk.f32.mxu0 %vm459_vm3, %v14142_v13  ;;  %v12953_v11 = vld [vmem:[%s18557_s8 + $0x3e8] sm:$0xff]  ;;  %v14174_v13 = vld [vmem:[%s18557_s8 + $0x192] sm:$0xff] }
 0x396   : > { %16262 = vmatmul.mubr.msk.f32.gmra.mrb[64].mxu1 %vm459_vm3, %v12922_v15  ;;  %17146 = vmatmul.mubr.msk.f32.vlgmr.msra.gmra.mrb[0].mxu0 %vm459_vm3, %v14143_v17  ;;  %v12954_v15 = vld [vmem:[%s18557_s8 + $0x3f0] sm:$0xff]  ;;  %v14175_v17 = vld [vmem:[%s18557_s8 + $0x19a] sm:$0xff] }
 0x397   : > { %16264 = vmatprep.mubr.msk.f32.mxu1 %vm459_vm3, %v12923_v19  ;;  %17148 = vmatprep.mubr.msk.f32.mxu0 %vm459_vm3, %v14144_v22  ;;  %v12955_v19 = vld [vmem:[%s18557_s8 + $0x3f8] sm:$0xff]  ;;  %v14176_v22 = vld [vmem:[%s18557_s8 + $0x1a2] sm:$0xff] }
 0x39a   : > { %16265 = vmatmul.mubr.msk.f32.gmra.mrb[66].mxu1 %vm459_vm3, %v12924_v41  ;;  %17149 = vmatmul.mubr.msk.f32.gmra.mrb[2].mxu0 %vm459_vm3, %v14145_v24  ;;  %v12956_v41 = vld [vmem:[%s18557_s8 + $0x400] sm:$0xff]  ;;  %v14177_v24 = vld [vmem:[%s18557_s8 + $0x1aa] sm:$0xff] }
 0x39b   : > { %16267 = vmatprep.mubr.msk.f32.mxu1 %vm459_vm3, %v12925_v26  ;;  %17151 = vmatprep.mubr.msk.f32.mxu0 %vm459_vm3, %v14146_v29  ;;  %v12957_v26 = vld [vmem:[%s18557_s8 + $0x410] sm:$0xff]  ;;  %v14178_v29 = vld [vmem:[%s18557_s8 + $0x1ba] sm:$0xff] }
 0x39e   : > { %16268 = vmatmul.mubr.msk.f32.gmra.mrb[68].mxu1 %vm459_vm3, %v12926_v4  ;;  %17152 = vmatmul.mubr.msk.f32.gmra.mrb[4].mxu0 %vm459_vm3, %v14147_v8  ;;  %v12958_v4 = vld [vmem:[%s18557_s8 + $0x418] sm:$0xff]  ;;  %v14179_v8 = vld [vmem:[%s18557_s8 + $0x1c2] sm:$0xff] }
 0x39f   : > { %16270 = vmatprep.mubr.msk.f32.mxu1 %vm459_vm3, %v12927_v31  ;;  %17154 = vmatprep.mubr.msk.f32.mxu0 %vm459_vm3, %v14148_v32  ;;  %v12959_v31 = vld [vmem:[%s18557_s8 + $0x420] sm:$0xff]  ;;  %v14180_v32 = vld [vmem:[%s18557_s8 + $0x1ca] sm:$0xff] }
 0x3a2   : > { %16271 = vmatmul.mubr.msk.f32.gmra.mrb[70].mxu1 %vm459_vm3, %v12928_v35  ;;  %17155 = vmatmul.mubr.msk.f32.gmra.mrb[6].mxu0 %vm459_vm3, %v14149_v37  ;;  %v12960_v35 = vld [vmem:[%s18557_s8 + $0x428] sm:$0xff]  ;;  %v14181_v37 = vld [vmem:[%s18557_s8 + $0x1d2] sm:$0xff] }
 0x3a3   : > { %16273 = vmatprep.mubr.msk.f32.mxu1 %vm459_vm3, %v12929_v39  ;;  %17157 = vmatprep.mubr.msk.f32.mxu0 %vm459_vm3, %v14150_v40  ;;  %v12961_v39 = vld [vmem:[%s18557_s8 + $0x438] sm:$0xff]  ;;  %v14182_v40 = vld [vmem:[%s18557_s8 + $0x1e2] sm:$0xff] }
 0x3a6   : > { %16274 = vmatmul.mubr.msk.f32.gmra.mrb[72].mxu1 %vm459_vm3, %v12930_v42  ;;  %17158 = vmatmul.mubr.msk.f32.gmra.mrb[8].mxu0 %vm459_vm3, %v14151_v44  ;;  %v12962_v42 = vld [vmem:[%s18557_s8 + $0x440] sm:$0xff]  ;;  %v14183_v44 = vld [vmem:[%s18557_s8 + $0x1ea] sm:$0xff] }
 0x3a7   : > { %16276 = vmatprep.mubr.msk.f32.mxu1 %vm459_vm3, %v12931_v48  ;;  %17160 = vmatprep.mubr.msk.f32.mxu0 %vm459_vm3, %v14152_v52  ;;  %v12963_v48 = vld [vmem:[%s18557_s8 + $0x448] sm:$0xff]  ;;  %v14184_v52 = vld [vmem:[%s18557_s8 + $0x1f2] sm:$0xff] }
 0x3aa   : > { %16277 = vmatmul.mubr.msk.f32.gmra.mrb[74].mxu1 %vm459_vm3, %v12932_v56  ;;  %17161 = vmatmul.mubr.msk.f32.gmra.mrb[10].mxu0 %vm459_vm3, %v14153_v60  ;;  %v12964_v56 = vld [vmem:[%s18557_s8 + $0x450] sm:$0xff]  ;;  %v14185_v60 = vld [vmem:[%s18557_s8 + $0x1fa] sm:$0xff] }
 0x3ab   : > { %16279 = vmatprep.mubr.msk.f32.mxu1 %vm459_vm3, %v12933_v0  ;;  %17163 = vmatprep.mubr.msk.f32.mxu0 %vm459_vm3, %v14154_v5  ;;  %v12965_v0 = vld [vmem:[%s18557_s8 + $0x460] sm:$0xff]  ;;  %v14186_v5 = vld [vmem:[%s18557_s8 + $0x20a] sm:$0xff] }
 0x3ae   : > { %16280 = vmatmul.mubr.msk.f32.gmra.mrb[76].mxu1 %vm459_vm3, %v12934_v10  ;;  %17164 = vmatmul.mubr.msk.f32.gmra.mrb[12].mxu0 %vm459_vm3, %v14155_v14 }
 0x3af   : > { %16282 = vmatprep.mubr.msk.f32.mxu1 %vm459_vm3, %v12935_v18  ;;  %17166 = vmatprep.mubr.msk.f32.mxu0 %vm459_vm3, %v14156_v23  ;;  %v12966_v18 = vld [vmem:[%s18557_s8 + $0x468] sm:$0xff]  ;;  %v14187_v23 = vld [vmem:[%s18557_s8 + $0x212] sm:$0xff] }
 0x3b2   : > { %16283 = vmatmul.mubr.msk.f32.gmra.mrb[78].mxu1 %vm459_vm3, %v12936_v28  ;;  %17167 = vmatmul.mubr.msk.f32.gmra.mrb[14].mxu0 %vm459_vm3, %v14157_v21  ;;  %v12967_v28 = vld [vmem:[%s18557_s8 + $0x470] sm:$0xff]  ;;  %v14188_v21 = vld [vmem:[%s18557_s8 + $0x21a] sm:$0xff] }
 0x3b3   : > { %16285 = vmatprep.mubr.msk.f32.mxu1 %vm459_vm3, %v12937_v36  ;;  %17169 = vmatprep.mubr.msk.f32.mxu0 %vm459_vm3, %v14158_v27 }
 0x3b6   : > { %16286 = vmatmul.mubr.msk.f32.gmra.mrb[80].mxu1 %vm459_vm3, %v12938_v43  ;;  %17170 = vmatmul.mubr.msk.f32.gmra.mrb[16].mxu0 %vm459_vm3, %v14159_v50  ;;  %v12968_v43 = vld [vmem:[%s18557_s8 + $0x478] sm:$0xff]  ;;  %v14189_v50 = vld [vmem:[%s18557_s8 + $0x222] sm:$0xff] }
 0x3b7   : > { %16288 = vmatprep.mubr.msk.f32.mxu1 %vm459_vm3, %v12939_v58  ;;  %17172 = vmatprep.mubr.msk.f32.mxu0 %vm459_vm3, %v14160_v2  ;;  %v12969_v58 = vld [vmem:[%s18557_s8 + $0x488] sm:$0xff]  ;;  %v14190_v2 = vld [vmem:[%s18557_s8 + $0x232] sm:$0xff] }
 0x3ba   : > { %16289 = vmatmul.mubr.msk.f32.gmra.mrb[82].mxu1 %vm459_vm3, %v12940_v12  ;;  %17173 = vmatmul.mubr.msk.f32.gmra.mrb[18].mxu0 %vm459_vm3, %v14161_v20 }
 0x3bb   : > { %16291 = vmatprep.mubr.msk.f32.mxu1 %vm459_vm3, %v12941_v30  ;;  %17175 = vmatprep.mubr.msk.f32.mxu0 %vm459_vm3, %v14162_v38  ;;  %v12970_v30 = vld [vmem:[%s18557_s8 + $0x490] sm:$0xff]  ;;  %v14191_v38 = vld [vmem:[%s18557_s8 + $0x23a] sm:$0xff] }
 0x3be   : > { %16292 = vmatmul.mubr.msk.f32.gmra.mrb[84].mxu1 %vm459_vm3, %v12942_v46  ;;  %17176 = vmatmul.mubr.msk.f32.gmra.mrb[20].mxu0 %vm459_vm3, %v14163_v62  ;;  %v12971_v46 = vld [vmem:[%s18557_s8 + $0x498] sm:$0xff]  ;;  %v14192_v62 = vld [vmem:[%s18557_s8 + $0x242] sm:$0xff] }
 0x3bf   : > { %16294 = vmatprep.mubr.msk.f32.mxu1 %vm459_vm3, %v12943_v16  ;;  %17178 = vmatprep.mubr.msk.f32.mxu0 %vm459_vm3, %v14164_v45 }
 0x3c2   : > { %16295 = vmatmul.mubr.msk.f32.gmra.mrb[86].mxu1 %vm459_vm3, %v12944_v33  ;;  %17179 = vmatmul.mubr.msk.f32.gmra.mrb[22].mxu0 %vm459_vm3, %v14165_v54  ;;  %v12972_v33 = vld [vmem:[%s18557_s8 + $0x4a0] sm:$0xff]  ;;  %v14193_v54 = vld [vmem:[%s18557_s8 + $0x24a] sm:$0xff] }
 0x3c3   : > { %16297 = vmatprep.mubr.msk.f32.mxu1 %vm459_vm3, %v12945_v7  ;;  %17181 = vmatprep.mubr.msk.f32.mxu0 %vm459_vm3, %v14166_v34  ;;  %v12973_v7 = vld [vmem:[%s18557_s8 + $0x4b0] sm:$0xff]  ;;  %v14194_v34 = vld [vmem:[%s18557_s8 + $0x25a] sm:$0xff] }
 0x3c6   : > { %16298 = vmatmul.mubr.msk.f32.gmra.mrb[88].mxu1 %vm459_vm3, %v12946_v47  ;;  %17182 = vmatmul.mubr.msk.f32.gmra.mrb[24].mxu0 %vm459_vm3, %v14167_v49 }
 0x3c7   : > { %16300 = vmatprep.mubr.msk.f32.mxu1 %vm459_vm3, %v12947_v51  ;;  %17184 = vmatprep.mubr.msk.f32.mxu0 %vm459_vm3, %v14168_v25  ;;  %v12974_v51 = vld [vmem:[%s18557_s8 + $0x4b8] sm:$0xff]  ;;  %v14195_v25 = vld [vmem:[%s18557_s8 + $0x262] sm:$0xff] }
 0x3ca   : > { %16301 = vmatmul.mubr.msk.f32.gmra.mrb[90].mxu1 %vm459_vm3, %v12948_v53  ;;  %17185 = vmatmul.mubr.msk.f32.gmra.mrb[26].mxu0 %vm459_vm3, %v14169_v55  ;;  %v12975_v53 = vld [vmem:[%s18557_s8 + $0x4c0] sm:$0xff]  ;;  %v14196_v55 = vld [vmem:[%s18557_s8 + $0x26a] sm:$0xff] }
 0x3cb   : > { %16303 = vmatprep.mubr.msk.f32.mxu1 %vm459_vm3, %v12949_v57  ;;  %17187 = vmatprep.mubr.msk.f32.mxu0 %vm459_vm3, %v14170_v59 }
 0x3ce   : > { %16304 = vmatmul.mubr.msk.f32.gmra.mrb[92].mxu1 %vm459_vm3, %v12950_v61  ;;  %17188 = vmatmul.mubr.msk.f32.gmra.mrb[28].mxu0 %vm459_vm3, %v14171_v63  ;;  %v12976_v61 = vld [vmem:[%s18557_s8 + $0x4c8] sm:$0xff]  ;;  %v14197_v63 = vld [vmem:[%s18557_s8 + $0x272] sm:$0xff] }
 0x3cf   : > { %16306 = vmatprep.mubr.msk.f32.mxu1 %vm459_vm3, %v12951_v1  ;;  %17190 = vmatprep.mubr.msk.f32.mxu0 %vm459_vm3, %v14172_v3  ;;  %v12977_v1 = vld [vmem:[%s18557_s8 + $0x4d8] sm:$0xff]  ;;  %v14198_v3 = vld [vmem:[%s18557_s8 + $0x282] sm:$0xff] }
 0x3d2   : > { %16307 = vmatmul.mubr.msk.f32.gmra.mrb[94].mxu1 %vm459_vm3, %v12952_v6  ;;  %17191 = vmatmul.mubr.msk.f32.gmra.mrb[30].mxu0 %vm459_vm3, %v14173_v9 }
 0x3d3   : > { %16309 = vmatprep.mubr.msk.f32.mxu1 %vm459_vm3, %v12953_v11  ;;  %17193 = vmatprep.mubr.msk.f32.mxu0 %vm459_vm3, %v14174_v13  ;;  %v12978_v11 = vld [vmem:[%s18557_s8 + $0x4e0] sm:$0xff]  ;;  %v14199_v13 = vld [vmem:[%s18557_s8 + $0x28a] sm:$0xff] }
 0x3d6   : > { %16310 = vmatmul.mubr.msk.f32.gmra.mrb[96].mxu1 %vm459_vm3, %v12954_v15  ;;  %17194 = vmatmul.mubr.msk.f32.gmra.mrb[32].mxu0 %vm459_vm3, %v14175_v17  ;;  %v12979_v15 = vld [vmem:[%s18557_s8 + $0x4e8] sm:$0xff]  ;;  %v14200_v17 = vld [vmem:[%s18557_s8 + $0x292] sm:$0xff] }
 0x3d7   : > { %16312 = vmatprep.mubr.msk.f32.mxu1 %vm459_vm3, %v12955_v19  ;;  %17196 = vmatprep.mubr.msk.f32.mxu0 %vm459_vm3, %v14176_v22 }
 0x3da   : > { %16313 = vmatmul.mubr.msk.f32.gmra.mrb[98].mxu1 %vm459_vm3, %v12956_v41  ;;  %17197 = vmatmul.mubr.msk.f32.gmra.mrb[34].mxu0 %vm459_vm3, %v14177_v24  ;;  %v12980_v41 = vld [vmem:[%s18557_s8 + $0x4f0] sm:$0xff]  ;;  %v14201_v24 = vld [vmem:[%s18557_s8 + $0x29a] sm:$0xff] }
 0x3db   : > { %16315 = vmatprep.mubr.msk.f32.mxu1 %vm459_vm3, %v12957_v26  ;;  %17199 = vmatprep.mubr.msk.f32.mxu0 %vm459_vm3, %v14178_v29  ;;  %v12981_v26 = vld [vmem:[%s18557_s8 + $0x500] sm:$0xff]  ;;  %v14202_v29 = vld [vmem:[%s18557_s8 + $0x2aa] sm:$0xff] }
 0x3de   : > { %16316 = vmatmul.mubr.msk.f32.gmra.mrb[100].mxu1 %vm459_vm3, %v12958_v4  ;;  %17200 = vmatmul.mubr.msk.f32.gmra.mrb[36].mxu0 %vm459_vm3, %v14179_v8 }
 0x3df   : > { %16318 = vmatprep.mubr.msk.f32.mxu1 %vm459_vm3, %v12959_v31  ;;  %17202 = vmatprep.mubr.msk.f32.mxu0 %vm459_vm3, %v14180_v32  ;;  %v12982_v31 = vld [vmem:[%s18557_s8 + $0x508] sm:$0xff]  ;;  %v14203_v32 = vld [vmem:[%s18557_s8 + $0x2b2] sm:$0xff] }
 0x3e2   : > { %16319 = vmatmul.mubr.msk.f32.gmra.mrb[102].mxu1 %vm459_vm3, %v12960_v35  ;;  %17203 = vmatmul.mubr.msk.f32.gmra.mrb[38].mxu0 %vm459_vm3, %v14181_v37  ;;  %v12983_v35 = vld [vmem:[%s18557_s8 + $0x510] sm:$0xff]  ;;  %v14204_v37 = vld [vmem:[%s18557_s8 + $0x2ba] sm:$0xff] }
 0x3e3   : > { %16321 = vmatprep.mubr.msk.f32.mxu1 %vm459_vm3, %v12961_v39  ;;  %17205 = vmatprep.mubr.msk.f32.mxu0 %vm459_vm3, %v14182_v40 }
 0x3e6   : > { %16322 = vmatmul.mubr.msk.f32.gmra.mrb[104].mxu1 %vm459_vm3, %v12962_v42  ;;  %17206 = vmatmul.mubr.msk.f32.gmra.mrb[40].mxu0 %vm459_vm3, %v14183_v44  ;;  %v12984_v42 = vld [vmem:[%s18557_s8 + $0x518] sm:$0xff]  ;;  %v14205_v44 = vld [vmem:[%s18557_s8 + $0x2c2] sm:$0xff] }
 0x3e7   : > { %16324 = vmatprep.mubr.msk.f32.mxu1 %vm459_vm3, %v12963_v48  ;;  %17208 = vmatprep.mubr.msk.f32.mxu0 %vm459_vm3, %v14184_v52  ;;  %v13178_v48 = vld [vmem:[%s18557_s8 + $0x2a9] sm:$0xff]  ;;  %v14206_v52 = vld [vmem:[%s18557_s8 + $0x2d2] sm:$0xff] }
 0x3e9   : > { %v20903_v10 = vpop.f32.mrb[0].mxu1 }
 0x3ea   : > { %v20905_v14 = vpop.f32.mrb[1].mxu1  ;;  %16325 = vmatmul.mubr.msk.f32.gmra.mrb[106].mxu1 %vm459_vm3, %v12964_v56  ;;  %17209 = vmatmul.mubr.msk.f32.gmra.mrb[42].mxu0 %vm459_vm3, %v14185_v60 }
 0x3eb   : > { %16327 = vmatprep.mubr.msk.f32.mxu1 %vm459_vm3, %v12965_v0  ;;  %17211 = vmatprep.mubr.msk.f32.mxu0 %vm459_vm3, %v14186_v5  ;;  %v13179_v0 = vld [vmem:[%s18557_s8 + $0x2b1] sm:$0xff]  ;;  %v14207_v5 = vld [vmem:[%s18557_s8 + $0x2da] sm:$0xff] }
 0x3ed   : > { %v20915_v36 = vpop.f32.mrb[2].mxu1 }
 0x3ee   : > { %v20917_v27 = vpop.f32.mrb[3].mxu1  ;;  %16328 = vmatmul.mubr.msk.f32.gmra.mrb[108].mxu1 %vm459_vm3, %v12966_v18  ;;  %17212 = vmatmul.mubr.msk.f32.gmra.mrb[44].mxu0 %vm459_vm3, %v14187_v23  ;;  %v13180_v18 = vld [vmem:[%s18557_s8 + $0x2b9] sm:$0xff]  ;;  %v14208_v23 = vld [vmem:[%s18557_s8 + $0x2e2] sm:$0xff] }
 0x3ef   : > { %16330 = vmatprep.mubr.msk.f32.mxu1 %vm459_vm3, %v12967_v28  ;;  %17214 = vmatprep.mubr.msk.f32.mxu0 %vm459_vm3, %v14188_v21 }
 0x3f1   : > { %v20927_v12 = vpop.f32.mrb[4].mxu1 }
 0x3f2   : > { %v20929_v20 = vpop.f32.mrb[5].mxu1  ;;  %16331 = vmatmul.mubr.msk.f32.gmra.mrb[110].mxu1 %vm459_vm3, %v12968_v43  ;;  %17215 = vmatmul.mubr.msk.f32.gmra.mrb[46].mxu0 %vm459_vm3, %v14189_v50  ;;  %v13181_v43 = vld [vmem:[%s18557_s8 + $0x2c1] sm:$0xff]  ;;  %v14209_v50 = vld [vmem:[%s18557_s8 + $0x2ea] sm:$0xff] }
 0x3f3   : > { %16333 = vmatprep.mubr.msk.f32.mxu1 %vm459_vm3, %v12969_v58  ;;  %17217 = vmatprep.mubr.msk.f32.mxu0 %vm459_vm3, %v14190_v2  ;;  %v13182_v58 = vld [vmem:[%s18557_s8 + $0x2d1] sm:$0xff]  ;;  %v14210_v2 = vld [vmem:[%s18557_s8 + $0x2fa] sm:$0xff] }
 0x3f5   : > { %v20939_v16 = vpop.f32.mrb[6].mxu1 }
 0x3f6   : > { %v20941_v45 = vpop.f32.mrb[7].mxu1  ;;  %16334 = vmatmul.mubr.msk.f32.gmra.mrb[112].mxu1 %vm459_vm3, %v12970_v30  ;;  %17218 = vmatmul.mubr.msk.f32.gmra.mrb[48].mxu0 %vm459_vm3, %v14191_v38 }
 0x3f7   : > { %16336 = vmatprep.mubr.msk.f32.mxu1 %vm459_vm3, %v12971_v46  ;;  %17220 = vmatprep.mubr.msk.f32.mxu0 %vm459_vm3, %v14192_v62  ;;  %v13183_v46 = vld [vmem:[%s18557_s8 + $0x2d9] sm:$0xff]  ;;  %v14211_v62 = vld [vmem:[%s18557_s8 + $0x302] sm:$0xff] }
 0x3f9   : > { %v20951_v47 = vpop.f32.mrb[8].mxu1 }
 0x3fa   : > { %v20953_v49 = vpop.f32.mrb[9].mxu1  ;;  %16337 = vmatmul.mubr.msk.f32.gmra.mrb[114].mxu1 %vm459_vm3, %v12972_v33  ;;  %17221 = vmatmul.mubr.msk.f32.gmra.mrb[50].mxu0 %vm459_vm3, %v14193_v54  ;;  %v13184_v33 = vld [vmem:[%s18557_s8 + $0x2e1] sm:$0xff]  ;;  %v14212_v54 = vld [vmem:[%s18557_s8 + $0x30a] sm:$0xff] }
 0x3fb   : > { %16339 = vmatprep.mubr.msk.f32.mxu1 %vm459_vm3, %v12973_v7  ;;  %17223 = vmatprep.mubr.msk.f32.mxu0 %vm459_vm3, %v14194_v34 }
 0x3fd   : > { %v20963_v57 = vpop.f32.mrb[10].mxu1 }
 0x3fe   : > { %v20965_v59 = vpop.f32.mrb[11].mxu1  ;;  %16340 = vmatmul.mubr.msk.f32.gmra.mrb[116].mxu1 %vm459_vm3, %v12974_v51  ;;  %17224 = vmatmul.mubr.msk.f32.gmra.mrb[52].mxu0 %vm459_vm3, %v14195_v25  ;;  %v13185_v51 = vld [vmem:[%s18557_s8 + $0x2e9] sm:$0xff]  ;;  %v14213_v25 = vld [vmem:[%s18557_s8 + $0x312] sm:$0xff] }
 0x3ff   : > { %16342 = vmatprep.mubr.msk.f32.mxu1 %vm459_vm3, %v12975_v53  ;;  %17226 = vmatprep.mubr.msk.f32.mxu0 %vm459_vm3, %v14196_v55  ;;  %v13186_v53 = vld [vmem:[%s18557_s8 + $0x2f9] sm:$0xff]  ;;  %v14214_v55 = vld [vmem:[%s18557_s8 + $0x322] sm:$0xff] }
 0x401   : > { %v20975_v6 = vpop.f32.mrb[12].mxu1 }
 0x402   : > { %v20977_v9 = vpop.f32.mrb[13].mxu1  ;;  %16343 = vmatmul.mubr.msk.f32.gmra.mrb[118].mxu1 %vm459_vm3, %v12976_v61  ;;  %17227 = vmatmul.mubr.msk.f32.gmra.mrb[54].mxu0 %vm459_vm3, %v14197_v63 }
 0x403   : > { %16345 = vmatprep.mubr.msk.f32.mxu1 %vm459_vm3, %v12977_v1  ;;  %17229 = vmatprep.mubr.msk.f32.mxu0 %vm459_vm3, %v14198_v3  ;;  %v13187_v1 = vld [vmem:[%s18557_s8 + $0x301] sm:$0xff]  ;;  %v14215_v3 = vld [vmem:[%s18557_s8 + $0x32a] sm:$0xff] }
 0x405   : > { %v20987_v19 = vpop.f32.mrb[14].mxu1 }
 0x406   : > { %v20989_v22 = vpop.f32.mrb[15].mxu1  ;;  %16346 = vmatmul.mubr.msk.f32.gmra.mrb[120].mxu1 %vm459_vm3, %v12978_v11  ;;  %17230 = vmatmul.mubr.msk.f32.gmra.mrb[56].mxu0 %vm459_vm3, %v14199_v13  ;;  %v13188_v11 = vld [vmem:[%s18557_s8 + $0x309] sm:$0xff]  ;;  %v14216_v13 = vld [vmem:[%s18557_s8 + $0x332] sm:$0xff] }
 0x407   : > { %16348 = vmatprep.mubr.msk.f32.mxu1 %vm459_vm3, %v12979_v15  ;;  %17232 = vmatprep.mubr.msk.f32.mxu0 %vm459_vm3, %v14200_v17 }
 0x409   : > { %v20999_v4 = vpop.f32.mrb[16].mxu1 }
 0x40a   : > { %v21001_v8 = vpop.f32.mrb[17].mxu1  ;;  %16349 = vmatmul.mubr.msk.f32.gmra.mrb[122].mxu1 %vm459_vm3, %v12980_v41  ;;  %17233 = vmatmul.mubr.msk.f32.gmra.mrb[58].mxu0 %vm459_vm3, %v14201_v24  ;;  %v13189_v41 = vld [vmem:[%s18557_s8 + $0x311] sm:$0xff]  ;;  %v14217_v24 = vld [vmem:[%s18557_s8 + $0x33a] sm:$0xff] }
 0x40b   : > { %16351 = vmatprep.mubr.msk.f32.mxu1 %vm459_vm3, %v12981_v26  ;;  %17235 = vmatprep.mubr.msk.f32.mxu0 %vm459_vm3, %v14202_v29  ;;  %v13190_v26 = vld [vmem:[%s18557_s8 + $0x321] sm:$0xff]  ;;  %v14218_v29 = vld [vmem:[%s18557_s8 + $0x34a] sm:$0xff] }
 0x40d   : > { %v21011_v39 = vpop.f32.mrb[18].mxu1 }
 0x40e   : > { %v21013_v40 = vpop.f32.mrb[19].mxu1  ;;  %16352 = vmatmul.mubr.msk.f32.gmra.mrb[124].mxu1 %vm459_vm3, %v12982_v31  ;;  %17236 = vmatmul.mubr.msk.f32.gmra.mrb[60].mxu0 %vm459_vm3, %v14203_v32 }
 0x40f   : > { %16354 = vmatprep.mubr.msk.f32.mxu1 %vm459_vm3, %v12983_v35  ;;  %17238 = vmatprep.mubr.msk.f32.mxu0 %vm459_vm3, %v14204_v37  ;;  %v13191_v35 = vld [vmem:[%s18557_s8 + $0x329] sm:$0xff]  ;;  %v14219_v37 = vld [vmem:[%s18557_s8 + $0x352] sm:$0xff] }
 0x411   : > { %v21023_v56 = vpop.f32.mrb[20].mxu1 }
 0x412   : > { %v21025_v60 = vpop.f32.mrb[21].mxu1  ;;  %16355 = vmatmul.mubr.msk.f32.gmra.mrb[126].mxu1 %vm459_vm3, %v12984_v42  ;;  %17239 = vmatmul.mubr.msk.f32.gmra.mrb[62].mxu0 %vm459_vm3, %v14205_v44  ;;  %v13192_v42 = vld [vmem:[%s18557_s8 + $0x331] sm:$0xff]  ;;  %v14220_v44 = vld [vmem:[%s18557_s8 + $0x35a] sm:$0xff] }
 0x413   : > { %16457 = vmatprep.mubr.msk.f32.mxu1 %vm459_vm3, %v13178_v48  ;;  %17241 = vmatprep.mubr.msk.f32.mxu0 %vm459_vm3, %v14206_v52 }
 0x415   : > { %v21035_v28 = vpop.f32.mrb[22].mxu1 }
 0x416   : > { %v21037_v21 = vpop.f32.mrb[23].mxu1  ;;  %16458 = vmatmul.mubr.msk.f32.vlgmr.msra.gmra.mrb[64].mxu1 %vm459_vm3, %v13179_v0  ;;  %17242 = vmatmul.mubr.msk.f32.gmra.mrb[64].mxu0 %vm459_vm3, %v14207_v5  ;;  %v13193_v0 = vld [vmem:[%s18557_s8 + $0x339] sm:$0xff]  ;;  %v14221_v5 = vld [vmem:[%s18557_s8 + $0x362] sm:$0xff] }
 0x417   : > { %16460 = vmatprep.mubr.msk.f32.mxu1 %vm459_vm3, %v13180_v18  ;;  %17244 = vmatprep.mubr.msk.f32.mxu0 %vm459_vm3, %v14208_v23  ;;  %v13194_v18 = vld [vmem:[%s18557_s8 + $0x349] sm:$0xff]  ;;  %v14222_v23 = vld [vmem:[%s18557_s8 + $0x372] sm:$0xff] }
 0x419   : > { %v21047_v30 = vpop.f32.mrb[24].mxu1 }
 0x41a   : > { %v21049_v38 = vpop.f32.mrb[25].mxu1  ;;  %16461 = vmatmul.mubr.msk.f32.gmra.mrb[66].mxu1 %vm459_vm3, %v13181_v43  ;;  %17245 = vmatmul.mubr.msk.f32.gmra.mrb[66].mxu0 %vm459_vm3, %v14209_v50 }
 0x41b   : > { %16463 = vmatprep.mubr.msk.f32.mxu1 %vm459_vm3, %v13182_v58  ;;  %17247 = vmatprep.mubr.msk.f32.mxu0 %vm459_vm3, %v14210_v2  ;;  %v13195_v58 = vld [vmem:[%s18557_s8 + $0x351] sm:$0xff]  ;;  %v14223_v2 = vld [vmem:[%s18557_s8 + $0x37a] sm:$0xff] }
 0x41d   : > { %v21059_v7 = vpop.f32.mrb[26].mxu1 }
 0x41e   : > { %v21061_v34 = vpop.f32.mrb[27].mxu1  ;;  %16464 = vmatmul.mubr.msk.f32.gmra.mrb[68].mxu1 %vm459_vm3, %v13183_v46  ;;  %17248 = vmatmul.mubr.msk.f32.gmra.mrb[68].mxu0 %vm459_vm3, %v14211_v62  ;;  %v13196_v46 = vld [vmem:[%s18557_s8 + $0x359] sm:$0xff]  ;;  %v14224_v62 = vld [vmem:[%s18557_s8 + $0x382] sm:$0xff] }
 0x41f   : > { %16466 = vmatprep.mubr.msk.f32.mxu1 %vm459_vm3, %v13184_v33  ;;  %17250 = vmatprep.mubr.msk.f32.mxu0 %vm459_vm3, %v14212_v54 }
 0x421   : > { %v21071_v61 = vpop.f32.mrb[28].mxu1 }
 0x422   : > { %v21073_v63 = vpop.f32.mrb[29].mxu1  ;;  %16467 = vmatmul.mubr.msk.f32.gmra.mrb[70].mxu1 %vm459_vm3, %v13185_v51  ;;  %17251 = vmatmul.mubr.msk.f32.gmra.mrb[70].mxu0 %vm459_vm3, %v14213_v25  ;;  %v13197_v51 = vld [vmem:[%s18557_s8 + $0x361] sm:$0xff]  ;;  %v14225_v25 = vld [vmem:[%s18557_s8 + $0x38a] sm:$0xff] }
 0x423   : > { %16469 = vmatprep.mubr.msk.f32.mxu1 %vm459_vm3, %v13186_v53  ;;  %17253 = vmatprep.mubr.msk.f32.mxu0 %vm459_vm3, %v14214_v55  ;;  %v13198_v53 = vld [vmem:[%s18557_s8 + $0x371] sm:$0xff]  ;;  %v14226_v55 = vld [vmem:[%s18557_s8 + $0x39a] sm:$0xff] }
 0x425   : > { %v21083_v15 = vpop.f32.mrb[30].mxu1 }
 0x426   : > { %v21085_v17 = vpop.f32.mrb[31].mxu1  ;;  %16470 = vmatmul.mubr.msk.f32.gmra.mrb[72].mxu1 %vm459_vm3, %v13187_v1  ;;  %17254 = vmatmul.mubr.msk.f32.gmra.mrb[72].mxu0 %vm459_vm3, %v14215_v3 }
 0x427   : > { %16472 = vmatprep.mubr.msk.f32.mxu1 %vm459_vm3, %v13188_v11  ;;  %17256 = vmatprep.mubr.msk.f32.mxu0 %vm459_vm3, %v14216_v13  ;;  %v13199_v11 = vld [vmem:[%s18557_s8 + $0x379] sm:$0xff]  ;;  %v14227_v13 = vld [vmem:[%s18557_s8 + $0x3a2] sm:$0xff] }
 0x429   : > { %v21095_v31 = vpop.f32.mrb[32].mxu1 }
 0x42a   : > { %v21097_v32 = vpop.f32.mrb[33].mxu1  ;;  %16473 = vmatmul.mubr.msk.f32.gmra.mrb[74].mxu1 %vm459_vm3, %v13189_v41  ;;  %17257 = vmatmul.mubr.msk.f32.gmra.mrb[74].mxu0 %vm459_vm3, %v14217_v24  ;;  %v13200_v41 = vld [vmem:[%s18557_s8 + $0x381] sm:$0xff]  ;;  %v14228_v24 = vld [vmem:[%s18557_s8 + $0x3aa] sm:$0xff] }
 0x42b   : > { %16475 = vmatprep.mubr.msk.f32.mxu1 %vm459_vm3, %v13190_v26  ;;  %17259 = vmatprep.mubr.msk.f32.mxu0 %vm459_vm3, %v14218_v29 }
 0x42d   : > { %v21107_v48 = vpop.f32.mrb[34].mxu1 }
 0x42e   : > { %v21109_v52 = vpop.f32.mrb[35].mxu1  ;;  %16476 = vmatmul.mubr.msk.f32.gmra.mrb[76].mxu1 %vm459_vm3, %v13191_v35  ;;  %17260 = vmatmul.mubr.msk.f32.gmra.mrb[76].mxu0 %vm459_vm3, %v14219_v37  ;;  %v13201_v35 = vld [vmem:[%s18557_s8 + $0x389] sm:$0xff]  ;;  %v14229_v37 = vld [vmem:[%s18557_s8 + $0x3b2] sm:$0xff] }
 0x42f   : > { %16478 = vmatprep.mubr.msk.f32.mxu1 %vm459_vm3, %v13192_v42  ;;  %17262 = vmatprep.mubr.msk.f32.mxu0 %vm459_vm3, %v14220_v44  ;;  %v13202_v42 = vld [vmem:[%s18557_s8 + $0x399] sm:$0xff]  ;;  %v14230_v44 = vld [vmem:[%s18557_s8 + $0x3c2] sm:$0xff] }
 0x431   : > { %v21119_v43 = vpop.f32.mrb[36].mxu1 }
 0x432   : > { %v21121_v50 = vpop.f32.mrb[37].mxu1  ;;  %16479 = vmatmul.mubr.msk.f32.gmra.mrb[78].mxu1 %vm459_vm3, %v13193_v0  ;;  %17263 = vmatmul.mubr.msk.f32.gmra.mrb[78].mxu0 %vm459_vm3, %v14221_v5 }
 0x433   : > { %16481 = vmatprep.mubr.msk.f32.mxu1 %vm459_vm3, %v13194_v18  ;;  %17265 = vmatprep.mubr.msk.f32.mxu0 %vm459_vm3, %v14222_v23  ;;  %v13203_v18 = vld [vmem:[%s18557_s8 + $0x3a1] sm:$0xff]  ;;  %v14231_v23 = vld [vmem:[%s18557_s8 + $0x3ca] sm:$0xff] }
 0x435   : > { %v21131_v33 = vpop.f32.mrb[38].mxu1 }
 0x436   : > { %v21133_v54 = vpop.f32.mrb[39].mxu1  ;;  %16482 = vmatmul.mubr.msk.f32.gmra.mrb[80].mxu1 %vm459_vm3, %v13195_v58  ;;  %17266 = vmatmul.mubr.msk.f32.gmra.mrb[80].mxu0 %vm459_vm3, %v14223_v2  ;;  %v13204_v58 = vld [vmem:[%s18557_s8 + $0x3a9] sm:$0xff]  ;;  %v14232_v2 = vld [vmem:[%s18557_s8 + $0x3d2] sm:$0xff] }
 0x437   : > { %16484 = vmatprep.mubr.msk.f32.mxu1 %vm459_vm3, %v13196_v46  ;;  %17268 = vmatprep.mubr.msk.f32.mxu0 %vm459_vm3, %v14224_v62 }
 0x439   : > { %v21143_v1 = vpop.f32.mrb[40].mxu1 }
 0x43a   : > { %v21145_v3 = vpop.f32.mrb[41].mxu1  ;;  %16485 = vmatmul.mubr.msk.f32.gmra.mrb[82].mxu1 %vm459_vm3, %v13197_v51  ;;  %17269 = vmatmul.mubr.msk.f32.gmra.mrb[82].mxu0 %vm459_vm3, %v14225_v25  ;;  %v13205_v51 = vld [vmem:[%s18557_s8 + $0x3b1] sm:$0xff]  ;;  %v14233_v25 = vld [vmem:[%s18557_s8 + $0x3da] sm:$0xff] }
 0x43b   : > { %16487 = vmatprep.mubr.msk.f32.mxu1 %vm459_vm3, %v13198_v53  ;;  %17271 = vmatprep.mubr.msk.f32.mxu0 %vm459_vm3, %v14226_v55  ;;  %v13206_v53 = vld [vmem:[%s18557_s8 + $0x3c1] sm:$0xff]  ;;  %v14234_v55 = vld [vmem:[%s18557_s8 + $0x3ea] sm:$0xff] }
 0x43d   : > { %v21155_v26 = vpop.f32.mrb[42].mxu1 }
 0x43e   : > { %v21157_v29 = vpop.f32.mrb[43].mxu1  ;;  %16488 = vmatmul.mubr.msk.f32.gmra.mrb[84].mxu1 %vm459_vm3, %v13199_v11  ;;  %17272 = vmatmul.mubr.msk.f32.gmra.mrb[84].mxu0 %vm459_vm3, %v14227_v13 }
 0x43f   : > { %16490 = vmatprep.mubr.msk.f32.mxu1 %vm459_vm3, %v13200_v41  ;;  %17274 = vmatprep.mubr.msk.f32.mxu0 %vm459_vm3, %v14228_v24  ;;  %v13207_v41 = vld [vmem:[%s18557_s8 + $0x3c9] sm:$0xff]  ;;  %v14235_v24 = vld [vmem:[%s18557_s8 + $0x3f2] sm:$0xff] }
 0x441   : > { %v21167_v0 = vpop.f32.mrb[44].mxu1 }
 0x442   : > { %v21169_v5 = vpop.f32.mrb[45].mxu1  ;;  %16491 = vmatmul.mubr.msk.f32.gmra.mrb[86].mxu1 %vm459_vm3, %v13201_v35  ;;  %17275 = vmatmul.mubr.msk.f32.gmra.mrb[86].mxu0 %vm459_vm3, %v14229_v37  ;;  %v13208_v35 = vld [vmem:[%s18557_s8 + $0x3d1] sm:$0xff]  ;;  %v14236_v37 = vld [vmem:[%s18557_s8 + $0x3fa] sm:$0xff] }
 0x443   : > { %16493 = vmatprep.mubr.msk.f32.mxu1 %vm459_vm3, %v13202_v42  ;;  %17277 = vmatprep.mubr.msk.f32.mxu0 %vm459_vm3, %v14230_v44 }
 0x445   : > { %v21179_v46 = vpop.f32.mrb[46].mxu1 }
 0x446   : > { %v21181_v62 = vpop.f32.mrb[47].mxu1  ;;  %16494 = vmatmul.mubr.msk.f32.gmra.mrb[88].mxu1 %vm459_vm3, %v13203_v18  ;;  %17278 = vmatmul.mubr.msk.f32.gmra.mrb[88].mxu0 %vm459_vm3, %v14231_v23  ;;  %v13209_v18 = vld [vmem:[%s18557_s8 + $0x3d9] sm:$0xff]  ;;  %v14237_v23 = vld [vmem:[%s18557_s8 + $0x402] sm:$0xff] }
 0x447   : > { %16496 = vmatprep.mubr.msk.f32.mxu1 %vm459_vm3, %v13204_v58  ;;  %17280 = vmatprep.mubr.msk.f32.mxu0 %vm459_vm3, %v14232_v2  ;;  %v13210_v58 = vld [vmem:[%s18557_s8 + $0x3e9] sm:$0xff]  ;;  %v14238_v2 = vld [vmem:[%s18557_s8 + $0x412] sm:$0xff] }
 0x449   : > { %v21191_v11 = vpop.f32.mrb[48].mxu1 }
 0x44a   : > { %v21193_v13 = vpop.f32.mrb[49].mxu1  ;;  %16497 = vmatmul.mubr.msk.f32.gmra.mrb[90].mxu1 %vm459_vm3, %v13205_v51  ;;  %17281 = vmatmul.mubr.msk.f32.gmra.mrb[90].mxu0 %vm459_vm3, %v14233_v25 }
 0x44b   : > { %16499 = vmatprep.mubr.msk.f32.mxu1 %vm459_vm3, %v13206_v53  ;;  %17283 = vmatprep.mubr.msk.f32.mxu0 %vm459_vm3, %v14234_v55  ;;  %v13211_v53 = vld [vmem:[%s18557_s8 + $0x3f1] sm:$0xff]  ;;  %v14239_v55 = vld [vmem:[%s18557_s8 + $0x41a] sm:$0xff] }
 0x44d   : > { %v21203_v42 = vpop.f32.mrb[50].mxu1 }
 0x44e   : > { %v21205_v44 = vpop.f32.mrb[51].mxu1  ;;  %16500 = vmatmul.mubr.msk.f32.gmra.mrb[92].mxu1 %vm459_vm3, %v13207_v41  ;;  %17284 = vmatmul.mubr.msk.f32.gmra.mrb[92].mxu0 %vm459_vm3, %v14235_v24  ;;  %v13212_v41 = vld [vmem:[%s18557_s8 + $0x3f9] sm:$0xff]  ;;  %v14240_v24 = vld [vmem:[%s18557_s8 + $0x422] sm:$0xff] }
 0x44f   : > { %16502 = vmatprep.mubr.msk.f32.mxu1 %vm459_vm3, %v13208_v35  ;;  %17286 = vmatprep.mubr.msk.f32.mxu0 %vm459_vm3, %v14236_v37 }
 0x451   : > { %v21215_v51 = vpop.f32.mrb[52].mxu1 }
 0x452   : > { %21853 = vst [vmem:[#allocation2_spill] sm:$0xff] %v21215_v51  ;;  %v21217_v25 = vpop.f32.mrb[53].mxu1  ;;  %16503 = vmatmul.mubr.msk.f32.gmra.mrb[94].mxu1 %vm459_vm3, %v13209_v18  ;;  %17287 = vmatmul.mubr.msk.f32.gmra.mrb[94].mxu0 %vm459_vm3, %v14237_v23  ;;  %v13213_v18 = vld [vmem:[%s18557_s8 + $0x401] sm:$0xff]  ;;  %v14241_v23 = vld [vmem:[%s18557_s8 + $0x42a] sm:$0xff] }
 0x453   : > { %21854 = vst [vmem:[#allocation3_spill] sm:$0xff] %v21217_v25  ;;  %16505 = vmatprep.mubr.msk.f32.mxu1 %vm459_vm3, %v13210_v58  ;;  %17289 = vmatprep.mubr.msk.f32.mxu0 %vm459_vm3, %v14238_v2  ;;  %v13214_v58 = vld [vmem:[%s18557_s8 + $0x411] sm:$0xff]  ;;  %v14242_v2 = vld [vmem:[%s18557_s8 + $0x43a] sm:$0xff] }
 0x455   : > { %v21227_v35 = vpop.f32.mrb[54].mxu1 }
 0x456   : > { %21855 = vst [vmem:[#allocation4_spill] sm:$0xff] %v21227_v35  ;;  %v21229_v37 = vpop.f32.mrb[55].mxu1  ;;  %16506 = vmatmul.mubr.msk.f32.gmra.mrb[96].mxu1 %vm459_vm3, %v13211_v53  ;;  %17290 = vmatmul.mubr.msk.f32.gmra.mrb[96].mxu0 %vm459_vm3, %v14239_v55  ;;  %v13215_v53 = vld [vmem:[%s18557_s8 + $0x419] sm:$0xff]  ;;  %v14243_v55 = vld [vmem:[%s18557_s8 + $0x442] sm:$0xff] }
 0x457   : > { %21856 = vst [vmem:[#allocation5_spill] sm:$0xff] %v21229_v37  ;;  %16508 = vmatprep.mubr.msk.f32.mxu1 %vm459_vm3, %v13212_v41  ;;  %17292 = vmatprep.mubr.msk.f32.mxu0 %vm459_vm3, %v14240_v24  ;;  %v13216_v41 = vld [vmem:[%s18557_s8 + $0x421] sm:$0xff]  ;;  %v14244_v24 = vld [vmem:[%s18557_s8 + $0x44a] sm:$0xff] }
 0x459   : > { %v21239_v25 = vpop.f32.mrb[56].mxu1 }
 0x45a   : > { %21857 = vst [vmem:[#allocation6_spill] sm:$0xff] %v21239_v25  ;;  %v21241_v35 = vpop.f32.mrb[57].mxu1  ;;  %16509 = vmatmul.mubr.msk.f32.gmra.mrb[98].mxu1 %vm459_vm3, %v13213_v18  ;;  %17293 = vmatmul.mubr.msk.f32.gmra.mrb[98].mxu0 %vm459_vm3, %v14241_v23  ;;  %v13217_v18 = vld [vmem:[%s18557_s8 + $0x429] sm:$0xff]  ;;  %v14245_v23 = vld [vmem:[%s18557_s8 + $0x452] sm:$0xff] }
 0x45b   : > { %21858 = vst [vmem:[#allocation7_spill] sm:$0xff] %v21241_v35  ;;  %16511 = vmatprep.mubr.msk.f32.mxu1 %vm459_vm3, %v13214_v58  ;;  %17295 = vmatprep.mubr.msk.f32.mxu0 %vm459_vm3, %v14242_v2  ;;  %v13218_v58 = vld [vmem:[%s18557_s8 + $0x439] sm:$0xff]  ;;  %v14246_v2 = vld [vmem:[%s18557_s8 + $0x462] sm:$0xff] }
 0x45d   : > { %v21251_v37 = vpop.f32.mrb[58].mxu1 }
 0x45e   : > { %21859 = vst [vmem:[#allocation8_spill] sm:$0xff] %v21251_v37  ;;  %v21253_v25 = vpop.f32.mrb[59].mxu1  ;;  %16512 = vmatmul.mubr.msk.f32.gmra.mrb[100].mxu1 %vm459_vm3, %v13215_v53  ;;  %17296 = vmatmul.mubr.msk.f32.gmra.mrb[100].mxu0 %vm459_vm3, %v14243_v55  ;;  %v13219_v53 = vld [vmem:[%s18557_s8 + $0x441] sm:$0xff]  ;;  %v14247_v55 = vld [vmem:[%s18557_s8 + $0x46a] sm:$0xff] }
 0x45f   : > { %21860 = vst [vmem:[#allocation9_spill] sm:$0xff] %v21253_v25  ;;  %16514 = vmatprep.mubr.msk.f32.mxu1 %vm459_vm3, %v13216_v41  ;;  %17298 = vmatprep.mubr.msk.f32.mxu0 %vm459_vm3, %v14244_v24  ;;  %v13220_v41 = vld [vmem:[%s18557_s8 + $0x449] sm:$0xff]  ;;  %v14248_v24 = vld [vmem:[%s18557_s8 + $0x472] sm:$0xff] }
 0x461   : > { %v21263_v35 = vpop.f32.mrb[60].mxu1 }
 0x462   : > { %21861 = vst [vmem:[#allocation10_spill] sm:$0xff] %v21263_v35  ;;  %v21265_v37 = vpop.f32.mrb[61].mxu1  ;;  %16515 = vmatmul.mubr.msk.f32.gmra.mrb[102].mxu1 %vm459_vm3, %v13217_v18  ;;  %17299 = vmatmul.mubr.msk.f32.gmra.mrb[102].mxu0 %vm459_vm3, %v14245_v23  ;;  %v13221_v18 = vld [vmem:[%s18557_s8 + $0x451] sm:$0xff]  ;;  %v14249_v23 = vld [vmem:[%s18557_s8 + $0x47a] sm:$0xff] }
 0x463   : > { %21862 = vst [vmem:[#allocation11_spill] sm:$0xff] %v21265_v37  ;;  %16517 = vmatprep.mubr.msk.f32.mxu1 %vm459_vm3, %v13218_v58  ;;  %17301 = vmatprep.mubr.msk.f32.mxu0 %vm459_vm3, %v14246_v2  ;;  %v13222_v58 = vld [vmem:[%s18557_s8 + $0x461] sm:$0xff]  ;;  %v14250_v2 = vld [vmem:[%s18557_s8 + $0x48a] sm:$0xff] }
 0x465   : > { %v21275_v35 = vpop.f32.mrb[62].mxu1 }
 0x466   : > { %21863 = vst [vmem:[#allocation12_spill] sm:$0xff] %v21275_v35  ;;  %v21277_v25 = vpop.f32.mrb[63].mxu1  ;;  %16518 = vmatmul.mubr.msk.f32.gmra.mrb[104].mxu1 %vm459_vm3, %v13219_v53  ;;  %17302 = vmatmul.mubr.msk.f32.gmra.mrb[104].mxu0 %vm459_vm3, %v14247_v55  ;;  %v21291_v53 = vld [vmem:[%s21842_s2] ss:$0 sm:$0xff] }
 0x467   : > { %21864 = vst [vmem:[#allocation13_spill] sm:$0xff] %v21277_v25  ;;  %16520 = vmatprep.mubr.msk.f32.mxu1 %vm459_vm3, %v13220_v41  ;;  %17304 = vmatprep.mubr.msk.f32.mxu0 %vm459_vm3, %v14248_v24  ;;  %v14252_v25 = vld [vmem:[%s18557_s8 + $0x49a] sm:$0xff] }
 0x469   : > { %v17147_v35 = vpop.f32.mrb[0].mxu0 }
 0x46a   : > { %v17393_v55 = vadd.f32 %v17147_v35, %v20903_v10  ;;  %16521 = vmatmul.mubr.msk.f32.gmra.mrb[106].mxu1 %vm459_vm3, %v13221_v18  ;;  %v11334_v41 = vpop.f32.mrb[1].mxu0  ;;  %17305 = vmatmul.mubr.msk.f32.gmra.mrb[106].mxu0 %vm459_vm3, %v14249_v23  ;;  %v13223_v10 = vld [vmem:[%s18557_s8 + $0x469] sm:$0xff]  ;;  %v14251_v35 = vld [vmem:[%s18557_s8 + $0x492] sm:$0xff] }
 0x46b   : > { %v17394_v24 = vadd.f32 %v11334_v41, %v20905_v14  ;;  %16523 = vmatprep.mubr.msk.f32.mxu1 %vm459_vm3, %v13222_v58  ;;  %17307 = vmatprep.mubr.msk.f32.mxu0 %vm459_vm3, %v14250_v2  ;;  %v13224_v23 = vld [vmem:[%s18557_s8 + $0x471] sm:$0xff]  ;;  %v14253_v41 = vld [vmem:[%s18557_s8 + $0x4a2] sm:$0xff] }
 0x46c   : > { %v12109_v18 = vadd.f32 %v17393_v55, %v21291_v53  ;;  %v13225_v55 = vld [vmem:[%s18557_s8 + $0x479] sm:$0xff] }
 0x46d   : > { %v12108_v37 = vadd.f32 %v17394_v24, %v21291_v53  ;;  %v17150_v51 = vpop.f32.mrb[2].mxu0  ;;  %v14254_v24 = vld [vmem:[%s18557_s8 + $0x4b2] sm:$0xff] }
 0x46e   : > { %12238 = vst.msk [vmem:[%s21299_s12 + $0x8] sm:$0xff] %vm12236_vm4, %v12109_v18  ;;  %v17395_v14 = vadd.f32 %v17150_v51, %v20915_v36  ;;  %16524 = vmatmul.mubr.msk.f32.gmra.mrb[108].mxu1 %vm459_vm3, %v13223_v10  ;;  %v11344_v58 = vpop.f32.mrb[3].mxu0  ;;  %17308 = vmatmul.mubr.msk.f32.gmra.mrb[108].mxu0 %vm459_vm3, %v14251_v35  ;;  %v13226_v51 = vld [vmem:[%s18557_s8 + $0x489] sm:$0xff]  ;;  %v13227_v18 = vld [vmem:[%s18557_s8 + $0x491] sm:$0xff] }
 0x46f   : > { %12237 = vst.msk [vmem:[%s21299_s12] sm:$0xff] %vm12236_vm4, %v12108_v37  ;;  %v17396_v2 = vadd.f32 %v11344_v58, %v20917_v27  ;;  %16526 = vmatprep.mubr.msk.f32.mxu1 %vm459_vm3, %v13224_v23  ;;  %17310 = vmatprep.mubr.msk.f32.mxu0 %vm459_vm3, %v14252_v25  ;;  %v14255_v23 = vld [vmem:[%s18557_s8 + $0x4ba] sm:$0xff]  ;;  %v14256_v58 = vld [vmem:[%s18557_s8 + $0x4c2] sm:$0xff] }
 0x470   : > { %v12111_v36 = vadd.f32 %v17395_v14, %v21291_v53  ;;  %v13228_v14 = vld [vmem:[%s18557_s8 + $0x499] sm:$0xff] }
 0x471   : > { %v12110_v10 = vadd.f32 %v17396_v2, %v21291_v53  ;;  %v17153_v37 = vpop.f32.mrb[4].mxu0 }
 0x472   : > { %12240 = vst.msk [vmem:[%s21299_s12 + $0x18] sm:$0xff] %vm12236_vm4, %v12111_v36  ;;  %v17397_v27 = vadd.f32 %v17153_v37, %v20927_v12  ;;  %16527 = vmatmul.mubr.msk.f32.gmra.mrb[110].mxu1 %vm459_vm3, %v13225_v55  ;;  %v11354_v25 = vpop.f32.mrb[5].mxu0  ;;  %17311 = vmatmul.mubr.msk.f32.gmra.mrb[110].mxu0 %vm459_vm3, %v14253_v41  ;;  %v14258_v37 = vld [vmem:[%s18557_s8 + $0x4da] sm:$0xff] }
 0x473   : > { %12239 = vst.msk [vmem:[%s21299_s12 + $0x10] sm:$0xff] %vm12236_vm4, %v12110_v10  ;;  %v17398_v35 = vadd.f32 %v11354_v25, %v20929_v20  ;;  %16529 = vmatprep.mubr.msk.f32.mxu1 %vm459_vm3, %v13226_v51  ;;  %17313 = vmatprep.mubr.msk.f32.mxu0 %vm459_vm3, %v14254_v24  ;;  %v13229_v51 = vld [vmem:[%s18557_s8 + $0x4a1] sm:$0xff]  ;;  %v14257_v24 = vld [vmem:[%s18557_s8 + $0x4ca] sm:$0xff] }
 0x474   : > { %v12113_v12 = vadd.f32 %v17397_v27, %v21291_v53  ;;  %v13230_v10 = vld [vmem:[%s18557_s8 + $0x4b1] sm:$0xff] }
 0x475   : > { %v12112_v2 = vadd.f32 %v17398_v35, %v21291_v53  ;;  %v17156_v55 = vpop.f32.mrb[6].mxu0 }
 0x476   : > { %12242 = vst.msk [vmem:[%s21299_s12 + $0x28] sm:$0xff] %vm12236_vm4, %v12113_v12  ;;  %v17399_v20 = vadd.f32 %v17156_v55, %v20939_v16  ;;  %16530 = vmatmul.mubr.msk.f32.gmra.mrb[112].mxu1 %vm459_vm3, %v13227_v18  ;;  %v11364_v41 = vpop.f32.mrb[7].mxu0  ;;  %17314 = vmatmul.mubr.msk.f32.gmra.mrb[112].mxu0 %vm459_vm3, %v14255_v23  ;;  %v13231_v23 = vld [vmem:[%s18557_s8 + $0x4b9] sm:$0xff]  ;;  %v14259_v12 = vld [vmem:[%s18557_s8 + $0x4e2] sm:$0xff] }
 0x477   : > { %12241 = vst.msk [vmem:[%s21299_s12 + $0x20] sm:$0xff] %vm12236_vm4, %v12112_v2  ;;  %v17400_v36 = vadd.f32 %v11364_v41, %v20941_v45  ;;  %16532 = vmatprep.mubr.msk.f32.mxu1 %vm459_vm3, %v13228_v14  ;;  %17316 = vmatprep.mubr.msk.f32.mxu0 %vm459_vm3, %v14256_v58  ;;  %v13232_v14 = vld [vmem:[%s18557_s8 + $0x4c1] sm:$0xff]  ;;  %v14260_v58 = vld [vmem:[%s18557_s8 + $0x4ea] sm:$0xff] }
 0x478   : > { %v12115_v16 = vadd.f32 %v17399_v20, %v21291_v53 }
 0x479   : > { %v12114_v27 = vadd.f32 %v17400_v36, %v21291_v53  ;;  %v17159_v25 = vpop.f32.mrb[8].mxu0  ;;  %v13233_v36 = vld [vmem:[%s18557_s8 + $0x4c9] sm:$0xff] }
 0x47a   : > { %12244 = vst.msk [vmem:[%s21299_s12 + $0x38] sm:$0xff] %vm12236_vm4, %v12115_v16  ;;  %v17401_v45 = vadd.f32 %v17159_v25, %v20951_v47  ;;  %16533 = vmatmul.mubr.msk.f32.gmra.mrb[114].mxu1 %vm459_vm3, %v13229_v51  ;;  %v11374_v35 = vpop.f32.mrb[9].mxu0  ;;  %17317 = vmatmul.mubr.msk.f32.gmra.mrb[114].mxu0 %vm459_vm3, %v14257_v24  ;;  %v14261_v51 = vld [vmem:[%s18557_s8 + $0x4f2] sm:$0xff]  ;;  %v14262_v16 = vld [vmem:[%s18557_s8 + $0x502] sm:$0xff] }
 0x47b   : > { %12243 = vst.msk [vmem:[%s21299_s12 + $0x30] sm:$0xff] %vm12236_vm4, %v12114_v27  ;;  %v17402_v18 = vadd.f32 %v11374_v35, %v20953_v49  ;;  %16535 = vmatprep.mubr.msk.f32.mxu1 %vm459_vm3, %v13230_v10  ;;  %17319 = vmatprep.mubr.msk.f32.mxu0 %vm459_vm3, %v14258_v37  ;;  %v13234_v24 = vld [vmem:[%s18557_s8 + $0x4d9] sm:$0xff]  ;;  %v14263_v35 = vld [vmem:[%s18557_s8 + $0x50a] sm:$0xff] }
 0x47c   : > { %v12117_v47 = vadd.f32 %v17401_v45, %v21291_v53  ;;  %v13235_v45 = vld [vmem:[%s18557_s8 + $0x4e1] sm:$0xff] }
 0x47d   : > { %v12116_v2 = vadd.f32 %v17402_v18, %v21291_v53  ;;  %v17162_v55 = vpop.f32.mrb[10].mxu0  ;;  %v13236_v18 = vld [vmem:[%s18557_s8 + $0x4e9] sm:$0xff] }
 0x47e   : > { %12246 = vst.msk [vmem:[%s21299_s12 + $0x48] sm:$0xff] %vm12236_vm4, %v12117_v47  ;;  %v17403_v49 = vadd.f32 %v17162_v55, %v20963_v57  ;;  %16536 = vmatmul.mubr.msk.f32.gmra.mrb[116].mxu1 %vm459_vm3, %v13231_v23  ;;  %v11384_v20 = vpop.f32.mrb[11].mxu0  ;;  %17320 = vmatmul.mubr.msk.f32.gmra.mrb[116].mxu0 %vm459_vm3, %v14259_v12  ;;  %v14264_v23 = vld [vmem:[%s18557_s8 + $0x512] sm:$0xff]  ;;  %v14265_v55 = vld [vmem:[%s18557_s8 + $0x51a] sm:$0xff] }
 0x47f   : > { %12245 = vst.msk [vmem:[%s21299_s12 + $0x40] sm:$0xff] %vm12236_vm4, %v12116_v2  ;;  %v17404_v41 = vadd.f32 %v11384_v20, %v20965_v59  ;;  %16538 = vmatprep.mubr.msk.f32.mxu1 %vm459_vm3, %v13232_v14  ;;  %17322 = vmatprep.mubr.msk.f32.mxu0 %vm459_vm3, %v14260_v58  ;;  %v13237_v2 = vld [vmem:[%s18557_s8 + $0x4f1] sm:$0xff] }
 0x480   : > { %v12119_v57 = vadd.f32 %v17403_v49, %v21291_v53  ;;  %v13238_v49 = vld [vmem:[%s18557_s8 + $0x501] sm:$0xff]  ;;  %v14266_v20 = vld [vmem:[%s18557_s8 + $0x52a] sm:$0xff] }
 0x481   : > { %v12118_v10 = vadd.f32 %v17404_v41, %v21291_v53  ;;  %v17165_v37 = vpop.f32.mrb[12].mxu0 }
 0x482   : > { %12248 = vst.msk [vmem:[%s21299_s12 + $0x58] sm:$0xff] %vm12236_vm4, %v12119_v57  ;;  %v17405_v59 = vadd.f32 %v17165_v37, %v20975_v6  ;;  %16539 = vmatmul.mubr.msk.f32.gmra.mrb[118].mxu1 %vm459_vm3, %v13233_v36  ;;  %v11394_v27 = vpop.f32.mrb[13].mxu0  ;;  %17323 = vmatmul.mubr.msk.f32.gmra.mrb[118].mxu0 %vm459_vm3, %v14261_v51  ;;  %v14268_v37 = vld [vmem:[%s18557_s8 + $0x53a] sm:$0xff] }
 0x483   : > { %12247 = vst.msk [vmem:[%s21299_s12 + $0x50] sm:$0xff] %vm12236_vm4, %v12118_v10  ;;  %v17406_v25 = vadd.f32 %v11394_v27, %v20977_v9  ;;  %16541 = vmatprep.mubr.msk.f32.mxu1 %vm459_vm3, %v13234_v24  ;;  %17325 = vmatprep.mubr.msk.f32.mxu0 %vm459_vm3, %v14262_v16  ;;  %v13239_v24 = vld [vmem:[%s18557_s8 + $0x509] sm:$0xff]  ;;  %v14267_v16 = vld [vmem:[%s18557_s8 + $0x532] sm:$0xff] }
 0x484   : > { %v12121_v6 = vadd.f32 %v17405_v59, %v21291_v53  ;;  %v13240_v10 = vld [vmem:[%s18557_s8 + $0x511] sm:$0xff] }
 0x485   : > { %v12120_v12 = vadd.f32 %v17406_v25, %v21291_v53  ;;  %v17168_v47 = vpop.f32.mrb[14].mxu0 }
 0x486   : > { %12250 = vst.msk [vmem:[%s21299_s12 + $0x68] sm:$0xff] %vm12236_vm4, %v12121_v6  ;;  %v17407_v9 = vadd.f32 %v17168_v47, %v20987_v19  ;;  %16542 = vmatmul.mubr.msk.f32.gmra.mrb[120].mxu1 %vm459_vm3, %v13235_v45  ;;  %v11404_v14 = vpop.f32.mrb[15].mxu0  ;;  %17326 = vmatmul.mubr.msk.f32.gmra.mrb[120].mxu0 %vm459_vm3, %v14263_v35  ;;  %v13241_v35 = vld [vmem:[%s18557_s8 + $0x519] sm:$0xff]  ;;  %v14269_v6 = vld [vmem:[%s18557_s8 + $0x542] sm:$0xff] }
 0x487   : > { %12249 = vst.msk [vmem:[%s21299_s12 + $0x60] sm:$0xff] %vm12236_vm4, %v12120_v12  ;;  %v17408_v58 = vadd.f32 %v11404_v14, %v20989_v22  ;;  %16544 = vmatprep.mubr.msk.f32.mxu1 %vm459_vm3, %v13236_v18  ;;  %17328 = vmatprep.mubr.msk.f32.mxu0 %vm459_vm3, %v14264_v23 }
 0x488   : > { %v12123_v19 = vadd.f32 %v17407_v9, %v21291_v53 }
 0x489   : > { %v12122_v41 = vadd.f32 %v17408_v58, %v21291_v53  ;;  %v17171_v36 = vpop.f32.mrb[16].mxu0 }
 0x48a   : > { %12252 = vst.msk [vmem:[%s21299_s12 + $0x78] sm:$0xff] %vm12236_vm4, %v12123_v19  ;;  %v17409_v22 = vadd.f32 %v17171_v36, %v20999_v4  ;;  %16545 = vmatmul.mubr.msk.f32.gmra.mrb[122].mxu1 %vm459_vm3, %v13237_v2  ;;  %v11414_v51 = vpop.f32.mrb[17].mxu0  ;;  %17329 = vmatmul.mubr.msk.f32.gmra.mrb[122].mxu0 %vm459_vm3, %v14265_v55 }
 0x48b   : > { %12251 = vst.msk [vmem:[%s21299_s12 + $0x70] sm:$0xff] %vm12236_vm4, %v12122_v41  ;;  %v17410_v57 = vadd.f32 %v11414_v51, %v21001_v8  ;;  %16547 = vmatprep.mubr.msk.f32.mxu1 %vm459_vm3, %v13238_v49  ;;  %17331 = vmatprep.mubr.msk.f32.mxu0 %vm459_vm3, %v14266_v20 }
 0x48c   : > { %v12125_v4 = vadd.f32 %v17409_v22, %v21291_v53 }
 0x48d   : > { %v12124_v59 = vadd.f32 %v17410_v57, %v21291_v53  ;;  %v17174_v27 = vpop.f32.mrb[18].mxu0 }
 0x48e   : > { %12254 = vst.msk [vmem:[%s21299_s12 + $0x88] sm:$0xff] %vm12236_vm4, %v12125_v4  ;;  %v17411_v8 = vadd.f32 %v17174_v27, %v21011_v39  ;;  %16548 = vmatmul.mubr.msk.f32.gmra.mrb[124].mxu1 %vm459_vm3, %v13239_v24  ;;  %v11424_v25 = vpop.f32.mrb[19].mxu0  ;;  %17332 = vmatmul.mubr.msk.f32.gmra.mrb[124].mxu0 %vm459_vm3, %v14267_v16 }
 0x48f   : > { %12253 = vst.msk [vmem:[%s21299_s12 + $0x80] sm:$0xff] %vm12236_vm4, %v12124_v59  ;;  %v17412_v45 = vadd.f32 %v11424_v25, %v21013_v40  ;;  %16550 = vmatprep.mubr.msk.f32.mxu1 %vm459_vm3, %v13240_v10  ;;  %17334 = vmatprep.mubr.msk.f32.mxu0 %vm459_vm3, %v14268_v37 }
 0x490   : > { %v12127_v18 = vadd.f32 %v17411_v8, %v21291_v53 }
 0x491   : > { %v12126_v39 = vadd.f32 %v17412_v45, %v21291_v53  ;;  %v17177_v23 = vpop.f32.mrb[20].mxu0 }
 0x492   : > { %12256 = vst.msk [vmem:[%s21299_s12 + $0x98] sm:$0xff] %vm12236_vm4, %v12127_v18  ;;  %v17413_v12 = vadd.f32 %v17177_v23, %v21023_v56  ;;  %16551 = vmatmul.mubr.msk.f32.gmra.mrb[126].mxu1 %vm459_vm3, %v13241_v35  ;;  %v11434_v40 = vpop.f32.mrb[21].mxu0  ;;  %17335 = vmatmul.mubr.msk.f32.gmra.mrb[126].mxu0 %vm459_vm3, %v14269_v6 }
 0x493   : > { %12255 = vst.msk [vmem:[%s21299_s12 + $0x90] sm:$0xff] %vm12236_vm4, %v12126_v39  ;;  %v17414_v47 = vadd.f32 %v11434_v40, %v21025_v60 }
 0x494   : > { %v12129_v9 = vadd.f32 %v17413_v12, %v21291_v53 }
 0x495   : > { %v12128_v14 = vadd.f32 %v17414_v47, %v21291_v53  ;;  %v17180_v58 = vpop.f32.mrb[22].mxu0 }
 0x496   : > { %12258 = vst.msk [vmem:[%s21299_s12 + $0xa8] sm:$0xff] %vm12236_vm4, %v12129_v9  ;;  %v17415_v56 = vadd.f32 %v17180_v58, %v21035_v28  ;;  %v11444_v2 = vpop.f32.mrb[23].mxu0 }
 0x497   : > { %12257 = vst.msk [vmem:[%s21299_s12 + $0xa0] sm:$0xff] %vm12236_vm4, %v12128_v14  ;;  %v17416_v55 = vadd.f32 %v11444_v2, %v21037_v21 }
 0x498   : > { %v12131_v19 = vadd.f32 %v17415_v56, %v21291_v53 }
 0x499   : > { %v12130_v60 = vadd.f32 %v17416_v55, %v21291_v53  ;;  %v17183_v49 = vpop.f32.mrb[24].mxu0 }
 0x49a   : > { %12260 = vst.msk [vmem:[%s21299_s12 + $0xb8] sm:$0xff] %vm12236_vm4, %v12131_v19  ;;  %v17417_v20 = vadd.f32 %v17183_v49, %v21047_v30  ;;  %v11454_v41 = vpop.f32.mrb[25].mxu0 }
 0x49b   : > { %12259 = vst.msk [vmem:[%s21299_s12 + $0xb0] sm:$0xff] %vm12236_vm4, %v12130_v60  ;;  %v17418_v28 = vadd.f32 %v11454_v41, %v21049_v38 }
 0x49c   : > { %v12133_v36 = vadd.f32 %v17417_v20, %v21291_v53 }
 0x49d   : > { %v12132_v21 = vadd.f32 %v17418_v28, %v21291_v53  ;;  %v17186_v22 = vpop.f32.mrb[26].mxu0 }
 0x49e   : > { %12262 = vst.msk [vmem:[%s21299_s12 + $0xc8] sm:$0xff] %vm12236_vm4, %v12133_v36  ;;  %v17419_v51 = vadd.f32 %v17186_v22, %v21059_v7  ;;  %v11464_v57 = vpop.f32.mrb[27].mxu0 }
 0x49f   : > { %12261 = vst.msk [vmem:[%s21299_s12 + $0xc0] sm:$0xff] %vm12236_vm4, %v12132_v21  ;;  %v17420_v30 = vadd.f32 %v11464_v57, %v21061_v34 }
 0x4a0   : > { %v12135_v24 = vadd.f32 %v17419_v51, %v21291_v53 }
 0x4a1   : > { %v12134_v38 = vadd.f32 %v17420_v30, %v21291_v53  ;;  %v17189_v16 = vpop.f32.mrb[28].mxu0 }
 0x4a2   : > { %12264 = vst.msk [vmem:[%s21299_s12 + $0xd8] sm:$0xff] %vm12236_vm4, %v12135_v24  ;;  %v17421_v4 = vadd.f32 %v17189_v16, %v21071_v61  ;;  %v11474_v10 = vpop.f32.mrb[29].mxu0 }
 0x4a3   : > { %12263 = vst.msk [vmem:[%s21299_s12 + $0xd0] sm:$0xff] %vm12236_vm4, %v12134_v38  ;;  %v17422_v7 = vadd.f32 %v11474_v10, %v21073_v63 }
 0x4a4   : > { %v12137_v37 = vadd.f32 %v17421_v4, %v21291_v53 }
 0x4a5   : > { %v12136_v34 = vadd.f32 %v17422_v7, %v21291_v53  ;;  %v17192_v59 = vpop.f32.mrb[30].mxu0 }
 0x4a6   : > { %12266 = vst.msk [vmem:[%s21299_s12 + $0xe8] sm:$0xff] %vm12236_vm4, %v12137_v37  ;;  %v17423_v27 = vadd.f32 %v17192_v59, %v21083_v15  ;;  %v11484_v8 = vpop.f32.mrb[31].mxu0 }
 0x4a7   : > { %12265 = vst.msk [vmem:[%s21299_s12 + $0xe0] sm:$0xff] %vm12236_vm4, %v12136_v34  ;;  %v17424_v61 = vadd.f32 %v11484_v8, %v21085_v17 }
 0x4a8   : > { %v12139_v25 = vadd.f32 %v17423_v27, %v21291_v53 }
 0x4a9   : > { %v12138_v63 = vadd.f32 %v17424_v61, %v21291_v53  ;;  %v17195_v45 = vpop.f32.mrb[32].mxu0 }
 0x4aa   : > { %12268 = vst.msk [vmem:[%s21299_s12 + $0xf8] sm:$0xff] %vm12236_vm4, %v12139_v25  ;;  %v17425_v35 = vadd.f32 %v17195_v45, %v21095_v31  ;;  %v11494_v6 = vpop.f32.mrb[33].mxu0  ;;  %v21865_v45 = vld [vmem:[#allocation2_spill] sm:$0xff] }
 0x4ab   : > { %12267 = vst.msk [vmem:[%s21299_s12 + $0xf0] sm:$0xff] %vm12236_vm4, %v12138_v63  ;;  %v17426_v15 = vadd.f32 %v11494_v6, %v21097_v32 }
 0x4ac   : > { %v12141_v18 = vadd.f32 %v17425_v35, %v21291_v53 }
 0x4ad   : > { %v12140_v17 = vadd.f32 %v17426_v15, %v21291_v53  ;;  %v17198_v39 = vpop.f32.mrb[34].mxu0 }
 0x4ae   : > { %12270 = vst.msk [vmem:[%s21299_s12 + $0x108] sm:$0xff] %vm12236_vm4, %v12141_v18  ;;  %v17427_v23 = vadd.f32 %v17198_v39, %v21107_v48  ;;  %v11504_v12 = vpop.f32.mrb[35].mxu0  ;;  %v21867_v39 = vld [vmem:[#allocation4_spill] sm:$0xff] }
 0x4af   : > { %12269 = vst.msk [vmem:[%s21299_s12 + $0x100] sm:$0xff] %vm12236_vm4, %v12140_v17  ;;  %v17428_v31 = vadd.f32 %v11504_v12, %v21109_v52 }
 0x4b0   : > { %v12143_v40 = vadd.f32 %v17427_v23, %v21291_v53 }
 0x4b1   : > { %v12142_v32 = vadd.f32 %v17428_v31, %v21291_v53  ;;  %v17201_v47 = vpop.f32.mrb[36].mxu0  ;;  %v21868_v31 = vld [vmem:[#allocation5_spill] sm:$0xff] }
 0x4b2   : > { %12272 = vst.msk [vmem:[%s21299_s12 + $0x118] sm:$0xff] %vm12236_vm4, %v12143_v40  ;;  %v17429_v9 = vadd.f32 %v17201_v47, %v21119_v43  ;;  %v11514_v14 = vpop.f32.mrb[37].mxu0 }
 0x4b3   : > { %12271 = vst.msk [vmem:[%s21299_s12 + $0x110] sm:$0xff] %vm12236_vm4, %v12142_v32  ;;  %v17430_v48 = vadd.f32 %v11514_v14, %v21121_v50  ;;  %v21869_v14 = vld [vmem:[#allocation6_spill] sm:$0xff] }
 0x4b4   : > { %v12145_v58 = vadd.f32 %v17429_v9, %v21291_v53 }
 0x4b5   : > { %v12144_v52 = vadd.f32 %v17430_v48, %v21291_v53  ;;  %v17204_v56 = vpop.f32.mrb[38].mxu0 }
 0x4b6   : > { %12274 = vst.msk [vmem:[%s21299_s12 + $0x128] sm:$0xff] %vm12236_vm4, %v12145_v58  ;;  %v17431_v2 = vadd.f32 %v17204_v56, %v21131_v33  ;;  %v11524_v55 = vpop.f32.mrb[39].mxu0 }
 0x4b7   : > { %12273 = vst.msk [vmem:[%s21299_s12 + $0x120] sm:$0xff] %vm12236_vm4, %v12144_v52  ;;  %v17432_v43 = vadd.f32 %v11524_v55, %v21133_v54  ;;  %v21870_v52 = vld [vmem:[#allocation7_spill] sm:$0xff] }
 0x4b8   : > { %v12147_v19 = vadd.f32 %v17431_v2, %v21291_v53 }
 0x4b9   : > { %v12146_v50 = vadd.f32 %v17432_v43, %v21291_v53  ;;  %v17207_v60 = vpop.f32.mrb[40].mxu0 }
 0x4ba   : > { %12276 = vst.msk [vmem:[%s21299_s12 + $0x138] sm:$0xff] %vm12236_vm4, %v12147_v19  ;;  %v17433_v49 = vadd.f32 %v17207_v60, %v21143_v1  ;;  %v11534_v20 = vpop.f32.mrb[41].mxu0  ;;  %v21871_v19 = vld [vmem:[#allocation8_spill] sm:$0xff] }
 0x4bb   : > { %12275 = vst.msk [vmem:[%s21299_s12 + $0x130] sm:$0xff] %vm12236_vm4, %v12146_v50  ;;  %v17434_v33 = vadd.f32 %v11534_v20, %v21145_v3 }
 0x4bc   : > { %v12149_v41 = vadd.f32 %v17433_v49, %v21291_v53  ;;  %v21872_v49 = vld [vmem:[#allocation9_spill] sm:$0xff] }
 0x4bd   : > { %v12148_v54 = vadd.f32 %v17434_v33, %v21291_v53  ;;  %v17210_v28 = vpop.f32.mrb[42].mxu0 }
 0x4be   : > { %12278 = vst.msk [vmem:[%s21299_s12 + $0x148] sm:$0xff] %vm12236_vm4, %v12149_v41  ;;  %v17435_v36 = vadd.f32 %v17210_v28, %v21155_v26  ;;  %v11544_v21 = vpop.f32.mrb[43].mxu0  ;;  %v21873_v28 = vld [vmem:[#allocation10_spill] sm:$0xff] }
 0x4bf   : > { %12277 = vst.msk [vmem:[%s21299_s12 + $0x140] sm:$0xff] %vm12236_vm4, %v12148_v54  ;;  %v17436_v1 = vadd.f32 %v11544_v21, %v21157_v29 }
 0x4c0   : > { %v12151_v22 = vadd.f32 %v17435_v36, %v21291_v53 }
 0x4c1   : > { %v12150_v3 = vadd.f32 %v17436_v1, %v21291_v53  ;;  %v17213_v51 = vpop.f32.mrb[44].mxu0  ;;  %v21874_v1 = vld [vmem:[#allocation11_spill] sm:$0xff] }
 0x4c2   : > { %12280 = vst.msk [vmem:[%s21299_s12 + $0x158] sm:$0xff] %vm12236_vm4, %v12151_v22  ;;  %v17437_v57 = vadd.f32 %v17213_v51, %v21167_v0  ;;  %v11554_v30 = vpop.f32.mrb[45].mxu0 }
 0x4c3   : > { %12279 = vst.msk [vmem:[%s21299_s12 + $0x150] sm:$0xff] %vm12236_vm4, %v12150_v3  ;;  %v17438_v26 = vadd.f32 %v11554_v30, %v21169_v5  ;;  %v21875_v30 = vld [vmem:[#allocation12_spill] sm:$0xff] }
 0x4c4   : > { %v12153_v24 = vadd.f32 %v17437_v57, %v21291_v53 }
 0x4c5   : > { %v12152_v29 = vadd.f32 %v17438_v26, %v21291_v53  ;;  %v17216_v38 = vpop.f32.mrb[46].mxu0 }
 0x4c6   : > { %12282 = vst.msk [vmem:[%s21299_s12 + $0x168] sm:$0xff] %vm12236_vm4, %v12153_v24  ;;  %v17439_v16 = vadd.f32 %v17216_v38, %v21179_v46  ;;  %v11564_v4 = vpop.f32.mrb[47].mxu0 }
 0x4c7   : > { %12281 = vst.msk [vmem:[%s21299_s12 + $0x160] sm:$0xff] %vm12236_vm4, %v12152_v29  ;;  %v17440_v0 = vadd.f32 %v11564_v4, %v21181_v62  ;;  %v21876_v29 = vld [vmem:[#allocation13_spill] sm:$0xff] }
 0x4c8   : > { %v12155_v10 = vadd.f32 %v17439_v16, %v21291_v53 }
 0x4c9   : > { %v12154_v5 = vadd.f32 %v17440_v0, %v21291_v53  ;;  %v17219_v7 = vpop.f32.mrb[48].mxu0 }
 0x4ca   : > { %12284 = vst.msk [vmem:[%s21299_s12 + $0x178] sm:$0xff] %vm12236_vm4, %v12155_v10  ;;  %v17441_v37 = vadd.f32 %v17219_v7, %v21191_v11  ;;  %v11574_v34 = vpop.f32.mrb[49].mxu0 }
 0x4cb   : > { %12283 = vst.msk [vmem:[%s21299_s12 + $0x170] sm:$0xff] %vm12236_vm4, %v12154_v5  ;;  %v17442_v46 = vadd.f32 %v11574_v34, %v21193_v13 }
 0x4cc   : > { %v12157_v59 = vadd.f32 %v17441_v37, %v21291_v53 }
 0x4cd   : > { %v12156_v62 = vadd.f32 %v17442_v46, %v21291_v53  ;;  %v17222_v27 = vpop.f32.mrb[50].mxu0 }
 0x4ce   : > { %12286 = vst.msk [vmem:[%s21299_s12 + $0x188] sm:$0xff] %vm12236_vm4, %v12157_v59  ;;  %v17443_v8 = vadd.f32 %v17222_v27, %v21203_v42  ;;  %v11584_v61 = vpop.f32.mrb[51].mxu0  ;;  %v21866_v42 = vld [vmem:[#allocation3_spill] sm:$0xff] }
 0x4cf   : > { %12285 = vst.msk [vmem:[%s21299_s12 + $0x180] sm:$0xff] %vm12236_vm4, %v12156_v62  ;;  %v17444_v11 = vadd.f32 %v11584_v61, %v21205_v44 }
 0x4d0   : > { %v12159_v25 = vadd.f32 %v17443_v8, %v21291_v53 }
 0x4d1   : > { %v12158_v13 = vadd.f32 %v17444_v11, %v21291_v53  ;;  %v17225_v63 = vpop.f32.mrb[52].mxu0 }
 0x4d2   : > { %12288 = vst.msk [vmem:[%s21299_s12 + $0x198] sm:$0xff] %vm12236_vm4, %v12159_v25  ;;  %v17445_v35 = vadd.f32 %v17225_v63, %v21865_v45  ;;  %v11594_v6 = vpop.f32.mrb[53].mxu0 }
 0x4d3   : > { %12287 = vst.msk [vmem:[%s21299_s12 + $0x190] sm:$0xff] %vm12236_vm4, %v12158_v13  ;;  %v17446_v15 = vadd.f32 %v11594_v6, %v21866_v42 }
 0x4d4   : > { %v12161_v18 = vadd.f32 %v17445_v35, %v21291_v53 }
 0x4d5   : > { %v12160_v44 = vadd.f32 %v17446_v15, %v21291_v53  ;;  %v17228_v17 = vpop.f32.mrb[54].mxu0 }
 0x4d6   : > { %12290 = vst.msk [vmem:[%s21299_s12 + $0x1a8] sm:$0xff] %vm12236_vm4, %v12161_v18  ;;  %v17447_v23 = vadd.f32 %v17228_v17, %v21867_v39  ;;  %v11604_v12 = vpop.f32.mrb[55].mxu0 }
 0x4d7   : > { %12289 = vst.msk [vmem:[%s21299_s12 + $0x1a0] sm:$0xff] %vm12236_vm4, %v12160_v44  ;;  %v17448_v40 = vadd.f32 %v11604_v12, %v21868_v31 }
 0x4d8   : > { %v12163_v32 = vadd.f32 %v17447_v23, %v21291_v53 }
 0x4d9   : > { %v12162_v47 = vadd.f32 %v17448_v40, %v21291_v53  ;;  %v17231_v9 = vpop.f32.mrb[56].mxu0 }
 0x4da   : > { %12292 = vst.msk [vmem:[%s21299_s12 + $0x1b8] sm:$0xff] %vm12236_vm4, %v12163_v32  ;;  %v17449_v48 = vadd.f32 %v17231_v9, %v21869_v14  ;;  %v11614_v58 = vpop.f32.mrb[57].mxu0 }
 0x4db   : > { %12291 = vst.msk [vmem:[%s21299_s12 + $0x1b0] sm:$0xff] %vm12236_vm4, %v12162_v47  ;;  %v17450_v56 = vadd.f32 %v11614_v58, %v21870_v52 }
 0x4dc   : > { %v12165_v2 = vadd.f32 %v17449_v48, %v21291_v53 }
 0x4dd   : > { %v12164_v55 = vadd.f32 %v17450_v56, %v21291_v53  ;;  %v17234_v43 = vpop.f32.mrb[58].mxu0 }
 0x4de   : > { %12294 = vst.msk [vmem:[%s21299_s12 + $0x1c8] sm:$0xff] %vm12236_vm4, %v12165_v2  ;;  %v17451_v50 = vadd.f32 %v17234_v43, %v21871_v19  ;;  %v11624_v60 = vpop.f32.mrb[59].mxu0 }
 0x4df   : > { %12293 = vst.msk [vmem:[%s21299_s12 + $0x1c0] sm:$0xff] %vm12236_vm4, %v12164_v55  ;;  %v17452_v20 = vadd.f32 %v11624_v60, %v21872_v49 }
 0x4e0   : > { %v12167_v33 = vadd.f32 %v17451_v50, %v21291_v53 }
 0x4e1   : > { %v12166_v41 = vadd.f32 %v17452_v20, %v21291_v53  ;;  %v17237_v54 = vpop.f32.mrb[60].mxu0 }
 0x4e2   : > { %12296 = vst.msk [vmem:[%s21299_s12 + $0x1d8] sm:$0xff] %vm12236_vm4, %v12167_v33  ;;  %v17453_v36 = vadd.f32 %v17237_v54, %v21873_v28  ;;  %v11634_v21 = vpop.f32.mrb[61].mxu0 }
 0x4e3   : > { %12295 = vst.msk [vmem:[%s21299_s12 + $0x1d0] sm:$0xff] %vm12236_vm4, %v12166_v41  ;;  %v17454_v22 = vadd.f32 %v11634_v21, %v21874_v1 }
 0x4e4   : > { %v12169_v3 = vadd.f32 %v17453_v36, %v21291_v53 }
 0x4e5   : > { %v12168_v51 = vadd.f32 %v17454_v22, %v21291_v53  ;;  %v17240_v57 = vpop.f32.mrb[62].mxu0 }
 0x4e6   : > { %12298 = vst.msk [vmem:[%s21299_s12 + $0x1e8] sm:$0xff] %vm12236_vm4, %v12169_v3  ;;  %v17455_v26 = vadd.f32 %v17240_v57, %v21875_v30  ;;  %v11644_v24 = vpop.f32.mrb[63].mxu0 }
 0x4e7   : > { %12297 = vst.msk [vmem:[%s21299_s12 + $0x1e0] sm:$0xff] %vm12236_vm4, %v12168_v51  ;;  %v17456_v38 = vadd.f32 %v11644_v24, %v21876_v29 }
 0x4e8   : > { %v12171_v16 = vadd.f32 %v17455_v26, %v21291_v53 }
 0x4e9   : > { %v12170_v4 = vadd.f32 %v17456_v38, %v21291_v53  ;;  %v16459_v0 = vpop.f32.mrb[64].mxu1  ;;  %v17243_v10 = vpop.f32.mrb[64].mxu0 }
 0x4ea   : > { %12300 = vst.msk [vmem:[%s21299_s12 + $0x1f8] sm:$0xff] %vm12236_vm4, %v12171_v16  ;;  %v17457_v5 = vadd.f32 %v17243_v10, %v16459_v0  ;;  %v6251_v7 = vpop.f32.mrb[65].mxu1  ;;  %v11654_v37 = vpop.f32.mrb[65].mxu0 }
 0x4eb   : > { %12299 = vst.msk [vmem:[%s21299_s12 + $0x1f0] sm:$0xff] %vm12236_vm4, %v12170_v4  ;;  %v17458_v34 = vadd.f32 %v11654_v37, %v6251_v7 }
 0x4ec   : > { %v12173_v46 = vadd.f32 %v17457_v5, %v21291_v53 }
 0x4ed   : > { %v12172_v59 = vadd.f32 %v17458_v34, %v21291_v53  ;;  %v16462_v62 = vpop.f32.mrb[66].mxu1  ;;  %v17246_v27 = vpop.f32.mrb[66].mxu0 }
 0x4ee   : > { %12302 = vst.msk [vmem:[%s21299_s12 + $0x208] sm:$0xff] %vm12236_vm4, %v12173_v46  ;;  %v17459_v8 = vadd.f32 %v17246_v27, %v16462_v62  ;;  %v6261_v61 = vpop.f32.mrb[67].mxu1  ;;  %v11664_v11 = vpop.f32.mrb[67].mxu0 }
 0x4ef   : > { %12301 = vst.msk [vmem:[%s21299_s12 + $0x200] sm:$0xff] %vm12236_vm4, %v12172_v59  ;;  %v17460_v25 = vadd.f32 %v11664_v11, %v6261_v61 }
 0x4f0   : > { %v12175_v13 = vadd.f32 %v17459_v8, %v21291_v53 }
 0x4f1   : > { %v12174_v63 = vadd.f32 %v17460_v25, %v21291_v53  ;;  %v16465_v45 = vpop.f32.mrb[68].mxu1  ;;  %v17249_v35 = vpop.f32.mrb[68].mxu0 }
 0x4f2   : > { %12304 = vst.msk [vmem:[%s21299_s12 + $0x218] sm:$0xff] %vm12236_vm4, %v12175_v13  ;;  %v17461_v6 = vadd.f32 %v17249_v35, %v16465_v45  ;;  %v6271_v42 = vpop.f32.mrb[69].mxu1  ;;  %v11674_v15 = vpop.f32.mrb[69].mxu0 }
 0x4f3   : > { %12303 = vst.msk [vmem:[%s21299_s12 + $0x210] sm:$0xff] %vm12236_vm4, %v12174_v63  ;;  %v17462_v18 = vadd.f32 %v11674_v15, %v6271_v42 }
 0x4f4   : > { %v12177_v44 = vadd.f32 %v17461_v6, %v21291_v53 }
 0x4f5   : > { %v12176_v17 = vadd.f32 %v17462_v18, %v21291_v53  ;;  %v16468_v39 = vpop.f32.mrb[70].mxu1  ;;  %v17252_v23 = vpop.f32.mrb[70].mxu0 }
 0x4f6   : > { %12306 = vst.msk [vmem:[%s21299_s12 + $0x228] sm:$0xff] %vm12236_vm4, %v12177_v44  ;;  %v17463_v12 = vadd.f32 %v17252_v23, %v16468_v39  ;;  %v6281_v31 = vpop.f32.mrb[71].mxu1  ;;  %v11684_v40 = vpop.f32.mrb[71].mxu0 }
 0x4f7   : > { %12305 = vst.msk [vmem:[%s21299_s12 + $0x220] sm:$0xff] %vm12236_vm4, %v12176_v17  ;;  %v17464_v32 = vadd.f32 %v11684_v40, %v6281_v31 }
 0x4f8   : > { %v12179_v47 = vadd.f32 %v17463_v12, %v21291_v53 }
 0x4f9   : > { %v12178_v9 = vadd.f32 %v17464_v32, %v21291_v53  ;;  %v16471_v14 = vpop.f32.mrb[72].mxu1  ;;  %v17255_v48 = vpop.f32.mrb[72].mxu0 }
 0x4fa   : > { %12308 = vst.msk [vmem:[%s21299_s12 + $0x238] sm:$0xff] %vm12236_vm4, %v12179_v47  ;;  %v17465_v58 = vadd.f32 %v17255_v48, %v16471_v14  ;;  %v6291_v52 = vpop.f32.mrb[73].mxu1  ;;  %v11694_v56 = vpop.f32.mrb[73].mxu0 }
 0x4fb   : > { %12307 = vst.msk [vmem:[%s21299_s12 + $0x230] sm:$0xff] %vm12236_vm4, %v12178_v9  ;;  %v17466_v2 = vadd.f32 %v11694_v56, %v6291_v52 }
 0x4fc   : > { %v12181_v55 = vadd.f32 %v17465_v58, %v21291_v53 }
 0x4fd   : > { %v12180_v43 = vadd.f32 %v17466_v2, %v21291_v53  ;;  %v16474_v19 = vpop.f32.mrb[74].mxu1  ;;  %v17258_v50 = vpop.f32.mrb[74].mxu0 }
 0x4fe   : > { %12310 = vst.msk [vmem:[%s21299_s12 + $0x248] sm:$0xff] %vm12236_vm4, %v12181_v55  ;;  %v17467_v60 = vadd.f32 %v17258_v50, %v16474_v19  ;;  %v6301_v49 = vpop.f32.mrb[75].mxu1  ;;  %v11704_v20 = vpop.f32.mrb[75].mxu0 }
 0x4ff   : > { %12309 = vst.msk [vmem:[%s21299_s12 + $0x240] sm:$0xff] %vm12236_vm4, %v12180_v43  ;;  %v17468_v33 = vadd.f32 %v11704_v20, %v6301_v49 }
 0x500   : > { %v12183_v41 = vadd.f32 %v17467_v60, %v21291_v53 }
 0x501   : > { %v12182_v54 = vadd.f32 %v17468_v33, %v21291_v53  ;;  %v16477_v28 = vpop.f32.mrb[76].mxu1  ;;  %v17261_v36 = vpop.f32.mrb[76].mxu0 }
 0x502   : > { %12312 = vst.msk [vmem:[%s21299_s12 + $0x258] sm:$0xff] %vm12236_vm4, %v12183_v41  ;;  %v17469_v21 = vadd.f32 %v17261_v36, %v16477_v28  ;;  %v6311_v1 = vpop.f32.mrb[77].mxu1  ;;  %v11714_v22 = vpop.f32.mrb[77].mxu0 }
 0x503   : > { %12311 = vst.msk [vmem:[%s21299_s12 + $0x250] sm:$0xff] %vm12236_vm4, %v12182_v54  ;;  %v17470_v3 = vadd.f32 %v11714_v22, %v6311_v1 }
 0x504   : > { %v12185_v51 = vadd.f32 %v17469_v21, %v21291_v53 }
 0x505   : > { %v12184_v57 = vadd.f32 %v17470_v3, %v21291_v53  ;;  %v16480_v30 = vpop.f32.mrb[78].mxu1  ;;  %v17264_v26 = vpop.f32.mrb[78].mxu0 }
 0x506   : > { %12314 = vst.msk [vmem:[%s21299_s12 + $0x268] sm:$0xff] %vm12236_vm4, %v12185_v51  ;;  %v17471_v24 = vadd.f32 %v17264_v26, %v16480_v30  ;;  %v6321_v29 = vpop.f32.mrb[79].mxu1  ;;  %v11724_v38 = vpop.f32.mrb[79].mxu0 }
 0x507   : > { %12313 = vst.msk [vmem:[%s21299_s12 + $0x260] sm:$0xff] %vm12236_vm4, %v12184_v57  ;;  %v17472_v16 = vadd.f32 %v11724_v38, %v6321_v29 }
 0x508   : > { %v12187_v4 = vadd.f32 %v17471_v24, %v21291_v53 }
 0x509   : > { %v12186_v0 = vadd.f32 %v17472_v16, %v21291_v53  ;;  %v16483_v10 = vpop.f32.mrb[80].mxu1  ;;  %v17267_v5 = vpop.f32.mrb[80].mxu0 }
 0x50a   : > { %12316 = vst.msk [vmem:[%s21299_s12 + $0x278] sm:$0xff] %vm12236_vm4, %v12187_v4  ;;  %v17473_v7 = vadd.f32 %v17267_v5, %v16483_v10  ;;  %v6331_v37 = vpop.f32.mrb[81].mxu1  ;;  %v11734_v34 = vpop.f32.mrb[81].mxu0 }
 0x50b   : > { %12315 = vst.msk [vmem:[%s21299_s12 + $0x270] sm:$0xff] %vm12236_vm4, %v12186_v0  ;;  %v17474_v46 = vadd.f32 %v11734_v34, %v6331_v37 }
 0x50c   : > { %v12189_v59 = vadd.f32 %v17473_v7, %v21291_v53 }
 0x50d   : > { %v12188_v62 = vadd.f32 %v17474_v46, %v21291_v53  ;;  %v16486_v27 = vpop.f32.mrb[82].mxu1  ;;  %v17270_v8 = vpop.f32.mrb[82].mxu0 }
 0x50e   : > { %12318 = vst.msk [vmem:[%s21299_s12 + $0x288] sm:$0xff] %vm12236_vm4, %v12189_v59  ;;  %v17475_v61 = vadd.f32 %v17270_v8, %v16486_v27  ;;  %v6341_v11 = vpop.f32.mrb[83].mxu1  ;;  %v11744_v25 = vpop.f32.mrb[83].mxu0 }
 0x50f   : > { %12317 = vst.msk [vmem:[%s21299_s12 + $0x280] sm:$0xff] %vm12236_vm4, %v12188_v62  ;;  %v17476_v13 = vadd.f32 %v11744_v25, %v6341_v11 }
 0x510   : > { %v12191_v63 = vadd.f32 %v17475_v61, %v21291_v53 }
 0x511   : > { %v12190_v45 = vadd.f32 %v17476_v13, %v21291_v53  ;;  %v16489_v35 = vpop.f32.mrb[84].mxu1  ;;  %v17273_v6 = vpop.f32.mrb[84].mxu0 }
 0x512   : > { %12320 = vst.msk [vmem:[%s21299_s12 + $0x298] sm:$0xff] %vm12236_vm4, %v12191_v63  ;;  %v17477_v42 = vadd.f32 %v17273_v6, %v16489_v35  ;;  %v6351_v15 = vpop.f32.mrb[85].mxu1  ;;  %v11754_v18 = vpop.f32.mrb[85].mxu0 }
 0x513   : > { %12319 = vst.msk [vmem:[%s21299_s12 + $0x290] sm:$0xff] %vm12236_vm4, %v12190_v45  ;;  %v17478_v44 = vadd.f32 %v11754_v18, %v6351_v15  ;;  %v21739_v45 = vld [vmem:[%s21842_s2] ss:$0 sm:$0xff] }
 0x514   : > { %v12193_v17 = vadd.f32 %v17477_v42, %v21291_v53 }
 0x515   : > { %v12192_v39 = vadd.f32 %v17478_v44, %v21291_v53  ;;  %v16492_v23 = vpop.f32.mrb[86].mxu1  ;;  %v17276_v12 = vpop.f32.mrb[86].mxu0 }
 0x516   : > { %12322 = vst.msk [vmem:[%s21299_s12 + $0x2a8] sm:$0xff] %vm12236_vm4, %v12193_v17  ;;  %v17479_v31 = vadd.f32 %v17276_v12, %v16492_v23  ;;  %v6361_v40 = vpop.f32.mrb[87].mxu1  ;;  %v11764_v32 = vpop.f32.mrb[87].mxu0 }
 0x517   : > { %12321 = vst.msk [vmem:[%s21299_s12 + $0x2a0] sm:$0xff] %vm12236_vm4, %v12192_v39  ;;  %v17480_v47 = vadd.f32 %v11764_v32, %v6361_v40 }
 0x518   : > { %v12195_v9 = vadd.f32 %v17479_v31, %v21291_v53 }
 0x519   : > { %v12194_v14 = vadd.f32 %v17480_v47, %v21291_v53  ;;  %v16495_v48 = vpop.f32.mrb[88].mxu1  ;;  %v17279_v58 = vpop.f32.mrb[88].mxu0 }
 0x51a   : > { %12324 = vst.msk [vmem:[%s21299_s12 + $0x2b8] sm:$0xff] %vm12236_vm4, %v12195_v9  ;;  %v17481_v52 = vadd.f32 %v17279_v58, %v16495_v48  ;;  %v6371_v56 = vpop.f32.mrb[89].mxu1  ;;  %v11774_v2 = vpop.f32.mrb[89].mxu0 }
 0x51b   : > { %12323 = vst.msk [vmem:[%s21299_s12 + $0x2b0] sm:$0xff] %vm12236_vm4, %v12194_v14  ;;  %v17482_v55 = vadd.f32 %v11774_v2, %v6371_v56 }
 0x51c   : > { %v12197_v43 = vadd.f32 %v17481_v52, %v21291_v53 }
 0x51d   : > { %v12196_v19 = vadd.f32 %v17482_v55, %v21291_v53  ;;  %v16498_v50 = vpop.f32.mrb[90].mxu1  ;;  %v17282_v60 = vpop.f32.mrb[90].mxu0 }
 0x51e   : > { %12326 = vst.msk [vmem:[%s21299_s12 + $0x2c8] sm:$0xff] %vm12236_vm4, %v12197_v43  ;;  %v17483_v49 = vadd.f32 %v17282_v60, %v16498_v50  ;;  %v6381_v20 = vpop.f32.mrb[91].mxu1  ;;  %v11784_v33 = vpop.f32.mrb[91].mxu0 }
 0x51f   : > { %12325 = vst.msk [vmem:[%s21299_s12 + $0x2c0] sm:$0xff] %vm12236_vm4, %v12196_v19  ;;  %v17484_v41 = vadd.f32 %v11784_v33, %v6381_v20 }
 0x520   : > { %v12199_v54 = vadd.f32 %v17483_v49, %v21291_v53 }
 0x521   : > { %v12198_v28 = vadd.f32 %v17484_v41, %v21291_v53  ;;  %v16501_v36 = vpop.f32.mrb[92].mxu1  ;;  %v17285_v21 = vpop.f32.mrb[92].mxu0 }
 0x522   : > { %12328 = vst.msk [vmem:[%s21299_s12 + $0x2d8] sm:$0xff] %vm12236_vm4, %v12199_v54  ;;  %v17485_v1 = vadd.f32 %v17285_v21, %v16501_v36  ;;  %v6391_v22 = vpop.f32.mrb[93].mxu1  ;;  %v11794_v3 = vpop.f32.mrb[93].mxu0 }
 0x523   : > { %12327 = vst.msk [vmem:[%s21299_s12 + $0x2d0] sm:$0xff] %vm12236_vm4, %v12198_v28  ;;  %v17486_v51 = vadd.f32 %v11794_v3, %v6391_v22 }
 0x524   : > { %v12201_v57 = vadd.f32 %v17485_v1, %v21291_v53 }
 0x525   : > { %v12200_v30 = vadd.f32 %v17486_v51, %v21291_v53  ;;  %v16504_v26 = vpop.f32.mrb[94].mxu1  ;;  %v17288_v24 = vpop.f32.mrb[94].mxu0 }
 0x526   : > { %12330 = vst.msk [vmem:[%s21299_s12 + $0x2e8] sm:$0xff] %vm12236_vm4, %v12201_v57  ;;  %v17487_v29 = vadd.f32 %v17288_v24, %v16504_v26  ;;  %v6401_v38 = vpop.f32.mrb[95].mxu1  ;;  %v11804_v16 = vpop.f32.mrb[95].mxu0 }
 0x527   : > { %12329 = vst.msk [vmem:[%s21299_s12 + $0x2e0] sm:$0xff] %vm12236_vm4, %v12200_v30  ;;  %v17488_v4 = vadd.f32 %v11804_v16, %v6401_v38 }
 0x528   : > { %v12203_v0 = vadd.f32 %v17487_v29, %v21291_v53 }
 0x529   : > { %v12202_v10 = vadd.f32 %v17488_v4, %v21291_v53  ;;  %v16507_v5 = vpop.f32.mrb[96].mxu1  ;;  %v17291_v7 = vpop.f32.mrb[96].mxu0 }
 0x52a   : > { %12332 = vst.msk [vmem:[%s21299_s12 + $0x2f8] sm:$0xff] %vm12236_vm4, %v12203_v0  ;;  %v17489_v37 = vadd.f32 %v17291_v7, %v16507_v5  ;;  %v6411_v34 = vpop.f32.mrb[97].mxu1  ;;  %v11814_v46 = vpop.f32.mrb[97].mxu0 }
 0x52b   : > { %12331 = vst.msk [vmem:[%s21299_s12 + $0x2f0] sm:$0xff] %vm12236_vm4, %v12202_v10  ;;  %v17490_v59 = vadd.f32 %v11814_v46, %v6411_v34 }
 0x52c   : > { %v12205_v62 = vadd.f32 %v17489_v37, %v21291_v53 }
 0x52d   : > { %v12204_v27 = vadd.f32 %v17490_v59, %v21291_v53  ;;  %v16510_v8 = vpop.f32.mrb[98].mxu1  ;;  %v17294_v61 = vpop.f32.mrb[98].mxu0 }
 0x52e   : > { %12334 = vst.msk [vmem:[%s21299_s12 + $0x308] sm:$0xff] %vm12236_vm4, %v12205_v62  ;;  %v17491_v11 = vadd.f32 %v17294_v61, %v16510_v8  ;;  %v6421_v25 = vpop.f32.mrb[99].mxu1  ;;  %v11824_v13 = vpop.f32.mrb[99].mxu0 }
 0x52f   : > { %12333 = vst.msk [vmem:[%s21299_s12 + $0x300] sm:$0xff] %vm12236_vm4, %v12204_v27  ;;  %v17492_v63 = vadd.f32 %v11824_v13, %v6421_v25 }
 0x530   : > { %v12207_v35 = vadd.f32 %v21739_v45, %v17491_v11 }
 0x531   : > { %v12206_v53 = vadd.f32 %v21739_v45, %v17492_v63  ;;  %v16513_v6 = vpop.f32.mrb[100].mxu1  ;;  %v17297_v42 = vpop.f32.mrb[100].mxu0 }
 0x532   : > { %12336 = vst.msk [vmem:[%s21299_s12 + $0x318] sm:$0xff] %vm12236_vm4, %v12207_v35  ;;  %v17493_v15 = vadd.f32 %v17297_v42, %v16513_v6  ;;  %v6431_v18 = vpop.f32.mrb[101].mxu1  ;;  %v11834_v44 = vpop.f32.mrb[101].mxu0 }
 0x533   : > { %12335 = vst.msk [vmem:[%s21299_s12 + $0x310] sm:$0xff] %vm12236_vm4, %v12206_v53  ;;  %v17494_v17 = vadd.f32 %v11834_v44, %v6431_v18 }
 0x534   : > { %v12209_v39 = vadd.f32 %v21739_v45, %v17493_v15 }
 0x535   : > { %v12208_v23 = vadd.f32 %v21739_v45, %v17494_v17  ;;  %v16516_v12 = vpop.f32.mrb[102].mxu1  ;;  %v17300_v31 = vpop.f32.mrb[102].mxu0 }
 0x536   : > { %12338 = vst.msk [vmem:[%s21299_s12 + $0x328] sm:$0xff] %vm12236_vm4, %v12209_v39  ;;  %v17495_v40 = vadd.f32 %v17300_v31, %v16516_v12  ;;  %v6441_v32 = vpop.f32.mrb[103].mxu1  ;;  %v11844_v47 = vpop.f32.mrb[103].mxu0 }
 0x537   : > { %12337 = vst.msk [vmem:[%s21299_s12 + $0x320] sm:$0xff] %vm12236_vm4, %v12208_v23  ;;  %v17496_v9 = vadd.f32 %v11844_v47, %v6441_v32 }
 0x538   : > { %v12211_v14 = vadd.f32 %v21739_v45, %v17495_v40 }
 0x539   : > { %v12210_v48 = vadd.f32 %v21739_v45, %v17496_v9  ;;  %v16519_v58 = vpop.f32.mrb[104].mxu1  ;;  %v17303_v52 = vpop.f32.mrb[104].mxu0 }
 0x53a   : > { %12340 = vst.msk [vmem:[%s21299_s12 + $0x338] sm:$0xff] %vm12236_vm4, %v12211_v14  ;;  %v17497_v56 = vadd.f32 %v17303_v52, %v16519_v58  ;;  %v6451_v2 = vpop.f32.mrb[105].mxu1  ;;  %v11854_v55 = vpop.f32.mrb[105].mxu0 }
 0x53b   : > { %12339 = vst.msk [vmem:[%s21299_s12 + $0x330] sm:$0xff] %vm12236_vm4, %v12210_v48  ;;  %v17498_v43 = vadd.f32 %v11854_v55, %v6451_v2 }
 0x53c   : > { %v12213_v19 = vadd.f32 %v21739_v45, %v17497_v56 }
 0x53d   : > { %v12212_v50 = vadd.f32 %v21739_v45, %v17498_v43  ;;  %v16522_v60 = vpop.f32.mrb[106].mxu1  ;;  %v17306_v49 = vpop.f32.mrb[106].mxu0 }
 0x53e   : > { %12342 = vst.msk [vmem:[%s21299_s12 + $0x348] sm:$0xff] %vm12236_vm4, %v12213_v19  ;;  %v17499_v20 = vadd.f32 %v17306_v49, %v16522_v60  ;;  %v6461_v33 = vpop.f32.mrb[107].mxu1  ;;  %v11864_v41 = vpop.f32.mrb[107].mxu0 }
 0x53f   : > { %12341 = vst.msk [vmem:[%s21299_s12 + $0x340] sm:$0xff] %vm12236_vm4, %v12212_v50  ;;  %v17500_v54 = vadd.f32 %v11864_v41, %v6461_v33 }
 0x540   : > { %v12215_v28 = vadd.f32 %v21739_v45, %v17499_v20 }
 0x541   : > { %v12214_v36 = vadd.f32 %v21739_v45, %v17500_v54  ;;  %v16525_v21 = vpop.f32.mrb[108].mxu1  ;;  %v17309_v1 = vpop.f32.mrb[108].mxu0 }
 0x542   : > { %12344 = vst.msk [vmem:[%s21299_s12 + $0x358] sm:$0xff] %vm12236_vm4, %v12215_v28  ;;  %v17501_v22 = vadd.f32 %v17309_v1, %v16525_v21  ;;  %v6471_v3 = vpop.f32.mrb[109].mxu1  ;;  %v11874_v51 = vpop.f32.mrb[109].mxu0 }
 0x543   : > { %12343 = vst.msk [vmem:[%s21299_s12 + $0x350] sm:$0xff] %vm12236_vm4, %v12214_v36  ;;  %v17502_v57 = vadd.f32 %v11874_v51, %v6471_v3 }
 0x544   : > { %v12217_v30 = vadd.f32 %v21739_v45, %v17501_v22 }
 0x545   : > { %v12216_v26 = vadd.f32 %v21739_v45, %v17502_v57  ;;  %v16528_v24 = vpop.f32.mrb[110].mxu1  ;;  %v17312_v29 = vpop.f32.mrb[110].mxu0 }
 0x546   : > { %12346 = vst.msk [vmem:[%s21299_s12 + $0x368] sm:$0xff] %vm12236_vm4, %v12217_v30  ;;  %v17503_v38 = vadd.f32 %v17312_v29, %v16528_v24  ;;  %v6481_v16 = vpop.f32.mrb[111].mxu1  ;;  %v11884_v4 = vpop.f32.mrb[111].mxu0 }
 0x547   : > { %12345 = vst.msk [vmem:[%s21299_s12 + $0x360] sm:$0xff] %vm12236_vm4, %v12216_v26  ;;  %v17504_v0 = vadd.f32 %v11884_v4, %v6481_v16 }
 0x548   : > { %v12219_v10 = vadd.f32 %v21739_v45, %v17503_v38 }
 0x549   : > { %v12218_v5 = vadd.f32 %v21739_v45, %v17504_v0  ;;  %v16531_v7 = vpop.f32.mrb[112].mxu1  ;;  %v17315_v37 = vpop.f32.mrb[112].mxu0 }
 0x54a   : > { %12348 = vst.msk [vmem:[%s21299_s12 + $0x378] sm:$0xff] %vm12236_vm4, %v12219_v10  ;;  %v17505_v34 = vadd.f32 %v17315_v37, %v16531_v7  ;;  %v6491_v46 = vpop.f32.mrb[113].mxu1  ;;  %v11894_v59 = vpop.f32.mrb[113].mxu0 }
 0x54b   : > { %12347 = vst.msk [vmem:[%s21299_s12 + $0x370] sm:$0xff] %vm12236_vm4, %v12218_v5  ;;  %v17506_v62 = vadd.f32 %v11894_v59, %v6491_v46 }
 0x54c   : > { %v12221_v27 = vadd.f32 %v21739_v45, %v17505_v34 }
 0x54d   : > { %v12220_v8 = vadd.f32 %v21739_v45, %v17506_v62  ;;  %v16534_v61 = vpop.f32.mrb[114].mxu1  ;;  %v17318_v11 = vpop.f32.mrb[114].mxu0 }
 0x54e   : > { %12350 = vst.msk [vmem:[%s21299_s12 + $0x388] sm:$0xff] %vm12236_vm4, %v12221_v27  ;;  %v17507_v25 = vadd.f32 %v17318_v11, %v16534_v61  ;;  %v6501_v13 = vpop.f32.mrb[115].mxu1  ;;  %v11904_v63 = vpop.f32.mrb[115].mxu0 }
 0x54f   : > { %12349 = vst.msk [vmem:[%s21299_s12 + $0x380] sm:$0xff] %vm12236_vm4, %v12220_v8  ;;  %v17508_v35 = vadd.f32 %v11904_v63, %v6501_v13 }
 0x550   : > { %v12223_v53 = vadd.f32 %v21739_v45, %v17507_v25 }
 0x551   : > { %v12222_v6 = vadd.f32 %v21739_v45, %v17508_v35  ;;  %v16537_v42 = vpop.f32.mrb[116].mxu1  ;;  %v17321_v15 = vpop.f32.mrb[116].mxu0 }
 0x552   : > { %12352 = vst.msk [vmem:[%s21299_s12 + $0x398] sm:$0xff] %vm12236_vm4, %v12223_v53  ;;  %v17509_v18 = vadd.f32 %v17321_v15, %v16537_v42  ;;  %v6511_v44 = vpop.f32.mrb[117].mxu1  ;;  %v11914_v17 = vpop.f32.mrb[117].mxu0 }
 0x553   : > { %12351 = vst.msk [vmem:[%s21299_s12 + $0x390] sm:$0xff] %vm12236_vm4, %v12222_v6  ;;  %v17510_v39 = vadd.f32 %v11914_v17, %v6511_v44 }
 0x554   : > { %v12225_v23 = vadd.f32 %v21739_v45, %v17509_v18 }
 0x555   : > { %v12224_v12 = vadd.f32 %v21739_v45, %v17510_v39  ;;  %v16540_v31 = vpop.f32.mrb[118].mxu1  ;;  %v17324_v40 = vpop.f32.mrb[118].mxu0 }
 0x556   : > { %12354 = vst.msk [vmem:[%s21299_s12 + $0x3a8] sm:$0xff] %vm12236_vm4, %v12225_v23  ;;  %v17511_v32 = vadd.f32 %v17324_v40, %v16540_v31  ;;  %v6521_v47 = vpop.f32.mrb[119].mxu1  ;;  %v11924_v9 = vpop.f32.mrb[119].mxu0 }
 0x557   : > { %12353 = vst.msk [vmem:[%s21299_s12 + $0x3a0] sm:$0xff] %vm12236_vm4, %v12224_v12  ;;  %v17512_v14 = vadd.f32 %v11924_v9, %v6521_v47 }
 0x558   : > { %v12227_v48 = vadd.f32 %v21739_v45, %v17511_v32 }
 0x559   : > { %v12226_v58 = vadd.f32 %v21739_v45, %v17512_v14  ;;  %v16543_v52 = vpop.f32.mrb[120].mxu1  ;;  %v17327_v56 = vpop.f32.mrb[120].mxu0 }
 0x55a   : > { %12356 = vst.msk [vmem:[%s21299_s12 + $0x3b8] sm:$0xff] %vm12236_vm4, %v12227_v48  ;;  %v17513_v2 = vadd.f32 %v17327_v56, %v16543_v52  ;;  %v6531_v55 = vpop.f32.mrb[121].mxu1  ;;  %v11934_v43 = vpop.f32.mrb[121].mxu0 }
 0x55b   : > { %12355 = vst.msk [vmem:[%s21299_s12 + $0x3b0] sm:$0xff] %vm12236_vm4, %v12226_v58  ;;  %v17514_v19 = vadd.f32 %v11934_v43, %v6531_v55 }
 0x55c   : > { %v12229_v50 = vadd.f32 %v21739_v45, %v17513_v2 }
 0x55d   : > { %v12228_v60 = vadd.f32 %v21739_v45, %v17514_v19  ;;  %v16546_v49 = vpop.f32.mrb[122].mxu1  ;;  %v17330_v20 = vpop.f32.mrb[122].mxu0 }
 0x55e   : > { %12358 = vst.msk [vmem:[%s21299_s12 + $0x3c8] sm:$0xff] %vm12236_vm4, %v12229_v50  ;;  %v17515_v33 = vadd.f32 %v17330_v20, %v16546_v49  ;;  %v6541_v41 = vpop.f32.mrb[123].mxu1  ;;  %v11944_v54 = vpop.f32.mrb[123].mxu0 }
 0x55f   : > { %12357 = vst.msk [vmem:[%s21299_s12 + $0x3c0] sm:$0xff] %vm12236_vm4, %v12228_v60  ;;  %v17516_v28 = vadd.f32 %v11944_v54, %v6541_v41 }
 0x560   : > { %v12231_v36 = vadd.f32 %v21739_v45, %v17515_v33 }
 0x561   : > { %v12230_v21 = vadd.f32 %v21739_v45, %v17516_v28  ;;  %v16549_v1 = vpop.f32.mrb[124].mxu1  ;;  %v17333_v22 = vpop.f32.mrb[124].mxu0 }
 0x562   : > { %12360 = vst.msk [vmem:[%s21299_s12 + $0x3d8] sm:$0xff] %vm12236_vm4, %v12231_v36  ;;  %v17517_v3 = vadd.f32 %v17333_v22, %v16549_v1  ;;  %v6551_v51 = vpop.f32.mrb[125].mxu1  ;;  %v11954_v57 = vpop.f32.mrb[125].mxu0 }
 0x563   : > { %12359 = vst.msk [vmem:[%s21299_s12 + $0x3d0] sm:$0xff] %vm12236_vm4, %v12230_v21  ;;  %v17518_v30 = vadd.f32 %v11954_v57, %v6551_v51 }
 0x564   : > { %v12233_v26 = vadd.f32 %v21739_v45, %v17517_v3 }
 0x565   : > { %v12232_v24 = vadd.f32 %v21739_v45, %v17518_v30  ;;  %v16552_v29 = vpop.f32.mrb[126].mxu1  ;;  %v17336_v38 = vpop.f32.mrb[126].mxu0 }
 0x566   : > { %12362 = vst.msk [vmem:[%s21299_s12 + $0x3e8] sm:$0xff] %vm12236_vm4, %v12233_v26  ;;  %v17519_v16 = vadd.f32 %v17336_v38, %v16552_v29  ;;  %v6561_v4 = vpop.f32.mrb[127].mxu1  ;;  %v11964_v0 = vpop.f32.mrb[127].mxu0 }
 0x567   : > { %12361 = vst.msk [vmem:[%s21299_s12 + $0x3e0] sm:$0xff] %vm12236_vm4, %v12232_v24  ;;  %v17520_v10 = vadd.f32 %v11964_v0, %v6561_v4 }
 0x568   : > { %v12235_v5 = vadd.f32 %v21739_v45, %v17519_v16 }
 0x569   : > { %v12234_v7 = vadd.f32 %v21739_v45, %v17520_v10 }
 0x56a   : > { %12364 = vst.msk [vmem:[%s21299_s12 + $0x3f8] sm:$0xff] %vm12236_vm4, %v12235_v5 }
 0x56b   : > { %12363 = vst.msk [vmem:[%s21299_s12 + $0x3f0] sm:$0xff] %vm12236_vm4, %v12234_v7 }
 0x56c PF: > { %s13_s14 = sadd.s32 1, %s18466_s14   ;;  %s21877_s12 = smov %s18462_s13 }
 0x56d   : > { %p10_p5 = scmp.ge.s32.totalorder %s13_s14, 4   ;;  %s21878_s13 = smov %s21880_s15 }
 0x56f   :  { %12 = sbr.rel (!%p10_p5) target bundleno = 2 (0x2), region = 65 }

</bundles_post_ra>
